<compile_context>
chip_gen: v7x
topology: tpu7x:2x2x1
jax: 0.10.0
libtpu: 0.0.40
codegen_flags: <defaults>
</compile_context>

<pallas_src>
import functools

import jax
import jax.numpy as jnp
from jax import lax
from jax.experimental import pallas as pl
from jax.experimental.pallas import tpu as pltpu


# --------------------------------------------------------------------------
# helpers
# --------------------------------------------------------------------------
def _cdiv(a, b):
    return -(-a // b)


def _round_up(a, m):
    return _cdiv(a, m) * m


def _vmem_limit_bytes():
    """Generation-aware scoped-VMEM request (64 MiB physical per TC on v7x)."""
    try:
        cap = int(pltpu.get_tpu_info().vmem_capacity_bytes)
    except Exception:
        cap = 128 * 1024 * 1024
    return int(min(cap // 2, 64 * 1024 * 1024))


VMEM_LIMIT = _vmem_limit_bytes()
TM_CONV = 512          # M tile for the conv tap-GEMM
TQ_ATTN = 256          # query tile for attention (v5e-friendly)


# --------------------------------------------------------------------------
# Pallas kernel 1: convolution as a tap-accumulated GEMM (in-kernel im2col)
# --------------------------------------------------------------------------
def _conv_taps_kernel(x_ref, w_ref, b_ref, o_ref, *, tap_offsets, tm):
    # x_ref: (P, Cin) f32  -- row-flattened, width-padded NHWC slab (one image),
    #                         resident in VMEM across the M-tile grid axis.
    # w_ref: (ntaps, Cin, Cout) bf16 ; b_ref: (1, Cout) f32 ; o_ref: (tm, Cout) f32
    base = pl.program_id(1) * tm
    acc = jnp.zeros(o_ref.shape, jnp.float32)
    for i, off in enumerate(tap_offsets):            # unrolled: 9 taps (or 1)
        xs = x_ref[pl.ds(base + off, tm), :].astype(jnp.bfloat16)
        acc += jnp.dot(xs, w_ref[i], preferred_element_type=jnp.float32)
    o_ref[...] = acc + b_ref[...]


def _conv_taps_pallas(x_flat, w_taps, bias, *, out_rows, tm, tap_offsets):
    B, P, cin = x_flat.shape
    ntaps, _, cout = w_taps.shape
    n_t = out_rows // tm
    kernel = functools.partial(_conv_taps_kernel,
                               tap_offsets=tuple(tap_offsets), tm=tm)
    return pl.pallas_call(
        kernel,
        grid=(B, n_t),
        in_specs=[
            pl.BlockSpec((None, P, cin), lambda b, t: (b, 0, 0)),      # per-image slab
            pl.BlockSpec((ntaps, cin, cout), lambda b, t: (0, 0, 0)),  # resident weights
            pl.BlockSpec((1, cout), lambda b, t: (0, 0)),
        ],
        out_specs=pl.BlockSpec((None, tm, cout), lambda b, t: (b, t, 0)),
        out_shape=jax.ShapeDtypeStruct((B, out_rows, cout), jnp.float32),
        compiler_params=pltpu.CompilerParams(
            dimension_semantics=("parallel", "parallel"),
            vmem_limit_bytes=VMEM_LIMIT),
    )(x_flat, w_taps, bias)


def conv3x3_same_nhwc(x_nchw, w_oihw, bias):
    """3x3 / stride 1 / pad 1 conv.  Returns NHWC (B, H, W, Cout) float32."""
    B, cin, H, W = x_nchw.shape
    cout = w_oihw.shape[0]
    wp = W + 2                                   # width-padded row length
    m_w = H * wp                                 # "wide" output rows (last 2 cols junk)
    tm = min(TM_CONV, _round_up(m_w, 8))
    m_pad = _round_up(m_w, tm)
    max_off = 2 * wp + 2
    P = m_pad + max_off                          # flattened padded input length
    x = jnp.transpose(x_nchw, (0, 2, 3, 1))                      # NHWC
    x = jnp.pad(x, ((0, 0), (0, 0), (1, 1), (0, 0)))             # width halo
    x = x.reshape(B, m_w, cin)
    x = jnp.pad(x, ((0, 0), (wp, P - wp - m_w), (0, 0)))         # top pad row + tail
    tap_offsets = [dy * wp + dx for dy in range(3) for dx in range(3)]
    w_taps = jnp.transpose(w_oihw, (2, 3, 1, 0)).reshape(9, cin, cout)
    out = _conv_taps_pallas(
        x.astype(jnp.float32), w_taps.astype(jnp.bfloat16),
        bias.reshape(1, cout).astype(jnp.float32),
        out_rows=m_pad, tm=tm, tap_offsets=tap_offsets)
    return out[:, :m_w, :].reshape(B, H, wp, cout)[:, :, :W, :]


def conv1x1_nhwc(x_nhwc, w_oihw, bias):
    """1x1 conv on an NHWC tensor via the same tap-GEMM kernel."""
    B, H, W, cin = x_nhwc.shape
    cout = w_oihw.shape[0]
    m_w = H * W
    tm = min(TM_CONV, _round_up(m_w, 8))
    m_pad = _round_up(m_w, tm)
    x = jnp.pad(x_nhwc.reshape(B, m_w, cin), ((0, 0), (0, m_pad - m_w), (0, 0)))
    w_taps = jnp.transpose(w_oihw, (2, 3, 1, 0)).reshape(1, cin, cout)
    out = _conv_taps_pallas(
        x.astype(jnp.float32), w_taps.astype(jnp.bfloat16),
        bias.reshape(1, cout).astype(jnp.float32),
        out_rows=m_pad, tm=tm, tap_offsets=[0])
    return out[:, :m_w, :].reshape(B, H, W, cout)


# --------------------------------------------------------------------------
# Pallas kernel 2: attention with in-MXU relative-bias expansion, query-tiled
# --------------------------------------------------------------------------
def _attn_kernel(q_ref, k_ref, v_ref, o_ref):
    # q_ref: (TQ, Daug) bf16   columns = [q*dkh^-0.5 | rel_w | rel_h]
    # k_ref: (Daug, HW) bf16   rows    = [k          | E_w   | E_h  ]
    # v_ref: (dvh, HW) bf16 ;  o_ref: (TQ, dvh) f32
    logits = jnp.dot(q_ref[...], k_ref[...], preferred_element_type=jnp.float32)
    m = jnp.max(logits, axis=-1, keepdims=True)
    p = jnp.exp(logits - m)
    inv = pl.reciprocal(jnp.sum(p, axis=-1, keepdims=True), approx=True)
    weights = (p * inv).astype(v_ref.dtype)
    o_ref[...] = lax.dot_general(weights, v_ref[...], (((1,), (1,)), ((), ())),
                                 preferred_element_type=jnp.float32)


def _attn_pallas(q_aug, k_aug, v, *, tq):
    B, Nh, HW, daug = q_aug.shape
    dvh = v.shape[2]
    n_q = HW // tq
    return pl.pallas_call(
        _attn_kernel,
        grid=(B, Nh, n_q),
        in_specs=[
            pl.BlockSpec((None, None, tq, daug), lambda b, h, t: (b, h, t, 0)),
            pl.BlockSpec((None, None, daug, HW), lambda b, h, t: (b, h, 0, 0)),
            pl.BlockSpec((None, None, dvh, HW), lambda b, h, t: (b, h, 0, 0)),
        ],
        out_specs=pl.BlockSpec((None, None, tq, dvh), lambda b, h, t: (b, h, t, 0)),
        out_shape=jax.ShapeDtypeStruct((B, Nh, HW, dvh), jnp.float32),
        compiler_params=pltpu.CompilerParams(
            dimension_semantics=("parallel", "parallel", "parallel"),
            vmem_limit_bytes=VMEM_LIMIT),
    )(q_aug, k_aug, v)


# --------------------------------------------------------------------------
# relative-position logits (compact, no (HW,HW)/jnp.tile materialization)
# --------------------------------------------------------------------------
def rel_to_abs(x):
    B, Nh, L, _ = x.shape
    x = jnp.concatenate([x, jnp.zeros((B, Nh, L, 1), x.dtype)], axis=3)
    flat_x = x.reshape(B, Nh, L * 2 * L)
    flat_x = jnp.concatenate([flat_x, jnp.zeros((B, Nh, L - 1), x.dtype)], axis=2)
    final_x = flat_x.reshape(B, Nh, L + 1, 2 * L - 1)
    return final_x[:, :, :L, L - 1:]


def _rel_logits_compact(q_t, rel_k, H, W, Nh):
    """q_t: (B, Nh, H, W, dkh) -> (B, Nh, H, W, W) compact relative logits."""
    rl = jnp.einsum('bhxyd,md->bhxym', q_t, rel_k)
    rl = rl.reshape(-1, Nh * H, W, 2 * W - 1)
    rl = rel_to_abs(rl)
    return rl.reshape(-1, Nh, H, W, W)


# --------------------------------------------------------------------------
# AugmentedConv forward (Pallas path)
# --------------------------------------------------------------------------
def augmented_conv_forward_pallas(x, p, *, dk, dv, Nh):
    """Mirrors AugmentedConv.forward (kernel_size=3, stride=1, relative=True)."""
    n5, c1, H, W = x.shape
    x = x.reshape(-1, 5 * c1, H, W)
    B = x.shape[0]
    dkh, dvh = dk // Nh, dv // Nh
    HW = H * W
    co = p['conv_out_w'].shape[0]

    # fused conv_out ++ qkv_conv -> one tap-GEMM kernel, shared input slab
    w_fused = jnp.concatenate([p['conv_out_w'], p['qkv_w']], axis=0)
    b_fused = jnp.concatenate([p['conv_out_b'], p['qkv_b']], axis=0)
    fused = conv3x3_same_nhwc(x, w_fused, b_fused)                 # (B,H,W,co+2dk+dv)
    conv_out = jnp.transpose(fused[..., :co], (0, 3, 1, 2))        # NCHW
    qkv = fused[..., co:]

    q_nhwc = qkv[..., :dk] * (dkh ** -0.5)
    k_nhwc = qkv[..., dk:2 * dk]
    v_nhwc = qkv[..., 2 * dk:]
    flat_qT = q_nhwc.reshape(B, HW, Nh, dkh).transpose(0, 2, 1, 3)   # (B,Nh,HW,dkh)
    flat_k = k_nhwc.reshape(B, HW, Nh, dkh).transpose(0, 2, 3, 1)    # (B,Nh,dkh,HW)
    flat_v = v_nhwc.reshape(B, HW, Nh, dvh).transpose(0, 2, 3, 1)    # (B,Nh,dvh,HW)

    # compact relative logits
    q_t = q_nhwc.reshape(B, H, W, Nh, dkh).transpose(0, 3, 1, 2, 4)  # (B,Nh,H,W,dkh)
    rw = _rel_logits_compact(q_t, p['key_rel_w'], H, W, Nh)          # [qh,qw,kw]
    rh = _rel_logits_compact(q_t.transpose(0, 1, 3, 2, 4),
                             p['key_rel_h'], W, H, Nh)               # [qw,qh,kh]
    rw_flat = rw.reshape(B, Nh, HW, W)
    rh_flat = jnp.swapaxes(rh, 2, 3).reshape(B, Nh, HW, H)

    # fold the bias into the QK matmul via 0/1 expansion rows
    kk = jnp.arange(HW)
    e_w = (kk[None, :] % W == jnp.arange(W)[:, None]).astype(jnp.float32)   # (W,HW)
    e_h = (kk[None, :] // W == jnp.arange(H)[:, None]).astype(jnp.float32)  # (H,HW)
    q_aug = jnp.concatenate([flat_qT, rw_flat, rh_flat], axis=-1)
    k_aug = jnp.concatenate([flat_k,
                             jnp.broadcast_to(e_w, (B, Nh, W, HW)),
                             jnp.broadcast_to(e_h, (B, Nh, H, HW))], axis=2)

    tq = min(TQ_ATTN, HW)
    while HW % tq:
        tq //= 2
    attn = _attn_pallas(q_aug.astype(jnp.bfloat16), k_aug.astype(jnp.bfloat16),
                        flat_v.astype(jnp.bfloat16), tq=tq)          # (B,Nh,HW,dvh) f32

    # torch-style raw reshapes (intentional quirk of the reference module),
    # then the 1x1 attn_out conv as a tiny tap-GEMM kernel.
    attn = attn.reshape(B, Nh, dvh, H, W).reshape(B, Nh * dvh, H, W)
    attn_out = conv1x1_nhwc(jnp.transpose(attn, (0, 2, 3, 1)),
                            p['attn_out_w'], p['attn_out_b'])
    attn_out = jnp.transpose(attn_out, (0, 3, 1, 2))
    return jnp.concatenate([conv_out, attn_out], axis=1)


# --------------------------------------------------------------------------
# pure-JAX reference (mirrors the PyTorch code, f32 HIGHEST precision)
# --------------------------------------------------------------------------
def _conv2d_ref(x, w, b, pad):
    out = lax.conv_general_dilated(x, w, (1, 1), [(pad, pad), (pad, pad)],
                                   dimension_numbers=('NCHW', 'OIHW', 'NCHW'),
                                   precision=lax.Precision.HIGHEST)
    return out + b.reshape(1, -1, 1, 1)


def _relative_logits_1d_ref(q, rel_k, H, W, Nh, case):
    rel_logits = jnp.einsum('bhxyd,md->bhxym', q, rel_k,
                            precision=lax.Precision.HIGHEST)
    rel_logits = rel_logits.reshape(-1, Nh * H, W, 2 * W - 1)
    rel_logits = rel_to_abs(rel_logits)
    rel_logits = rel_logits.reshape(-1, Nh, H, W, W)
    rel_logits = jnp.expand_dims(rel_logits, 3)
    rel_logits = jnp.tile(rel_logits, (1, 1, 1, H, 1, 1))
    if case == 'w':
        rel_logits = jnp.swapaxes(rel_logits, 3, 4)
    elif case == 'h':
        rel_logits = jnp.swapaxes(
            jnp.swapaxes(jnp.swapaxes(rel_logits, 2, 4), 4, 5), 3, 5)
    return rel_logits.reshape(-1, Nh, H * W, H * W)


def augmented_conv_forward_ref(x, p, *, dk, dv, Nh):
    n5, c1, H, W = x.shape
    x = x.reshape(-1, 5 * c1, H, W)
    conv_out = _conv2d_ref(x, p['conv_out_w'], p['conv_out_b'], 1)
    B = conv_out.shape[0]
    qkv = _conv2d_ref(x, p['qkv_w'], p['qkv_b'], 1)
    q, k, v = qkv[:, :dk], qkv[:, dk:2 * dk], qkv[:, 2 * dk:]
    dkh, dvh = dk // Nh, dv // Nh
    q = q.reshape(B, Nh, dkh, H, W) * (dkh ** -0.5)
    k = k.reshape(B, Nh, dkh, H, W)
    v = v.reshape(B, Nh, dvh, H, W)
    flat_q = q.reshape(B, Nh, dkh, H * W)
    flat_k = k.reshape(B, Nh, dkh, H * W)
    flat_v = v.reshape(B, Nh, dvh, H * W)
    q_t = jnp.swapaxes(jnp.swapaxes(q, 2, 4), 2, 3)
    w_rel = _relative_logits_1d_ref(q_t, p['key_rel_w'], H, W, Nh, 'w')
    h_rel = _relative_logits_1d_ref(jnp.swapaxes(q_t, 2, 3), p['key_rel_h'], W, H, Nh, 'h')
    logits = jnp.einsum('bndp,bndq->bnpq', flat_q, flat_k,
                        precision=lax.Precision.HIGHEST) + h_rel + w_rel
    weights = jax.nn.softmax(logits, axis=-1)
    attn = jnp.einsum('bnpq,bndq->bnpd', weights, flat_v,
                      precision=lax.Precision.HIGHEST)
    attn = attn.reshape(B, Nh, dvh, H, W).reshape(B, Nh * dvh, H, W)
    attn = _conv2d_ref(attn, p['attn_out_w'], p['attn_out_b'], 0)
    return jnp.concatenate([conv_out, attn], axis=1)


# --------------------------------------------------------------------------
# parameters + ProposalNetwork1-style driver
# --------------------------------------------------------------------------
def init_augconv_params(key, in_ch, out_ch, dk, dv, Nh, shape):
    ks = jax.random.split(key, 8)
    dkh = dk // Nh
    s = 0.05
    return dict(
        conv_out_w=jax.random.normal(ks[0], (out_ch - dv, in_ch, 3, 3), jnp.float32) * s,
        conv_out_b=jax.random.normal(ks[1], (out_ch - dv,), jnp.float32) * s,
        qkv_w=jax.random.normal(ks[2], (2 * dk + dv, in_ch, 3, 3), jnp.float32) * s,
        qkv_b=jax.random.normal(ks[3], (2 * dk + dv,), jnp.float32) * s,
        attn_out_w=jax.random.normal(ks[4], (dv, dv, 1, 1), jnp.float32) * s,
        attn_out_b=jax.random.normal(ks[5], (dv,), jnp.float32) * s,
        key_rel_w=jax.random.normal(ks[6], (2 * shape - 1, dkh), jnp.float32),
        key_rel_h=jax.random.normal(ks[7], (2 * shape - 1, dkh), jnp.float32),
    )


if __name__ == "__main__":
    key = jax.random.PRNGKey(0)

    # Scaled-down hyperparameters consistent with the module
    # (original: in=5*256, out=256, dk=40, dv=4, Nh=2, shapes 64/32/16/8/4).
    B_IMAGES = 2
    C1 = 16
    OUT = 16
    DK, DV, NH = 8, 4, 2
    level_shapes = {'p3': 32, 'p4': 16, 'p5': 8, 'p6': 4, 'p7': 2}

    # TODO(synk): backbone (FPN), proposal_generator (RPN), ImageList/pixel-norm
    # preprocessing and detector_postprocess are external detectron2 components;
    # synthetic backbone features stand in for them here.
    keys = jax.random.split(key, 2 * len(level_shapes))
    features, params = {}, {}
    for i, (name, s) in enumerate(level_shapes.items()):
        features[name] = jax.random.normal(keys[2 * i],
                                           (5 * B_IMAGES, C1, s, s), jnp.float32)
        params[name] = init_augconv_params(keys[2 * i + 1], 5 * C1, OUT, DK, DV, NH, s)

    fwd = jax.jit(functools.partial(augmented_conv_forward_pallas,
                                    dk=DK, dv=DV, Nh=NH))

    # feature_fused[p*] = augmentedConv_*(features[p*])   (the Pallas hot path)
    feature_fused = {name: fwd(features[name], params[name]) for name in level_shapes}
    feature_fused = jax.block_until_ready(feature_fused)

    # sanity: Pallas (bf16 operands, f32 accumulation) vs pure-JAX f32 reference
    for name, s in level_shapes.items():
        ref = augmented_conv_forward_ref(features[name], params[name],
                                         dk=DK, dv=DV, Nh=NH)
        assert feature_fused[name].shape == (B_IMAGES, OUT, s, s), name
        err = float(jnp.max(jnp.abs(feature_fused[name] - ref)))
        assert jnp.allclose(feature_fused[name], ref, atol=3e-2, rtol=3e-2), (name, err)

    print("KERNEL_OK")
</pallas_src>

<mosaic_0001>
module attributes {stable_mosaic.version = 11 : i64} {
  func.func @_conv_taps_kernel(%arg0: i32, %arg1: i32, %arg2: memref<1x1606x80xf32, #tpu.memory_space<vmem>>, %arg3: memref<9x80x32xbf16, #tpu.memory_space<vmem>>, %arg4: memref<1x32xf32, #tpu.memory_space<vmem>>, %arg5: memref<1x512x32xf32, #tpu.memory_space<vmem>>) attributes {dimension_semantics = [#tpu.dimension_semantics<parallel>, #tpu.dimension_semantics<parallel>], iteration_bounds = array<i64: 2, 3>, scalar_prefetch = 0 : i64, scratch_operands = 0 : i64, tpu.core_type = #tpu.core_type<tc>, window_params = [{transform_indices = @transform_0, window_bounds = array<i64: 1, 1606, 80>}, {pipeline_mode = #tpu.pipeline_mode<synchronous>, transform_indices = @transform_1, window_bounds = array<i64: 9, 80, 32>}, {pipeline_mode = #tpu.pipeline_mode<synchronous>, transform_indices = @transform_2, window_bounds = array<i64: 1, 32>}, {transform_indices = @transform_3, window_bounds = array<i64: 1, 512, 32>}]} {
    %c512_i32 = arith.constant 512 : i32
    %0 = arith.muli %arg1, %c512_i32 : i32
    %cst = arith.constant 0.000000e+00 : f32
    %1 = vector.broadcast %cst : f32 to vector<512x32xf32>
    %c0_i32 = arith.constant 0 : i32
    %2 = arith.addi %0, %c0_i32 : i32
    %c0 = arith.constant 0 : index
    %3 = arith.index_cast %2 : i32 to index
    %c0_0 = arith.constant 0 : index
    %4 = vector.load %arg2[%c0, %3, %c0_0] : memref<1x1606x80xf32, #tpu.memory_space<vmem>>, vector<1x512x80xf32>
    %5 = vector.shape_cast %4 : vector<1x512x80xf32> to vector<512x80xf32>
    %6 = arith.truncf %5 : vector<512x80xf32> to vector<512x80xbf16>
    %c0_1 = arith.constant 0 : index
    %c0_2 = arith.constant 0 : index
    %c0_3 = arith.constant 0 : index
    %7 = vector.load %arg3[%c0_1, %c0_2, %c0_3] : memref<9x80x32xbf16, #tpu.memory_space<vmem>>, vector<1x80x32xbf16>
    %8 = vector.shape_cast %7 : vector<1x80x32xbf16> to vector<80x32xbf16>
    %cst_4 = arith.constant dense<0.000000e+00> : vector<512x32xf32>
    %9 = tpu.matmul %6, %8, %cst_4 {dimension_numbers = #tpu.dot_dimension_numbers<[1], [0], [0], [1], [0, 0, 1, 1], [], []>} : vector<512x80xbf16>, vector<80x32xbf16>, vector<512x32xf32> -> vector<512x32xf32>
    %10 = arith.addf %1, %9 : vector<512x32xf32>
    %c1_i32 = arith.constant 1 : i32
    %11 = arith.addi %0, %c1_i32 : i32
    %c0_5 = arith.constant 0 : index
    %12 = arith.index_cast %11 : i32 to index
    %c0_6 = arith.constant 0 : index
    %13 = vector.load %arg2[%c0_5, %12, %c0_6] : memref<1x1606x80xf32, #tpu.memory_space<vmem>>, vector<1x512x80xf32>
    %14 = vector.shape_cast %13 : vector<1x512x80xf32> to vector<512x80xf32>
    %15 = arith.truncf %14 : vector<512x80xf32> to vector<512x80xbf16>
    %c1 = arith.constant 1 : index
    %c0_7 = arith.constant 0 : index
    %c0_8 = arith.constant 0 : index
    %16 = vector.load %arg3[%c1, %c0_7, %c0_8] : memref<9x80x32xbf16, #tpu.memory_space<vmem>>, vector<1x80x32xbf16>
    %17 = vector.shape_cast %16 : vector<1x80x32xbf16> to vector<80x32xbf16>
    %cst_9 = arith.constant dense<0.000000e+00> : vector<512x32xf32>
    %18 = tpu.matmul %15, %17, %cst_9 {dimension_numbers = #tpu.dot_dimension_numbers<[1], [0], [0], [1], [0, 0, 1, 1], [], []>} : vector<512x80xbf16>, vector<80x32xbf16>, vector<512x32xf32> -> vector<512x32xf32>
    %19 = arith.addf %10, %18 : vector<512x32xf32>
    %c2_i32 = arith.constant 2 : i32
    %20 = arith.addi %0, %c2_i32 : i32
    %c0_10 = arith.constant 0 : index
    %21 = arith.index_cast %20 : i32 to index
    %c0_11 = arith.constant 0 : index
    %22 = vector.load %arg2[%c0_10, %21, %c0_11] : memref<1x1606x80xf32, #tpu.memory_space<vmem>>, vector<1x512x80xf32>
    %23 = vector.shape_cast %22 : vector<1x512x80xf32> to vector<512x80xf32>
    %24 = arith.truncf %23 : vector<512x80xf32> to vector<512x80xbf16>
    %c2 = arith.constant 2 : index
    %c0_12 = arith.constant 0 : index
    %c0_13 = arith.constant 0 : index
    %25 = vector.load %arg3[%c2, %c0_12, %c0_13] : memref<9x80x32xbf16, #tpu.memory_space<vmem>>, vector<1x80x32xbf16>
    %26 = vector.shape_cast %25 : vector<1x80x32xbf16> to vector<80x32xbf16>
    %cst_14 = arith.constant dense<0.000000e+00> : vector<512x32xf32>
    %27 = tpu.matmul %24, %26, %cst_14 {dimension_numbers = #tpu.dot_dimension_numbers<[1], [0], [0], [1], [0, 0, 1, 1], [], []>} : vector<512x80xbf16>, vector<80x32xbf16>, vector<512x32xf32> -> vector<512x32xf32>
    %28 = arith.addf %19, %27 : vector<512x32xf32>
    %c34_i32 = arith.constant 34 : i32
    %29 = arith.addi %0, %c34_i32 : i32
    %c0_15 = arith.constant 0 : index
    %30 = arith.index_cast %29 : i32 to index
    %c0_16 = arith.constant 0 : index
    %31 = vector.load %arg2[%c0_15, %30, %c0_16] : memref<1x1606x80xf32, #tpu.memory_space<vmem>>, vector<1x512x80xf32>
    %32 = vector.shape_cast %31 : vector<1x512x80xf32> to vector<512x80xf32>
    %33 = arith.truncf %32 : vector<512x80xf32> to vector<512x80xbf16>
    %c3 = arith.constant 3 : index
    %c0_17 = arith.constant 0 : index
    %c0_18 = arith.constant 0 : index
    %34 = vector.load %arg3[%c3, %c0_17, %c0_18] : memref<9x80x32xbf16, #tpu.memory_space<vmem>>, vector<1x80x32xbf16>
    %35 = vector.shape_cast %34 : vector<1x80x32xbf16> to vector<80x32xbf16>
    %cst_19 = arith.constant dense<0.000000e+00> : vector<512x32xf32>
    %36 = tpu.matmul %33, %35, %cst_19 {dimension_numbers = #tpu.dot_dimension_numbers<[1], [0], [0], [1], [0, 0, 1, 1], [], []>} : vector<512x80xbf16>, vector<80x32xbf16>, vector<512x32xf32> -> vector<512x32xf32>
    %37 = arith.addf %28, %36 : vector<512x32xf32>
    %c35_i32 = arith.constant 35 : i32
    %38 = arith.addi %0, %c35_i32 : i32
    %c0_20 = arith.constant 0 : index
    %39 = arith.index_cast %38 : i32 to index
    %c0_21 = arith.constant 0 : index
    %40 = vector.load %arg2[%c0_20, %39, %c0_21] : memref<1x1606x80xf32, #tpu.memory_space<vmem>>, vector<1x512x80xf32>
    %41 = vector.shape_cast %40 : vector<1x512x80xf32> to vector<512x80xf32>
    %42 = arith.truncf %41 : vector<512x80xf32> to vector<512x80xbf16>
    %c4 = arith.constant 4 : index
    %c0_22 = arith.constant 0 : index
    %c0_23 = arith.constant 0 : index
    %43 = vector.load %arg3[%c4, %c0_22, %c0_23] : memref<9x80x32xbf16, #tpu.memory_space<vmem>>, vector<1x80x32xbf16>
    %44 = vector.shape_cast %43 : vector<1x80x32xbf16> to vector<80x32xbf16>
    %cst_24 = arith.constant dense<0.000000e+00> : vector<512x32xf32>
    %45 = tpu.matmul %42, %44, %cst_24 {dimension_numbers = #tpu.dot_dimension_numbers<[1], [0], [0], [1], [0, 0, 1, 1], [], []>} : vector<512x80xbf16>, vector<80x32xbf16>, vector<512x32xf32> -> vector<512x32xf32>
    %46 = arith.addf %37, %45 : vector<512x32xf32>
    %c36_i32 = arith.constant 36 : i32
    %47 = arith.addi %0, %c36_i32 : i32
    %c0_25 = arith.constant 0 : index
    %48 = arith.index_cast %47 : i32 to index
    %c0_26 = arith.constant 0 : index
    %49 = vector.load %arg2[%c0_25, %48, %c0_26] : memref<1x1606x80xf32, #tpu.memory_space<vmem>>, vector<1x512x80xf32>
    %50 = vector.shape_cast %49 : vector<1x512x80xf32> to vector<512x80xf32>
    %51 = arith.truncf %50 : vector<512x80xf32> to vector<512x80xbf16>
    %c5 = arith.constant 5 : index
    %c0_27 = arith.constant 0 : index
    %c0_28 = arith.constant 0 : index
    %52 = vector.load %arg3[%c5, %c0_27, %c0_28] : memref<9x80x32xbf16, #tpu.memory_space<vmem>>, vector<1x80x32xbf16>
    %53 = vector.shape_cast %52 : vector<1x80x32xbf16> to vector<80x32xbf16>
    %cst_29 = arith.constant dense<0.000000e+00> : vector<512x32xf32>
    %54 = tpu.matmul %51, %53, %cst_29 {dimension_numbers = #tpu.dot_dimension_numbers<[1], [0], [0], [1], [0, 0, 1, 1], [], []>} : vector<512x80xbf16>, vector<80x32xbf16>, vector<512x32xf32> -> vector<512x32xf32>
    %55 = arith.addf %46, %54 : vector<512x32xf32>
    %c68_i32 = arith.constant 68 : i32
    %56 = arith.addi %0, %c68_i32 : i32
    %c0_30 = arith.constant 0 : index
    %57 = arith.index_cast %56 : i32 to index
    %c0_31 = arith.constant 0 : index
    %58 = vector.load %arg2[%c0_30, %57, %c0_31] : memref<1x1606x80xf32, #tpu.memory_space<vmem>>, vector<1x512x80xf32>
    %59 = vector.shape_cast %58 : vector<1x512x80xf32> to vector<512x80xf32>
    %60 = arith.truncf %59 : vector<512x80xf32> to vector<512x80xbf16>
    %c6 = arith.constant 6 : index
    %c0_32 = arith.constant 0 : index
    %c0_33 = arith.constant 0 : index
    %61 = vector.load %arg3[%c6, %c0_32, %c0_33] : memref<9x80x32xbf16, #tpu.memory_space<vmem>>, vector<1x80x32xbf16>
    %62 = vector.shape_cast %61 : vector<1x80x32xbf16> to vector<80x32xbf16>
    %cst_34 = arith.constant dense<0.000000e+00> : vector<512x32xf32>
    %63 = tpu.matmul %60, %62, %cst_34 {dimension_numbers = #tpu.dot_dimension_numbers<[1], [0], [0], [1], [0, 0, 1, 1], [], []>} : vector<512x80xbf16>, vector<80x32xbf16>, vector<512x32xf32> -> vector<512x32xf32>
    %64 = arith.addf %55, %63 : vector<512x32xf32>
    %c69_i32 = arith.constant 69 : i32
    %65 = arith.addi %0, %c69_i32 : i32
    %c0_35 = arith.constant 0 : index
    %66 = arith.index_cast %65 : i32 to index
    %c0_36 = arith.constant 0 : index
    %67 = vector.load %arg2[%c0_35, %66, %c0_36] : memref<1x1606x80xf32, #tpu.memory_space<vmem>>, vector<1x512x80xf32>
    %68 = vector.shape_cast %67 : vector<1x512x80xf32> to vector<512x80xf32>
    %69 = arith.truncf %68 : vector<512x80xf32> to vector<512x80xbf16>
    %c7 = arith.constant 7 : index
    %c0_37 = arith.constant 0 : index
    %c0_38 = arith.constant 0 : index
    %70 = vector.load %arg3[%c7, %c0_37, %c0_38] : memref<9x80x32xbf16, #tpu.memory_space<vmem>>, vector<1x80x32xbf16>
    %71 = vector.shape_cast %70 : vector<1x80x32xbf16> to vector<80x32xbf16>
    %cst_39 = arith.constant dense<0.000000e+00> : vector<512x32xf32>
    %72 = tpu.matmul %69, %71, %cst_39 {dimension_numbers = #tpu.dot_dimension_numbers<[1], [0], [0], [1], [0, 0, 1, 1], [], []>} : vector<512x80xbf16>, vector<80x32xbf16>, vector<512x32xf32> -> vector<512x32xf32>
    %73 = arith.addf %64, %72 : vector<512x32xf32>
    %c70_i32 = arith.constant 70 : i32
    %74 = arith.addi %0, %c70_i32 : i32
    %c0_40 = arith.constant 0 : index
    %75 = arith.index_cast %74 : i32 to index
    %c0_41 = arith.constant 0 : index
    %76 = vector.load %arg2[%c0_40, %75, %c0_41] : memref<1x1606x80xf32, #tpu.memory_space<vmem>>, vector<1x512x80xf32>
    %77 = vector.shape_cast %76 : vector<1x512x80xf32> to vector<512x80xf32>
    %78 = arith.truncf %77 : vector<512x80xf32> to vector<512x80xbf16>
    %c8 = arith.constant 8 : index
    %c0_42 = arith.constant 0 : index
    %c0_43 = arith.constant 0 : index
    %79 = vector.load %arg3[%c8, %c0_42, %c0_43] : memref<9x80x32xbf16, #tpu.memory_space<vmem>>, vector<1x80x32xbf16>
    %80 = vector.shape_cast %79 : vector<1x80x32xbf16> to vector<80x32xbf16>
    %cst_44 = arith.constant dense<0.000000e+00> : vector<512x32xf32>
    %81 = tpu.matmul %78, %80, %cst_44 {dimension_numbers = #tpu.dot_dimension_numbers<[1], [0], [0], [1], [0, 0, 1, 1], [], []>} : vector<512x80xbf16>, vector<80x32xbf16>, vector<512x32xf32> -> vector<512x32xf32>
    %82 = arith.addf %73, %81 : vector<512x32xf32>
    %c0_45 = arith.constant 0 : index
    %c0_46 = arith.constant 0 : index
    %83 = vector.load %arg4[%c0_45, %c0_46] : memref<1x32xf32, #tpu.memory_space<vmem>>, vector<1x32xf32>
    %84 = vector.broadcast %83 : vector<1x32xf32> to vector<512x32xf32>
    %85 = arith.addf %82, %84 : vector<512x32xf32>
    %c0_47 = arith.constant 0 : index
    %c0_48 = arith.constant 0 : index
    %c0_49 = arith.constant 0 : index
    %86 = vector.load %arg5[%c0_47, %c0_48, %c0_49] : memref<1x512x32xf32, #tpu.memory_space<vmem>>, vector<1x512x32xf32>
    %87 = vector.shape_cast %86 : vector<1x512x32xf32> to vector<512x32xf32>
    %88 = vector.shape_cast %85 : vector<512x32xf32> to vector<1x512x32xf32>
    tpu.vector_store %arg5[%c0_47, %c0_48, %c0_49], %88 {strides = array<i32>} : memref<1x512x32xf32, #tpu.memory_space<vmem>>, vector<1x512x32xf32>,
    return
  }
  func.func @transform_0(%arg0: i32, %arg1: i32) -> (i32, i32, i32) {
    %c0_i32 = arith.constant 0 : i32
    %c0_i32_0 = arith.constant 0 : i32
    %c0_i32_1 = arith.constant 0 : i32
    return %arg0, %c0_i32, %c0_i32_0 : i32, i32, i32
  }
  func.func @transform_1(%arg0: i32, %arg1: i32) -> (i32, i32, i32) {
    %c0_i32 = arith.constant 0 : i32
    %c0_i32_0 = arith.constant 0 : i32
    %c0_i32_1 = arith.constant 0 : i32
    %c0_i32_2 = arith.constant 0 : i32
    return %c0_i32, %c0_i32_0, %c0_i32_1 : i32, i32, i32
  }
  func.func @transform_2(%arg0: i32, %arg1: i32) -> (i32, i32) {
    %c0_i32 = arith.constant 0 : i32
    %c0_i32_0 = arith.constant 0 : i32
    %c0_i32_1 = arith.constant 0 : i32
    return %c0_i32, %c0_i32_0 : i32, i32
  }
  func.func @transform_3(%arg0: i32, %arg1: i32) -> (i32, i32, i32) {
    %c0_i32 = arith.constant 0 : i32
    %c0_i32_0 = arith.constant 0 : i32
    return %arg0, %arg1, %c0_i32 : i32, i32, i32
  }
}

module attributes {stable_mosaic.version = 11 : i64} {
  func.func @_attn_kernel(%arg0: i32, %arg1: i32, %arg2: i32, %arg3: memref<1x1x256x68xbf16, #tpu.memory_space<vmem>>, %arg4: memref<1x1x68x1024xbf16, #tpu.memory_space<vmem>>, %arg5: memref<1x1x2x1024xbf16, #tpu.memory_space<vmem>>, %arg6: memref<1x1x256x2xf32, #tpu.memory_space<vmem>>) attributes {dimension_semantics = [#tpu.dimension_semantics<parallel>, #tpu.dimension_semantics<parallel>, #tpu.dimension_semantics<parallel>], iteration_bounds = array<i64: 2, 2, 4>, scalar_prefetch = 0 : i64, scratch_operands = 0 : i64, tpu.core_type = #tpu.core_type<tc>, window_params = [{transform_indices = @transform_0, window_bounds = array<i64: 1, 1, 256, 68>}, {transform_indices = @transform_1, window_bounds = array<i64: 1, 1, 68, 1024>}, {transform_indices = @transform_2, window_bounds = array<i64: 1, 1, 2, 1024>}, {transform_indices = @transform_3, window_bounds = array<i64: 1, 1, 256, 2>}]} {
    %c0 = arith.constant 0 : index
    %c0_0 = arith.constant 0 : index
    %c0_1 = arith.constant 0 : index
    %c0_2 = arith.constant 0 : index
    %0 = vector.load %arg3[%c0, %c0_0, %c0_1, %c0_2] : memref<1x1x256x68xbf16, #tpu.memory_space<vmem>>, vector<1x1x256x68xbf16>
    %1 = vector.shape_cast %0 : vector<1x1x256x68xbf16> to vector<256x68xbf16>
    %c0_3 = arith.constant 0 : index
    %c0_4 = arith.constant 0 : index
    %c0_5 = arith.constant 0 : index
    %c0_6 = arith.constant 0 : index
    %2 = vector.load %arg4[%c0_3, %c0_4, %c0_5, %c0_6] : memref<1x1x68x1024xbf16, #tpu.memory_space<vmem>>, vector<1x1x68x1024xbf16>
    %3 = vector.shape_cast %2 : vector<1x1x68x1024xbf16> to vector<68x1024xbf16>
    %cst = arith.constant dense<0.000000e+00> : vector<256x1024xf32>
    %4 = tpu.matmul %1, %3, %cst {dimension_numbers = #tpu.dot_dimension_numbers<[1], [0], [0], [1], [0, 0, 1, 1], [], []>} : vector<256x68xbf16>, vector<68x1024xbf16>, vector<256x1024xf32> -> vector<256x1024xf32>
    %cst_7 = arith.constant dense<0xFF800000> : vector<256xf32>
    %5 = vector.multi_reduction <maximumf>, %4, %cst_7 [1] : vector<256x1024xf32> to vector<256xf32>
    %6 = vector.shape_cast %5 : vector<256xf32> to vector<256x1xf32>
    %7 = vector.broadcast %6 : vector<256x1xf32> to vector<256x1024xf32>
    %8 = arith.subf %4, %7 : vector<256x1024xf32>
    %9 = math.exp %8 : vector<256x1024xf32>
    %cst_8 = arith.constant dense<0.000000e+00> : vector<256xf32>
    %10 = vector.multi_reduction <add>, %9, %cst_8 [1] : vector<256x1024xf32> to vector<256xf32>
    %11 = vector.shape_cast %10 : vector<256xf32> to vector<256x1xf32>
    %12 = tpu.reciprocal %11 {approx = true} : vector<256x1xf32> -> vector<256x1xf32>
    %13 = vector.broadcast %12 : vector<256x1xf32> to vector<256x1024xf32>
    %14 = arith.mulf %9, %13 : vector<256x1024xf32>
    %15 = arith.truncf %14 : vector<256x1024xf32> to vector<256x1024xbf16>
    %c0_9 = arith.constant 0 : index
    %c0_10 = arith.constant 0 : index
    %c0_11 = arith.constant 0 : index
    %c0_12 = arith.constant 0 : index
    %16 = vector.load %arg5[%c0_9, %c0_10, %c0_11, %c0_12] : memref<1x1x2x1024xbf16, #tpu.memory_space<vmem>>, vector<1x1x2x1024xbf16>
    %17 = vector.shape_cast %16 : vector<1x1x2x1024xbf16> to vector<2x1024xbf16>
    %cst_13 = arith.constant dense<0.000000e+00> : vector<256x2xf32>
    %18 = tpu.matmul %15, %17, %cst_13 {dimension_numbers = #tpu.dot_dimension_numbers<[1], [1], [0], [0], [0, 0, 1, 0], [], []>} : vector<256x1024xbf16>, vector<2x1024xbf16>, vector<256x2xf32> -> vector<256x2xf32>
    %c0_14 = arith.constant 0 : index
    %c0_15 = arith.constant 0 : index
    %c0_16 = arith.constant 0 : index
    %c0_17 = arith.constant 0 : index
    %19 = vector.load %arg6[%c0_14, %c0_15, %c0_16, %c0_17] : memref<1x1x256x2xf32, #tpu.memory_space<vmem>>, vector<1x1x256x2xf32>
    %20 = vector.shape_cast %19 : vector<1x1x256x2xf32> to vector<256x2xf32>
    %21 = vector.shape_cast %18 : vector<256x2xf32> to vector<1x1x256x2xf32>
    tpu.vector_store %arg6[%c0_14, %c0_15, %c0_16, %c0_17], %21 {strides = array<i32>} : memref<1x1x256x2xf32, #tpu.memory_space<vmem>>, vector<1x1x256x2xf32>,
    return
  }
  func.func @transform_0(%arg0: i32, %arg1: i32, %arg2: i32) -> (i32, i32, i32, i32) {
    %c0_i32 = arith.constant 0 : i32
    %c0_i32_0 = arith.constant 0 : i32
    return %arg0, %arg1, %arg2, %c0_i32 : i32, i32, i32, i32
  }
  func.func @transform_1(%arg0: i32, %arg1: i32, %arg2: i32) -> (i32, i32, i32, i32) {
    %c0_i32 = arith.constant 0 : i32
    %c0_i32_0 = arith.constant 0 : i32
    %c0_i32_1 = arith.constant 0 : i32
    return %arg0, %arg1, %c0_i32, %c0_i32_0 : i32, i32, i32, i32
  }
  func.func @transform_2(%arg0: i32, %arg1: i32, %arg2: i32) -> (i32, i32, i32, i32) {
    %c0_i32 = arith.constant 0 : i32
    %c0_i32_0 = arith.constant 0 : i32
    %c0_i32_1 = arith.constant 0 : i32
    return %arg0, %arg1, %c0_i32, %c0_i32_0 : i32, i32, i32, i32
  }
  func.func @transform_3(%arg0: i32, %arg1: i32, %arg2: i32) -> (i32, i32, i32, i32) {
    %c0_i32 = arith.constant 0 : i32
    %c0_i32_0 = arith.constant 0 : i32
    return %arg0, %arg1, %arg2, %c0_i32 : i32, i32, i32, i32
  }
}

module attributes {stable_mosaic.version = 11 : i64} {
  func.func @_conv_taps_kernel(%arg0: i32, %arg1: i32, %arg2: memref<1x1024x4xf32, #tpu.memory_space<vmem>>, %arg3: memref<1x4x4xbf16, #tpu.memory_space<vmem>>, %arg4: memref<1x4xf32, #tpu.memory_space<vmem>>, %arg5: memref<1x512x4xf32, #tpu.memory_space<vmem>>) attributes {dimension_semantics = [#tpu.dimension_semantics<parallel>, #tpu.dimension_semantics<parallel>], iteration_bounds = array<i64: 2, 2>, scalar_prefetch = 0 : i64, scratch_operands = 0 : i64, tpu.core_type = #tpu.core_type<tc>, window_params = [{transform_indices = @transform_0, window_bounds = array<i64: 1, 1024, 4>}, {pipeline_mode = #tpu.pipeline_mode<synchronous>, transform_indices = @transform_1, window_bounds = array<i64: 1, 4, 4>}, {pipeline_mode = #tpu.pipeline_mode<synchronous>, transform_indices = @transform_2, window_bounds = array<i64: 1, 4>}, {transform_indices = @transform_3, window_bounds = array<i64: 1, 512, 4>}]} {
    %c512_i32 = arith.constant 512 : i32
    %0 = arith.muli %arg1, %c512_i32 : i32
    %cst = arith.constant 0.000000e+00 : f32
    %1 = vector.broadcast %cst : f32 to vector<512x4xf32>
    %c0_i32 = arith.constant 0 : i32
    %2 = arith.addi %0, %c0_i32 : i32
    %c0 = arith.constant 0 : index
    %3 = arith.index_cast %2 : i32 to index
    %c0_0 = arith.constant 0 : index
    %4 = vector.load %arg2[%c0, %3, %c0_0] : memref<1x1024x4xf32, #tpu.memory_space<vmem>>, vector<1x512x4xf32>
    %5 = vector.shape_cast %4 : vector<1x512x4xf32> to vector<512x4xf32>
    %6 = arith.truncf %5 : vector<512x4xf32> to vector<512x4xbf16>
    %c0_1 = arith.constant 0 : index
    %c0_2 = arith.constant 0 : index
    %c0_3 = arith.constant 0 : index
    %7 = vector.load %arg3[%c0_1, %c0_2, %c0_3] : memref<1x4x4xbf16, #tpu.memory_space<vmem>>, vector<1x4x4xbf16>
    %8 = vector.shape_cast %7 : vector<1x4x4xbf16> to vector<4x4xbf16>
    %cst_4 = arith.constant dense<0.000000e+00> : vector<512x4xf32>
    %9 = tpu.matmul %6, %8, %cst_4 {dimension_numbers = #tpu.dot_dimension_numbers<[1], [0], [0], [1], [0, 0, 1, 1], [], []>} : vector<512x4xbf16>, vector<4x4xbf16>, vector<512x4xf32> -> vector<512x4xf32>
    %10 = arith.addf %1, %9 : vector<512x4xf32>
    %c0_5 = arith.constant 0 : index
    %c0_6 = arith.constant 0 : index
    %11 = vector.load %arg4[%c0_5, %c0_6] : memref<1x4xf32, #tpu.memory_space<vmem>>, vector<1x4xf32>
    %12 = vector.broadcast %11 : vector<1x4xf32> to vector<512x4xf32>
    %13 = arith.addf %10, %12 : vector<512x4xf32>
    %c0_7 = arith.constant 0 : index
    %c0_8 = arith.constant 0 : index
    %c0_9 = arith.constant 0 : index
    %14 = vector.load %arg5[%c0_7, %c0_8, %c0_9] : memref<1x512x4xf32, #tpu.memory_space<vmem>>, vector<1x512x4xf32>
    %15 = vector.shape_cast %14 : vector<1x512x4xf32> to vector<512x4xf32>
    %16 = vector.shape_cast %13 : vector<512x4xf32> to vector<1x512x4xf32>
    tpu.vector_store %arg5[%c0_7, %c0_8, %c0_9], %16 {strides = array<i32>} : memref<1x512x4xf32, #tpu.memory_space<vmem>>, vector<1x512x4xf32>,
    return
  }
  func.func @transform_0(%arg0: i32, %arg1: i32) -> (i32, i32, i32) {
    %c0_i32 = arith.constant 0 : i32
    %c0_i32_0 = arith.constant 0 : i32
    %c0_i32_1 = arith.constant 0 : i32
    return %arg0, %c0_i32, %c0_i32_0 : i32, i32, i32
  }
  func.func @transform_1(%arg0: i32, %arg1: i32) -> (i32, i32, i32) {
    %c0_i32 = arith.constant 0 : i32
    %c0_i32_0 = arith.constant 0 : i32
    %c0_i32_1 = arith.constant 0 : i32
    %c0_i32_2 = arith.constant 0 : i32
    return %c0_i32, %c0_i32_0, %c0_i32_1 : i32, i32, i32
  }
  func.func @transform_2(%arg0: i32, %arg1: i32) -> (i32, i32) {
    %c0_i32 = arith.constant 0 : i32
    %c0_i32_0 = arith.constant 0 : i32
    %c0_i32_1 = arith.constant 0 : i32
    return %c0_i32, %c0_i32_0 : i32, i32
  }
  func.func @transform_3(%arg0: i32, %arg1: i32) -> (i32, i32, i32) {
    %c0_i32 = arith.constant 0 : i32
    %c0_i32_0 = arith.constant 0 : i32
    return %arg0, %arg1, %c0_i32 : i32, i32, i32
  }
}

</mosaic_0001>

<bundles_post_ra>
// kernel: augmented_conv_forward_pallas.3
= control target key start
LH: loop header
LB: loop body
LE: loop exit
PB: predicated region body
PF: predicated region fallthrough
CT: control target
= control target key end

     0   :  { %s10078_s0 = inlined_call_operand.hbm [shape: f32[2,1606,80], index: 0, kind: input, shape index: {}]   ;;  %s10079_s1 = inlined_call_operand.hbm [shape: bf16[9,80,32], index: 1, kind: input, shape index: {}]   ;;  %s10080_s2 = inlined_call_operand.hbm [shape: f32[1,32], index: 2, kind: input, shape index: {}]   ;;  %s10081_s3 = inlined_call_operand.hbm [shape: f32[2,1536,32], index: 3, kind: output, shape index: {}]  }
   0x1   :  { %10091 = sst [smem:[#allocation16_spill]] %s10079_s1 }
   0x2   :  { %10092 = sst [smem:[#allocation17_spill]] %s10080_s2 }
   0x3   :  { %8 = vsyncpa [#allocation3], 0 }
   0x4   :  { %10 = vsyncpa [#allocation3 + $0x1], 0 }
   0x5   :  { %11 = vsyncpa [#allocation6], 0 }
   0x6   :  { %12 = vsyncpa [#allocation4], 0 }
   0x7   :  { %14 = vsyncpa [#allocation4 + $0x1], 0  ;;  %s8499_s12 = smov 0   ;;  %s8501_s13 = smov 0  }
   0x8   :  { %s8503_s14 = smov 0   ;;  %s8505_s15 = smov 0  }
   0x9   :  { %s8507_s16 = smov 0   ;;  %s8509_s17 = smov 0  }
   0xa   :  { %s8511_s18 = smov 0   ;;  %s8513_s19 = smov 0  }
   0xb   :  { %s8515_s20 = smov 0   ;;  %s8517_s21 = smov 0  }
   0xc   :  { %s8519_s22 = smov 0  }
   0xd LB: > { %10093 = sst [smem:[#allocation12_spill]] %s8427_s12  ;;  %s5680_s23 = sadd.s32 4294967295, %s8467_s22   ;;  %s8467_s22 = sphi %s8519_s22, %s20_s22   ;;  %s8463_s21 = sphi %s8517_s21, %s10124_s21   ;;  %s8459_s20 = sphi %s8515_s20, %s10116_s20   ;;  %s8455_s19 = sphi %s8513_s19, %s10123_s19   ;;  %s8451_s18 = sphi %s8511_s18, %s10115_s18   ;;  %s8447_s17 = sphi %s8509_s17, %s10122_s17   ;;  %s8443_s16 = sphi %s8507_s16, %s10121_s16   ;;  %s8439_s15 = sphi %s8505_s15, %s10120_s15   ;;  %s8435_s14 = sphi %s8503_s14, %s10119_s14   ;;  %s8431_s13 = sphi %s8501_s13, %s10118_s13   ;;  %s8427_s12 = sphi %s8499_s12, %s10117_s12  }
   0xe   : > { %10094 = sst [smem:[#allocation13_spill]] %s8459_s20  ;;  %s5681_s24 = sadd.s32 4294967294, %s8467_s22  }
   0xf   : > { %p52_p0 = scmp.ne.s32.totalorder %s8443_s16, %s8439_s15  ;;  %p8555_p1 = scmp.eq.s32.totalorder %s5680_s23, 0 }
  0x10   : > { %p119_p2 = scmp.ne.s32.totalorder %s8435_s14, %s8431_s13  ;;  %p120_p4 = scmp.eq.s32.totalorder %s5680_s23, 5 }
  0x11   : > { %s10095_s25 = scalar_select %p8555_p1, 1, 0 }
  0x12   : > { %p8564_p3 = por %p8555_p1, %p52_p0  ;;  %p125_p5 = scmp.ne.s32.totalorder %s8431_s13, %s8427_s12 }
  0x13   : > { %p126_p6 = scmp.eq.s32.totalorder %s5681_s24, 5  ;;  %p8570_p7 = por %p120_p4, %p119_p2 }
  0x14   : > { %s10096_s27 = scalar_select %p8564_p3, 1, 0 }
  0x15   : > { %s10097_s28 = scalar_select %p8570_p7, 1, 0 }
  0x16   : > { %p5682_p8 = scmp.ge.s32.totalorder %s8467_s22, 1  ;;  %p8575_p9 = por %p126_p6, %p125_p5 }
  0x17   : > { %p133_p10 = scmp.lt.s32.totalorder %s8467_s22, 7  ;;  %s8469_s4 = smov [#allocation5]  }
  0x18   : > { %s10098_s29 = scalar_select %p8575_p9, 1, 0 }
  0x19   : > { %p8580_p11 = pnand %p5682_p8, %p133_p10  ;;  %s145_s5 = sshll.u32 %s8469_s4, 4  ;;  %s146_s5 = int_to_ptr.vmem [resolvable:$true] %s145_s5 }
  0x1a   : > { %10099 = sst [smem:[#allocation14_spill]] %s10098_s29  ;;  %s8470_s7 = smov [#allocation7]  }
  0x1b   : > { %s10100_s30 = scalar_select %p8580_p11, 1, 0 }
  0x1c   : > { %p8088_p12 = pneg %p8580_p11  ;;  %s159_s8 = sshll.u32 %s8470_s7, 4  ;;  %s8592_s8 = int_to_ptr.vmem [resolvable:$true] %s159_s8 }
  0x1d   : > { %s10102_s1 = sld [smem:[#allocation16_spill]] }
  0x1e   : > { %p8588_p13 = pnand %p8088_p12, %p8555_p1 }
  0x20   : > { %p8257_p2 = pneg %p8588_p13 }
  0x23   : > { %s8255_s11 = scalar_lea.hbm %s10102_s1, 5760 }
  0x24   : > { %p8256_p0 = scmp.ne.s32.totalorder %s10102_s1, %s8255_s11  ;;  %p8262_p6 = scmp.lt.u32.totalorder %s8255_s11, %s10102_s1 }
  0x26   : > { %p8258_p4 = pnand %p8257_p2, %p8256_p0 }
  0x28   : > { %p8259_p5 = pneg %p8258_p4 }
  0x2a   : > { %p8264_p8 = pnand %p8262_p6, %p8259_p5 }
  0x2c   : > { %8267 = shalt.err (!%p8264_p8)
}
  0x2d   : > { %s8268_s7 = scalar_lea.vmem %s146_s5, 5760  ;;  %p8276_p7 = scmp.lt.s32.totalorder %s146_s5, %s146_s5 }
  0x2e   : > { %p8269_p10 = scmp.ne.s32.totalorder %s146_s5, %s8268_s7  ;;  %p8277_p1 = scmp.lt.s32.totalorder %s8268_s7, %s8268_s7 }
  0x30   : > { %p8271_p12 = pnand %p8269_p10, %p8257_p2  ;;  %p8278_p3 = por %p8277_p1, %p8276_p7 }
  0x32   : > { %p8272_p9 = pneg %p8271_p12 }
  0x34   : > { %p8279_p11 = pnand %p8278_p3, %p8272_p9 }
  0x36   : > { %8282 = shalt.err (!%p8279_p11)
}
  0x37   : > { %s8471_s9 = smov 64   ;;  %s8472_s10 = smov 4  }
  0x38   : > { %8091 = dma.hbm_to_vmem [thread:$0]  (!%p8588_p13), %s10102_s1, 5760, %s146_s5, [#allocation6], %s8471_s9, %s8471_s9, %s8472_s10  }
  0x39   : > { %s10103_s2 = sld [smem:[#allocation17_spill]] }
  0x3f   : > { %s8283_s4 = scalar_lea.hbm %s10103_s2, 16 }
  0x40   : > { %p8284_p0 = scmp.ne.s32.totalorder %s10103_s2, %s8283_s4  ;;  %p8290_p7 = scmp.lt.u32.totalorder %s8283_s4, %s10103_s2 }
  0x42   : > { %p8286_p1 = pnand %p8284_p0, %p8257_p2 }
  0x44   : > { %p8287_p3 = pneg %p8286_p1 }
  0x46   : > { %p8292_p9 = pnand %p8290_p7, %p8287_p3 }
  0x48   : > { %8295 = shalt.err (!%p8292_p9)
}
  0x49   : > { %s8296_s5 = scalar_lea.vmem %s8592_s8, 16  ;;  %s8303_s26 = scalar_lea.vmem %s8592_s8, 32 }
  0x4a   : > { %p8297_p11 = scmp.ne.s32.totalorder %s8592_s8, %s8296_s5  ;;  %p8304_p6 = scmp.lt.s32.totalorder %s8592_s8, %s8592_s8 }
  0x4b   : > { %p8305_p8 = scmp.lt.s32.totalorder %s8303_s26, %s8296_s5 }
  0x4c   : > { %p8299_p4 = pnand %p8297_p11, %p8257_p2 }
  0x4d   : > { %p8306_p10 = por %p8305_p8, %p8304_p6 }
  0x4e   : > { %p8300_p5 = pneg %p8299_p4 }
  0x50   : > { %p8307_p12 = pnand %p8306_p10, %p8300_p5 }
  0x52   : > { %8310 = shalt.err (!%p8307_p12)
}
  0x53   : > { %8094 = dma.hbm_to_vmem [thread:$0]  (!%p8588_p13), %s10103_s2, 16, %s8592_s8, [#allocation6]  }
  0x54   : > { %s29_s9 = sadd.s32 1, %s8459_s20  ;;  %s32_s10 = sadd.s32 1, %s8463_s21 }
  0x55   : > { %p30_p2 = scmp.ge.s32.totalorder %s29_s9, 3  ;;  %s39_s6 = sadd.s32 1, %s8447_s17 }
  0x56   : > { %p46_p0 = scmp.ne.s32.totalorder %s8447_s17, %s8443_s16  ;;  %p47_p1 = scmp.eq.s32.totalorder %s8467_s22, 0 }
  0x57   : > { %s10126_s9 = smov (%p30_p2, %s29_s9), 0  ;;  %s10128_s10 = smov (!%p30_p2, %s32_s10), %s8463_s21 }
  0x58   : > { %10104 = sst [smem:[#allocation15_spill]] %s10126_s9  ;;  %p8651_p3 = por %p47_p1, %p46_p0 }
  0x59   : > { %s105_s15 = ssub.s32 %s8459_s20, %s10126_s9  ;;  %p34_p13 = scmp.ge.s32.totalorder %s10128_s10, 2 }
  0x5a   : > { %p8105_p7 = scmp.lt.s32.totalorder %s8467_s22, 6  ;;  %s170_s8 = sand.u32 1, %s8447_s17  }
  0x5b   : > { %s8073_s23 = smul.u32 25728, %s8463_s21  ;;  %s10130_s10 = smov (%p34_p13, %s10128_s10), 0 }
  0x5c   : > { %s8072_s24 = smul.u32 1608, %s170_s8  ;;  %s36_s4 = ssub.s32 %s8463_s21, %s10130_s10 }
  0x5d   : > { %s8667_s26 = scalar_lea.hbm %s10078_s0, %s8073_s23  ;;  %p37_p9 = scmp.eq.s32.totalorder %s36_s4, 0 }
  0x5e   : > { %s106_s12 = sor.u32 %s105_s15, %s36_s4  ;;  %s10106_s1 = sadd.s32 1, %s8435_s14 }
  0x5f   : > { %p107_p11 = scmp.eq.s32.totalorder %s106_s12, 0  ;;  %s174_s9 = scalar_lea.vmem [#allocation2], %s8072_s24 }
  0x60   : > { %s8670_s29 = scalar_select %p37_p9, %s8447_s17, %s39_s6  }
  0x61   : > { %s8675_s2 = scalar_select %p107_p11, %s8435_s14, %s10106_s1  }
  0x62   : > { %s181_s20 = sshll.u32 %s174_s9, 4  ;;  %p8681_p4 = pnand %p8105_p7, %p8651_p3  ;;  %s8685_s20 = int_to_ptr.vmem [resolvable:$true] %s181_s20 }
  0x63   : > { %s8687_s15 = scalar_lea.sflag [#allocation3], %s170_s8  ;;  %s8311_s6 = scalar_lea.hbm %s8667_s26, 25728 }
  0x64   : > { %p8312_p5 = scmp.ne.s32.totalorder %s8667_s26, %s8311_s6  ;;  %p8313_p6 = pneg %p8681_p4 }
  0x65   : > { %s8316_s11 = scalar_lea.hbm %s10078_s0, 51456  ;;  %p8317_p12 = scmp.lt.u32.totalorder %s8667_s26, %s10078_s0 }
  0x66   : > { %p8314_p8 = pnand %p8313_p6, %p8312_p5  ;;  %p8318_p2 = scmp.lt.u32.totalorder %s8316_s11, %s8311_s6 }
  0x67   : > { %p8320_p1 = scmp.lt.u32.totalorder %s8311_s6, %s8667_s26 }
  0x68   : > { %p8315_p10 = pneg %p8314_p8  ;;  %p8319_p0 = por %p8318_p2, %p8317_p12 }
  0x6a   : > { %p8321_p3 = por %p8320_p1, %p8319_p0 }
  0x6c   : > { %p8322_p13 = pnand %p8321_p3, %p8315_p10 }
  0x6e   : > { %8325 = shalt.err (!%p8322_p13)
}
  0x6f   : > { %s8326_s8 = scalar_lea.vmem %s8685_s20, 25728  ;;  %s8473_s4 = smov [#allocation2]  }
  0x70   : > { %p8327_p7 = scmp.ne.s32.totalorder %s8685_s20, %s8326_s8  ;;  %s8331_s5 = sshll.u32 %s8473_s4, 4  ;;  %s8332_s5 = int_to_ptr.vmem [resolvable:$false] %s8331_s5 }
  0x71   : > { %s8333_s12 = scalar_lea.vmem %s8332_s5, 51456  ;;  %p8334_p5 = scmp.lt.s32.totalorder %s8685_s20, %s8332_s5 }
  0x72   : > { %p8329_p9 = pnand %p8327_p7, %p8313_p6  ;;  %p8335_p8 = scmp.lt.s32.totalorder %s8333_s12, %s8326_s8 }
  0x74   : > { %p8330_p11 = pneg %p8329_p9  ;;  %p8336_p12 = por %p8335_p8, %p8334_p5 }
  0x76   : > { %p8337_p2 = pnand %p8336_p12, %p8330_p11 }
  0x78   : > { %8340 = shalt.err (!%p8337_p2)
}
  0x79   : > { %s8474_s6 = smov 128   ;;  %s8475_s1 = smov 8  }
  0x7a   : > { %8098 = dma.hbm_to_vmem [thread:$0]  (!%p8681_p4), %s8667_s26, 25728, %s8685_s20, %s8687_s15, %s8474_s6, %s8474_s6, %s8475_s1  }
  0x7b   : > { %p10108_p6 = scmp.ne.s32.totalorder %s10100_s30, 0 }
  0x7c   : > { %s195_s9 = sand.u32 (!%p10108_p6), 1, %s8443_s16   ;;  %p10109_p10 = scmp.ne.s32.totalorder (!%p10108_p6), %s10096_s27, 0 }
  0x7d   : > { %193 = sbr.rel (%p10108_p6) target bundleno = 959 (0x3bf), region = 32  ;;  %s196_s23 = scalar_lea.sflag (!%p10108_p6), [#allocation3], %s195_s9 }
  0x7e   : > { %s8074_s11 = smul.u32 (!%p10108_p6), 1608, %s195_s9 }
  0x80   : > { %s199_s24 = scalar_lea.vmem (!%p10108_p6), [#allocation2], %s8074_s11 }
  0x84   : > { %8414 = dma.done.wait (%p10109_p10), %s196_s23, 25728  }
  0x85   : > { %8416 = vsyncadd (%p10109_p10), %s196_s23, 4294941568  ;;  %p10110_p0 = scmp.ne.s32.totalorder %s10095_s25, 0 }
  0x87   : > { %8418 = dma.done.wait (%p10110_p0), [#allocation6], 5776  }
  0x88   : > { %8420 = vsyncadd (%p10110_p0), [#allocation6], 4294961520  ;;  %v8205_v0 = vld [vmem:[#allocation5 + $0x28] sm:$0xff]   ;;  %v8206_v1 = vld [vmem:[#allocation5 + $0xa0] sm:$0xff]   ;;  %s5691_s20 = sshll.u32 %s8451_s18, 9  ;;  %vm479_vm0 = vcmask 654336  }
  0x89   : > { %6884 = vmatprep.subr.bf16.mxu1 %v8205_v0  ;;  %v8207_v2 = vld [vmem:[#allocation5 + $0x30] sm:$0xff]   ;;  %7180 = vmatprep.subr.bf16.mxu0 %v8206_v1  ;;  %v8208_v3 = vld [vmem:[#allocation5 + $0xa8] sm:$0xff]   ;;  %v8209_v4 = vld [vmem:[#allocation5 + $0x38] sm:$0xff]   ;;  %s8727_s27 = scalar_lea.vmem %s199_s24, %s5691_s20 [#allocation2]  ;;  %s227_s25 = sand.u32 1, %s8431_s13   ;;  %vm5467_vm1 = vcmask 261120  }
  0x8a   : > { %6885 = vmatpush3.bf16.msra.mxu1 %v8205_v0  ;;  %7181 = vmatpush3.bf16.msra.mxu0 %v8206_v1  ;;  %v8210_v5 = vld [vmem:[#allocation5 + $0xb0] sm:$0xff]   ;;  %v8211_v6 = vld [vmem:[#allocation5 + $0x40] sm:$0xff]   ;;  %v8212_v7 = vld [vmem:[#allocation5 + $0xb8] sm:$0xff]   ;;  %s5690_s30 = sshll.u32 %s227_s25, 9  ;;  %s8075_s7 = smul.u32 192, %s8455_s19 }
  0x8b   : > { %6886 = vmatprep.subr.bf16.mxu1 %v8207_v2  ;;  %7182 = vmatprep.subr.bf16.mxu0 %v8208_v3  ;;  %v5693_v8 = vld [vmem:[%s8727_s27 + $0x1] sm:$0xff]  ;;  %v5694_v9 = vld [vmem:[%s8727_s27 + $0x9] sm:$0xff]  ;;  %v8213_v13 = vld [vmem:[#allocation5 + $0x48] sm:$0xff]   ;;  %s9790_s26 = scalar_lea.vmem [#allocation8], %s5690_s30  ;;  %s6547_s15 = sshll.u32 %s8451_s18, 6 }
  0x8c   : > { %v6036_v10 = vld [vmem:[%s8727_s27 + $0x23] sm:$0xff]  ;;  %v406_v11 = vpack.c.bf16 %v5694_v9, %v5693_v8  ;;  %v6037_v12 = vld [vmem:[%s8727_s27 + $0x2b] sm:$0xff]  ;;  %v5696_v17 = vld [vmem:[%s8727_s27 + $0x19] sm:$0xff]  ;;  %s5545_s8 = sadd.s32 %s8075_s7, %s6547_s15  ;;  %s5548_s19 = sshll.u32 %s9790_s26, 4  ;;  %s10006_s19 = int_to_ptr.vmem [resolvable:$true] %s5548_s19 }
  0x8d   : > { %v2522_v14 = vpack.c.bf16 %v6037_v12, %v6036_v10  ;;  %v8214_v15 = vld [vmem:[#allocation5 + $0xc0] sm:$0xff]   ;;  %v6039_v20 = vld [vmem:[%s8727_s27 + $0x3b] sm:$0xff]  ;;  %v6040_v25 = vld [vmem:[%s8727_s27 + $0x43] sm:$0xff]  ;;  %s6548_s18 = sshll.u32 %s5545_s8, 7  ;;  %s10017_s6 = scalar_lea.sflag [#allocation4], %s227_s25 }
  0x8e   : > { %6887 = vmatpush3.bf16.msra.mxu1 %v8207_v2  ;;  %7183 = vmatpush3.bf16.msra.mxu0 %v8208_v3  ;;  %v5695_v16 = vld [vmem:[%s8727_s27 + $0x11] sm:$0xff]  ;;  %v5697_v22 = vld [vmem:[%s8727_s27 + $0x21] sm:$0xff]  ;;  %v5698_v23 = vld [vmem:[%s8727_s27 + $0x29] sm:$0xff]  ;;  %s10004_s12 = scalar_lea.hbm %s10081_s3, %s6548_s18  ;;  %s8341_s1 = scalar_lea.vmem %s10006_s19, 8192 }
  0x8f   : > { %6888 = vmatprep.subr.bf16.mxu1 %v8209_v4  ;;  %7184 = vmatprep.subr.bf16.mxu0 %v8210_v5  ;;  %v8215_v18 = vld [vmem:[#allocation5] sm:$0xff]   ;;  %v8216_v21 = vld [vmem:[#allocation5 + $0xc8] sm:$0xff]   ;;  %v407_v24 = vpack.c.bf16 %v5696_v17, %v5695_v16  ;;  %v408_v28 = vpack.c.bf16 %v5698_v23, %v5697_v22  ;;  %v8217_v32 = vld [vmem:[#allocation5 + $0xd0] sm:$0xff]   ;;  %p8342_p4 = scmp.ne.s32.totalorder %s10006_s19, %s8341_s1  ;;  %p10111_p1 = scmp.ne.s32.totalorder %s10097_s28, 0 }
  0x90   : > { %6894 = vmatprep.mubr.msk.bf16.mxu1 %vm479_vm0, %v406_v11  ;;  %7190 = vmatprep.mubr.msk.bf16.mxu0 %vm479_vm0, %v2522_v14  ;;  %v6038_v19 = vld [vmem:[%s8727_s27 + $0x33] sm:$0xff]  ;;  %v6041_v26 = vld [vmem:[%s8727_s27 + $0x4b] sm:$0xff]  ;;  %v6043_v34 = vld [vmem:[%s8727_s27 + $0x5b] sm:$0xff]  ;;  %s8476_s9 = smov [#allocation8]  }
  0x91   : > { %v2523_v27 = vpack.c.bf16 %v6039_v20, %v6038_v19  ;;  %v2524_v29 = vpack.c.bf16 %v6041_v26, %v6040_v25  ;;  %v5699_v30 = vld [vmem:[%s8727_s27 + $0x31] sm:$0xff]  ;;  %v5700_v31 = vld [vmem:[%s8727_s27 + $0x39] sm:$0xff]  ;;  %v5701_v35 = vld [vmem:[%s8727_s27 + $0x41] sm:$0xff]  ;;  %p8343_p3 = pnand %p8342_p4, %p10111_p1  ;;  %s8345_s11 = sshll.u32 %s8476_s9, 4  ;;  %s8346_s11 = int_to_ptr.vmem [resolvable:$false] %s8345_s11 }
  0x92   : > { %6889 = vmatpush3.bf16.msra.mxu1 %v8209_v4  ;;  %7185 = vmatpush3.bf16.msra.mxu0 %v8210_v5  ;;  %v6042_v33 = vld [vmem:[%s8727_s27 + $0x53] sm:$0xff]  ;;  %v5702_v36 = vld [vmem:[%s8727_s27 + $0x49] sm:$0xff]  ;;  %v409_v41 = vpack.c.bf16 %v5700_v31, %v5699_v30  ;;  %v6047_v49 = vld [vmem:[%s8727_s27 + $0x7b] sm:$0xff]  ;;  %s8347_s23 = scalar_lea.vmem %s8346_s11, 16384  ;;  %p8348_p7 = scmp.lt.s32.totalorder %s10006_s19, %s8346_s11 }
  0x93   : > { %6890 = vmatprep.subr.bf16.mxu1 %v8211_v6  ;;  %7186 = vmatprep.subr.bf16.mxu0 %v8212_v7  ;;  %v6044_v37 = vld [vmem:[%s8727_s27 + $0x63] sm:$0xff]  ;;  %v8218_v38 = vld [vmem:[#allocation5 + $0x8] sm:$0xff]   ;;  %v6045_v39 = vld [vmem:[%s8727_s27 + $0x6b] sm:$0xff]  ;;  %v2525_v42 = vpack.c.bf16 %v6043_v34, %v6042_v33  ;;  %v410_v43 = vpack.c.bf16 %v5702_v36, %v5701_v35  ;;  %p8344_p13 = pneg %p8343_p3  ;;  %p8349_p9 = scmp.lt.s32.totalorder %s8347_s23, %s8341_s1 }
  0x94   : > { %v8219_v40 = vld [vmem:[#allocation5 + $0xd8] sm:$0xff]   ;;  %v2526_v44 = vpack.c.bf16 %v6045_v39, %v6044_v37  ;;  %v8220_v45 = vld [vmem:[#allocation5 + $0xe0] sm:$0xff]   ;;  %v5704_v47 = vld [vmem:[%s8727_s27 + $0x59] sm:$0xff] }
  0x95   : > { %v5703_v46 = vld [vmem:[%s8727_s27 + $0x51] sm:$0xff]  ;;  %v5705_v50 = vld [vmem:[%s8727_s27 + $0x61] sm:$0xff]  ;;  %v5706_v51 = vld [vmem:[%s8727_s27 + $0x69] sm:$0xff]  ;;  %p8350_p11 = por %p8349_p9, %p8348_p7 }
  0x96   : > { %6891 = vmatpush3.bf16.msra.mxu1 %v8211_v6  ;;  %7187 = vmatpush3.bf16.msra.mxu0 %v8212_v7  ;;  %v6046_v48 = vld [vmem:[%s8727_s27 + $0x73] sm:$0xff]  ;;  %v6048_v52 = vld [vmem:[%s8727_s27 + $0x83] sm:$0xff]  ;;  %v6049_v53 = vld [vmem:[%s8727_s27 + $0x8b] sm:$0xff]  ;;  %v411_v54 = vpack.c.bf16 %v5704_v47, %v5703_v46  ;;  %v412_v56 = vpack.c.bf16 %v5706_v51, %v5705_v50 }
  0x97   : > { %6892 = vmatprep.subr.bf16.mxu1 %v8213_v13  ;;  %7188 = vmatprep.subr.bf16.mxu0 %v8214_v15  ;;  %v2527_v55 = vpack.c.bf16 %v6047_v49, %v6046_v48  ;;  %v8221_v57 = vld [vmem:[#allocation5 + $0x10] sm:$0xff]   ;;  %v2528_v58 = vpack.c.bf16 %v6049_v53, %v6048_v52  ;;  %v8222_v59 = vld [vmem:[#allocation5 + $0xe8] sm:$0xff]   ;;  %v5710_v1 = vld [vmem:[%s8727_s27 + $0x89] sm:$0xff]  ;;  %p8351_p5 = pnand %p8350_p11, %p8344_p13 }
  0x98   : > { %v5707_v60 = vld [vmem:[%s8727_s27 + $0x71] sm:$0xff]  ;;  %v5708_v61 = vld [vmem:[%s8727_s27 + $0x79] sm:$0xff]  ;;  %v5709_v0 = vld [vmem:[%s8727_s27 + $0x81] sm:$0xff] }
  0x99   : > { %v6050_v62 = vld [vmem:[%s8727_s27 + $0x93] sm:$0xff]  ;;  %v6051_v63 = vld [vmem:[%s8727_s27 + $0x9b] sm:$0xff]  ;;  %v6052_v2 = vld [vmem:[%s8727_s27 + $0xa3] sm:$0xff]  ;;  %v413_v4 = vpack.c.bf16 %v5708_v61, %v5707_v60  ;;  %v414_v7 = vpack.c.bf16 %v5710_v1, %v5709_v0 }
  0x9a   : > { %6893 = vmatpush3.bf16.msra.mxu1 %v8213_v13  ;;  %7189 = vmatpush3.bf16.msra.mxu0 %v8214_v15  ;;  %v6053_v3 = vld [vmem:[%s8727_s27 + $0xab] sm:$0xff]  ;;  %v8779_v5 = vld [vmem:[#allocation5 + $0xf0] sm:$0xff]   ;;  %v2529_v6 = vpack.c.bf16 %v6051_v63, %v6050_v62  ;;  %v6054_v12 = vld [vmem:[%s8727_s27 + $0xb3] sm:$0xff] }
  0x9b   : > { %6958 = vmatprep.subr.bf16.mxu1 %v8215_v18  ;;  %7254 = vmatprep.subr.bf16.mxu0 %v8216_v21  ;;  %v2530_v8 = vpack.c.bf16 %v6053_v3, %v6052_v2  ;;  %v8224_v9 = vld [vmem:[#allocation5 + $0x18] sm:$0xff]   ;;  %v5711_v10 = vld [vmem:[%s8727_s27 + $0x91] sm:$0xff]  ;;  %v5712_v11 = vld [vmem:[%s8727_s27 + $0x99] sm:$0xff] }
  0x9c   : > { %v6055_v13 = vld [vmem:[%s8727_s27 + $0xbb] sm:$0xff]  ;;  %v5714_v15 = vld [vmem:[%s8727_s27 + $0xa9] sm:$0xff]  ;;  %v5715_v22 = vld [vmem:[%s8727_s27 + $0xb1] sm:$0xff] }
  0x9d   : > { %6895 = vmatmul.mubr.msk.bf16.vlgmr.msra.gmra.mrb[0].mxu1 %vm479_vm0, %v407_v24  ;;  %7191 = vmatmul.mubr.msk.bf16.vlgmr.msra.gmra.mrb[0].mxu0 %vm479_vm0, %v2523_v27  ;;  %v5713_v14 = vld [vmem:[%s8727_s27 + $0xa1] sm:$0xff]  ;;  %v6057_v17 = vld [vmem:[%s8727_s27 + $0xcb] sm:$0xff]  ;;  %v2531_v19 = vpack.c.bf16 %v6055_v13, %v6054_v12  ;;  %v5716_v23 = vld [vmem:[%s8727_s27 + $0xb9] sm:$0xff] }
  0x9e   : > { %6959 = vmatpush3.bf16.msra.mxu1 %v8215_v18  ;;  %7255 = vmatpush3.bf16.msra.mxu0 %v8216_v21  ;;  %v6056_v16 = vld [vmem:[%s8727_s27 + $0xc3] sm:$0xff]  ;;  %v415_v18 = vpack.c.bf16 %v5712_v11, %v5711_v10  ;;  %v416_v20 = vpack.c.bf16 %v5714_v15, %v5713_v14  ;;  %v6058_v24 = vld [vmem:[%s8727_s27 + $0xd3] sm:$0xff]  ;;  %v6059_v25 = vld [vmem:[%s8727_s27 + $0xdb] sm:$0xff]  ;;  %v417_v31 = vpack.c.bf16 %v5716_v23, %v5715_v22 }
  0x9f   : > { %6898 = vmatprep.mubr.msk.bf16.mxu1 %vm479_vm0, %v408_v28  ;;  %7194 = vmatprep.mubr.msk.bf16.mxu0 %vm479_vm0, %v2524_v29  ;;  %v2532_v21 = vpack.c.bf16 %v6057_v17, %v6056_v16  ;;  %v5717_v26 = vld [vmem:[%s8727_s27 + $0xc1] sm:$0xff]  ;;  %v5718_v27 = vld [vmem:[%s8727_s27 + $0xc9] sm:$0xff]  ;;  %v5719_v35 = vld [vmem:[%s8727_s27 + $0xd1] sm:$0xff] }
  0xa0   : > { %7256 = vmatprep.subr.bf16.mxu0 %v8217_v32  ;;  %6960 = vmatprep.subr.bf16.mxu1 %v8218_v38  ;;  %v6060_v28 = vld [vmem:[%s8727_s27 + $0xe3] sm:$0xff]  ;;  %v6061_v29 = vld [vmem:[%s8727_s27 + $0xeb] sm:$0xff]  ;;  %v418_v33 = vpack.c.bf16 %v5718_v27, %v5717_v26  ;;  %v5720_v36 = vld [vmem:[%s8727_s27 + $0xd9] sm:$0xff] }
  0xa1   : > { %v8226_v30 = vld [vmem:[#allocation5 + $0x20] sm:$0xff]   ;;  %v2534_v34 = vpack.c.bf16 %v6061_v29, %v6060_v28  ;;  %v5721_v39 = vld [vmem:[%s8727_s27 + $0xe1] sm:$0xff]  ;;  %v5724_v49 = vld [vmem:[%s8727_s27 + $0xf9] sm:$0xff] }
  0xa2   : > { %6961 = vmatpush3.bf16.msra.mxu1 %v8218_v38  ;;  %7257 = vmatpush3.bf16.msra.mxu0 %v8217_v32  ;;  %v2533_v32 = vpack.c.bf16 %v6059_v25, %v6058_v24  ;;  %v6062_v37 = vld [vmem:[%s8727_s27 + $0xf3] sm:$0xff]  ;;  %v6063_v38 = vld [vmem:[%s8727_s27 + $0xfb] sm:$0xff]  ;;  %v5726_v53 = vld [vmem:[%s8727_s27 + $0x109] sm:$0xff] }
  0xa3   : > { %7258 = vmatprep.subr.bf16.mxu0 %v8219_v40  ;;  %6962 = vmatprep.subr.bf16.mxu1 %v8221_v57  ;;  %v8818_v47 = vld [vmem:[#allocation5 + $0x50] sm:$0xff]   ;;  %v5723_v48 = vld [vmem:[%s8727_s27 + $0xf1] sm:$0xff]  ;;  %v5730_v1 = vld [vmem:[%s8727_s27 + $0x129] sm:$0xff] }
  0xa4   : > { %v6066_v50 = vld [vmem:[%s8727_s27 + $0x113] sm:$0xff]  ;;  %v6067_v51 = vld [vmem:[%s8727_s27 + $0x11b] sm:$0xff]  ;;  %v6142_v2 = vld [vmem:[%s8727_s27 + $0x44] sm:$0xff] }
  0xa5   : > { %6899 = vmatmul.mubr.msk.bf16.gmra.mrb[4].mxu1 %vm479_vm0, %v409_v41  ;;  %7195 = vmatmul.mubr.msk.bf16.gmra.mrb[4].mxu0 %vm479_vm0, %v2525_v42  ;;  %v6064_v41 = vld [vmem:[%s8727_s27 + $0x103] sm:$0xff]  ;;  %v6065_v42 = vld [vmem:[%s8727_s27 + $0x10b] sm:$0xff]  ;;  %v5728_v61 = vld [vmem:[%s8727_s27 + $0x119] sm:$0xff] }
  0xa6   : > { %6902 = vmatprep.mubr.msk.bf16.mxu1 %vm479_vm0, %v410_v43  ;;  %7198 = vmatprep.mubr.msk.bf16.mxu0 %vm479_vm0, %v2526_v44  ;;  %v419_v43 = vpack.c.bf16 %v5720_v36, %v5719_v35  ;;  %v2535_v44 = vpack.c.bf16 %v6063_v38, %v6062_v37  ;;  %v2536_v46 = vpack.c.bf16 %v6065_v42, %v6064_v41  ;;  %v5725_v52 = vld [vmem:[%s8727_s27 + $0x101] sm:$0xff]  ;;  %v5727_v60 = vld [vmem:[%s8727_s27 + $0x111] sm:$0xff]  ;;  %v5732_v11 = vld [vmem:[%s8727_s27 + $0x139] sm:$0xff] }
  0xa7   : > { %7259 = vmatpush3.bf16.msra.mxu0 %v8219_v40  ;;  %6963 = vmatpush3.bf16.msra.mxu1 %v8221_v57  ;;  %v5722_v40 = vld [vmem:[%s8727_s27 + $0xe9] sm:$0xff]  ;;  %v2537_v57 = vpack.c.bf16 %v6067_v51, %v6066_v50  ;;  %v6140_v62 = vld [vmem:[%s8727_s27 + $0x34] sm:$0xff]  ;;  %v6141_v63 = vld [vmem:[%s8727_s27 + $0x3c] sm:$0xff] }
  0xa8   : > { %7260 = vmatprep.subr.bf16.mxu0 %v8220_v45  ;;  %6964 = vmatprep.subr.bf16.mxu1 %v8224_v9  ;;  %v5729_v0 = vld [vmem:[%s8727_s27 + $0x121] sm:$0xff]  ;;  %v6143_v3 = vld [vmem:[%s8727_s27 + $0x4c] sm:$0xff]  ;;  %v6144_v12 = vld [vmem:[%s8727_s27 + $0x54] sm:$0xff] }
  0xa9   : > { %v5731_v10 = vld [vmem:[%s8727_s27 + $0x131] sm:$0xff]  ;;  %v6145_v13 = vld [vmem:[%s8727_s27 + $0x5c] sm:$0xff]  ;;  %v5734_v15 = vld [vmem:[%s8727_s27 + $0x149] sm:$0xff] }
  0xaa   : > { %v5733_v14 = vld [vmem:[%s8727_s27 + $0x141] sm:$0xff]  ;;  %v6147_v17 = vld [vmem:[%s8727_s27 + $0x6c] sm:$0xff]  ;;  %v5736_v24 = vld [vmem:[%s8727_s27 + $0x159] sm:$0xff] }
  0xab   : > { %7261 = vmatpush3.bf16.msra.mxu0 %v8220_v45  ;;  %6965 = vmatpush3.bf16.msra.mxu1 %v8224_v9  ;;  %v420_v45 = vpack.c.bf16 %v5722_v40, %v5721_v39  ;;  %v8225_v9 = vld [vmem:[#allocation5 + $0xf8] sm:$0xff]   ;;  %v5735_v23 = vld [vmem:[%s8727_s27 + $0x151] sm:$0xff]  ;;  %v6149_v26 = vld [vmem:[%s8727_s27 + $0x7c] sm:$0xff] }
  0xac   : > { %7262 = vmatprep.subr.bf16.mxu0 %v8222_v59  ;;  %6966 = vmatprep.subr.bf16.mxu1 %v8226_v30  ;;  %v6146_v16 = vld [vmem:[%s8727_s27 + $0x64] sm:$0xff]  ;;  %v6148_v25 = vld [vmem:[%s8727_s27 + $0x74] sm:$0xff]  ;;  %v6153_v40 = vld [vmem:[%s8727_s27 + $0x9c] sm:$0xff] }
  0xad   : > { %6903 = vmatmul.mubr.msk.bf16.gmra.mrb[8].mxu1 %vm479_vm0, %v411_v54  ;;  %7199 = vmatmul.mubr.msk.bf16.gmra.mrb[8].mxu0 %vm479_vm0, %v2527_v55  ;;  %v6138_v54 = vld [vmem:[%s8727_s27 + $0x24] sm:$0xff]  ;;  %v6139_v55 = vld [vmem:[%s8727_s27 + $0x2c] sm:$0xff]  ;;  %v8863_v22 = vpack.c.bf16 %v6147_v17, %v6146_v16  ;;  %v5740_v38 = vld [vmem:[%s8727_s27 + $0x179] sm:$0xff] }
  0xae   : > { %6906 = vmatprep.mubr.msk.bf16.mxu1 %vm479_vm0, %v412_v56  ;;  %7202 = vmatprep.mubr.msk.bf16.mxu0 %vm479_vm0, %v2528_v58  ;;  %v421_v56 = vpack.c.bf16 %v5724_v49, %v5723_v48  ;;  %v422_v58 = vpack.c.bf16 %v5726_v53, %v5725_v52  ;;  %v5737_v27 = vld [vmem:[%s8727_s27 + $0x161] sm:$0xff]  ;;  %v5738_v28 = vld [vmem:[%s8727_s27 + $0x169] sm:$0xff]  ;;  %v5739_v37 = vld [vmem:[%s8727_s27 + $0x171] sm:$0xff] }
  0xaf   : > { %7263 = vmatpush3.bf16.msra.mxu0 %v8222_v59  ;;  %6967 = vmatpush3.bf16.msra.mxu1 %v8226_v30  ;;  %v3110_v59 = vpack.c.bf16 %v6139_v55, %v6138_v54  ;;  %v6150_v29 = vld [vmem:[%s8727_s27 + $0x84] sm:$0xff]  ;;  %v6151_v30 = vld [vmem:[%s8727_s27 + $0x8c] sm:$0xff]  ;;  %v6152_v39 = vld [vmem:[%s8727_s27 + $0x94] sm:$0xff] }
  0xb0   : > { %7328 = vmatprep.subr.bf16.mxu0 %v8779_v5  ;;  %7032 = vmatprep.subr.bf16.mxu1 %v8818_v47  ;;  %v8881_v35 = vld [vmem:[#allocation5 + $0x118] sm:$0xff]   ;;  %v8883_v36 = vpack.c.bf16 %v6151_v30, %v6150_v29  ;;  %v5743_v50 = vld [vmem:[%s8727_s27 + $0x191] sm:$0xff]  ;;  %v5744_v51 = vld [vmem:[%s8727_s27 + $0x199] sm:$0xff] }
  0xb1   : > { %v5741_v41 = vld [vmem:[%s8727_s27 + $0x181] sm:$0xff]  ;;  %v5742_v42 = vld [vmem:[%s8727_s27 + $0x189] sm:$0xff]  ;;  %v6156_v52 = vld [vmem:[%s8727_s27 + $0xb4] sm:$0xff] }
  0xb2   : > { %v430_v48 = vpack.c.bf16 %v5742_v42, %v5741_v41  ;;  %v6157_v53 = vld [vmem:[%s8727_s27 + $0xbc] sm:$0xff]  ;;  %v5746_v55 = vld [vmem:[%s8727_s27 + $0x1a9] sm:$0xff]  ;;  %v6172_v42 = vld [vmem:[%s8727_s27 + $0x134] sm:$0xff] }
  0xb3   : > { %v5745_v54 = vld [vmem:[%s8727_s27 + $0x1a1] sm:$0xff]  ;;  %v5754_v17 = vld [vmem:[%s8727_s27 + $0x1e9] sm:$0xff]  ;;  %v237_v41 = vld [vmem:[%s8727_s27 + $0x18] sm:$0xff] }
  0xb4   : > { %v5753_v16 = vld [vmem:[%s8727_s27 + $0x1e1] sm:$0xff] }
  0xb5   : > { %6907 = vmatmul.mubr.msk.bf16.gmra.mrb[12].mxu1 %vm479_vm0, %v413_v4  ;;  %7203 = vmatmul.mubr.msk.bf16.gmra.mrb[12].mxu0 %vm479_vm0, %v2529_v6  ;;  %v423_v4 = vpack.c.bf16 %v5728_v61, %v5727_v60  ;;  %v3111_v6 = vpack.c.bf16 %v6141_v63, %v6140_v62  ;;  %v432_v60 = vpack.c.bf16 %v5746_v55, %v5745_v54  ;;  %v5747_v62 = vld [vmem:[%s8727_s27 + $0x1b1] sm:$0xff]  ;;  %v5748_v63 = vld [vmem:[%s8727_s27 + $0x1b9] sm:$0xff]  ;;  %v235_v30 = vld [vmem:[%s8727_s27 + $0x8] sm:$0xff] }
  0xb6   : > { %6910 = vmatprep.mubr.msk.bf16.mxu1 %vm479_vm0, %v414_v7  ;;  %7206 = vmatprep.mubr.msk.bf16.mxu0 %vm479_vm0, %v2530_v8  ;;  %v424_v7 = vpack.c.bf16 %v5730_v1, %v5729_v0  ;;  %v8845_v8 = vpack.c.bf16 %v6143_v3, %v6142_v2  ;;  %v6160_v0 = vld [vmem:[%s8727_s27 + $0xd4] sm:$0xff]  ;;  %v6161_v1 = vld [vmem:[%s8727_s27 + $0xdc] sm:$0xff]  ;;  %v5750_v3 = vld [vmem:[%s8727_s27 + $0x1c9] sm:$0xff] }
  0xb7   : > { %v5749_v2 = vld [vmem:[%s8727_s27 + $0x1c1] sm:$0xff] }
  0xb8   : > { %v234_v29 = vld [vmem:[%s8727_s27] sm:$0xff]  ;;  %v8230_v55 = vld [vmem:[#allocation5 + $0x58] sm:$0xff]  }
  0xbd   : > { %6911 = vmatmul.mubr.msk.bf16.gmra.mrb[16].mxu1 %vm479_vm0, %v415_v18  ;;  %7207 = vmatmul.mubr.msk.bf16.gmra.mrb[16].mxu0 %vm479_vm0, %v2531_v19  ;;  %v8227_v18 = vld [vmem:[#allocation5 + $0x100] sm:$0xff]   ;;  %v425_v19 = vpack.c.bf16 %v5732_v11, %v5731_v10  ;;  %v434_v10 = vpack.c.bf16 %v5750_v3, %v5749_v2 }
  0xbe   : > { %6914 = vmatprep.mubr.msk.bf16.mxu1 %vm479_vm0, %v416_v20  ;;  %7210 = vmatprep.mubr.msk.bf16.mxu0 %vm479_vm0, %v2532_v21  ;;  %v8861_v20 = vpack.c.bf16 %v6145_v13, %v6144_v12  ;;  %v426_v21 = vpack.c.bf16 %v5734_v15, %v5733_v14  ;;  %v5751_v12 = vld [vmem:[%s8727_s27 + $0x1d1] sm:$0xff]  ;;  %v5752_v13 = vld [vmem:[%s8727_s27 + $0x1d9] sm:$0xff] }
  0xbf   : > { %v6164_v14 = vld [vmem:[%s8727_s27 + $0xf4] sm:$0xff]  ;;  %v6165_v15 = vld [vmem:[%s8727_s27 + $0xfc] sm:$0xff]  ;;  %v6179_v2 = vld [vmem:[%s8727_s27 + $0x16c] sm:$0xff] }
  0xc5   : > { %6915 = vmatmul.mubr.msk.bf16.gmra.mrb[20].mxu1 %vm479_vm0, %v417_v31  ;;  %7211 = vmatmul.mubr.msk.bf16.gmra.mrb[20].mxu0 %vm479_vm0, %v2533_v32  ;;  %v8231_v31 = vld [vmem:[#allocation5 + $0x110] sm:$0xff]   ;;  %v427_v32 = vpack.c.bf16 %v5736_v24, %v5735_v23  ;;  %v436_v23 = vpack.c.bf16 %v5754_v17, %v5753_v16  ;;  %v247_v16 = vld [vmem:[%s8727_s27 + $0x68] sm:$0xff] }
  0xc6   : > { %6918 = vmatprep.mubr.msk.bf16.mxu1 %vm479_vm0, %v418_v33  ;;  %7214 = vmatprep.mubr.msk.bf16.mxu0 %vm479_vm0, %v2534_v34  ;;  %v8879_v33 = vpack.c.bf16 %v6149_v26, %v6148_v25  ;;  %v428_v34 = vpack.c.bf16 %v5738_v28, %v5737_v27  ;;  %v5755_v25 = vld [vmem:[%s8727_s27 + $0x1f1] sm:$0xff]  ;;  %v5756_v26 = vld [vmem:[%s8727_s27 + $0x1f9] sm:$0xff]  ;;  %v6182_v17 = vld [vmem:[%s8727_s27 + $0x184] sm:$0xff] }
  0xc7   : > { %v6168_v27 = vld [vmem:[%s8727_s27 + $0x114] sm:$0xff]  ;;  %v6169_v28 = vld [vmem:[%s8727_s27 + $0x11c] sm:$0xff] }
  0xcd   : > { %6919 = vmatmul.mubr.msk.bf16.gmra.mrb[24].mxu1 %vm479_vm0, %v419_v43  ;;  %7215 = vmatmul.mubr.msk.bf16.gmra.mrb[24].mxu0 %vm479_vm0, %v2535_v44  ;;  %v6154_v43 = vld [vmem:[%s8727_s27 + $0xa4] sm:$0xff]  ;;  %v6155_v44 = vld [vmem:[%s8727_s27 + $0xac] sm:$0xff] }
  0xce   : > { %6922 = vmatprep.mubr.msk.bf16.mxu1 %vm479_vm0, %v420_v45  ;;  %7218 = vmatprep.mubr.msk.bf16.mxu0 %vm479_vm0, %v2536_v46  ;;  %v429_v45 = vpack.c.bf16 %v5740_v38, %v5739_v37  ;;  %v8900_v46 = vpack.c.bf16 %v6153_v40, %v6152_v39  ;;  %v8902_v49 = vpack.c.bf16 %v6155_v44, %v6154_v43  ;;  %v236_v40 = vld [vmem:[%s8727_s27 + $0x10] sm:$0xff]  ;;  %v6173_v43 = vld [vmem:[%s8727_s27 + $0x13c] sm:$0xff] }
  0xcf   : > { %v8972_v37 = vpack.c.bf16 %v6169_v28, %v6168_v27  ;;  %v298_v38 = vpack.c.bf16 %v235_v30, %v234_v29  ;;  %v238_v44 = vld [vmem:[%s8727_s27 + $0x20] sm:$0xff]  ;;  %v9031_v27 = vld [vmem:[#allocation5 + $0x78] sm:$0xff]   ;;  %v248_v28 = vld [vmem:[%s8727_s27 + $0x70] sm:$0xff] }
  0xd0   : > { %v249_v29 = vld [vmem:[%s8727_s27 + $0x78] sm:$0xff] }
  0xd1   : > { %v6184_v30 = vld [vmem:[%s8727_s27 + $0x194] sm:$0xff] }
  0xd5   : > { %6923 = vmatmul.mubr.msk.bf16.gmra.mrb[28].mxu1 %vm479_vm0, %v421_v56  ;;  %7219 = vmatmul.mubr.msk.bf16.gmra.mrb[28].mxu0 %vm479_vm0, %v2537_v57  ;;  %v6158_v56 = vld [vmem:[%s8727_s27 + $0xc4] sm:$0xff]  ;;  %v6159_v57 = vld [vmem:[%s8727_s27 + $0xcc] sm:$0xff] }
  0xd6   : > { %6926 = vmatprep.mubr.msk.bf16.mxu1 %vm479_vm0, %v422_v58  ;;  %7264 = vmatprep.mubr.msk.bf16.mxu0 %vm479_vm0, %v3110_v59  ;;  %v431_v58 = vpack.c.bf16 %v5744_v51, %v5743_v50  ;;  %v8918_v59 = vpack.c.bf16 %v6157_v53, %v6156_v52  ;;  %v8920_v61 = vpack.c.bf16 %v6159_v57, %v6158_v56  ;;  %v6175_v50 = vld [vmem:[%s8727_s27 + $0x14c] sm:$0xff]  ;;  %v241_v57 = vld [vmem:[%s8727_s27 + $0x38] sm:$0xff] }
  0xd7   : > { %v299_v51 = vpack.c.bf16 %v237_v41, %v236_v40  ;;  %v8990_v52 = vpack.c.bf16 %v6173_v43, %v6172_v42  ;;  %v240_v56 = vld [vmem:[%s8727_s27 + $0x30] sm:$0xff]  ;;  %v305_v41 = vpack.c.bf16 %v249_v29, %v248_v28  ;;  %v263_v28 = vld [vmem:[%s8727_s27 + $0xe8] sm:$0xff] }
  0xd8   : > { %v6187_v40 = vld [vmem:[%s8727_s27 + $0x1ac] sm:$0xff]  ;;  %v6198_v29 = vld [vmem:[%s8727_s27 + $0x204] sm:$0xff] }
  0xdd   : > { %6927 = vmatmul.mubr.msk.bf16.gmra.mrb[32].mxu1 %vm479_vm0, %v423_v4  ;;  %7265 = vmatmul.mubr.msk.bf16.vlgmr.msra.gmra.mrb[0].mxu0 %vm479_vm0, %v3111_v6  ;;  %v6162_v4 = vld [vmem:[%s8727_s27 + $0xe4] sm:$0xff]  ;;  %v6163_v6 = vld [vmem:[%s8727_s27 + $0xec] sm:$0xff] }
  0xde   : > { %6930 = vmatprep.mubr.msk.bf16.mxu1 %vm479_vm0, %v424_v7  ;;  %7329 = vmatpush3.bf16.msra.mxu0 %v8779_v5  ;;  %v8229_v5 = vld [vmem:[#allocation5 + $0x108] sm:$0xff]   ;;  %v433_v7 = vpack.c.bf16 %v5748_v63, %v5747_v62  ;;  %v8938_v11 = vpack.c.bf16 %v6163_v6, %v6162_v4  ;;  %v242_v62 = vld [vmem:[%s8727_s27 + $0x40] sm:$0xff]  ;;  %v243_v63 = vld [vmem:[%s8727_s27 + $0x48] sm:$0xff] }
  0xdf   : > { %7268 = vmatprep.mubr.msk.bf16.mxu0 %vm479_vm0, %v8845_v8  ;;  %7330 = vmatprep.subr.bf16.mxu0 %v8225_v9  ;;  %v302_v4 = vpack.c.bf16 %v243_v63, %v242_v62 }
  0xe2   : > { %7331 = vmatpush3.bf16.msra.mxu0 %v8225_v9  ;;  %v8936_v9 = vpack.c.bf16 %v6161_v1, %v6160_v0  ;;  %v8232_v0 = vld [vmem:[#allocation5 + $0x60] sm:$0xff]   ;;  %v6178_v1 = vld [vmem:[%s8727_s27 + $0x164] sm:$0xff] }
  0xe3   : > { %7332 = vmatprep.subr.bf16.mxu0 %v8227_v18  ;;  %v9011_v6 = vpack.c.bf16 %v6179_v2, %v6178_v1  ;;  %v257_v1 = vld [vmem:[%s8727_s27 + $0xb8] sm:$0xff] }
  0xe4   : > { %v6192_v2 = vld [vmem:[%s8727_s27 + $0x1d4] sm:$0xff] }
  0xe5   : > { %6931 = vmatmul.mubr.msk.bf16.gmra.mrb[36].mxu1 %vm479_vm0, %v425_v19  ;;  %7269 = vmatmul.mubr.msk.bf16.gmra.mrb[4].mxu0 %vm479_vm0, %v8861_v20  ;;  %v6167_v19 = vld [vmem:[%s8727_s27 + $0x10c] sm:$0xff] }
  0xe6   : > { %6934 = vmatprep.mubr.msk.bf16.mxu1 %vm479_vm0, %v426_v21  ;;  %7272 = vmatprep.mubr.msk.bf16.mxu0 %vm479_vm0, %v8863_v22  ;;  %v435_v21 = vpack.c.bf16 %v5752_v13, %v5751_v12  ;;  %v245_v12 = vld [vmem:[%s8727_s27 + $0x58] sm:$0xff] }
  0xe7   : > { %7333 = vmatpush3.bf16.msra.mxu0 %v8227_v18  ;;  %v6166_v18 = vld [vmem:[%s8727_s27 + $0x104] sm:$0xff]  ;;  %v6180_v13 = vld [vmem:[%s8727_s27 + $0x174] sm:$0xff] }
  0xe8   : > { %7334 = vmatprep.subr.bf16.mxu0 %v8229_v5  ;;  %v8956_v24 = vpack.c.bf16 %v6167_v19, %v6166_v18  ;;  %v6183_v18 = vld [vmem:[%s8727_s27 + $0x18c] sm:$0xff]  ;;  %v8236_v19 = vld [vmem:[#allocation5 + $0x70] sm:$0xff]  }
  0xeb   : > { %7335 = vmatpush3.bf16.msra.mxu0 %v8229_v5  ;;  %v8954_v5 = vpack.c.bf16 %v6165_v15, %v6164_v14  ;;  %v6181_v14 = vld [vmem:[%s8727_s27 + $0x17c] sm:$0xff] }
  0xec   : > { %7336 = vmatprep.subr.bf16.mxu0 %v8231_v31  ;;  %v246_v15 = vld [vmem:[%s8727_s27 + $0x60] sm:$0xff] }
  0xed   : > { %6935 = vmatmul.mubr.msk.bf16.gmra.mrb[40].mxu1 %vm479_vm0, %v427_v32  ;;  %7273 = vmatmul.mubr.msk.bf16.gmra.mrb[8].mxu0 %vm479_vm0, %v8879_v33  ;;  %v6171_v32 = vld [vmem:[%s8727_s27 + $0x12c] sm:$0xff] }
  0xee   : > { %6938 = vmatprep.mubr.msk.bf16.mxu1 %vm479_vm0, %v428_v34  ;;  %7276 = vmatprep.mubr.msk.bf16.mxu0 %vm479_vm0, %v8883_v36  ;;  %v437_v34 = vpack.c.bf16 %v5756_v26, %v5755_v25  ;;  %v304_v25 = vpack.c.bf16 %v247_v16, %v246_v15  ;;  %v9029_v26 = vpack.c.bf16 %v6183_v18, %v6182_v17  ;;  %v260_v17 = vld [vmem:[%s8727_s27 + $0xd0] sm:$0xff]  ;;  %v261_v18 = vld [vmem:[%s8727_s27 + $0xd8] sm:$0xff] }
  0xef   : > { %7337 = vmatpush3.bf16.msra.mxu0 %v8231_v31  ;;  %v6170_v31 = vld [vmem:[%s8727_s27 + $0x124] sm:$0xff] }
  0xf0   : > { %7402 = vmatprep.subr.bf16.mxu0 %v8881_v35  ;;  %v8974_v39 = vpack.c.bf16 %v6171_v32, %v6170_v31  ;;  %v6185_v31 = vld [vmem:[%s8727_s27 + $0x19c] sm:$0xff] }
  0xf1   : > { %v250_v32 = vld [vmem:[%s8727_s27 + $0x80] sm:$0xff]  ;;  %v9048_v42 = vpack.c.bf16 %v6185_v31, %v6184_v30  ;;  %v6199_v30 = vld [vmem:[%s8727_s27 + $0x20c] sm:$0xff]  ;;  %v311_v31 = vpack.c.bf16 %v261_v18, %v260_v17 }
  0xf2   : > { %v279_v17 = vld [vmem:[%s8727_s27 + $0x168] sm:$0xff] }
  0xf3   : > { %v8241_v18 = vld [vmem:[#allocation5 + $0x138] sm:$0xff]  }
  0xf5   : > { %6939 = vmatmul.mubr.msk.bf16.gmra.mrb[44].mxu1 %vm479_vm0, %v429_v45  ;;  %7277 = vmatmul.mubr.msk.bf16.gmra.mrb[12].mxu0 %vm479_vm0, %v8900_v46  ;;  %v239_v45 = vld [vmem:[%s8727_s27 + $0x28] sm:$0xff] }
  0xf6   : > { %6942 = vmatprep.mubr.msk.bf16.mxu1 %vm479_vm0, %v430_v48  ;;  %7280 = vmatprep.mubr.msk.bf16.mxu0 %vm479_vm0, %v8902_v49  ;;  %v6174_v48 = vld [vmem:[%s8727_s27 + $0x144] sm:$0xff]  ;;  %v300_v53 = vpack.c.bf16 %v239_v45, %v238_v44  ;;  %v252_v45 = vld [vmem:[%s8727_s27 + $0x90] sm:$0xff] }
  0xf7   : > { %v8992_v54 = vpack.c.bf16 %v6175_v50, %v6174_v48  ;;  %v253_v48 = vld [vmem:[%s8727_s27 + $0x98] sm:$0xff] }
  0xf8   : > { %v6188_v50 = vld [vmem:[%s8727_s27 + $0x1b4] sm:$0xff] }
  0xfd   : > { %6943 = vmatmul.mubr.msk.bf16.gmra.mrb[48].mxu1 %vm479_vm0, %v431_v58  ;;  %7281 = vmatmul.mubr.msk.bf16.gmra.mrb[16].mxu0 %vm479_vm0, %v8918_v59  ;;  %v6176_v58 = vld [vmem:[%s8727_s27 + $0x154] sm:$0xff] }
  0xfe   : > { %6946 = vmatprep.mubr.msk.bf16.mxu1 %vm479_vm0, %v432_v60  ;;  %7284 = vmatprep.mubr.msk.bf16.mxu0 %vm479_vm0, %v8920_v61  ;;  %v6177_v60 = vld [vmem:[%s8727_s27 + $0x15c] sm:$0xff] }
  0xff   : > { %v9009_v3 = vpack.c.bf16 %v6177_v60, %v6176_v58  ;;  %v307_v58 = vpack.c.bf16 %v253_v48, %v252_v45  ;;  %v6201_v45 = vld [vmem:[%s8727_s27 + $0x21c] sm:$0xff] }
 0x100   : > { %v266_v48 = vld [vmem:[%s8727_s27 + $0x100] sm:$0xff] }
 0x105   : > { %6947 = vmatmul.mubr.msk.bf16.gmra.mrb[52].mxu1 %vm479_vm0, %v433_v7  ;;  %7285 = vmatmul.mubr.msk.bf16.gmra.mrb[20].mxu0 %vm479_vm0, %v8936_v9  ;;  %v8234_v7 = vld [vmem:[#allocation5 + $0x68] sm:$0xff]  }
 0x106   : > { %6950 = vmatprep.mubr.msk.bf16.mxu1 %vm479_vm0, %v434_v10  ;;  %7288 = vmatprep.mubr.msk.bf16.mxu0 %vm479_vm0, %v8938_v11  ;;  %v244_v10 = vld [vmem:[%s8727_s27 + $0x50] sm:$0xff] }
 0x10d   : > { %6951 = vmatmul.mubr.msk.bf16.gmra.mrb[56].mxu1 %vm479_vm0, %v435_v21  ;;  %7289 = vmatmul.mubr.msk.bf16.gmra.mrb[24].mxu0 %vm479_vm0, %v8954_v5  ;;  %v303_v21 = vpack.c.bf16 %v245_v12, %v244_v10  ;;  %v6194_v10 = vld [vmem:[%s8727_s27 + $0x1e4] sm:$0xff]  ;;  %v6195_v12 = vld [vmem:[%s8727_s27 + $0x1ec] sm:$0xff] }
 0x10e   : > { %6954 = vmatprep.mubr.msk.bf16.mxu1 %vm479_vm0, %v436_v23  ;;  %7292 = vmatprep.mubr.msk.bf16.mxu0 %vm479_vm0, %v8956_v24  ;;  %v9027_v23 = vpack.c.bf16 %v6181_v14, %v6180_v13  ;;  %v9086_v16 = vpack.c.bf16 %v6195_v12, %v6194_v10  ;;  %v8237_v10 = vld [vmem:[#allocation5 + $0x128] sm:$0xff]  }
 0x115   : > { %6955 = vmatmul.mubr.msk.bf16.gmra.mrb[60].mxu1 %vm479_vm0, %v437_v34  ;;  %7293 = vmatmul.mubr.msk.bf16.gmra.mrb[28].mxu0 %vm479_vm0, %v8972_v37  ;;  %v251_v34 = vld [vmem:[%s8727_s27 + $0x88] sm:$0xff] }
 0x116   : > { %6968 = vmatprep.mubr.msk.bf16.mxu1 %vm479_vm0, %v298_v38  ;;  %7296 = vmatprep.mubr.msk.bf16.mxu0 %vm479_vm0, %v8974_v39  ;;  %v6186_v38 = vld [vmem:[%s8727_s27 + $0x1a4] sm:$0xff]  ;;  %v306_v43 = vpack.c.bf16 %v251_v34, %v250_v32 }
 0x117   : > { %v9050_v44 = vpack.c.bf16 %v6187_v40, %v6186_v38  ;;  %v9104_v38 = vpack.c.bf16 %v6199_v30, %v6198_v29  ;;  %v264_v40 = vld [vmem:[%s8727_s27 + $0xf0] sm:$0xff]  ;;  %v283_v29 = vld [vmem:[%s8727_s27 + $0x188] sm:$0xff] }
 0x11d   : > { %6969 = vmatmul.mubr.msk.bf16.vlgmr.msra.gmra.mrb[0].mxu1 %vm479_vm0, %v299_v51  ;;  %7297 = vmatmul.mubr.msk.bf16.gmra.mrb[32].mxu0 %vm479_vm0, %v8990_v52  ;;  %v6189_v51 = vld [vmem:[%s8727_s27 + $0x1bc] sm:$0xff] }
 0x11e   : > { %7033 = vmatpush3.bf16.msra.mxu1 %v8818_v47  ;;  %6972 = vmatprep.mubr.msk.bf16.mxu1 %vm479_vm0, %v300_v53  ;;  %v301_v47 = vpack.c.bf16 %v241_v57, %v240_v56  ;;  %v254_v53 = vld [vmem:[%s8727_s27 + $0xa0] sm:$0xff]  ;;  %v6191_v57 = vld [vmem:[%s8727_s27 + $0x1cc] sm:$0xff]  ;;  %v9066_v60 = vpack.c.bf16 %v6189_v51, %v6188_v50 }
 0x11f   : > { %7300 = vmatprep.mubr.msk.bf16.mxu0 %vm479_vm0, %v8992_v54  ;;  %7034 = vmatprep.subr.bf16.mxu1 %v8230_v55  ;;  %v6190_v56 = vld [vmem:[%s8727_s27 + $0x1c4] sm:$0xff] }
 0x120   : > { %v9068_v63 = vpack.c.bf16 %v6191_v57, %v6190_v56  ;;  %v267_v50 = vld [vmem:[%s8727_s27 + $0x108] sm:$0xff]  ;;  %v268_v56 = vld [vmem:[%s8727_s27 + $0x110] sm:$0xff]  ;;  %v269_v57 = vld [vmem:[%s8727_s27 + $0x118] sm:$0xff] }
 0x122   : > { %7035 = vmatpush3.bf16.msra.mxu1 %v8230_v55  ;;  %v255_v55 = vld [vmem:[%s8727_s27 + $0xa8] sm:$0xff] }
 0x123   : > { %7036 = vmatprep.subr.bf16.mxu1 %v8232_v0  ;;  %v308_v62 = vpack.c.bf16 %v255_v55, %v254_v53  ;;  %v314_v55 = vpack.c.bf16 %v267_v50, %v266_v48  ;;  %v291_v48 = vld [vmem:[%s8727_s27 + $0x1c8] sm:$0xff] }
 0x125   : > { %6973 = vmatmul.mubr.msk.bf16.gmra.mrb[4].mxu1 %vm479_vm0, %v301_v47  ;;  %7301 = vmatmul.mubr.msk.bf16.gmra.mrb[36].mxu0 %vm479_vm0, %v9009_v3  ;;  %v6193_v47 = vld [vmem:[%s8727_s27 + $0x1dc] sm:$0xff] }
 0x126   : > { %6976 = vmatprep.mubr.msk.bf16.mxu1 %vm479_vm0, %v302_v4  ;;  %7304 = vmatprep.mubr.msk.bf16.mxu0 %vm479_vm0, %v9011_v6  ;;  %v258_v4 = vld [vmem:[%s8727_s27 + $0xc0] sm:$0xff]  ;;  %v9084_v14 = vpack.c.bf16 %v6193_v47, %v6192_v2  ;;  %v8235_v2 = vld [vmem:[#allocation5 + $0x120] sm:$0xff]  }
 0x127   : > { %7037 = vmatpush3.bf16.msra.mxu1 %v8232_v0  ;;  %v256_v0 = vld [vmem:[%s8727_s27 + $0xb0] sm:$0xff] }
 0x128   : > { %7038 = vmatprep.subr.bf16.mxu1 %v8234_v7  ;;  %v309_v13 = vpack.c.bf16 %v257_v1, %v256_v0  ;;  %v315_v0 = vpack.c.bf16 %v269_v57, %v268_v56  ;;  %v272_v47 = vld [vmem:[%s8727_s27 + $0x130] sm:$0xff]  ;;  %v295_v56 = vld [vmem:[%s8727_s27 + $0x1e8] sm:$0xff] }
 0x12b   : > { %7039 = vmatpush3.bf16.msra.mxu1 %v8234_v7  ;;  %v259_v7 = vld [vmem:[%s8727_s27 + $0xc8] sm:$0xff] }
 0x12c   : > { %7040 = vmatprep.subr.bf16.mxu1 %v8236_v19  ;;  %v310_v15 = vpack.c.bf16 %v259_v7, %v258_v4  ;;  %v273_v4 = vld [vmem:[%s8727_s27 + $0x138] sm:$0xff]  ;;  %v275_v7 = vld [vmem:[%s8727_s27 + $0x148] sm:$0xff] }
 0x12d   : > { %6977 = vmatmul.mubr.msk.bf16.gmra.mrb[8].mxu1 %vm479_vm0, %v303_v21  ;;  %7305 = vmatmul.mubr.msk.bf16.gmra.mrb[40].mxu0 %vm479_vm0, %v9027_v23  ;;  %v6197_v21 = vld [vmem:[%s8727_s27 + $0x1fc] sm:$0xff]  ;;  %v317_v12 = vpack.c.bf16 %v273_v4, %v272_v47  ;;  %v5837_v4 = vld [vmem:[%s8727_s27 + $0x2a] sm:$0xff] }
 0x12e   : > { %6980 = vmatprep.mubr.msk.bf16.mxu1 %vm479_vm0, %v304_v25  ;;  %7308 = vmatprep.mubr.msk.bf16.mxu0 %vm479_vm0, %v9029_v26  ;;  %v262_v25 = vld [vmem:[%s8727_s27 + $0xe0] sm:$0xff] }
 0x12f   : > { %7041 = vmatpush3.bf16.msra.mxu1 %v8236_v19  ;;  %v6196_v19 = vld [vmem:[%s8727_s27 + $0x1f4] sm:$0xff]  ;;  %v312_v34 = vpack.c.bf16 %v263_v28, %v262_v25  ;;  %v282_v28 = vld [vmem:[%s8727_s27 + $0x180] sm:$0xff] }
 0x130   : > { %7106 = vmatprep.subr.bf16.mxu1 %v9031_v27  ;;  %v9102_v32 = vpack.c.bf16 %v6197_v21, %v6196_v19  ;;  %v281_v25 = vld [vmem:[%s8727_s27 + $0x178] sm:$0xff] }
 0x131   : > { %v5835_v47 = vld [vmem:[%s8727_s27 + $0x1a] sm:$0xff] }
 0x135   : > { %6981 = vmatmul.mubr.msk.bf16.gmra.mrb[12].mxu1 %vm479_vm0, %v305_v41  ;;  %7309 = vmatmul.mubr.msk.bf16.gmra.mrb[44].mxu0 %vm479_vm0, %v9048_v42  ;;  %v265_v41 = vld [vmem:[%s8727_s27 + $0xf8] sm:$0xff] }
 0x136   : > { %6984 = vmatprep.mubr.msk.bf16.mxu1 %vm479_vm0, %v306_v43  ;;  %7312 = vmatprep.mubr.msk.bf16.mxu0 %vm479_vm0, %v9050_v44  ;;  %v6200_v43 = vld [vmem:[%s8727_s27 + $0x214] sm:$0xff]  ;;  %v313_v51 = vpack.c.bf16 %v265_v41, %v264_v40  ;;  %v287_v40 = vld [vmem:[%s8727_s27 + $0x1a8] sm:$0xff] }
 0x137   : > { %v9118_v53 = vpack.c.bf16 %v6201_v45, %v6200_v43  ;;  %v289_v45 = vld [vmem:[%s8727_s27 + $0x1b8] sm:$0xff] }
 0x13d   : > { %6985 = vmatmul.mubr.msk.bf16.gmra.mrb[16].mxu1 %vm479_vm0, %v307_v58  ;;  %7313 = vmatmul.mubr.msk.bf16.gmra.mrb[48].mxu0 %vm479_vm0, %v9066_v60  ;;  %v270_v58 = vld [vmem:[%s8727_s27 + $0x120] sm:$0xff] }
 0x13e   : > { %6988 = vmatprep.mubr.msk.bf16.mxu1 %vm479_vm0, %v308_v62  ;;  %7316 = vmatprep.mubr.msk.bf16.mxu0 %vm479_vm0, %v9068_v63  ;;  %v271_v62 = vld [vmem:[%s8727_s27 + $0x128] sm:$0xff] }
 0x13f   : > { %v316_v1 = vpack.c.bf16 %v271_v62, %v270_v58  ;;  %v297_v62 = vld [vmem:[%s8727_s27 + $0x1f8] sm:$0xff] }
 0x145   : > { %6989 = vmatmul.mubr.msk.bf16.gmra.mrb[20].mxu1 %vm479_vm0, %v309_v13  ;;  %7317 = vmatmul.mubr.msk.bf16.gmra.mrb[52].mxu0 %vm479_vm0, %v9084_v14 }
 0x146   : > { %6992 = vmatprep.mubr.msk.bf16.mxu1 %vm479_vm0, %v310_v15  ;;  %7320 = vmatprep.mubr.msk.bf16.mxu0 %vm479_vm0, %v9086_v16  ;;  %v278_v15 = vld [vmem:[%s8727_s27 + $0x160] sm:$0xff] }
 0x147   : > { %v320_v21 = vpack.c.bf16 %v279_v17, %v278_v15  ;;  %v5844_v15 = vld [vmem:[%s8727_s27 + $0x62] sm:$0xff]  ;;  %v5845_v17 = vld [vmem:[%s8727_s27 + $0x6a] sm:$0xff] }
 0x14d   : > { %6993 = vmatmul.mubr.msk.bf16.gmra.mrb[24].mxu1 %vm479_vm0, %v311_v31  ;;  %7321 = vmatmul.mubr.msk.bf16.gmra.mrb[56].mxu0 %vm479_vm0, %v9102_v32  ;;  %v322_v31 = vpack.c.bf16 %v283_v29, %v282_v28  ;;  %v9260_v28 = vld [vmem:[#allocation5 + $0xa0] sm:$0xff]  }
 0x14e   : > { %6996 = vmatprep.mubr.msk.bf16.mxu1 %vm479_vm0, %v312_v34  ;;  %7324 = vmatprep.mubr.msk.bf16.mxu0 %vm479_vm0, %v9104_v38  ;;  %v286_v34 = vld [vmem:[%s8727_s27 + $0x1a0] sm:$0xff] }
 0x14f   : > { %v324_v43 = vpack.c.bf16 %v287_v40, %v286_v34  ;;  %v5856_v40 = vld [vmem:[%s8727_s27 + $0xc2] sm:$0xff] }
 0x155   : > { %6997 = vmatmul.mubr.msk.bf16.gmra.mrb[28].mxu1 %vm479_vm0, %v313_v51  ;;  %7325 = vmatmul.mubr.msk.bf16.gmra.mrb[60].mxu0 %vm479_vm0, %v9118_v53 }
 0x156   : > { %7000 = vmatprep.mubr.msk.bf16.mxu1 %vm479_vm0, %v314_v55  ;;  %7338 = vmatprep.mubr.msk.bf16.mxu0 %vm479_vm0, %v8845_v8  ;;  %v274_v8 = vld [vmem:[%s8727_s27 + $0x140] sm:$0xff]  ;;  %v293_v55 = vld [vmem:[%s8727_s27 + $0x1d8] sm:$0xff] }
 0x157   : > { %v318_v13 = vpack.c.bf16 %v275_v7, %v274_v8 }
 0x15d   : > { %7001 = vmatmul.mubr.msk.bf16.gmra.mrb[32].mxu1 %vm479_vm0, %v315_v0  ;;  %7339 = vmatmul.mubr.msk.bf16.vlgmr.msra.gmra.mrb[0].mxu0 %vm479_vm0, %v8861_v20  ;;  %v8239_v20 = vld [vmem:[#allocation5 + $0x130] sm:$0xff]   ;;  %v5833_v0 = vld [vmem:[%s8727_s27 + $0xa] sm:$0xff] }
 0x15e   : > { %7004 = vmatprep.mubr.msk.bf16.mxu1 %vm479_vm0, %v316_v1  ;;  %7403 = vmatpush3.bf16.msra.mxu0 %v8881_v35  ;;  %v276_v35 = vld [vmem:[%s8727_s27 + $0x150] sm:$0xff] }
 0x15f   : > { %7342 = vmatprep.mubr.msk.bf16.mxu0 %vm479_vm0, %v8863_v22  ;;  %7404 = vmatprep.subr.bf16.mxu0 %v8235_v2  ;;  %v277_v22 = vld [vmem:[%s8727_s27 + $0x158] sm:$0xff] }
 0x160   : > { %v319_v19 = vpack.c.bf16 %v277_v22, %v276_v35  ;;  %v5843_v22 = vld [vmem:[%s8727_s27 + $0x5a] sm:$0xff] }
 0x162   : > { %7405 = vmatpush3.bf16.msra.mxu0 %v8235_v2 }
 0x163   : > { %7406 = vmatprep.subr.bf16.mxu0 %v8237_v10 }
 0x165   : > { %7005 = vmatmul.mubr.msk.bf16.gmra.mrb[36].mxu1 %vm479_vm0, %v317_v12  ;;  %7343 = vmatmul.mubr.msk.bf16.gmra.mrb[4].mxu0 %vm479_vm0, %v8879_v33  ;;  %v9151_v33 = vld [vmem:[#allocation5 + $0x140] sm:$0xff]   ;;  %v5839_v12 = vld [vmem:[%s8727_s27 + $0x3a] sm:$0xff] }
 0x166   : > { %7008 = vmatprep.mubr.msk.bf16.mxu1 %vm479_vm0, %v318_v13  ;;  %7346 = vmatprep.mubr.msk.bf16.mxu0 %vm479_vm0, %v8883_v36  ;;  %v280_v36 = vld [vmem:[%s8727_s27 + $0x170] sm:$0xff] }
 0x167   : > { %7407 = vmatpush3.bf16.msra.mxu0 %v8237_v10  ;;  %v321_v30 = vpack.c.bf16 %v281_v25, %v280_v36  ;;  %v8240_v10 = vld [vmem:[#allocation5 + $0x80] sm:$0xff]   ;;  %v5848_v36 = vld [vmem:[%s8727_s27 + $0x82] sm:$0xff] }
 0x168   : > { %7408 = vmatprep.subr.bf16.mxu0 %v8239_v20  ;;  %v5841_v13 = vld [vmem:[%s8727_s27 + $0x4a] sm:$0xff] }
 0x169   : > { %v5849_v25 = vld [vmem:[%s8727_s27 + $0x8a] sm:$0xff] }
 0x16a   : > { %v9265_v29 = vpack.c.bf16 %v5849_v25, %v5848_v36  ;;  %v6351_v36 = vld [vmem:[%s8727_s27 + $0x8d] sm:$0xff]  ;;  %v8247_v25 = vld [vmem:[#allocation5 + $0x150] sm:$0xff]  }
 0x16b   : > { %7409 = vmatpush3.bf16.msra.mxu0 %v8239_v20  ;;  %v8242_v20 = vld [vmem:[#allocation5 + $0x88] sm:$0xff]  }
 0x16c   : > { %7410 = vmatprep.subr.bf16.mxu0 %v8241_v18 }
 0x16d   : > { %7009 = vmatmul.mubr.msk.bf16.gmra.mrb[40].mxu1 %vm479_vm0, %v319_v19  ;;  %7347 = vmatmul.mubr.msk.bf16.gmra.mrb[8].mxu0 %vm479_vm0, %v8900_v46  ;;  %v284_v46 = vld [vmem:[%s8727_s27 + $0x190] sm:$0xff] }
 0x16e   : > { %7012 = vmatprep.mubr.msk.bf16.mxu1 %vm479_vm0, %v320_v21  ;;  %7350 = vmatprep.mubr.msk.bf16.mxu0 %vm479_vm0, %v8902_v49  ;;  %v285_v49 = vld [vmem:[%s8727_s27 + $0x198] sm:$0xff] }
 0x16f   : > { %7411 = vmatpush3.bf16.msra.mxu0 %v8241_v18  ;;  %v323_v41 = vpack.c.bf16 %v285_v49, %v284_v46  ;;  %v8246_v18 = vld [vmem:[#allocation5 + $0x98] sm:$0xff]   ;;  %v5847_v21 = vld [vmem:[%s8727_s27 + $0x7a] sm:$0xff] }
 0x170   : > { %7476 = vmatprep.subr.bf16.mxu0 %v9151_v33  ;;  %v5853_v46 = vld [vmem:[%s8727_s27 + $0xaa] sm:$0xff] }
 0x175   : > { %7013 = vmatmul.mubr.msk.bf16.gmra.mrb[44].mxu1 %vm479_vm0, %v321_v30  ;;  %7351 = vmatmul.mubr.msk.bf16.gmra.mrb[12].mxu0 %vm479_vm0, %v8918_v59  ;;  %v288_v59 = vld [vmem:[%s8727_s27 + $0x1b0] sm:$0xff]  ;;  %v5851_v30 = vld [vmem:[%s8727_s27 + $0x9a] sm:$0xff] }
 0x176   : > { %7016 = vmatprep.mubr.msk.bf16.mxu1 %vm479_vm0, %v322_v31  ;;  %7354 = vmatprep.mubr.msk.bf16.mxu0 %vm479_vm0, %v8920_v61  ;;  %v290_v61 = vld [vmem:[%s8727_s27 + $0x1c0] sm:$0xff]  ;;  %v325_v50 = vpack.c.bf16 %v289_v45, %v288_v59 }
 0x177   : > { %v326_v51 = vpack.c.bf16 %v291_v48, %v290_v61  ;;  %v5852_v31 = vld [vmem:[%s8727_s27 + $0xa2] sm:$0xff]  ;;  %v5861_v61 = vld [vmem:[%s8727_s27 + $0xea] sm:$0xff] }
 0x178   : > { %v9281_v34 = vpack.c.bf16 %v5853_v46, %v5852_v31  ;;  %v5860_v45 = vld [vmem:[%s8727_s27 + $0xe2] sm:$0xff] }
 0x179   : > { %v6300_v48 = vld [vmem:[%s8727_s27 + $0x224] sm:$0xff] }
 0x17a   : > { %v8248_v46 = vld [vmem:[#allocation5 + $0x158] sm:$0xff]  }
 0x17d   : > { %7017 = vmatmul.mubr.msk.bf16.gmra.mrb[48].mxu1 %vm479_vm0, %v323_v41  ;;  %7355 = vmatmul.mubr.msk.bf16.gmra.mrb[16].mxu0 %vm479_vm0, %v8936_v9  ;;  %v292_v9 = vld [vmem:[%s8727_s27 + $0x1d0] sm:$0xff] }
 0x17e   : > { %7020 = vmatprep.mubr.msk.bf16.mxu1 %vm479_vm0, %v324_v43  ;;  %7358 = vmatprep.mubr.msk.bf16.mxu0 %vm479_vm0, %v8938_v11  ;;  %v294_v11 = vld [vmem:[%s8727_s27 + $0x1e0] sm:$0xff]  ;;  %v327_v57 = vpack.c.bf16 %v293_v55, %v292_v9  ;;  %v5857_v41 = vld [vmem:[%s8727_s27 + $0xca] sm:$0xff] }
 0x17f   : > { %v328_v58 = vpack.c.bf16 %v295_v56, %v294_v11  ;;  %v9297_v59 = vpack.c.bf16 %v5857_v41, %v5856_v40  ;;  %v5863_v55 = vld [vmem:[%s8727_s27 + $0xfa] sm:$0xff] }
 0x180   : > { %v6302_v11 = vld [vmem:[%s8727_s27 + $0x234] sm:$0xff]  ;;  %v6303_v56 = vld [vmem:[%s8727_s27 + $0x23c] sm:$0xff] }
 0x181   : > { %v6352_v40 = vld [vmem:[%s8727_s27 + $0x95] sm:$0xff]  ;;  %v6353_v41 = vld [vmem:[%s8727_s27 + $0x9d] sm:$0xff] }
 0x185   : > { %7021 = vmatmul.mubr.msk.bf16.gmra.mrb[52].mxu1 %vm479_vm0, %v325_v50  ;;  %7359 = vmatmul.mubr.msk.bf16.gmra.mrb[20].mxu0 %vm479_vm0, %v8954_v5  ;;  %v296_v5 = vld [vmem:[%s8727_s27 + $0x1f0] sm:$0xff] }
 0x186   : > { %7024 = vmatprep.mubr.msk.bf16.mxu1 %vm479_vm0, %v326_v51  ;;  %7362 = vmatprep.mubr.msk.bf16.mxu0 %vm479_vm0, %v8956_v24  ;;  %v5832_v24 = vld [vmem:[%s8727_s27 + $0x2] sm:$0xff]  ;;  %v329_v1 = vpack.c.bf16 %v297_v62, %v296_v5  ;;  %v6301_v50 = vld [vmem:[%s8727_s27 + $0x22c] sm:$0xff]  ;;  %v9315_v51 = vpack.c.bf16 %v5861_v61, %v5860_v45 }
 0x187   : > { %v1346_v2 = vpack.c.bf16 %v5833_v0, %v5832_v24  ;;  %v3728_v9 = vpack.c.bf16 %v6301_v50, %v6300_v48  ;;  %v6342_v5 = vld [vmem:[%s8727_s27 + $0x45] sm:$0xff]  ;;  %v3729_v24 = vpack.c.bf16 %v6303_v56, %v6302_v11  ;;  %v6355_v61 = vld [vmem:[%s8727_s27 + $0xad] sm:$0xff]  ;;  %v5879_v56 = vld [vmem:[%s8727_s27 + $0x17a] sm:$0xff] }
 0x188   : > { %v6354_v45 = vld [vmem:[%s8727_s27 + $0xa5] sm:$0xff]  ;;  %v8249_v48 = vld [vmem:[#allocation5 + $0x160] sm:$0xff]  }
 0x189   : > { %v5878_v11 = vld [vmem:[%s8727_s27 + $0x172] sm:$0xff] }
 0x18d   : > { %7025 = vmatmul.mubr.msk.bf16.gmra.mrb[56].mxu1 %vm479_vm0, %v327_v57  ;;  %7363 = vmatmul.mubr.msk.bf16.gmra.mrb[24].mxu0 %vm479_vm0, %v8972_v37  ;;  %v5834_v37 = vld [vmem:[%s8727_s27 + $0x12] sm:$0xff]  ;;  %v5864_v57 = vld [vmem:[%s8727_s27 + $0x102] sm:$0xff] }
 0x18e   : > { %7028 = vmatprep.mubr.msk.bf16.mxu1 %vm479_vm0, %v328_v58  ;;  %7366 = vmatprep.mubr.msk.bf16.mxu0 %vm479_vm0, %v8974_v39  ;;  %v5836_v39 = vld [vmem:[%s8727_s27 + $0x22] sm:$0xff]  ;;  %v1347_v8 = vpack.c.bf16 %v5835_v47, %v5834_v37  ;;  %v5865_v58 = vld [vmem:[%s8727_s27 + $0x10a] sm:$0xff]  ;;  %v5867_v37 = vld [vmem:[%s8727_s27 + $0x11a] sm:$0xff] }
 0x18f   : > { %v9214_v7 = vpack.c.bf16 %v5837_v4, %v5836_v39  ;;  %v9334_v0 = vpack.c.bf16 %v5865_v58, %v5864_v57  ;;  %v6344_v47 = vld [vmem:[%s8727_s27 + $0x55] sm:$0xff]  ;;  %v6345_v39 = vld [vmem:[%s8727_s27 + $0x5d] sm:$0xff] }
 0x190   : > { %v5868_v4 = vld [vmem:[%s8727_s27 + $0x122] sm:$0xff]  ;;  %v6356_v57 = vld [vmem:[%s8727_s27 + $0xb5] sm:$0xff] }
 0x191   : > { %v6357_v58 = vld [vmem:[%s8727_s27 + $0xbd] sm:$0xff] }
 0x195   : > { %7029 = vmatmul.mubr.msk.bf16.gmra.mrb[60].mxu1 %vm479_vm0, %v329_v1  ;;  %7367 = vmatmul.mubr.msk.bf16.gmra.mrb[28].mxu0 %vm479_vm0, %v8990_v52  ;;  %v5838_v52 = vld [vmem:[%s8727_s27 + $0x32] sm:$0xff] }
 0x196   : > { %7042 = vmatprep.mubr.msk.bf16.mxu1 %vm479_vm0, %v1346_v2  ;;  %7370 = vmatprep.mubr.msk.bf16.mxu0 %vm479_vm0, %v8992_v54  ;;  %v5840_v54 = vld [vmem:[%s8727_s27 + $0x42] sm:$0xff]  ;;  %v9228_v35 = vpack.c.bf16 %v5839_v12, %v5838_v52  ;;  %v5866_v2 = vld [vmem:[%s8727_s27 + $0x112] sm:$0xff] }
 0x197   : > { %v6347_v52 = vld [vmem:[%s8727_s27 + $0x6d] sm:$0xff]  ;;  %v9350_v12 = vpack.c.bf16 %v5867_v37, %v5866_v2  ;;  %v9405_v2 = vpack.c.bf16 %v5879_v56, %v5878_v11  ;;  %v4293_v37 = vpack.c.bf16 %v6357_v58, %v6356_v57  ;;  %v6370_v11 = vld [vmem:[%s8727_s27 + $0x125] sm:$0xff] }
 0x198   : > { %v6371_v56 = vld [vmem:[%s8727_s27 + $0x12d] sm:$0xff] }
 0x19d   : > { %7043 = vmatmul.mubr.msk.bf16.vlgmr.msra.gmra.mrb[0].mxu1 %vm479_vm0, %v1347_v8  ;;  %7371 = vmatmul.mubr.msk.bf16.gmra.mrb[32].mxu0 %vm479_vm0, %v9009_v3  ;;  %v9230_v3 = vpack.c.bf16 %v5841_v13, %v5840_v54  ;;  %v5869_v8 = vld [vmem:[%s8727_s27 + $0x12a] sm:$0xff]  ;;  %v4287_v54 = vpack.c.bf16 %v6345_v39, %v6344_v47 }
 0x19e   : > { %7107 = vmatpush3.bf16.msra.mxu1 %v9031_v27  ;;  %7046 = vmatprep.mubr.msk.bf16.mxu1 %vm479_vm0, %v9214_v7  ;;  %v8244_v27 = vld [vmem:[#allocation5 + $0x90] sm:$0xff]   ;;  %v9352_v13 = vpack.c.bf16 %v5869_v8, %v5868_v4  ;;  %v5882_v4 = vld [vmem:[%s8727_s27 + $0x192] sm:$0xff] }
 0x19f   : > { %7374 = vmatprep.mubr.msk.bf16.mxu0 %vm479_vm0, %v9011_v6  ;;  %7108 = vmatprep.subr.bf16.mxu1 %v8240_v10  ;;  %v5842_v6 = vld [vmem:[%s8727_s27 + $0x52] sm:$0xff]  ;;  %v5883_v8 = vld [vmem:[%s8727_s27 + $0x19a] sm:$0xff] }
 0x1a0   : > { %v9244_v19 = vpack.c.bf16 %v5843_v22, %v5842_v6  ;;  %v5870_v6 = vld [vmem:[%s8727_s27 + $0x132] sm:$0xff]  ;;  %v5871_v22 = vld [vmem:[%s8727_s27 + $0x13a] sm:$0xff] }
 0x1a2   : > { %7109 = vmatpush3.bf16.msra.mxu1 %v8240_v10  ;;  %v6346_v10 = vld [vmem:[%s8727_s27 + $0x65] sm:$0xff] }
 0x1a3   : > { %7110 = vmatprep.subr.bf16.mxu1 %v8242_v20 }
 0x1a5   : > { %7047 = vmatmul.mubr.msk.bf16.gmra.mrb[4].mxu1 %vm479_vm0, %v9228_v35  ;;  %7375 = vmatmul.mubr.msk.bf16.gmra.mrb[36].mxu0 %vm479_vm0, %v9027_v23  ;;  %v9246_v23 = vpack.c.bf16 %v5845_v17, %v5844_v15  ;;  %v6348_v15 = vld [vmem:[%s8727_s27 + $0x75] sm:$0xff]  ;;  %v6349_v17 = vld [vmem:[%s8727_s27 + $0x7d] sm:$0xff] }
 0x1a6   : > { %7050 = vmatprep.mubr.msk.bf16.mxu1 %vm479_vm0, %v9230_v3  ;;  %7378 = vmatprep.mubr.msk.bf16.mxu0 %vm479_vm0, %v9029_v26  ;;  %v5846_v26 = vld [vmem:[%s8727_s27 + $0x72] sm:$0xff] }
 0x1a7   : > { %7111 = vmatpush3.bf16.msra.mxu1 %v8242_v20  ;;  %v4288_v20 = vpack.c.bf16 %v6347_v52, %v6346_v10  ;;  %v6360_v10 = vld [vmem:[%s8727_s27 + $0xd5] sm:$0xff]  ;;  %v6361_v52 = vld [vmem:[%s8727_s27 + $0xdd] sm:$0xff] }
 0x1a8   : > { %7112 = vmatprep.subr.bf16.mxu1 %v8244_v27 }
 0x1ab   : > { %7113 = vmatpush3.bf16.msra.mxu1 %v8244_v27  ;;  %v8245_v27 = vld [vmem:[#allocation5 + $0x148] sm:$0xff]  }
 0x1ac   : > { %7114 = vmatprep.subr.bf16.mxu1 %v8246_v18 }
 0x1ad   : > { %7051 = vmatmul.mubr.msk.bf16.gmra.mrb[8].mxu1 %vm479_vm0, %v9244_v19  ;;  %7379 = vmatmul.mubr.msk.bf16.gmra.mrb[40].mxu0 %vm479_vm0, %v9048_v42  ;;  %v9263_v42 = vpack.c.bf16 %v5847_v21, %v5846_v26  ;;  %v5873_v26 = vld [vmem:[%s8727_s27 + $0x14a] sm:$0xff] }
 0x1ae   : > { %7054 = vmatprep.mubr.msk.bf16.mxu1 %vm479_vm0, %v9246_v23  ;;  %7382 = vmatprep.mubr.msk.bf16.mxu0 %vm479_vm0, %v9050_v44  ;;  %v5850_v44 = vld [vmem:[%s8727_s27 + $0x92] sm:$0xff]  ;;  %v6350_v21 = vld [vmem:[%s8727_s27 + $0x85] sm:$0xff] }
 0x1af   : > { %7115 = vmatpush3.bf16.msra.mxu1 %v8246_v18  ;;  %v9279_v49 = vpack.c.bf16 %v5851_v30, %v5850_v44  ;;  %v5872_v18 = vld [vmem:[%s8727_s27 + $0x142] sm:$0xff]  ;;  %v9369_v44 = vpack.c.bf16 %v5871_v22, %v5870_v6  ;;  %v4289_v30 = vpack.c.bf16 %v6349_v17, %v6348_v15  ;;  %v6363_v6 = vld [vmem:[%s8727_s27 + $0xed] sm:$0xff]  ;;  %v9423_v22 = vpack.c.bf16 %v5883_v8, %v5882_v4 }
 0x1b0   : > { %7550 = vmatprep.subr.bf16.mxu1 %v9260_v28  ;;  %v9371_v31 = vpack.c.bf16 %v5873_v26, %v5872_v18  ;;  %v4295_v15 = vpack.c.bf16 %v6361_v52, %v6360_v10  ;;  %v5886_v26 = vld [vmem:[%s8727_s27 + $0x1b2] sm:$0xff]  ;;  %v6374_v4 = vld [vmem:[%s8727_s27 + $0x145] sm:$0xff] }
 0x1b1   : > { %v6375_v8 = vld [vmem:[%s8727_s27 + $0x14d] sm:$0xff] }
 0x1b5   : > { %7055 = vmatmul.mubr.msk.bf16.gmra.mrb[12].mxu1 %vm479_vm0, %v9263_v42  ;;  %7383 = vmatmul.mubr.msk.bf16.gmra.mrb[44].mxu0 %vm479_vm0, %v9066_v60  ;;  %v5854_v60 = vld [vmem:[%s8727_s27 + $0xb2] sm:$0xff] }
 0x1b6   : > { %7058 = vmatprep.mubr.msk.bf16.mxu1 %vm479_vm0, %v9265_v29  ;;  %7386 = vmatprep.mubr.msk.bf16.mxu0 %vm479_vm0, %v9068_v63  ;;  %v5855_v63 = vld [vmem:[%s8727_s27 + $0xba] sm:$0xff] }
 0x1b7   : > { %v9295_v43 = vpack.c.bf16 %v5855_v63, %v5854_v60  ;;  %v5874_v60 = vld [vmem:[%s8727_s27 + $0x152] sm:$0xff]  ;;  %v5875_v63 = vld [vmem:[%s8727_s27 + $0x15a] sm:$0xff] }
 0x1b8   : > { %v9387_v50 = vpack.c.bf16 %v5875_v63, %v5874_v60  ;;  %v6367_v60 = vld [vmem:[%s8727_s27 + $0x10d] sm:$0xff] }
 0x1bd   : > { %7059 = vmatmul.mubr.msk.bf16.gmra.mrb[16].mxu1 %vm479_vm0, %v9279_v49  ;;  %7387 = vmatmul.mubr.msk.bf16.gmra.mrb[48].mxu0 %vm479_vm0, %v9084_v14  ;;  %v5858_v14 = vld [vmem:[%s8727_s27 + $0xd2] sm:$0xff] }
 0x1be   : > { %7062 = vmatprep.mubr.msk.bf16.mxu1 %vm479_vm0, %v9281_v34  ;;  %7390 = vmatprep.mubr.msk.bf16.mxu0 %vm479_vm0, %v9086_v16  ;;  %v5859_v16 = vld [vmem:[%s8727_s27 + $0xda] sm:$0xff] }
 0x1c5   : > { %7063 = vmatmul.mubr.msk.bf16.gmra.mrb[20].mxu1 %vm479_vm0, %v9295_v43  ;;  %7391 = vmatmul.mubr.msk.bf16.gmra.mrb[52].mxu0 %vm479_vm0, %v9102_v32  ;;  %v9313_v32 = vpack.c.bf16 %v5859_v16, %v5858_v14  ;;  %v5876_v14 = vld [vmem:[%s8727_s27 + $0x162] sm:$0xff]  ;;  %v5877_v16 = vld [vmem:[%s8727_s27 + $0x16a] sm:$0xff] }
 0x1c6   : > { %7066 = vmatprep.mubr.msk.bf16.mxu1 %vm479_vm0, %v9297_v59  ;;  %7394 = vmatprep.mubr.msk.bf16.mxu0 %vm479_vm0, %v9104_v38  ;;  %v5862_v38 = vld [vmem:[%s8727_s27 + $0xf2] sm:$0xff] }
 0x1c7   : > { %v9332_v62 = vpack.c.bf16 %v5863_v55, %v5862_v38  ;;  %v9389_v38 = vpack.c.bf16 %v5877_v16, %v5876_v14  ;;  %v4292_v55 = vpack.c.bf16 %v6355_v61, %v6354_v45  ;;  %v5890_v16 = vld [vmem:[%s8727_s27 + $0x1d2] sm:$0xff]  ;;  %v5891_v45 = vld [vmem:[%s8727_s27 + $0x1da] sm:$0xff] }
 0x1c8   : > { %v6368_v61 = vld [vmem:[%s8727_s27 + $0x115] sm:$0xff]  ;;  %v9459_v57 = vpack.c.bf16 %v5891_v45, %v5890_v16 }
 0x1c9   : > { %v8254_v45 = vld [vmem:[#allocation5 + $0xc0] sm:$0xff]  }
 0x1cd   : > { %7067 = vmatmul.mubr.msk.bf16.gmra.mrb[24].mxu1 %vm479_vm0, %v9313_v32  ;;  %7395 = vmatmul.mubr.msk.bf16.gmra.mrb[56].mxu0 %vm479_vm0, %v9118_v53  ;;  %v6343_v53 = vld [vmem:[%s8727_s27 + $0x4d] sm:$0xff] }
 0x1ce   : > { %7070 = vmatprep.mubr.msk.bf16.mxu1 %vm479_vm0, %v9315_v51  ;;  %7398 = vmatprep.mubr.msk.bf16.mxu0 %vm479_vm0, %v3728_v9  ;;  %v4286_v1 = vpack.c.bf16 %v6343_v53, %v6342_v5  ;;  %v4291_v9 = vpack.c.bf16 %v6353_v41, %v6352_v40  ;;  %v5880_v5 = vld [vmem:[%s8727_s27 + $0x182] sm:$0xff]  ;;  %v5881_v53 = vld [vmem:[%s8727_s27 + $0x18a] sm:$0xff] }
 0x1cf   : > { %v9407_v47 = vpack.c.bf16 %v5881_v53, %v5880_v5  ;;  %v4300_v53 = vpack.c.bf16 %v6371_v56, %v6370_v11  ;;  %v6394_v56 = vld [vmem:[%s8727_s27 + $0x1e5] sm:$0xff] }
 0x1d5   : > { %7071 = vmatmul.mubr.msk.bf16.gmra.mrb[28].mxu1 %vm479_vm0, %v9332_v62  ;;  %7399 = vmatmul.mubr.msk.bf16.gmra.mrb[60].mxu0 %vm479_vm0, %v3729_v24  ;;  %v6358_v24 = vld [vmem:[%s8727_s27 + $0xc5] sm:$0xff] }
 0x1d6   : > { %7074 = vmatprep.mubr.msk.bf16.mxu1 %vm479_vm0, %v9334_v0  ;;  %7412 = vmatprep.mubr.msk.bf16.mxu0 %vm479_vm0, %v4286_v1  ;;  %v6359_v1 = vld [vmem:[%s8727_s27 + $0xcd] sm:$0xff] }
 0x1d7   : > { %v4294_v39 = vpack.c.bf16 %v6359_v1, %v6358_v24  ;;  %v5894_v24 = vld [vmem:[%s8727_s27 + $0x1f2] sm:$0xff]  ;;  %v5895_v1 = vld [vmem:[%s8727_s27 + $0x1fa] sm:$0xff] }
 0x1d8   : > { %v9475_v10 = vpack.c.bf16 %v5895_v1, %v5894_v24  ;;  %v6398_v1 = vld [vmem:[%s8727_s27 + $0x205] sm:$0xff] }
 0x1dd   : > { %7075 = vmatmul.mubr.msk.bf16.gmra.mrb[32].mxu1 %vm479_vm0, %v9350_v12  ;;  %7413 = vmatmul.mubr.msk.bf16.vlgmr.msra.gmra.mrb[0].mxu0 %vm479_vm0, %v4287_v54  ;;  %v5884_v54 = vld [vmem:[%s8727_s27 + $0x1a2] sm:$0xff] }
 0x1de   : > { %7078 = vmatprep.mubr.msk.bf16.mxu1 %vm479_vm0, %v9352_v13  ;;  %7477 = vmatpush3.bf16.msra.mxu0 %v9151_v33  ;;  %v4290_v33 = vpack.c.bf16 %v6351_v36, %v6350_v21  ;;  %v5887_v21 = vld [vmem:[%s8727_s27 + $0x1ba] sm:$0xff] }
 0x1df   : > { %7416 = vmatprep.mubr.msk.bf16.mxu0 %vm479_vm0, %v4288_v20  ;;  %7478 = vmatprep.subr.bf16.mxu0 %v8245_v27  ;;  %v5885_v20 = vld [vmem:[%s8727_s27 + $0x1aa] sm:$0xff]  ;;  %v6364_v36 = vld [vmem:[%s8727_s27 + $0xf5] sm:$0xff]  ;;  %v9441_v63 = vpack.c.bf16 %v5887_v21, %v5886_v26  ;;  %v6381_v21 = vld [vmem:[%s8727_s27 + $0x17d] sm:$0xff] }
 0x1e0   : > { %v9425_v17 = vpack.c.bf16 %v5885_v20, %v5884_v54  ;;  %v4302_v54 = vpack.c.bf16 %v6375_v8, %v6374_v4  ;;  %v6376_v20 = vld [vmem:[%s8727_s27 + $0x155] sm:$0xff]  ;;  %v6402_v8 = vld [vmem:[%s8727_s27 + $0x225] sm:$0xff] }
 0x1e2   : > { %7479 = vmatpush3.bf16.msra.mxu0 %v8245_v27  ;;  %v6362_v27 = vld [vmem:[%s8727_s27 + $0xe5] sm:$0xff] }
 0x1e3   : > { %7480 = vmatprep.subr.bf16.mxu0 %v8247_v25  ;;  %v4296_v18 = vpack.c.bf16 %v6363_v6, %v6362_v27  ;;  %v6377_v27 = vld [vmem:[%s8727_s27 + $0x15d] sm:$0xff]  ;;  %v6378_v6 = vld [vmem:[%s8727_s27 + $0x165] sm:$0xff] }
 0x1e5   : > { %7079 = vmatmul.mubr.msk.bf16.gmra.mrb[36].mxu1 %vm479_vm0, %v9369_v44  ;;  %7417 = vmatmul.mubr.msk.bf16.gmra.mrb[4].mxu0 %vm479_vm0, %v4289_v30  ;;  %v5888_v30 = vld [vmem:[%s8727_s27 + $0x1c2] sm:$0xff] }
 0x1e6   : > { %7082 = vmatprep.mubr.msk.bf16.mxu1 %vm479_vm0, %v9371_v31  ;;  %7420 = vmatprep.mubr.msk.bf16.mxu0 %vm479_vm0, %v4290_v33  ;;  %v5889_v33 = vld [vmem:[%s8727_s27 + $0x1ca] sm:$0xff] }
 0x1e7   : > { %7481 = vmatpush3.bf16.msra.mxu0 %v8247_v25  ;;  %v6365_v25 = vld [vmem:[%s8727_s27 + $0xfd] sm:$0xff]  ;;  %v9443_v41 = vpack.c.bf16 %v5889_v33, %v5888_v30 }
 0x1e8   : > { %7482 = vmatprep.subr.bf16.mxu0 %v8248_v46  ;;  %v4297_v40 = vpack.c.bf16 %v6365_v25, %v6364_v36  ;;  %v6382_v36 = vld [vmem:[%s8727_s27 + $0x185] sm:$0xff]  ;;  %v6383_v25 = vld [vmem:[%s8727_s27 + $0x18d] sm:$0xff]  ;;  %v8251_v30 = vld [vmem:[#allocation5 + $0xa8] sm:$0xff]  }
 0x1e9   : > { %v4306_v33 = vpack.c.bf16 %v6383_v25, %v6382_v36  ;;  %v6452_v25 = vld [vmem:[%s8727_s27 + $0x86] sm:$0xff] }
 0x1eb   : > { %7483 = vmatpush3.bf16.msra.mxu0 %v8248_v46  ;;  %v6366_v46 = vld [vmem:[%s8727_s27 + $0x105] sm:$0xff] }
 0x1ec   : > { %7484 = vmatprep.subr.bf16.mxu0 %v8249_v48  ;;  %v4298_v14 = vpack.c.bf16 %v6367_v60, %v6366_v46  ;;  %v8252_v46 = vld [vmem:[#allocation5 + $0xb0] sm:$0xff]  }
 0x1ed   : > { %7083 = vmatmul.mubr.msk.bf16.gmra.mrb[40].mxu1 %vm479_vm0, %v9387_v50  ;;  %7421 = vmatmul.mubr.msk.bf16.gmra.mrb[8].mxu0 %vm479_vm0, %v4291_v9  ;;  %v5892_v9 = vld [vmem:[%s8727_s27 + $0x1e2] sm:$0xff] }
 0x1ee   : > { %7086 = vmatprep.mubr.msk.bf16.mxu1 %vm479_vm0, %v9389_v38  ;;  %7424 = vmatprep.mubr.msk.bf16.mxu0 %vm479_vm0, %v4292_v55  ;;  %v5893_v55 = vld [vmem:[%s8727_s27 + $0x1ea] sm:$0xff] }
 0x1ef   : > { %7485 = vmatpush3.bf16.msra.mxu0 %v8249_v48  ;;  %v6369_v48 = vld [vmem:[%s8727_s27 + $0x11d] sm:$0xff]  ;;  %v9461_v5 = vpack.c.bf16 %v5893_v55, %v5892_v9  ;;  %v6386_v60 = vld [vmem:[%s8727_s27 + $0x1a5] sm:$0xff]  ;;  %v6391_v9 = vld [vmem:[%s8727_s27 + $0x1cd] sm:$0xff] }
 0x1f0   : > { %v4299_v58 = vpack.c.bf16 %v6369_v48, %v6368_v61  ;;  %v6389_v61 = vld [vmem:[%s8727_s27 + $0x1bd] sm:$0xff]  ;;  %v6390_v48 = vld [vmem:[%s8727_s27 + $0x1c5] sm:$0xff] }
 0x1f1   : > { %v4310_v11 = vpack.c.bf16 %v6391_v9, %v6390_v48  ;;  %v6468_v9 = vld [vmem:[%s8727_s27 + $0x106] sm:$0xff] }
 0x1f5   : > { %7087 = vmatmul.mubr.msk.bf16.gmra.mrb[44].mxu1 %vm479_vm0, %v9405_v2  ;;  %7425 = vmatmul.mubr.msk.bf16.gmra.mrb[12].mxu0 %vm479_vm0, %v4293_v37  ;;  %v6372_v37 = vld [vmem:[%s8727_s27 + $0x135] sm:$0xff] }
 0x1f6   : > { %7090 = vmatprep.mubr.msk.bf16.mxu1 %vm479_vm0, %v9407_v47  ;;  %7428 = vmatprep.mubr.msk.bf16.mxu0 %vm479_vm0, %v4294_v39  ;;  %v6373_v39 = vld [vmem:[%s8727_s27 + $0x13d] sm:$0xff] }
 0x1f7   : > { %v4301_v52 = vpack.c.bf16 %v6373_v39, %v6372_v37  ;;  %v6399_v37 = vld [vmem:[%s8727_s27 + $0x20d] sm:$0xff] }
 0x1f8   : > { %v4314_v4 = vpack.c.bf16 %v6399_v37, %v6398_v1  ;;  %v6474_v1 = vld [vmem:[%s8727_s27 + $0x136] sm:$0xff]  ;;  %v6475_v37 = vld [vmem:[%s8727_s27 + $0x13e] sm:$0xff] }
 0x1fd   : > { %7091 = vmatmul.mubr.msk.bf16.gmra.mrb[48].mxu1 %vm479_vm0, %v9423_v22  ;;  %7429 = vmatmul.mubr.msk.bf16.gmra.mrb[16].mxu0 %vm479_vm0, %v4295_v15  ;;  %v6379_v15 = vld [vmem:[%s8727_s27 + $0x16d] sm:$0xff] }
 0x1fe   : > { %7094 = vmatprep.mubr.msk.bf16.mxu1 %vm479_vm0, %v9425_v17  ;;  %7432 = vmatprep.mubr.msk.bf16.mxu0 %vm479_vm0, %v4296_v18  ;;  %v4303_v18 = vpack.c.bf16 %v6377_v27, %v6376_v20  ;;  %v4304_v26 = vpack.c.bf16 %v6379_v15, %v6378_v6  ;;  %v6444_v27 = vld [vmem:[%s8727_s27 + $0x46] sm:$0xff]  ;;  %v6445_v6 = vld [vmem:[%s8727_s27 + $0x4e] sm:$0xff] }
 0x205   : > { %7095 = vmatmul.mubr.msk.bf16.gmra.mrb[52].mxu1 %vm479_vm0, %v9441_v63  ;;  %7433 = vmatmul.mubr.msk.bf16.gmra.mrb[20].mxu0 %vm479_vm0, %v4297_v40  ;;  %v6387_v40 = vld [vmem:[%s8727_s27 + $0x1ad] sm:$0xff] }
 0x206   : > { %7098 = vmatprep.mubr.msk.bf16.mxu1 %vm479_vm0, %v9443_v41  ;;  %7436 = vmatprep.mubr.msk.bf16.mxu0 %vm479_vm0, %v4298_v14  ;;  %v8253_v14 = vld [vmem:[#allocation5 + $0xb8] sm:$0xff]  }
 0x20d   : > { %7099 = vmatmul.mubr.msk.bf16.gmra.mrb[56].mxu1 %vm479_vm0, %v9459_v57  ;;  %7437 = vmatmul.mubr.msk.bf16.gmra.mrb[24].mxu0 %vm479_vm0, %v4299_v58  ;;  %v6395_v58 = vld [vmem:[%s8727_s27 + $0x1ed] sm:$0xff] }
 0x20e   : > { %7102 = vmatprep.mubr.msk.bf16.mxu1 %vm479_vm0, %v9461_v5  ;;  %7440 = vmatprep.mubr.msk.bf16.mxu0 %vm479_vm0, %v4300_v53  ;;  %v4312_v24 = vpack.c.bf16 %v6395_v58, %v6394_v56  ;;  %v5995_v56 = vld [vmem:[%s8727_s27 + $0x20a] sm:$0xff] }
 0x20f   : > { %v6472_v58 = vld [vmem:[%s8727_s27 + $0x126] sm:$0xff] }
 0x215   : > { %7103 = vmatmul.mubr.msk.bf16.gmra.mrb[60].mxu1 %vm479_vm0, %v9475_v10  ;;  %7441 = vmatmul.mubr.msk.bf16.gmra.mrb[28].mxu0 %vm479_vm0, %v4301_v52  ;;  %v6403_v52 = vld [vmem:[%s8727_s27 + $0x22d] sm:$0xff] }
 0x216   : > { %7116 = vmatprep.mubr.msk.bf16.mxu1 %vm479_vm0, %v9214_v7  ;;  %7444 = vmatprep.mubr.msk.bf16.mxu0 %vm479_vm0, %v4302_v54  ;;  %v6380_v7 = vld [vmem:[%s8727_s27 + $0x175] sm:$0xff]  ;;  %v4316_v20 = vpack.c.bf16 %v6403_v52, %v6402_v8  ;;  %v4889_v8 = vpack.c.bf16 %v6475_v37, %v6474_v1  ;;  %v6496_v1 = vld [vmem:[%s8727_s27 + $0x1e6] sm:$0xff] }
 0x217   : > { %v6497_v37 = vld [vmem:[%s8727_s27 + $0x1ee] sm:$0xff] }
 0x21d   : > { %7117 = vmatmul.mubr.msk.bf16.vlgmr.msra.gmra.mrb[0].mxu1 %vm479_vm0, %v9228_v35  ;;  %7445 = vmatmul.mubr.msk.bf16.gmra.mrb[32].mxu0 %vm479_vm0, %v4303_v18  ;;  %v4305_v35 = vpack.c.bf16 %v6381_v21, %v6380_v7  ;;  %v4874_v18 = vpack.c.bf16 %v6445_v6, %v6444_v27  ;;  %v6449_v7 = vld [vmem:[%s8727_s27 + $0x6e] sm:$0xff]  ;;  %v6479_v27 = vld [vmem:[%s8727_s27 + $0x15e] sm:$0xff] }
 0x21e   : > { %7555 = vmatpush3.bf16.msra.mxu1 %v9260_v28  ;;  %7120 = vmatprep.mubr.msk.bf16.mxu1 %vm479_vm0, %v9230_v3  ;;  %v6384_v3 = vld [vmem:[%s8727_s27 + $0x195] sm:$0xff]  ;;  %v6385_v28 = vld [vmem:[%s8727_s27 + $0x19d] sm:$0xff] }
 0x21f   : > { %7448 = vmatprep.mubr.msk.bf16.mxu0 %vm479_vm0, %v4304_v26  ;;  %7551 = vmatprep.subr.bf16.mxu1 %v8251_v30  ;;  %v4307_v16 = vpack.c.bf16 %v6385_v28, %v6384_v3  ;;  %v6448_v26 = vld [vmem:[%s8727_s27 + $0x66] sm:$0xff]  ;;  %v6457_v3 = vld [vmem:[%s8727_s27 + $0xae] sm:$0xff] }
 0x220   : > { %v4876_v36 = vpack.c.bf16 %v6449_v7, %v6448_v26  ;;  %v6072_v6 = vld [vmem:[%s8727_s27 + $0x143] sm:$0xff] }
 0x222   : > { %7556 = vmatpush3.bf16.msra.mxu1 %v8251_v30  ;;  %v6453_v30 = vld [vmem:[%s8727_s27 + $0x8e] sm:$0xff] }
 0x223   : > { %7552 = vmatprep.subr.bf16.mxu1 %v8252_v46 }
 0x225   : > { %7121 = vmatmul.mubr.msk.bf16.gmra.mrb[4].mxu1 %vm479_vm0, %v9244_v19  ;;  %7449 = vmatmul.mubr.msk.bf16.gmra.mrb[36].mxu0 %vm479_vm0, %v4305_v35  ;;  %v4308_v19 = vpack.c.bf16 %v6387_v40, %v6386_v60  ;;  %v6460_v40 = vld [vmem:[%s8727_s27 + $0xc6] sm:$0xff] }
 0x226   : > { %7124 = vmatprep.mubr.msk.bf16.mxu1 %vm479_vm0, %v9246_v23  ;;  %7452 = vmatprep.mubr.msk.bf16.mxu0 %vm479_vm0, %v4306_v33  ;;  %v6388_v23 = vld [vmem:[%s8727_s27 + $0x1b5] sm:$0xff]  ;;  %v4878_v33 = vpack.c.bf16 %v6453_v30, %v6452_v25  ;;  %v6483_v25 = vld [vmem:[%s8727_s27 + $0x17e] sm:$0xff] }
 0x227   : > { %7557 = vmatpush3.bf16.msra.mxu1 %v8252_v46  ;;  %v4309_v55 = vpack.c.bf16 %v6389_v61, %v6388_v23  ;;  %v6456_v46 = vld [vmem:[%s8727_s27 + $0xa6] sm:$0xff]  ;;  %v6465_v23 = vld [vmem:[%s8727_s27 + $0xee] sm:$0xff] }
 0x228   : > { %7553 = vmatprep.subr.bf16.mxu1 %v8253_v14  ;;  %v4880_v60 = vpack.c.bf16 %v6457_v3, %v6456_v46  ;;  %v6076_v30 = vld [vmem:[%s8727_s27 + $0x163] sm:$0xff] }
 0x22b   : > { %7558 = vmatpush3.bf16.msra.mxu1 %v8253_v14  ;;  %v6461_v14 = vld [vmem:[%s8727_s27 + $0xce] sm:$0xff] }
 0x22c   : > { %7554 = vmatprep.subr.bf16.mxu1 %v8254_v45 }
 0x22d   : > { %7125 = vmatmul.mubr.msk.bf16.gmra.mrb[8].mxu1 %vm479_vm0, %v9263_v42  ;;  %7453 = vmatmul.mubr.msk.bf16.gmra.mrb[40].mxu0 %vm479_vm0, %v4307_v16  ;;  %v6392_v42 = vld [vmem:[%s8727_s27 + $0x1d5] sm:$0xff] }
 0x22e   : > { %7128 = vmatprep.mubr.msk.bf16.mxu1 %vm479_vm0, %v9265_v29  ;;  %7456 = vmatprep.mubr.msk.bf16.mxu0 %vm479_vm0, %v4308_v19  ;;  %v6393_v29 = vld [vmem:[%s8727_s27 + $0x1dd] sm:$0xff]  ;;  %v4882_v19 = vpack.c.bf16 %v6461_v14, %v6460_v40 }
 0x22f   : > { %7559 = vmatpush3.bf16.msra.mxu1 %v8254_v45  ;;  %v4311_v53 = vpack.c.bf16 %v6393_v29, %v6392_v42  ;;  %v6464_v45 = vld [vmem:[%s8727_s27 + $0xe6] sm:$0xff]  ;;  %v6487_v40 = vld [vmem:[%s8727_s27 + $0x19e] sm:$0xff] }
 0x230   : > { %v4884_v48 = vpack.c.bf16 %v6465_v23, %v6464_v45  ;;  %v5994_v29 = vld [vmem:[%s8727_s27 + $0x202] sm:$0xff] }
 0x231   : > { %v6080_v14 = vld [vmem:[%s8727_s27 + $0x183] sm:$0xff] }
 0x235   : > { %7129 = vmatmul.mubr.msk.bf16.gmra.mrb[12].mxu1 %vm479_vm0, %v9279_v49  ;;  %7457 = vmatmul.mubr.msk.bf16.gmra.mrb[44].mxu0 %vm479_vm0, %v4309_v55  ;;  %v6396_v49 = vld [vmem:[%s8727_s27 + $0x1f5] sm:$0xff] }
 0x236   : > { %7132 = vmatprep.mubr.msk.bf16.mxu1 %vm479_vm0, %v9281_v34  ;;  %7460 = vmatprep.mubr.msk.bf16.mxu0 %vm479_vm0, %v4310_v11  ;;  %v6397_v34 = vld [vmem:[%s8727_s27 + $0x1fd] sm:$0xff]  ;;  %v6469_v55 = vld [vmem:[%s8727_s27 + $0x10e] sm:$0xff] }
 0x237   : > { %v4313_v39 = vpack.c.bf16 %v6397_v34, %v6396_v49  ;;  %v4886_v42 = vpack.c.bf16 %v6469_v55, %v6468_v9  ;;  %v5997_v34 = vld [vmem:[%s8727_s27 + $0x21a] sm:$0xff]  ;;  %v6084_v55 = vld [vmem:[%s8727_s27 + $0x1a3] sm:$0xff] }
 0x238   : > { %v6491_v9 = vld [vmem:[%s8727_s27 + $0x1be] sm:$0xff] }
 0x23d   : > { %7133 = vmatmul.mubr.msk.bf16.gmra.mrb[16].mxu1 %vm479_vm0, %v9295_v43  ;;  %7461 = vmatmul.mubr.msk.bf16.gmra.mrb[48].mxu0 %vm479_vm0, %v4311_v53  ;;  %v6400_v43 = vld [vmem:[%s8727_s27 + $0x215] sm:$0xff] }
 0x23e   : > { %7136 = vmatprep.mubr.msk.bf16.mxu1 %vm479_vm0, %v9297_v59  ;;  %7464 = vmatprep.mubr.msk.bf16.mxu0 %vm479_vm0, %v4312_v24  ;;  %v6401_v59 = vld [vmem:[%s8727_s27 + $0x21d] sm:$0xff]  ;;  %v1964_v24 = vpack.c.bf16 %v5995_v56, %v5994_v29 }
 0x23f   : > { %v4315_v54 = vpack.c.bf16 %v6401_v59, %v6400_v43  ;;  %v6476_v43 = vld [vmem:[%s8727_s27 + $0x146] sm:$0xff] }
 0x245   : > { %7137 = vmatmul.mubr.msk.bf16.gmra.mrb[20].mxu1 %vm479_vm0, %v9313_v32  ;;  %7465 = vmatmul.mubr.msk.bf16.gmra.mrb[52].mxu0 %vm479_vm0, %v4313_v39  ;;  %v6404_v32 = vld [vmem:[%s8727_s27 + $0x235] sm:$0xff]  ;;  %v6068_v39 = vld [vmem:[%s8727_s27 + $0x123] sm:$0xff] }
 0x246   : > { %7140 = vmatprep.mubr.msk.bf16.mxu1 %vm479_vm0, %v9315_v51  ;;  %7468 = vmatprep.mubr.msk.bf16.mxu0 %vm479_vm0, %v4314_v4  ;;  %v6405_v51 = vld [vmem:[%s8727_s27 + $0x23d] sm:$0xff]  ;;  %v6069_v4 = vld [vmem:[%s8727_s27 + $0x12b] sm:$0xff] }
 0x247   : > { %v4317_v15 = vpack.c.bf16 %v6405_v51, %v6404_v32  ;;  %v2538_v52 = vpack.c.bf16 %v6069_v4, %v6068_v39  ;;  %v6071_v32 = vld [vmem:[%s8727_s27 + $0x13b] sm:$0xff] }
 0x248   : > { %v6478_v51 = vld [vmem:[%s8727_s27 + $0x156] sm:$0xff] }
 0x249   : > { %v4891_v26 = vpack.c.bf16 %v6479_v27, %v6478_v51  ;;  %v6500_v51 = vld [vmem:[%s8727_s27 + $0x206] sm:$0xff]  ;;  %v6501_v27 = vld [vmem:[%s8727_s27 + $0x20e] sm:$0xff] }
 0x24d   : > { %7141 = vmatmul.mubr.msk.bf16.gmra.mrb[24].mxu1 %vm479_vm0, %v9332_v62  ;;  %7469 = vmatmul.mubr.msk.bf16.gmra.mrb[56].mxu0 %vm479_vm0, %v4315_v54  ;;  %v6446_v62 = vld [vmem:[%s8727_s27 + $0x56] sm:$0xff] }
 0x24e   : > { %7144 = vmatprep.mubr.msk.bf16.mxu1 %vm479_vm0, %v9334_v0  ;;  %7472 = vmatprep.mubr.msk.bf16.mxu0 %vm479_vm0, %v4316_v20  ;;  %v6447_v0 = vld [vmem:[%s8727_s27 + $0x5e] sm:$0xff]  ;;  %v6070_v20 = vld [vmem:[%s8727_s27 + $0x133] sm:$0xff] }
 0x24f   : > { %v4875_v21 = vpack.c.bf16 %v6447_v0, %v6446_v62  ;;  %v6481_v62 = vld [vmem:[%s8727_s27 + $0x16e] sm:$0xff]  ;;  %v2539_v0 = vpack.c.bf16 %v6071_v32, %v6070_v20  ;;  %v6092_v20 = vld [vmem:[%s8727_s27 + $0x1e3] sm:$0xff] }
 0x250   : > { %v6093_v32 = vld [vmem:[%s8727_s27 + $0x1eb] sm:$0xff] }
 0x255   : > { %7145 = vmatmul.mubr.msk.bf16.gmra.mrb[28].mxu1 %vm479_vm0, %v9350_v12  ;;  %7473 = vmatmul.mubr.msk.bf16.gmra.mrb[60].mxu0 %vm479_vm0, %v4317_v15  ;;  %v6450_v12 = vld [vmem:[%s8727_s27 + $0x76] sm:$0xff]  ;;  %v6073_v15 = vld [vmem:[%s8727_s27 + $0x14b] sm:$0xff] }
 0x256   : > { %7148 = vmatprep.mubr.msk.bf16.mxu1 %vm479_vm0, %v9352_v13  ;;  %7486 = vmatprep.mubr.msk.bf16.mxu0 %vm479_vm0, %v4874_v18  ;;  %v6451_v13 = vld [vmem:[%s8727_s27 + $0x7e] sm:$0xff]  ;;  %v6480_v18 = vld [vmem:[%s8727_s27 + $0x166] sm:$0xff]  ;;  %v2540_v7 = vpack.c.bf16 %v6073_v15, %v6072_v6 }
 0x257   : > { %v4877_v35 = vpack.c.bf16 %v6451_v13, %v6450_v12  ;;  %v6075_v12 = vld [vmem:[%s8727_s27 + $0x15b] sm:$0xff] }
 0x258   : > { %v6482_v13 = vld [vmem:[%s8727_s27 + $0x176] sm:$0xff] }
 0x259   : > { %v4893_v46 = vpack.c.bf16 %v6483_v25, %v6482_v13  ;;  %v6504_v13 = vld [vmem:[%s8727_s27 + $0x226] sm:$0xff]  ;;  %v6505_v25 = vld [vmem:[%s8727_s27 + $0x22e] sm:$0xff] }
 0x25d   : > { %7149 = vmatmul.mubr.msk.bf16.gmra.mrb[32].mxu1 %vm479_vm0, %v9369_v44  ;;  %7487 = vmatmul.mubr.msk.bf16.vlgmr.msra.gmra.mrb[0].mxu0 %vm479_vm0, %v4875_v21  ;;  %v6454_v44 = vld [vmem:[%s8727_s27 + $0x96] sm:$0xff]  ;;  %v4892_v21 = vpack.c.bf16 %v6481_v62, %v6480_v18  ;;  %v2550_v18 = vpack.c.bf16 %v6093_v32, %v6092_v20  ;;  %v4902_v62 = vpack.c.bf16 %v6501_v27, %v6500_v51 }
 0x25e   : > { %7152 = vmatprep.mubr.msk.bf16.mxu1 %vm479_vm0, %v9371_v31  ;;  %7490 = vmatprep.mubr.msk.bf16.mxu0 %vm479_vm0, %v4876_v36  ;;  %v6455_v31 = vld [vmem:[%s8727_s27 + $0x9e] sm:$0xff]  ;;  %v6074_v36 = vld [vmem:[%s8727_s27 + $0x153] sm:$0xff] }
 0x25f   : > { %v4879_v28 = vpack.c.bf16 %v6455_v31, %v6454_v44  ;;  %v6485_v44 = vld [vmem:[%s8727_s27 + $0x18e] sm:$0xff]  ;;  %v2541_v31 = vpack.c.bf16 %v6075_v12, %v6074_v36  ;;  %v6096_v36 = vld [vmem:[%s8727_s27 + $0x203] sm:$0xff] }
 0x260   : > { %v6097_v12 = vld [vmem:[%s8727_s27 + $0x20b] sm:$0xff] }
 0x265   : > { %7153 = vmatmul.mubr.msk.bf16.gmra.mrb[36].mxu1 %vm479_vm0, %v9387_v50  ;;  %7491 = vmatmul.mubr.msk.bf16.gmra.mrb[4].mxu0 %vm479_vm0, %v4877_v35  ;;  %v6458_v50 = vld [vmem:[%s8727_s27 + $0xb6] sm:$0xff]  ;;  %v6077_v35 = vld [vmem:[%s8727_s27 + $0x16b] sm:$0xff] }
 0x266   : > { %7156 = vmatprep.mubr.msk.bf16.mxu1 %vm479_vm0, %v9389_v38  ;;  %7494 = vmatprep.mubr.msk.bf16.mxu0 %vm479_vm0, %v4878_v33  ;;  %v6459_v38 = vld [vmem:[%s8727_s27 + $0xbe] sm:$0xff]  ;;  %v6484_v33 = vld [vmem:[%s8727_s27 + $0x186] sm:$0xff]  ;;  %v2542_v3 = vpack.c.bf16 %v6077_v35, %v6076_v30 }
 0x267   : > { %v4881_v16 = vpack.c.bf16 %v6459_v38, %v6458_v50  ;;  %v6079_v50 = vld [vmem:[%s8727_s27 + $0x17b] sm:$0xff] }
 0x268   : > { %v6486_v38 = vld [vmem:[%s8727_s27 + $0x196] sm:$0xff] }
 0x269   : > { %v4895_v45 = vpack.c.bf16 %v6487_v40, %v6486_v38 }
 0x26d   : > { %7157 = vmatmul.mubr.msk.bf16.gmra.mrb[40].mxu1 %vm479_vm0, %v9405_v2  ;;  %7495 = vmatmul.mubr.msk.bf16.gmra.mrb[8].mxu0 %vm479_vm0, %v4879_v28  ;;  %v6462_v2 = vld [vmem:[%s8727_s27 + $0xd6] sm:$0xff]  ;;  %v4894_v28 = vpack.c.bf16 %v6485_v44, %v6484_v33  ;;  %v2552_v33 = vpack.c.bf16 %v6097_v12, %v6096_v36  ;;  %v4904_v44 = vpack.c.bf16 %v6505_v25, %v6504_v13 }
 0x26e   : > { %7160 = vmatprep.mubr.msk.bf16.mxu1 %vm479_vm0, %v9407_v47  ;;  %7498 = vmatprep.mubr.msk.bf16.mxu0 %vm479_vm0, %v4880_v60  ;;  %v6463_v47 = vld [vmem:[%s8727_s27 + $0xde] sm:$0xff]  ;;  %v6078_v60 = vld [vmem:[%s8727_s27 + $0x173] sm:$0xff] }
 0x26f   : > { %v4883_v61 = vpack.c.bf16 %v6463_v47, %v6462_v2  ;;  %v6489_v2 = vld [vmem:[%s8727_s27 + $0x1ae] sm:$0xff]  ;;  %v2543_v47 = vpack.c.bf16 %v6079_v50, %v6078_v60 }
 0x275   : > { %7161 = vmatmul.mubr.msk.bf16.gmra.mrb[44].mxu1 %vm479_vm0, %v9423_v22  ;;  %7499 = vmatmul.mubr.msk.bf16.gmra.mrb[12].mxu0 %vm479_vm0, %v4881_v16  ;;  %v6466_v22 = vld [vmem:[%s8727_s27 + $0xf6] sm:$0xff]  ;;  %v6081_v16 = vld [vmem:[%s8727_s27 + $0x18b] sm:$0xff] }
 0x276   : > { %7164 = vmatprep.mubr.msk.bf16.mxu1 %vm479_vm0, %v9425_v17  ;;  %7502 = vmatprep.mubr.msk.bf16.mxu0 %vm479_vm0, %v4882_v19  ;;  %v6467_v17 = vld [vmem:[%s8727_s27 + $0xfe] sm:$0xff]  ;;  %v6488_v19 = vld [vmem:[%s8727_s27 + $0x1a6] sm:$0xff]  ;;  %v2544_v23 = vpack.c.bf16 %v6081_v16, %v6080_v14 }
 0x277   : > { %v4885_v11 = vpack.c.bf16 %v6467_v17, %v6466_v22  ;;  %v6083_v22 = vld [vmem:[%s8727_s27 + $0x19b] sm:$0xff] }
 0x278   : > { %v6490_v17 = vld [vmem:[%s8727_s27 + $0x1b6] sm:$0xff] }
 0x279   : > { %v4897_v29 = vpack.c.bf16 %v6491_v9, %v6490_v17 }
 0x27d   : > { %7165 = vmatmul.mubr.msk.bf16.gmra.mrb[48].mxu1 %vm479_vm0, %v9441_v63  ;;  %7503 = vmatmul.mubr.msk.bf16.gmra.mrb[16].mxu0 %vm479_vm0, %v4883_v61  ;;  %v6470_v63 = vld [vmem:[%s8727_s27 + $0x116] sm:$0xff]  ;;  %v4896_v61 = vpack.c.bf16 %v6489_v2, %v6488_v19 }
 0x27e   : > { %7168 = vmatprep.mubr.msk.bf16.mxu1 %vm479_vm0, %v9443_v41  ;;  %7506 = vmatprep.mubr.msk.bf16.mxu0 %vm479_vm0, %v4884_v48  ;;  %v6471_v41 = vld [vmem:[%s8727_s27 + $0x11e] sm:$0xff]  ;;  %v6082_v48 = vld [vmem:[%s8727_s27 + $0x193] sm:$0xff] }
 0x27f   : > { %v4887_v53 = vpack.c.bf16 %v6471_v41, %v6470_v63  ;;  %v6493_v63 = vld [vmem:[%s8727_s27 + $0x1ce] sm:$0xff]  ;;  %v2545_v41 = vpack.c.bf16 %v6083_v22, %v6082_v48 }
 0x285   : > { %7169 = vmatmul.mubr.msk.bf16.gmra.mrb[52].mxu1 %vm479_vm0, %v9459_v57  ;;  %7507 = vmatmul.mubr.msk.bf16.gmra.mrb[20].mxu0 %vm479_vm0, %v4885_v11  ;;  %v6473_v57 = vld [vmem:[%s8727_s27 + $0x12e] sm:$0xff] }
 0x286   : > { %7172 = vmatprep.mubr.msk.bf16.mxu1 %vm479_vm0, %v9461_v5  ;;  %7510 = vmatprep.mubr.msk.bf16.mxu0 %vm479_vm0, %v4886_v42  ;;  %v4888_v49 = vpack.c.bf16 %v6473_v57, %v6472_v58  ;;  %v5996_v5 = vld [vmem:[%s8727_s27 + $0x212] sm:$0xff]  ;;  %v6492_v42 = vld [vmem:[%s8727_s27 + $0x1c6] sm:$0xff] }
 0x287   : > { %v1965_v59 = vpack.c.bf16 %v5997_v34, %v5996_v5  ;;  %v6085_v11 = vld [vmem:[%s8727_s27 + $0x1ab] sm:$0xff]  ;;  %v4898_v58 = vpack.c.bf16 %v6493_v63, %v6492_v42  ;;  %v6086_v57 = vld [vmem:[%s8727_s27 + $0x1b3] sm:$0xff]  ;;  %v6088_v5 = vld [vmem:[%s8727_s27 + $0x1c3] sm:$0xff] }
 0x288   : > { %v2546_v56 = vpack.c.bf16 %v6085_v11, %v6084_v55  ;;  %v6089_v34 = vld [vmem:[%s8727_s27 + $0x1cb] sm:$0xff] }
 0x28d   : > { %7173 = vmatmul.mubr.msk.bf16.gmra.mrb[56].mxu1 %vm479_vm0, %v9475_v10  ;;  %7511 = vmatmul.mubr.msk.bf16.gmra.mrb[24].mxu0 %vm479_vm0, %v4887_v53  ;;  %v6477_v10 = vld [vmem:[%s8727_s27 + $0x14e] sm:$0xff]  ;;  %v6087_v53 = vld [vmem:[%s8727_s27 + $0x1bb] sm:$0xff] }
 0x28e   : > { %7176 = vmatprep.mubr.msk.bf16.mxu1 %vm479_vm0, %v1964_v24  ;;  %7514 = vmatprep.mubr.msk.bf16.mxu0 %vm479_vm0, %v4888_v49  ;;  %v4890_v54 = vpack.c.bf16 %v6477_v10, %v6476_v43  ;;  %v6494_v24 = vld [vmem:[%s8727_s27 + $0x1d6] sm:$0xff]  ;;  %v6495_v49 = vld [vmem:[%s8727_s27 + $0x1de] sm:$0xff]  ;;  %v2547_v39 = vpack.c.bf16 %v6087_v53, %v6086_v57  ;;  %v2548_v43 = vpack.c.bf16 %v6089_v34, %v6088_v5 }
 0x28f   : > { %v4899_v4 = vpack.c.bf16 %v6495_v49, %v6494_v24  ;;  %v4900_v10 = vpack.c.bf16 %v6497_v37, %v6496_v1 }
 0x295   : > { %7177 = vmatmul.mubr.msk.bf16.gmra.mrb[60].mxu1 %vm479_vm0, %v1965_v59  ;;  %7515 = vmatmul.mubr.msk.bf16.gmra.mrb[28].mxu0 %vm479_vm0, %v4889_v8  ;;  %v6090_v59 = vld [vmem:[%s8727_s27 + $0x1d3] sm:$0xff]  ;;  %v6091_v8 = vld [vmem:[%s8727_s27 + $0x1db] sm:$0xff] }
 0x296   : > { %7222 = vmatprep.mubr.msk.bf16.mxu1 %vm479_vm0, %v2538_v52  ;;  %7518 = vmatprep.mubr.msk.bf16.mxu0 %vm479_vm0, %v4890_v54  ;;  %v6498_v52 = vld [vmem:[%s8727_s27 + $0x1f6] sm:$0xff]  ;;  %v6499_v54 = vld [vmem:[%s8727_s27 + $0x1fe] sm:$0xff]  ;;  %v2549_v6 = vpack.c.bf16 %v6091_v8, %v6090_v59 }
 0x297   : > { %v4901_v15 = vpack.c.bf16 %v6499_v54, %v6498_v52 }
 0x29d   : > { %7223 = vmatmul.mubr.msk.bf16.vlgmr.msra.gmra.mrb[32].mxu1 %vm479_vm0, %v2539_v0  ;;  %7519 = vmatmul.mubr.msk.bf16.gmra.mrb[32].mxu0 %vm479_vm0, %v4891_v26  ;;  %v6094_v0 = vld [vmem:[%s8727_s27 + $0x1f3] sm:$0xff]  ;;  %v6095_v26 = vld [vmem:[%s8727_s27 + $0x1fb] sm:$0xff] }
 0x29e   : > { %7226 = vmatprep.mubr.msk.bf16.mxu1 %vm479_vm0, %v2540_v7  ;;  %7522 = vmatprep.mubr.msk.bf16.mxu0 %vm479_vm0, %v4892_v21  ;;  %v6502_v7 = vld [vmem:[%s8727_s27 + $0x216] sm:$0xff]  ;;  %v6503_v21 = vld [vmem:[%s8727_s27 + $0x21e] sm:$0xff]  ;;  %v2551_v30 = vpack.c.bf16 %v6095_v26, %v6094_v0 }
 0x29f   : > { %v4903_v35 = vpack.c.bf16 %v6503_v21, %v6502_v7 }
 0x2a5   : > { %7227 = vmatmul.mubr.msk.bf16.gmra.mrb[36].mxu1 %vm479_vm0, %v2541_v31  ;;  %7523 = vmatmul.mubr.msk.bf16.gmra.mrb[36].mxu0 %vm479_vm0, %v4893_v46  ;;  %v6098_v31 = vld [vmem:[%s8727_s27 + $0x213] sm:$0xff]  ;;  %v6099_v46 = vld [vmem:[%s8727_s27 + $0x21b] sm:$0xff] }
 0x2a6   : > { %7230 = vmatprep.mubr.msk.bf16.mxu1 %vm479_vm0, %v2542_v3  ;;  %7526 = vmatprep.mubr.msk.bf16.mxu0 %vm479_vm0, %v4894_v28  ;;  %v6506_v3 = vld [vmem:[%s8727_s27 + $0x236] sm:$0xff]  ;;  %v6507_v28 = vld [vmem:[%s8727_s27 + $0x23e] sm:$0xff]  ;;  %v2553_v60 = vpack.c.bf16 %v6099_v46, %v6098_v31 }
 0x2a7   : > { %v4905_v50 = vpack.c.bf16 %v6507_v28, %v6506_v3 }
 0x2ad   : > { %7231 = vmatmul.mubr.msk.bf16.gmra.mrb[40].mxu1 %vm479_vm0, %v2543_v47  ;;  %7527 = vmatmul.mubr.msk.bf16.gmra.mrb[40].mxu0 %vm479_vm0, %v4895_v45 }
 0x2ae   : > { %7234 = vmatprep.mubr.msk.bf16.mxu1 %vm479_vm0, %v2544_v23  ;;  %7530 = vmatprep.mubr.msk.bf16.mxu0 %vm479_vm0, %v4896_v61 }
 0x2b5   : > { %7235 = vmatmul.mubr.msk.bf16.gmra.mrb[44].mxu1 %vm479_vm0, %v2545_v41  ;;  %7531 = vmatmul.mubr.msk.bf16.gmra.mrb[44].mxu0 %vm479_vm0, %v4897_v29 }
 0x2b6   : > { %7238 = vmatprep.mubr.msk.bf16.mxu1 %vm479_vm0, %v2546_v56  ;;  %7534 = vmatprep.mubr.msk.bf16.mxu0 %vm479_vm0, %v4898_v58 }
 0x2bd   : > { %7239 = vmatmul.mubr.msk.bf16.gmra.mrb[48].mxu1 %vm479_vm0, %v2547_v39  ;;  %7535 = vmatmul.mubr.msk.bf16.gmra.mrb[48].mxu0 %vm479_vm0, %v4899_v4 }
 0x2be   : > { %7242 = vmatprep.mubr.msk.bf16.mxu1 %vm479_vm0, %v2548_v43  ;;  %7538 = vmatprep.mubr.msk.bf16.mxu0 %vm479_vm0, %v4900_v10  ;;  %v9786_v10 = vld [vmem:[#allocation7] ss:$0 sm:$0xff] }
 0x2c5   : > { %7243 = vmatmul.mubr.msk.bf16.gmra.mrb[52].mxu1 %vm479_vm0, %v2549_v6  ;;  %7539 = vmatmul.mubr.msk.bf16.gmra.mrb[52].mxu0 %vm479_vm0, %v4901_v15 }
 0x2c6   : > { %7246 = vmatprep.mubr.msk.bf16.mxu1 %vm479_vm0, %v2550_v18  ;;  %7542 = vmatprep.mubr.msk.bf16.mxu0 %vm479_vm0, %v4902_v62 }
 0x2cd   : > { %7247 = vmatmul.mubr.msk.bf16.gmra.mrb[56].mxu1 %vm479_vm0, %v2551_v30  ;;  %7543 = vmatmul.mubr.msk.bf16.gmra.mrb[56].mxu0 %vm479_vm0, %v4903_v35 }
 0x2ce   : > { %7250 = vmatprep.mubr.msk.bf16.mxu1 %vm479_vm0, %v2552_v33  ;;  %7546 = vmatprep.mubr.msk.bf16.mxu0 %vm479_vm0, %v4904_v44 }
 0x2d5   : > { %7251 = vmatmul.mubr.msk.bf16.gmra.mrb[60].mxu1 %vm479_vm0, %v2553_v60  ;;  %7547 = vmatmul.mubr.msk.bf16.gmra.mrb[60].mxu0 %vm479_vm0, %v4905_v50 }
 0x2f0   : > { %v7118_v38 = vpop.f32.mrb[0].mxu1 }
 0x2f1   : > { %v2137_v40 = vpop.f32.mrb[1].mxu1 }
 0x2f2   : > { %v7119_v14 = vpop.f32.mrb[2].mxu1 }
 0x2f3   : > { %v2140_v16 = vpop.f32.mrb[3].mxu1 }
 0x2f8   : > { %v7122_v19 = vpop.f32.mrb[4].mxu1 }
 0x2f9   : > { %v2153_v2 = vpop.f32.mrb[5].mxu1 }
 0x2fa   : > { %v7123_v47 = vpop.f32.mrb[6].mxu1 }
 0x2fb   : > { %v2156_v45 = vpop.f32.mrb[7].mxu1 }
 0x300   : > { %v7126_v23 = vpop.f32.mrb[8].mxu1 }
 0x301   : > { %v9737_v61 = vpop.f32.mrb[9].mxu1 }
 0x302   : > { %v9739_v48 = vpop.f32.mrb[10].mxu1 }
 0x303   : > { %v9741_v22 = vpop.f32.mrb[11].mxu1 }
 0x308   : > { %v9743_v17 = vpop.f32.mrb[12].mxu1 }
 0x309   : > { %v9745_v9 = vpop.f32.mrb[13].mxu1 }
 0x30a   : > { %v9747_v55 = vpop.f32.mrb[14].mxu1 }
 0x30b   : > { %v9749_v11 = vpop.f32.mrb[15].mxu1 }
 0x310   : > { %v9751_v42 = vpop.f32.mrb[16].mxu1 }
 0x311   : > { %v9753_v63 = vpop.f32.mrb[17].mxu1 }
 0x312   : > { %v9755_v41 = vpop.f32.mrb[18].mxu1 }
 0x313   : > { %v9757_v29 = vpop.f32.mrb[19].mxu1 }
 0x318   : > { %v9759_v56 = vpop.f32.mrb[20].mxu1 }
 0x319   : > { %v9761_v58 = vpop.f32.mrb[21].mxu1 }
 0x31a   : > { %v9763_v57 = vpop.f32.mrb[22].mxu1 }
 0x31b   : > { %v9765_v53 = vpop.f32.mrb[23].mxu1 }
 0x320   : > { %v9767_v24 = vpop.f32.mrb[24].mxu1 }
 0x321   : > { %v9769_v49 = vpop.f32.mrb[25].mxu1 }
 0x322   : > { %v9771_v5 = vpop.f32.mrb[26].mxu1 }
 0x323   : > { %v9773_v34 = vpop.f32.mrb[27].mxu1 }
 0x328   : > { %v9775_v1 = vpop.f32.mrb[28].mxu1 }
 0x329   : > { %v9777_v37 = vpop.f32.mrb[29].mxu1 }
 0x32a   : > { %v9779_v39 = vpop.f32.mrb[30].mxu1 }
 0x32b   : > { %v9781_v4 = vpop.f32.mrb[31].mxu1 }
 0x330   : > { %v7488_v43 = vpop.f32.mrb[0].mxu0 }
 0x331   : > { %v7560_v59 = vadd.f32 %v7488_v43, %v7118_v38  ;;  %v5077_v8 = vpop.f32.mrb[1].mxu0 }
 0x332   : > { %v7561_v52 = vadd.f32 %v5077_v8, %v2137_v40  ;;  %v7489_v54 = vpop.f32.mrb[2].mxu0 }
 0x333   : > { %v5405_v20 = vadd.f32 %v7560_v59, %v9786_v10  ;;  %v7562_v32 = vadd.f32 %v7489_v54, %v7119_v14  ;;  %v5080_v51 = vpop.f32.mrb[3].mxu0 }
 0x334   : > { %v5403_v27 = vadd.f32 %v7561_v52, %v9786_v10  ;;  %v7563_v6 = vadd.f32 %v5080_v51, %v2140_v16 }
 0x335   : > { %5470 = vst.msk [vmem:[%s9790_s26 + $0x10] sm:$0xff] %vm5467_vm1, %v5405_v20  ;;  %v5406_v15 = vadd.f32 %v7562_v32, %v9786_v10 }
 0x336   : > { %5468 = vst.msk [vmem:[%s9790_s26] sm:$0xff] %vm5467_vm1, %v5403_v27  ;;  %v5404_v18 = vadd.f32 %v7563_v6, %v9786_v10 }
 0x337   : > { %5471 = vst.msk [vmem:[%s9790_s26 + $0x18] sm:$0xff] %vm5467_vm1, %v5406_v15 }
 0x338   : > { %5469 = vst.msk [vmem:[%s9790_s26 + $0x8] sm:$0xff] %vm5467_vm1, %v5404_v18  ;;  %v7492_v62 = vpop.f32.mrb[4].mxu0 }
 0x339   : > { %v7564_v0 = vadd.f32 %v7492_v62, %v7122_v19  ;;  %v5093_v26 = vpop.f32.mrb[5].mxu0 }
 0x33a   : > { %v7565_v7 = vadd.f32 %v5093_v26, %v2153_v2  ;;  %v7493_v21 = vpop.f32.mrb[6].mxu0 }
 0x33b   : > { %v5409_v36 = vadd.f32 %v7564_v0, %v9786_v10  ;;  %v7566_v12 = vadd.f32 %v7493_v21, %v7123_v47  ;;  %v5096_v13 = vpop.f32.mrb[7].mxu0 }
 0x33c   : > { %v5407_v25 = vadd.f32 %v7565_v7, %v9786_v10  ;;  %v7567_v30 = vadd.f32 %v5096_v13, %v2156_v45 }
 0x33d   : > { %5474 = vst.msk [vmem:[%s9790_s26 + $0x30] sm:$0xff] %vm5467_vm1, %v5409_v36  ;;  %v5410_v35 = vadd.f32 %v7566_v12, %v9786_v10 }
 0x33e   : > { %5472 = vst.msk [vmem:[%s9790_s26 + $0x20] sm:$0xff] %vm5467_vm1, %v5407_v25  ;;  %v5408_v33 = vadd.f32 %v7567_v30, %v9786_v10 }
 0x33f   : > { %5475 = vst.msk [vmem:[%s9790_s26 + $0x38] sm:$0xff] %vm5467_vm1, %v5410_v35 }
 0x340   : > { %5473 = vst.msk [vmem:[%s9790_s26 + $0x28] sm:$0xff] %vm5467_vm1, %v5408_v33  ;;  %v7496_v44 = vpop.f32.mrb[8].mxu0 }
 0x341   : > { %v7568_v31 = vadd.f32 %v7496_v44, %v7126_v23  ;;  %v5109_v46 = vpop.f32.mrb[9].mxu0 }
 0x342   : > { %v7569_v3 = vadd.f32 %v5109_v46, %v9737_v61  ;;  %v7497_v28 = vpop.f32.mrb[10].mxu0 }
 0x343   : > { %v5413_v60 = vadd.f32 %v7568_v31, %v9786_v10  ;;  %v7570_v50 = vadd.f32 %v7497_v28, %v9739_v48  ;;  %v5112_v38 = vpop.f32.mrb[11].mxu0 }
 0x344   : > { %v5411_v40 = vadd.f32 %v7569_v3, %v9786_v10  ;;  %v7571_v14 = vadd.f32 %v5112_v38, %v9741_v22 }
 0x345   : > { %5478 = vst.msk [vmem:[%s9790_s26 + $0x50] sm:$0xff] %vm5467_vm1, %v5413_v60  ;;  %v5414_v16 = vadd.f32 %v7570_v50, %v9786_v10 }
 0x346   : > { %5476 = vst.msk [vmem:[%s9790_s26 + $0x40] sm:$0xff] %vm5467_vm1, %v5411_v40  ;;  %v5412_v19 = vadd.f32 %v7571_v14, %v9786_v10 }
 0x347   : > { %5479 = vst.msk [vmem:[%s9790_s26 + $0x58] sm:$0xff] %vm5467_vm1, %v5414_v16 }
 0x348   : > { %5477 = vst.msk [vmem:[%s9790_s26 + $0x48] sm:$0xff] %vm5467_vm1, %v5412_v19  ;;  %v7500_v2 = vpop.f32.mrb[12].mxu0 }
 0x349   : > { %v7572_v47 = vadd.f32 %v7500_v2, %v9743_v17  ;;  %v5125_v45 = vpop.f32.mrb[13].mxu0 }
 0x34a   : > { %v7573_v23 = vadd.f32 %v5125_v45, %v9745_v9  ;;  %v7501_v61 = vpop.f32.mrb[14].mxu0 }
 0x34b   : > { %v5417_v48 = vadd.f32 %v7572_v47, %v9786_v10  ;;  %v7574_v22 = vadd.f32 %v7501_v61, %v9747_v55  ;;  %v5128_v43 = vpop.f32.mrb[15].mxu0 }
 0x34c   : > { %v5415_v59 = vadd.f32 %v7573_v23, %v9786_v10  ;;  %v7575_v8 = vadd.f32 %v5128_v43, %v9749_v11 }
 0x34d   : > { %5482 = vst.msk [vmem:[%s9790_s26 + $0x70] sm:$0xff] %vm5467_vm1, %v5417_v48  ;;  %v5418_v52 = vadd.f32 %v7574_v22, %v9786_v10 }
 0x34e   : > { %5480 = vst.msk [vmem:[%s9790_s26 + $0x60] sm:$0xff] %vm5467_vm1, %v5415_v59  ;;  %v5416_v17 = vadd.f32 %v7575_v8, %v9786_v10 }
 0x34f   : > { %5483 = vst.msk [vmem:[%s9790_s26 + $0x78] sm:$0xff] %vm5467_vm1, %v5418_v52 }
 0x350   : > { %5481 = vst.msk [vmem:[%s9790_s26 + $0x68] sm:$0xff] %vm5467_vm1, %v5416_v17  ;;  %v7504_v9 = vpop.f32.mrb[16].mxu0 }
 0x351   : > { %v7576_v55 = vadd.f32 %v7504_v9, %v9751_v42  ;;  %v5141_v11 = vpop.f32.mrb[17].mxu0 }
 0x352   : > { %v7577_v54 = vadd.f32 %v5141_v11, %v9753_v63  ;;  %v7505_v20 = vpop.f32.mrb[18].mxu0 }
 0x353   : > { %v5421_v32 = vadd.f32 %v7576_v55, %v9786_v10  ;;  %v7578_v51 = vadd.f32 %v7505_v20, %v9755_v41  ;;  %v5144_v27 = vpop.f32.mrb[19].mxu0 }
 0x354   : > { %v5419_v6 = vadd.f32 %v7577_v54, %v9786_v10  ;;  %v7579_v15 = vadd.f32 %v5144_v27, %v9757_v29 }
 0x355   : > { %5486 = vst.msk [vmem:[%s9790_s26 + $0x90] sm:$0xff] %vm5467_vm1, %v5421_v32  ;;  %v5422_v18 = vadd.f32 %v7578_v51, %v9786_v10 }
 0x356   : > { %5484 = vst.msk [vmem:[%s9790_s26 + $0x80] sm:$0xff] %vm5467_vm1, %v5419_v6  ;;  %v5420_v42 = vadd.f32 %v7579_v15, %v9786_v10 }
 0x357   : > { %5487 = vst.msk [vmem:[%s9790_s26 + $0x98] sm:$0xff] %vm5467_vm1, %v5422_v18 }
 0x358   : > { %5485 = vst.msk [vmem:[%s9790_s26 + $0x88] sm:$0xff] %vm5467_vm1, %v5420_v42  ;;  %v7508_v63 = vpop.f32.mrb[20].mxu0 }
 0x359   : > { %v7580_v41 = vadd.f32 %v7508_v63, %v9759_v56  ;;  %v5157_v29 = vpop.f32.mrb[21].mxu0 }
 0x35a   : > { %v7581_v62 = vadd.f32 %v5157_v29, %v9761_v58  ;;  %v7509_v0 = vpop.f32.mrb[22].mxu0 }
 0x35b   : > { %v5425_v26 = vadd.f32 %v7580_v41, %v9786_v10  ;;  %v7582_v7 = vadd.f32 %v7509_v0, %v9763_v57  ;;  %v5160_v21 = vpop.f32.mrb[23].mxu0 }
 0x35c   : > { %v5423_v36 = vadd.f32 %v7581_v62, %v9786_v10  ;;  %v7583_v12 = vadd.f32 %v5160_v21, %v9765_v53 }
 0x35d   : > { %5490 = vst.msk [vmem:[%s9790_s26 + $0xb0] sm:$0xff] %vm5467_vm1, %v5425_v26  ;;  %v5426_v13 = vadd.f32 %v7582_v7, %v9786_v10 }
 0x35e   : > { %5488 = vst.msk [vmem:[%s9790_s26 + $0xa0] sm:$0xff] %vm5467_vm1, %v5423_v36  ;;  %v5424_v56 = vadd.f32 %v7583_v12, %v9786_v10 }
 0x35f   : > { %5491 = vst.msk [vmem:[%s9790_s26 + $0xb8] sm:$0xff] %vm5467_vm1, %v5426_v13 }
 0x360   : > { %5489 = vst.msk [vmem:[%s9790_s26 + $0xa8] sm:$0xff] %vm5467_vm1, %v5424_v56  ;;  %v7512_v58 = vpop.f32.mrb[24].mxu0 }
 0x361   : > { %v7584_v57 = vadd.f32 %v7512_v58, %v9767_v24  ;;  %v5173_v53 = vpop.f32.mrb[25].mxu0 }
 0x362   : > { %v7585_v25 = vadd.f32 %v5173_v53, %v9769_v49  ;;  %v7513_v30 = vpop.f32.mrb[26].mxu0 }
 0x363   : > { %v5429_v35 = vadd.f32 %v7584_v57, %v9786_v10  ;;  %v7586_v33 = vadd.f32 %v7513_v30, %v9771_v5  ;;  %v5176_v44 = vpop.f32.mrb[27].mxu0 }
 0x364   : > { %v5427_v31 = vadd.f32 %v7585_v25, %v9786_v10  ;;  %v7587_v46 = vadd.f32 %v5176_v44, %v9773_v34 }
 0x365   : > { %5494 = vst.msk [vmem:[%s9790_s26 + $0xd0] sm:$0xff] %vm5467_vm1, %v5429_v35  ;;  %v5430_v3 = vadd.f32 %v7586_v33, %v9786_v10 }
 0x366   : > { %5492 = vst.msk [vmem:[%s9790_s26 + $0xc0] sm:$0xff] %vm5467_vm1, %v5427_v31  ;;  %v5428_v24 = vadd.f32 %v7587_v46, %v9786_v10 }
 0x367   : > { %5495 = vst.msk [vmem:[%s9790_s26 + $0xd8] sm:$0xff] %vm5467_vm1, %v5430_v3 }
 0x368   : > { %5493 = vst.msk [vmem:[%s9790_s26 + $0xc8] sm:$0xff] %vm5467_vm1, %v5428_v24  ;;  %v7516_v49 = vpop.f32.mrb[28].mxu0 }
 0x369   : > { %v7588_v5 = vadd.f32 %v7516_v49, %v9775_v1  ;;  %v5189_v34 = vpop.f32.mrb[29].mxu0 }
 0x36a   : > { %v7589_v28 = vadd.f32 %v5189_v34, %v9777_v37  ;;  %v7517_v60 = vpop.f32.mrb[30].mxu0 }
 0x36b   : > { %v5433_v50 = vadd.f32 %v7588_v5, %v9786_v10  ;;  %v7590_v38 = vadd.f32 %v7517_v60, %v9779_v39  ;;  %v5192_v40 = vpop.f32.mrb[31].mxu0 }
 0x36c   : > { %v5431_v14 = vadd.f32 %v7589_v28, %v9786_v10  ;;  %v7591_v16 = vadd.f32 %v5192_v40, %v9781_v4 }
 0x36d   : > { %5498 = vst.msk [vmem:[%s9790_s26 + $0xf0] sm:$0xff] %vm5467_vm1, %v5433_v50  ;;  %v5434_v19 = vadd.f32 %v7590_v38, %v9786_v10 }
 0x36e   : > { %5496 = vst.msk [vmem:[%s9790_s26 + $0xe0] sm:$0xff] %vm5467_vm1, %v5431_v14  ;;  %v5432_v1 = vadd.f32 %v7591_v16, %v9786_v10 }
 0x36f   : > { %5499 = vst.msk [vmem:[%s9790_s26 + $0xf8] sm:$0xff] %vm5467_vm1, %v5434_v19 }
 0x370   : > { %v7224_v37 = vpop.f32.mrb[32].mxu1  ;;  %5497 = vst.msk [vmem:[%s9790_s26 + $0xe8] sm:$0xff] %vm5467_vm1, %v5432_v1  ;;  %v7520_v39 = vpop.f32.mrb[32].mxu0 }
 0x371   : > { %v2853_v2 = vpop.f32.mrb[33].mxu1  ;;  %v7592_v47 = vadd.f32 %v7520_v39, %v7224_v37  ;;  %v5205_v4 = vpop.f32.mrb[33].mxu0 }
 0x372   : > { %v7225_v45 = vpop.f32.mrb[34].mxu1  ;;  %v7593_v23 = vadd.f32 %v5205_v4, %v2853_v2  ;;  %v7521_v61 = vpop.f32.mrb[34].mxu0 }
 0x373   : > { %v2856_v48 = vpop.f32.mrb[35].mxu1  ;;  %v5437_v22 = vadd.f32 %v7592_v47, %v9786_v10  ;;  %v7594_v43 = vadd.f32 %v7521_v61, %v7225_v45  ;;  %v5208_v59 = vpop.f32.mrb[35].mxu0 }
 0x374   : > { %v5435_v8 = vadd.f32 %v7593_v23, %v9786_v10  ;;  %v7595_v52 = vadd.f32 %v5208_v59, %v2856_v48 }
 0x375   : > { %5502 = vst.msk [vmem:[%s9790_s26 + $0x110] sm:$0xff] %vm5467_vm1, %v5437_v22  ;;  %v5438_v17 = vadd.f32 %v7594_v43, %v9786_v10 }
 0x376   : > { %5500 = vst.msk [vmem:[%s9790_s26 + $0x100] sm:$0xff] %vm5467_vm1, %v5435_v8  ;;  %v5436_v9 = vadd.f32 %v7595_v52, %v9786_v10 }
 0x377   : > { %5503 = vst.msk [vmem:[%s9790_s26 + $0x118] sm:$0xff] %vm5467_vm1, %v5438_v17 }
 0x378   : > { %v7228_v55 = vpop.f32.mrb[36].mxu1  ;;  %5501 = vst.msk [vmem:[%s9790_s26 + $0x108] sm:$0xff] %vm5467_vm1, %v5436_v9  ;;  %v7524_v11 = vpop.f32.mrb[36].mxu0 }
 0x379   : > { %v2869_v54 = vpop.f32.mrb[37].mxu1  ;;  %v7596_v20 = vadd.f32 %v7524_v11, %v7228_v55  ;;  %v5221_v32 = vpop.f32.mrb[37].mxu0 }
 0x37a   : > { %v7229_v51 = vpop.f32.mrb[38].mxu1  ;;  %v7597_v27 = vadd.f32 %v5221_v32, %v2869_v54  ;;  %v7525_v6 = vpop.f32.mrb[38].mxu0 }
 0x37b   : > { %v2872_v15 = vpop.f32.mrb[39].mxu1  ;;  %v5441_v18 = vadd.f32 %v7596_v20, %v9786_v10  ;;  %v7598_v42 = vadd.f32 %v7525_v6, %v7229_v51  ;;  %v5224_v63 = vpop.f32.mrb[39].mxu0 }
 0x37c   : > { %v5439_v41 = vadd.f32 %v7597_v27, %v9786_v10  ;;  %v7599_v29 = vadd.f32 %v5224_v63, %v2872_v15 }
 0x37d   : > { %5506 = vst.msk [vmem:[%s9790_s26 + $0x130] sm:$0xff] %vm5467_vm1, %v5441_v18  ;;  %v5442_v62 = vadd.f32 %v7598_v42, %v9786_v10 }
 0x37e   : > { %5504 = vst.msk [vmem:[%s9790_s26 + $0x120] sm:$0xff] %vm5467_vm1, %v5439_v41  ;;  %v5440_v0 = vadd.f32 %v7599_v29, %v9786_v10 }
 0x37f   : > { %5507 = vst.msk [vmem:[%s9790_s26 + $0x138] sm:$0xff] %vm5467_vm1, %v5442_v62 }
 0x380   : > { %v7232_v26 = vpop.f32.mrb[40].mxu1  ;;  %5505 = vst.msk [vmem:[%s9790_s26 + $0x128] sm:$0xff] %vm5467_vm1, %v5440_v0  ;;  %v7528_v7 = vpop.f32.mrb[40].mxu0 }
 0x381   : > { %v2885_v21 = vpop.f32.mrb[41].mxu1  ;;  %v7600_v36 = vadd.f32 %v7528_v7, %v7232_v26  ;;  %v5237_v12 = vpop.f32.mrb[41].mxu0 }
 0x382   : > { %v7233_v13 = vpop.f32.mrb[42].mxu1  ;;  %v7601_v56 = vadd.f32 %v5237_v12, %v2885_v21  ;;  %v7529_v58 = vpop.f32.mrb[42].mxu0 }
 0x383   : > { %v2888_v57 = vpop.f32.mrb[43].mxu1  ;;  %v5445_v53 = vadd.f32 %v7600_v36, %v9786_v10  ;;  %v7602_v25 = vadd.f32 %v7529_v58, %v7233_v13  ;;  %v5240_v30 = vpop.f32.mrb[43].mxu0 }
 0x384   : > { %v5443_v35 = vadd.f32 %v7601_v56, %v9786_v10  ;;  %v7603_v33 = vadd.f32 %v5240_v30, %v2888_v57 }
 0x385   : > { %5510 = vst.msk [vmem:[%s9790_s26 + $0x150] sm:$0xff] %vm5467_vm1, %v5445_v53  ;;  %v5446_v44 = vadd.f32 %v7602_v25, %v9786_v10 }
 0x386   : > { %5508 = vst.msk [vmem:[%s9790_s26 + $0x140] sm:$0xff] %vm5467_vm1, %v5443_v35  ;;  %v5444_v31 = vadd.f32 %v7603_v33, %v9786_v10 }
 0x387   : > { %5511 = vst.msk [vmem:[%s9790_s26 + $0x158] sm:$0xff] %vm5467_vm1, %v5446_v44 }
 0x388   : > { %v7236_v46 = vpop.f32.mrb[44].mxu1  ;;  %5509 = vst.msk [vmem:[%s9790_s26 + $0x148] sm:$0xff] %vm5467_vm1, %v5444_v31  ;;  %v7532_v3 = vpop.f32.mrb[44].mxu0 }
 0x389   : > { %v2901_v24 = vpop.f32.mrb[45].mxu1  ;;  %v7604_v49 = vadd.f32 %v7532_v3, %v7236_v46  ;;  %v5253_v5 = vpop.f32.mrb[45].mxu0 }
 0x38a   : > { %v7237_v34 = vpop.f32.mrb[46].mxu1  ;;  %v7605_v28 = vadd.f32 %v5253_v5, %v2901_v24  ;;  %v7533_v60 = vpop.f32.mrb[46].mxu0 }
 0x38b   : > { %v2904_v50 = vpop.f32.mrb[47].mxu1  ;;  %v5449_v38 = vadd.f32 %v7604_v49, %v9786_v10  ;;  %v7606_v40 = vadd.f32 %v7533_v60, %v7237_v34  ;;  %v5256_v14 = vpop.f32.mrb[47].mxu0 }
 0x38c   : > { %v5447_v16 = vadd.f32 %v7605_v28, %v9786_v10  ;;  %v7607_v19 = vadd.f32 %v5256_v14, %v2904_v50 }
 0x38d   : > { %5514 = vst.msk [vmem:[%s9790_s26 + $0x170] sm:$0xff] %vm5467_vm1, %v5449_v38  ;;  %v5450_v1 = vadd.f32 %v7606_v40, %v9786_v10 }
 0x38e   : > { %5512 = vst.msk [vmem:[%s9790_s26 + $0x160] sm:$0xff] %vm5467_vm1, %v5447_v16  ;;  %v5448_v37 = vadd.f32 %v7607_v19, %v9786_v10 }
 0x38f   : > { %5515 = vst.msk [vmem:[%s9790_s26 + $0x178] sm:$0xff] %vm5467_vm1, %v5450_v1 }
 0x390   : > { %v7240_v39 = vpop.f32.mrb[48].mxu1  ;;  %5513 = vst.msk [vmem:[%s9790_s26 + $0x168] sm:$0xff] %vm5467_vm1, %v5448_v37  ;;  %v7536_v2 = vpop.f32.mrb[48].mxu0 }
 0x391   : > { %v2917_v47 = vpop.f32.mrb[49].mxu1  ;;  %v7608_v4 = vadd.f32 %v7536_v2, %v7240_v39  ;;  %v5269_v45 = vpop.f32.mrb[49].mxu0 }
 0x392   : > { %v7241_v23 = vpop.f32.mrb[50].mxu1  ;;  %v7609_v61 = vadd.f32 %v5269_v45, %v2917_v47  ;;  %v7537_v48 = vpop.f32.mrb[50].mxu0 }
 0x393   : > { %v2920_v22 = vpop.f32.mrb[51].mxu1  ;;  %v5453_v43 = vadd.f32 %v7608_v4, %v9786_v10  ;;  %v7610_v59 = vadd.f32 %v7537_v48, %v7241_v23  ;;  %v5272_v8 = vpop.f32.mrb[51].mxu0 }
 0x394   : > { %v5451_v52 = vadd.f32 %v7609_v61, %v9786_v10  ;;  %v7611_v17 = vadd.f32 %v5272_v8, %v2920_v22 }
 0x395   : > { %5518 = vst.msk [vmem:[%s9790_s26 + $0x190] sm:$0xff] %vm5467_vm1, %v5453_v43  ;;  %v5454_v9 = vadd.f32 %v7610_v59, %v9786_v10 }
 0x396   : > { %5516 = vst.msk [vmem:[%s9790_s26 + $0x180] sm:$0xff] %vm5467_vm1, %v5451_v52  ;;  %v5452_v55 = vadd.f32 %v7611_v17, %v9786_v10 }
 0x397   : > { %5519 = vst.msk [vmem:[%s9790_s26 + $0x198] sm:$0xff] %vm5467_vm1, %v5454_v9 }
 0x398   : > { %v7244_v11 = vpop.f32.mrb[52].mxu1  ;;  %5517 = vst.msk [vmem:[%s9790_s26 + $0x188] sm:$0xff] %vm5467_vm1, %v5452_v55  ;;  %v7540_v54 = vpop.f32.mrb[52].mxu0 }
 0x399   : > { %v2933_v20 = vpop.f32.mrb[53].mxu1  ;;  %v7612_v32 = vadd.f32 %v7540_v54, %v7244_v11  ;;  %v5285_v51 = vpop.f32.mrb[53].mxu0 }
 0x39a   : > { %v7245_v27 = vpop.f32.mrb[54].mxu1  ;;  %v7613_v6 = vadd.f32 %v5285_v51, %v2933_v20  ;;  %v7541_v15 = vpop.f32.mrb[54].mxu0 }
 0x39b   : > { %v2936_v18 = vpop.f32.mrb[55].mxu1  ;;  %v5457_v42 = vadd.f32 %v7612_v32, %v9786_v10  ;;  %v7614_v63 = vadd.f32 %v7541_v15, %v7245_v27  ;;  %v5288_v41 = vpop.f32.mrb[55].mxu0 }
 0x39c   : > { %v5455_v29 = vadd.f32 %v7613_v6, %v9786_v10  ;;  %v7615_v62 = vadd.f32 %v5288_v41, %v2936_v18 }
 0x39d   : > { %5522 = vst.msk [vmem:[%s9790_s26 + $0x1b0] sm:$0xff] %vm5467_vm1, %v5457_v42  ;;  %v5458_v0 = vadd.f32 %v7614_v63, %v9786_v10 }
 0x39e   : > { %5520 = vst.msk [vmem:[%s9790_s26 + $0x1a0] sm:$0xff] %vm5467_vm1, %v5455_v29  ;;  %v5456_v26 = vadd.f32 %v7615_v62, %v9786_v10 }
 0x39f   : > { %5523 = vst.msk [vmem:[%s9790_s26 + $0x1b8] sm:$0xff] %vm5467_vm1, %v5458_v0 }
 0x3a0   : > { %v7248_v7 = vpop.f32.mrb[56].mxu1  ;;  %5521 = vst.msk [vmem:[%s9790_s26 + $0x1a8] sm:$0xff] %vm5467_vm1, %v5456_v26  ;;  %v7544_v21 = vpop.f32.mrb[56].mxu0 }
 0x3a1   : > { %v2949_v36 = vpop.f32.mrb[57].mxu1  ;;  %v7616_v12 = vadd.f32 %v7544_v21, %v7248_v7  ;;  %v5301_v13 = vpop.f32.mrb[57].mxu0 }
 0x3a2   : > { %v7249_v56 = vpop.f32.mrb[58].mxu1  ;;  %v7617_v58 = vadd.f32 %v5301_v13, %v2949_v36  ;;  %v7545_v57 = vpop.f32.mrb[58].mxu0 }
 0x3a3   : > { %v2952_v53 = vpop.f32.mrb[59].mxu1  ;;  %v5461_v25 = vadd.f32 %v7616_v12, %v9786_v10  ;;  %v7618_v30 = vadd.f32 %v7545_v57, %v7249_v56  ;;  %v5304_v35 = vpop.f32.mrb[59].mxu0 }
 0x3a4   : > { %v5459_v33 = vadd.f32 %v7617_v58, %v9786_v10  ;;  %v7619_v44 = vadd.f32 %v5304_v35, %v2952_v53 }
 0x3a5   : > { %5526 = vst.msk [vmem:[%s9790_s26 + $0x1d0] sm:$0xff] %vm5467_vm1, %v5461_v25  ;;  %v5462_v31 = vadd.f32 %v7618_v30, %v9786_v10 }
 0x3a6   : > { %5524 = vst.msk [vmem:[%s9790_s26 + $0x1c0] sm:$0xff] %vm5467_vm1, %v5459_v33  ;;  %v5460_v46 = vadd.f32 %v7619_v44, %v9786_v10 }
 0x3a7   : > { %5527 = vst.msk [vmem:[%s9790_s26 + $0x1d8] sm:$0xff] %vm5467_vm1, %v5462_v31 }
 0x3a8   : > { %v7252_v3 = vpop.f32.mrb[60].mxu1  ;;  %5525 = vst.msk [vmem:[%s9790_s26 + $0x1c8] sm:$0xff] %vm5467_vm1, %v5460_v46  ;;  %v7548_v24 = vpop.f32.mrb[60].mxu0 }
 0x3a9   : > { %v2965_v49 = vpop.f32.mrb[61].mxu1  ;;  %v7620_v5 = vadd.f32 %v7548_v24, %v7252_v3  ;;  %v5317_v34 = vpop.f32.mrb[61].mxu0 }
 0x3aa   : > { %v7253_v28 = vpop.f32.mrb[62].mxu1  ;;  %v7621_v60 = vadd.f32 %v5317_v34, %v2965_v49  ;;  %v7549_v50 = vpop.f32.mrb[62].mxu0 }
 0x3ab   : > { %v2968_v38 = vpop.f32.mrb[63].mxu1  ;;  %v5465_v40 = vadd.f32 %v7620_v5, %v9786_v10  ;;  %v7622_v14 = vadd.f32 %v7549_v50, %v7253_v28  ;;  %v5320_v16 = vpop.f32.mrb[63].mxu0 }
 0x3ac   : > { %v5463_v19 = vadd.f32 %v7621_v60, %v9786_v10  ;;  %v7623_v1 = vadd.f32 %v5320_v16, %v2968_v38 }
 0x3ad   : > { %5530 = vst.msk [vmem:[%s9790_s26 + $0x1f0] sm:$0xff] %vm5467_vm1, %v5465_v40  ;;  %v5466_v37 = vadd.f32 %v7622_v14, %v9786_v10 }
 0x3ae   : > { %5528 = vst.msk [vmem:[%s9790_s26 + $0x1e0] sm:$0xff] %vm5467_vm1, %v5463_v19  ;;  %v5464_v39 = vadd.f32 %v7623_v1, %v9786_v10 }
 0x3af   : > { %5531 = vst.msk [vmem:[%s9790_s26 + $0x1f8] sm:$0xff] %vm5467_vm1, %v5466_v37 }
 0x3b0   : > { %5529 = vst.msk [vmem:[%s9790_s26 + $0x1e8] sm:$0xff] %vm5467_vm1, %v5464_v39 }
 0x3b1   : > { %8354 = shalt.err (!%p8351_p5)
}
 0x3b2   : > { %s8355_s24 = scalar_lea.hbm %s10004_s12, 8192  ;;  %s8359_s25 = scalar_lea.hbm %s10081_s3, 49152 }
 0x3b3   : > { %p8356_p8 = scmp.ne.s32.totalorder %s10004_s12, %s8355_s24  ;;  %p8360_p6 = scmp.lt.u32.totalorder %s10004_s12, %s10081_s3 }
 0x3b4   : > { %p8361_p10 = scmp.lt.u32.totalorder %s8359_s25, %s8355_s24  ;;  %p8363_p4 = scmp.lt.u32.totalorder %s8355_s24, %s10004_s12 }
 0x3b5   : > { %p8357_p12 = pnand %p8356_p8, %p10111_p1 }
 0x3b6   : > { %p8362_p0 = por %p8361_p10, %p8360_p6 }
 0x3b7   : > { %p8358_p2 = pneg %p8357_p12 }
 0x3b8   : > { %p8364_p3 = por %p8363_p4, %p8362_p0 }
 0x3ba   : > { %p8365_p13 = pnand %p8364_p3, %p8358_p2 }
 0x3bc   : > { %8368 = shalt.err (!%p8365_p13)
}
 0x3bd   : > { %s8477_s7 = smov 128   ;;  %s8478_s15 = smov 8  }
 0x3be   : > { %8086 = dma.vmem_to_hbm [thread:$0]  (%p10111_p1), %s10006_s19, 8192, %s10004_s12, %s10017_s6, %s8477_s7, %s8477_s7, %s8478_s15  }
 0x3bf PF: > { %s10112_s8 = sld [smem:[#allocation12_spill]]  ;;  %s10113_s18 = sld [smem:[#allocation14_spill]] }
 0x3c0   : > { %p8108_p7 = scmp.ge.s32.totalorder %s8467_s22, 2 }
 0x3c5   : > { %s5563_s4 = sand.u32 1, %s10112_s8   ;;  %p10114_p9 = scmp.ne.s32.totalorder %s10113_s18, 0 }
 0x3c6   : > { %s5564_s5 = scalar_lea.sflag [#allocation4], %s5563_s4 }
 0x3c7   : > { %p8100_p11 = pnand %p8108_p7, %p10114_p9 }
 0x3c9   : > { %8422 = dma.done.wait (!%p8100_p11), %s5564_s5, 8192  }
 0x3ca   : > { %8424 = vsyncadd (!%p8100_p11), %s5564_s5, 4294959104  ;;  %s20_s22 = sadd.s32 1, %s8467_s22   ;;  %s10115_s18 = sld [smem:[#allocation13_spill]] }
 0x3cb   : > { %p17_p5 = scmp.ge.s32.totalorder %s20_s22, 8   ;;  %s10116_s20 = sld [smem:[#allocation15_spill]] }
 0x3cc   : > { %s10117_s12 = smov %s8431_s13  ;;  %s10118_s13 = smov %s8435_s14 }
 0x3cd   : > { %s10119_s14 = smov %s8675_s2  ;;  %s10120_s15 = smov %s8443_s16 }
 0x3ce   : > { %s10121_s16 = smov %s8447_s17  ;;  %s10122_s17 = smov %s8670_s29 }
 0x3cf   : > { %s10123_s19 = smov %s8463_s21  ;;  %s10124_s21 = smov %s10130_s10 }
 0x3d0   :  { %19 = sbr.rel (!%p17_p5) target bundleno = 13 (0xd), region = 102 }
 0x3d7   :  { %5569 = vsyncpa [#allocation3], 1 }
 0x3d8   :  { %5571 = vsyncpa [#allocation3 + $0x1], 1 }
 0x3d9   :  { %5572 = vsyncpa [#allocation6], 1 }
 0x3da   :  { %5573 = vsyncpa [#allocation4], 1 }
 0x3db   :  { %5575 = vsyncpa [#allocation4 + $0x1], 1 }

// kernel: augmented_conv_forward_pallas.4
= control target key start
LH: loop header
LB: loop body
LE: loop exit
PB: predicated region body
PF: predicated region fallthrough
CT: control target
= control target key end

     0   :  { %s10558_s0 = inlined_call_operand.hbm [shape: bf16[2,2,1024,68], index: 0, kind: input, shape index: {}]   ;;  %s10559_s1 = inlined_call_operand.hbm [shape: bf16[2,2,68,1024], index: 1, kind: input, shape index: {}]   ;;  %s10560_s2 = inlined_call_operand.hbm [shape: bf16[2,2,2,1024], index: 2, kind: input, shape index: {}]   ;;  %s10561_s3 = inlined_call_operand.hbm [shape: f32[2,2,1024,2], index: 3, kind: output, shape index: {}]  }
   0x1   :  { %11263 = sst [smem:[#allocation274_spill]] %s10559_s1 }
   0x2   :  { %11264 = sst [smem:[#allocation275_spill]] %s10561_s3 }
   0x3   :  { %8 = vsyncpa [#allocation3], 0 }
   0x4   :  { %10 = vsyncpa [#allocation3 + $0x1], 0 }
   0x5   :  { %11 = vsyncpa [#allocation6], 0 }
   0x6   :  { %13 = vsyncpa [#allocation6 + $0x1], 0 }
   0x7   :  { %14 = vsyncpa [#allocation4], 0 }
   0x8   :  { %16 = vsyncpa [#allocation4 + $0x1], 0  ;;  %s5493_s12 = smov 0   ;;  %s5495_s13 = smov 0  }
   0x9   :  { %s5497_s14 = smov 0   ;;  %s5499_s15 = smov 0  }
   0xa   :  { %s5501_s16 = smov 0   ;;  %s5503_s17 = smov 0  }
   0xb   :  { %s5505_s18 = smov 0   ;;  %s5507_s19 = smov 0  }
   0xc   :  { %s5509_s20 = smov 0   ;;  %s5511_s21 = smov 0  }
   0xd   :  { %s5513_s22 = smov 0   ;;  %s5515_s23 = smov 0  }
   0xe   :  { %s5517_s24 = smov 0  }
   0xf LB: > { %11265 = sst [smem:[#allocation12_spill]] %s5415_s13  ;;  %s5557_s25 = sadd.s32 4294967295, %s5459_s24   ;;  %s5459_s24 = sphi %s5517_s24, %s22_s24   ;;  %s5455_s23 = sphi %s5515_s23, %s12835_s23   ;;  %s5451_s22 = sphi %s5513_s22, %s12834_s22   ;;  %s5447_s21 = sphi %s5511_s21, %s12833_s21   ;;  %s5443_s20 = sphi %s5509_s20, %s12832_s20   ;;  %s5439_s19 = sphi %s5507_s19, %s12831_s19   ;;  %s5435_s18 = sphi %s5505_s18, %s12830_s18   ;;  %s5431_s17 = sphi %s5503_s17, %s12829_s17   ;;  %s5427_s16 = sphi %s5501_s16, %s12828_s16   ;;  %s5423_s15 = sphi %s5499_s15, %s12821_s15   ;;  %s5419_s14 = sphi %s5497_s14, %s12827_s14   ;;  %s5415_s13 = sphi %s5495_s13, %s12826_s13   ;;  %s5411_s12 = sphi %s5493_s12, %s12820_s12  }
  0x10   : > { %11266 = sst [smem:[#allocation13_spill]] %s5423_s15  ;;  %p10566_p0 = scmp.eq.s32.totalorder %s5459_s24, 0 }
  0x11   : > { %11267 = sst [smem:[#allocation14_spill]] %s5427_s16  ;;  %p10565_p1 = scmp.eq.s32.totalorder %s5557_s25, 0 }
  0x12   : > { %11268 = sst [smem:[#allocation15_spill]] %s5435_s18  ;;  %p87_p2 = scmp.ne.s32.totalorder %s5419_s14, %s5415_s13 }
  0x13   : > { %11269 = sst [smem:[#allocation16_spill]] %s5439_s19  ;;  %p93_p3 = scmp.ne.s32.totalorder %s5415_s13, %s5411_s12 }
  0x14   : > { %11270 = sst [smem:[#allocation17_spill]] %s5443_s20  ;;  %p10564_p4 = scmp.lt.s32.totalorder %s5459_s24, 16 }
  0x15   : > { %11271 = sst [smem:[#allocation18_spill]] %s5557_s25  ;;  %p89_p5 = por %p87_p2, %p10566_p0 }
  0x16   : > { %p5570_p6 = por %p93_p3, %p10565_p1  ;;  %s200_s28 = sand.u32 1, %s5459_s24  }
  0x17   : > { %s10562_s29 = sand.u32 1, %s5419_s14   ;;  %s4485_s4 = smul.u32 72, %s5451_s22 }
  0x18   : > { %s11272_s27 = scalar_select %p5570_p6, 1, 0 }
  0x19   : > { %s4484_s30 = smul.u32 288, %s10562_s29  ;;  %p5581_p7 = pnand %p10564_p4, %p89_p5 }
  0x1a   : > { %11273 = sst [smem:[#allocation19_spill]] %s11272_s27  ;;  %s4486_s6 = smul.u32 144, %s5455_s23 }
  0x1b   : > { %s204_s7 = scalar_lea.vmem [#allocation5], %s4484_s30  ;;  %s11275_s1 = sld [smem:[#allocation274_spill]] }
  0x1c   : > { %s213_s8 = sshll.u32 %s204_s7, 4  ;;  %s210_s9 = sadd.s32 %s4486_s6, %s4485_s4  ;;  %s5586_s8 = int_to_ptr.vmem [resolvable:$true] %s213_s8 }
  0x1d   : > { %s4152_s10 = sshll.u32 %s210_s9, 6  ;;  %s5593_s29 = scalar_lea.sflag [#allocation6], %s200_s28 }
  0x1e   : > { %p10567_p9 = pneg %p5581_p7 }
  0x21   : > { %s5591_s26 = scalar_lea.hbm %s11275_s1, %s4152_s10  ;;  %s5232_s6 = scalar_lea.hbm %s11275_s1, 18432 }
  0x22   : > { %s5227_s3 = scalar_lea.hbm %s5591_s26, 4608  ;;  %p5233_p12 = scmp.lt.u32.totalorder %s5591_s26, %s11275_s1 }
  0x23   : > { %p5228_p8 = scmp.ne.s32.totalorder %s5591_s26, %s5227_s3  ;;  %p5234_p13 = scmp.lt.u32.totalorder %s5232_s6, %s5227_s3 }
  0x24   : > { %p5236_p3 = scmp.lt.u32.totalorder %s5227_s3, %s5591_s26 }
  0x25   : > { %p5230_p10 = pnand %p10567_p9, %p5228_p8  ;;  %p5235_p2 = por %p5234_p13, %p5233_p12 }
  0x27   : > { %p5231_p11 = pneg %p5230_p10  ;;  %p5237_p5 = por %p5236_p3, %p5235_p2 }
  0x29   : > { %p5238_p4 = pnand %p5237_p5, %p5231_p11 }
  0x2b   : > { %5241 = shalt.err (!%p5238_p4)
}
  0x2c   : > { %s5242_s28 = scalar_lea.vmem %s5586_s8, 4608  ;;  %s5461_s10 = smov [#allocation5]  }
  0x2d   : > { %p5243_p8 = scmp.ne.s32.totalorder %s5586_s8, %s5242_s28  ;;  %s5247_s11 = sshll.u32 %s5461_s10, 4  ;;  %s5248_s11 = int_to_ptr.vmem [resolvable:$false] %s5247_s11 }
  0x2e   : > { %s5249_s12 = scalar_lea.vmem %s5248_s11, 9216  ;;  %p5250_p0 = scmp.lt.s32.totalorder %s5586_s8, %s5248_s11 }
  0x2f   : > { %p5245_p10 = pnand %p5243_p8, %p10567_p9  ;;  %p5251_p12 = scmp.lt.s32.totalorder %s5249_s12, %s5242_s28 }
  0x31   : > { %p5246_p1 = pneg %p5245_p10  ;;  %p5252_p13 = por %p5251_p12, %p5250_p0 }
  0x33   : > { %p5253_p2 = pnand %p5252_p13, %p5246_p1 }
  0x35   : > { %5256 = shalt.err (!%p5253_p2)
}
  0x36   : > { %s5462_s3 = smov 512   ;;  %s5463_s30 = smov 32  }
  0x37   : > { %4502 = dma.hbm_to_vmem [thread:$0]  (!%p5581_p7), %s5591_s26, 4608, %s5586_s8, %s5593_s29, %s5462_s3, %s5462_s3, %s5463_s30  }
  0x38   : > { %p4157_p0 = scmp.ge.s32.totalorder %s5459_s24, 1  ;;  %p242_p1 = scmp.lt.s32.totalorder %s5459_s24, 17 }
  0x39   : > { %s4144_s6 = sadd.s32 4294967294, %s5459_s24   ;;  %s34_s7 = sadd.s32 1, %s5447_s21 }
  0x3a   : > { %p5623_p4 = pnand %p4157_p0, %p242_p1  ;;  %s37_s9 = sadd.s32 1, %s5451_s22 }
  0x3b   : > { %p35_p11 = scmp.ge.s32.totalorder %s34_s7, 4  ;;  %s41_s28 = sadd.s32 1, %s5455_s23 }
  0x3c   : > { %s11276_s4 = scalar_select %p5623_p4, 1, 0 }
  0x3d   : > { %s52_s26 = sadd.s32 1, %s5431_s17  ;;  %p59_p3 = scmp.ne.s32.totalorder %s5431_s17, %s5427_s16 }
  0x3e   : > { %s12837_s7 = smov (%p35_p11, %s34_s7), 0  ;;  %s12839_s9 = smov (!%p35_p11, %s37_s9), %s5451_s22 }
  0x3f   : > { %11277 = sst [smem:[#allocation20_spill]] %s12837_s7  ;;  %s48_s8 = ssub.s32 %s5447_s21, %s12837_s7 }
  0x40   : > { %p11278_p5 = scmp.eq.s32.totalorder %s5459_s24, 0  ;;  %p39_p10 = scmp.ge.s32.totalorder %s12839_s9, 2 }
  0x41   : > { %p65_p12 = scmp.ne.s32.totalorder %s5427_s16, %s5423_s15  ;;  %p149_p13 = scmp.eq.s32.totalorder %s5557_s25, 15 }
  0x42   : > { %p5644_p8 = por %p11278_p5, %p59_p3  ;;  %p155_p2 = scmp.eq.s32.totalorder %s4144_s6, 15 }
  0x43   : > { %s12841_s9 = smov (%p39_p10, %s12839_s9), 0  ;;  %s12843_s28 = smov (!%p39_p10, %s41_s28), %s5455_s23 }
  0x44   : > { %11280 = sst [smem:[#allocation21_spill]] %s12841_s9  ;;  %s46_s11 = ssub.s32 %s5451_s22, %s12841_s9 }
  0x45   : > { %p11281_p0 = scmp.eq.s32.totalorder %s5557_s25, 0  ;;  %p43_p11 = scmp.ge.s32.totalorder %s12843_s28, 2 }
  0x46   : > { %p5665_p5 = por %p149_p13, %p59_p3  ;;  %p5669_p9 = por %p155_p2, %p65_p12 }
  0x47   : > { %p5658_p1 = por %p11281_p0, %p65_p12  ;;  %s175_s6 = sand.u32 1, %s5431_s17  }
  0x48   : > { %s11284_s3 = scalar_select %p5665_p5, 1, 0 }
  0x49   : > { %s11282_s12 = scalar_select %p5658_p1, 1, 0 }
  0x4a   : > { %11285 = sst [smem:[#allocation23_spill]] %s11284_s3  ;;  %s12845_s28 = smov (%p43_p11, %s12843_s28), 0 }
  0x4b   : > { %11283 = sst [smem:[#allocation22_spill]] %s11282_s12  ;;  %s4147_s1 = sshll.u32 %s175_s6, 7 }
  0x4c   : > { %s11286_s30 = scalar_select %p5669_p9, 1, 0 }
  0x4d   : > { %11288 = sst [smem:[#allocation25_spill]] %s12845_s28  ;;  %s45_s9 = ssub.s32 %s5455_s23, %s12845_s28 }
  0x4e   : > { %11287 = sst [smem:[#allocation24_spill]] %s11286_s30  ;;  %s47_s7 = sor.u32 %s46_s11, %s45_s9 }
  0x4f   : > { %s4148_s15 = sshll.u32 %s5447_s21, 5  ;;  %s49_s20 = sor.u32 %s48_s8, %s47_s7 }
  0x50   : > { %p78_p3 = scmp.eq.s32.totalorder %s47_s7, 0  ;;  %p50_p10 = scmp.eq.s32.totalorder %s49_s20, 0 }
  0x51   : > { %s4149_s19 = sshll.u32 %s5451_s22, 7  ;;  %s11289_s3 = sadd.s32 1, %s5419_s14 }
  0x52   : > { %s5683_s18 = scalar_select %p78_p3, %s5419_s14, %s11289_s3  }
  0x53   : > { %s5686_s27 = scalar_select %p50_p10, %s5431_s17, %s52_s26  }
  0x54   : > { %s185_s30 = sadd.s32 %s4149_s19, %s4148_s15  ;;  %s4150_s13 = sshll.u32 %s5455_s23, 8 }
  0x55   : > { %s187_s25 = sadd.s32 %s4150_s13, %s185_s30  ;;  %s179_s12 = scalar_lea.vmem [#allocation2], %s4147_s1 }
  0x56   : > { %s190_s16 = sshll.u32 %s179_s12, 4  ;;  %s4151_s28 = sshll.u32 %s187_s25, 6  ;;  %s5689_s16 = int_to_ptr.vmem [resolvable:$true] %s190_s16 }
  0x57   : > { %s5694_s8 = scalar_lea.hbm %s10558_s0, %s4151_s28  ;;  %p11290_p12 = scmp.lt.s32.totalorder %s5459_s24, 16 }
  0x58   : > { %s11292_s1 = sand.u32 1, %s5419_s14   ;;  %s5708_s19 = scalar_lea.sflag [#allocation3], %s175_s6 }
  0x59   : > { %p5700_p13 = pnand %p11290_p12, %p5644_p8  ;;  %s5706_s13 = sshll.u32 %s11292_s1, 3 }
  0x5a   : > { %s5257_s20 = scalar_lea.hbm %s5694_s8, 2048  ;;  %s5262_s28 = scalar_lea.hbm %s10558_s0, 32768 }
  0x5b   : > { %p5258_p2 = scmp.ne.s32.totalorder %s5694_s8, %s5257_s20  ;;  %p5259_p0 = pneg %p5700_p13 }
  0x5c   : > { %p5263_p8 = scmp.lt.u32.totalorder %s5694_s8, %s10558_s0  ;;  %p5264_p10 = scmp.lt.u32.totalorder %s5262_s28, %s5257_s20 }
  0x5d   : > { %p5260_p11 = pnand %p5259_p0, %p5258_p2  ;;  %p5266_p9 = scmp.lt.u32.totalorder %s5257_s20, %s5694_s8 }
  0x5e   : > { %p5265_p12 = por %p5264_p10, %p5263_p8 }
  0x5f   : > { %p5261_p3 = pneg %p5260_p11 }
  0x60   : > { %p5267_p5 = por %p5266_p9, %p5265_p12 }
  0x62   : > { %p5268_p6 = pnand %p5267_p5, %p5261_p3 }
  0x64   : > { %5271 = shalt.err (!%p5268_p6)
}
  0x65   : > { %s5272_s12 = scalar_lea.vmem %s5689_s16, 2048  ;;  %s5464_s3 = smov [#allocation2]  }
  0x66   : > { %p5273_p2 = scmp.ne.s32.totalorder %s5689_s16, %s5272_s12  ;;  %s5277_s30 = sshll.u32 %s5464_s3, 4  ;;  %s5278_s30 = int_to_ptr.vmem [resolvable:$false] %s5277_s30 }
  0x67   : > { %s5279_s6 = scalar_lea.vmem %s5278_s30, 4096  ;;  %p5280_p4 = scmp.lt.s32.totalorder %s5689_s16, %s5278_s30 }
  0x68   : > { %p5275_p11 = pnand %p5273_p2, %p5259_p0  ;;  %p5281_p8 = scmp.lt.s32.totalorder %s5279_s6, %s5272_s12 }
  0x6a   : > { %p5276_p1 = pneg %p5275_p11  ;;  %p5282_p10 = por %p5281_p8, %p5280_p4 }
  0x6c   : > { %p5283_p9 = pnand %p5282_p10, %p5276_p1 }
  0x6e   : > { %5286 = shalt.err (!%p5283_p9)
}
  0x6f   : > { %s5465_s9 = smov 64   ;;  %s5466_s11 = smov 4  }
  0x70   : > { %4499 = dma.hbm_to_vmem [thread:$0]  (!%p5700_p13), %s5694_s8, 2048, %s5689_s16, %s5708_s19, %s5465_s9, %s5465_s9, %s5466_s11  }
  0x71   : > { %s4154_s1 = sshll.u32 %s5451_s22, 3  ;;  %s4155_s20 = sshll.u32 %s5455_s23, 4 }
  0x72   : > { %s227_s25 = scalar_lea.vmem [#allocation7], %s5706_s13  ;;  %s233_s28 = sadd.s32 %s4155_s20, %s4154_s1 }
  0x73   : > { %s237_s7 = sshll.u32 %s227_s25, 4  ;;  %s4156_s26 = sshll.u32 %s233_s28, 4  ;;  %s5739_s7 = int_to_ptr.vmem [resolvable:$true] %s237_s7 }
  0x74   : > { %s235_s3 = scalar_lea.hbm %s10560_s2, %s4156_s26  ;;  %p11293_p4 = pneg %p5581_p7 }
  0x75   : > { %s5287_s30 = scalar_lea.hbm %s235_s3, 128  ;;  %s5292_s8 = scalar_lea.hbm %s10560_s2, 512 }
  0x76   : > { %p5288_p6 = scmp.ne.s32.totalorder %s235_s3, %s5287_s30  ;;  %p5293_p13 = scmp.lt.u32.totalorder %s235_s3, %s10560_s2 }
  0x77   : > { %p5294_p0 = scmp.lt.u32.totalorder %s5292_s8, %s5287_s30  ;;  %p5296_p12 = scmp.lt.u32.totalorder %s5287_s30, %s235_s3 }
  0x78   : > { %p5290_p1 = pnand %p5288_p6, %p11293_p4 }
  0x79   : > { %p5295_p3 = por %p5294_p0, %p5293_p13 }
  0x7a   : > { %p5291_p5 = pneg %p5290_p1 }
  0x7b   : > { %p5297_p2 = por %p5296_p12, %p5295_p3 }
  0x7d   : > { %p5298_p11 = pnand %p5297_p2, %p5291_p5 }
  0x7f   : > { %5301 = shalt.err (!%p5298_p11)
}
  0x80   : > { %s5302_s6 = scalar_lea.vmem %s5739_s7, 128  ;;  %p11294_p10 = pmov %p11293_p4 }
  0x81   : > { %p5303_p8 = scmp.ne.s32.totalorder %s5739_s7, %s5302_s6  ;;  %s5467_s9 = smov [#allocation7]  }
  0x82   : > { %s5307_s11 = sshll.u32 %s5467_s9, 4  ;;  %s5308_s11 = int_to_ptr.vmem [resolvable:$false] %s5307_s11 }
  0x83   : > { %p5305_p9 = pnand %p5303_p8, %p11294_p10  ;;  %s5309_s1 = scalar_lea.vmem %s5308_s11, 256 }
  0x84   : > { %p5310_p4 = scmp.lt.s32.totalorder %s5739_s7, %s5308_s11  ;;  %p5311_p1 = scmp.lt.s32.totalorder %s5309_s1, %s5302_s6 }
  0x85   : > { %p5306_p6 = pneg %p5305_p9 }
  0x86   : > { %p5312_p13 = por %p5311_p1, %p5310_p4 }
  0x88   : > { %p5313_p0 = pnand %p5312_p13, %p5306_p6 }
  0x8a   : > { %5316 = shalt.err (!%p5313_p0)
}
  0x8b   : > { %4505 = dma.hbm_to_vmem [thread:$0]  (!%p5581_p7), %s235_s3, 128, %s5739_s7, %s5593_s29  }
  0x8c   : > { %p11295_p5 = scmp.ne.s32.totalorder %s11276_s4, 0 }
  0x8e   : > { %246 = sbr.rel (%p11295_p5) target bundleno = 2001 (0x7d1), region = 32 }
  0x95   : > { %s11296_s20 = sld [smem:[#allocation14_spill]]  ;;  %s11297_s25 = sld [smem:[#allocation22_spill]] }
  0x9b   : > { %s5766_s28 = sand.u32 1, %s11296_s20   ;;  %p11298_p3 = scmp.ne.s32.totalorder %s11297_s25, 0 }
  0x9c   : > { %s4158_s26 = sshll.u32 %s5766_s28, 7  ;;  %s249_s10 = scalar_lea.sflag [#allocation3], %s5766_s28 }
  0x9d   : > { %s5770_s12 = scalar_lea.vmem [#allocation2], %s4158_s26 }
  0x9e   : > { %5398 = dma.done.wait (%p11298_p3), %s249_s10, 2048  }
  0x9f   : > { %5400 = vsyncadd (%p11298_p3), %s249_s10, 4294965248  ;;  %s11299_s5 = sld [smem:[#allocation18_spill]]  ;;  %s11300_s29 = sld [smem:[#allocation12_spill]] }
  0xa0   : > { %s11301_s4 = sld [smem:[#allocation19_spill]] }
  0xa5   : > { %s257_s7 = sand.u32 1, %s11299_s5   ;;  %s259_s3 = sand.u32 1, %s11300_s29  }
  0xa6   : > { %s4487_s30 = smul.u32 288, %s259_s3  ;;  %s258_s15 = scalar_lea.sflag [#allocation6], %s257_s7 }
  0xa7   : > { %p11302_p7 = scmp.ne.s32.totalorder %s11301_s4, 0 }
  0xa8   : > { %s5780_s16 = scalar_lea.vmem [#allocation5], %s4487_s30 }
  0xa9   : > { %5402 = dma.done.wait (%p11302_p7), %s258_s15, 4736  }
  0xaa   : > { %5404 = vsyncadd (%p11302_p7), %s258_s15, 4294962560  ;;  %v10627_v0 = vmov 0   ;;  %v338_v1 = vld [vmem:[%s5780_s16] sm:$0xff]  ;;  %v339_v20 = vld [vmem:[%s5780_s16 + $0x8] sm:$0xff]  ;;  %vm683_vm0 = vcmask 1041408   ;;  %vm634_vm1 = vcmask 556032  }
  0xab   : > { %740 = vmatprep.mubr.bf16.mxu1 %v10627_v0  ;;  %v342_v2 = vld [vmem:[%s5780_s16 + $0x20] sm:$0xff]  ;;  %v343_v21 = vld [vmem:[%s5780_s16 + $0x28] sm:$0xff]  ;;  %v5810_v31 = vld [vmem:[%s5780_s16 + $0x10] sm:$0xff]  ;;  %s8580_s8 = sshll.u32 %s259_s3, 3  ;;  %s4160_s19 = sshll.u32 %s5766_s28, 8  ;;  %vm3943_vm2 = vcmask 15360  }
  0xac   : > { %v346_v3 = vld [vmem:[%s5780_s16 + $0x40] sm:$0xff]  ;;  %v4178_v4 = vcombine.high %v338_v1, %v342_v2  ;;  %v4177_v5 = vcombine.low %v338_v1, %v342_v2  ;;  %v4180_v23 = vcombine.high %v339_v20, %v343_v21  ;;  %v347_v24 = vld [vmem:[%s5780_s16 + $0x48] sm:$0xff]  ;;  %v4179_v27 = vcombine.low %v339_v20, %v343_v21  ;;  %v5813_v32 = vld [vmem:[%s5780_s16 + $0x30] sm:$0xff]  ;;  %s270_s13 = scalar_lea.vmem [#allocation7], %s8580_s8  ;;  %s10408_s6 = scalar_lea.vmem [#allocation8], %s4160_s19 }
  0xad   : > { %v350_v6 = vld [vmem:[%s5780_s16 + $0x60] sm:$0xff]  ;;  %v351_v25 = vld [vmem:[%s5780_s16 + $0x68] sm:$0xff]  ;;  %v4181_v34 = vcombine.low %v5810_v31, %v5813_v32  ;;  %v5828_v45 = vld [vmem:[%s5770_s12 + $0x10] sm:$0xff]   ;;  %v4182_v47 = vcombine.high %v5810_v31, %v5813_v32  ;;  %s12810_s9 = sld [smem:[#allocation15_spill]]  ;;  %s12811_s11 = sld [smem:[#allocation16_spill]] }
  0xae   : > { %v4186_v7 = vcombine.high %v346_v3, %v350_v6  ;;  %v354_v8 = vld [vmem:[%s5780_s16 + $0x80] sm:$0xff]  ;;  %708 = vmatprep.subr.bf16.mxu1 %v4178_v4  ;;  %v4185_v10 = vcombine.low %v346_v3, %v350_v6  ;;  %v4188_v28 = vcombine.high %v347_v24, %v351_v25  ;;  %v355_v29 = vld [vmem:[%s5780_s16 + $0x88] sm:$0xff]  ;;  %v4187_v33 = vcombine.low %v347_v24, %v351_v25  ;;  %v5838_v48 = vld [vmem:[%s5770_s12 + $0x18] sm:$0xff]   ;;  %s12812_s1 = sld [smem:[#allocation17_spill]]  ;;  %s3994_s29 = sshll.u32 %s10408_s6, 4  ;;  %s10474_s29 = int_to_ptr.vmem [resolvable:$true] %s3994_s29 }
  0xaf   : > { %v358_v9 = vld [vmem:[%s5780_s16 + $0xa0] sm:$0xff]  ;;  %709 = vmatpush1.bf16.msra.mxu1 %v4177_v5  ;;  %v359_v30 = vld [vmem:[%s5780_s16 + $0xa8] sm:$0xff]  ;;  %v5856_v51 = vld [vmem:[%s5770_s12 + $0x30] sm:$0xff]   ;;  %s12814_s30 = sld [smem:[#allocation275_spill]]  ;;  %s5317_s8 = scalar_lea.vmem %s10474_s29, 4096 }
  0xb0   : > { %710 = vmatprep.subr.bf16.mxu1 %v4186_v7  ;;  %v4194_v11 = vcombine.high %v354_v8, %v358_v9  ;;  %v362_v12 = vld [vmem:[%s5780_s16 + $0xc0] sm:$0xff]  ;;  %v4193_v14 = vcombine.low %v354_v8, %v358_v9  ;;  %v4196_v35 = vcombine.high %v355_v29, %v359_v30  ;;  %v363_v36 = vld [vmem:[%s5780_s16 + $0xc8] sm:$0xff]  ;;  %v4195_v39 = vcombine.low %v355_v29, %v359_v30  ;;  %v5862_v52 = vld [vmem:[%s5770_s12 + $0x38] sm:$0xff]   ;;  %p5318_p12 = scmp.ne.s32.totalorder %s10474_s29, %s5317_s8 }
  0xb1   : > { %v366_v13 = vld [vmem:[%s5780_s16 + $0xe0] sm:$0xff]  ;;  %v367_v37 = vld [vmem:[%s5780_s16 + $0xe8] sm:$0xff]  ;;  %11305 = vst [vmem:[#allocation28_spill] sm:$0xff] %v5856_v51  ;;  %11306 = vst [vmem:[#allocation29_spill] sm:$0xff] %v5862_v52 }
  0xb2   : > { %v4202_v15 = vcombine.high %v362_v12, %v366_v13  ;;  %v370_v16 = vld [vmem:[%s5780_s16 + $0x100] sm:$0x33]  ;;  %v4201_v17 = vcombine.low %v362_v12, %v366_v13  ;;  %v5821_v38 = vld [vmem:[%s5770_s12 + $0x8] sm:$0xff]   ;;  %v4204_v40 = vcombine.high %v363_v36, %v367_v37  ;;  %v4203_v42 = vcombine.low %v363_v36, %v367_v37  ;;  %v5880_v55 = vld [vmem:[%s5770_s12 + $0x50] sm:$0xff]  }
  0xb3   : > { %711 = vmatpush1.bf16.msra.mxu1 %v4185_v10  ;;  %v4210_v18 = vcombine.high %v370_v16, %v370_v16  ;;  %v4209_v19 = vcombine.low %v370_v16, %v370_v16  ;;  %v5803_v26 = vld [vmem:[%s5770_s12] sm:$0xff]   ;;  %v371_v41 = vld [vmem:[%s5780_s16 + $0x108] sm:$0x33]  ;;  %11309 = vst [vmem:[#allocation32_spill] sm:$0xff] %v5880_v55  ;;  %v5886_v56 = vld [vmem:[%s5770_s12 + $0x58] sm:$0xff]   ;;  %s4286_s20 = sshll.u32 %s12810_s9, 5 }
  0xb4   : > { %712 = vmatprep.subr.bf16.mxu1 %v4194_v11  ;;  %v4212_v43 = vcombine.high %v371_v41, %v371_v41  ;;  %v4211_v44 = vcombine.low %v371_v41, %v371_v41  ;;  %v5844_v49 = vld [vmem:[%s5770_s12 + $0x20] sm:$0xff]   ;;  %v5850_v50 = vld [vmem:[%s5770_s12 + $0x28] sm:$0xff]   ;;  %11310 = vst [vmem:[#allocation33_spill] sm:$0xff] %v5886_v56  ;;  %v5904_v59 = vld [vmem:[%s5770_s12 + $0x70] sm:$0xff]   ;;  %s4287_s25 = sshll.u32 %s12811_s11, 7  ;;  %s4288_s10 = sshll.u32 %s12812_s1, 8 }
  0xb5   : > { %v685_v22 = vsel %vm683_vm0, %v4209_v19, 0  ;;  %11303 = vst [vmem:[#allocation26_spill] sm:$0xff] %v5844_v49  ;;  %11304 = vst [vmem:[#allocation27_spill] sm:$0xff] %v5850_v50  ;;  %v5868_v53 = vld [vmem:[%s5770_s12 + $0x40] sm:$0xff]   ;;  %v5874_v54 = vld [vmem:[%s5770_s12 + $0x48] sm:$0xff]   ;;  %s3989_s26 = sadd.s32 %s4287_s25, %s4286_s20 }
  0xb6   : > { %v691_v46 = vsel %vm683_vm0, %v4211_v44, 0  ;;  %11307 = vst [vmem:[#allocation30_spill] sm:$0xff] %v5868_v53  ;;  %11308 = vst [vmem:[#allocation31_spill] sm:$0xff] %v5874_v54  ;;  %v5892_v57 = vld [vmem:[%s5770_s12 + $0x60] sm:$0xff]   ;;  %v5898_v58 = vld [vmem:[%s5770_s12 + $0x68] sm:$0xff]   ;;  %s3991_s5 = sadd.s32 %s4288_s10, %s3989_s26 }
  0xb7   : > { %713 = vmatpush1.bf16.msra.mxu1 %v4193_v14  ;;  %v5910_v60 = vld [vmem:[%s5770_s12 + $0x78] sm:$0xff]   ;;  %v348_v61 = vld [vmem:[%s5780_s16 + $0x50] sm:$0xff]  ;;  %s12813_s12 = sld [smem:[#allocation23_spill]]  ;;  %s4289_s4 = sshll.u32 %s3991_s5, 7 }
  0xb8   : > { %714 = vmatprep.subr.bf16.mxu1 %v4202_v15  ;;  %v352_v62 = vld [vmem:[%s5780_s16 + $0x70] sm:$0xff]  ;;  %v5922_v3 = vld [vmem:[%s5780_s16 + $0x18] sm:$0xff]  ;;  %s10481_s15 = scalar_lea.hbm %s12814_s30, %s4289_s4 }
  0xb9   : > { %v4190_v63 = vcombine.high %v348_v61, %v352_v62  ;;  %v356_v1 = vld [vmem:[%s5780_s16 + $0x90] sm:$0xff]  ;;  %v5925_v4 = vld [vmem:[%s5780_s16 + $0x38] sm:$0xff]  ;;  %v4189_v5 = vcombine.low %v348_v61, %v352_v62 }
  0xba   : > { %v360_v2 = vld [vmem:[%s5780_s16 + $0xb0] sm:$0xff]  ;;  %v4183_v6 = vcombine.low %v5922_v3, %v5925_v4 }
  0xbb   : > { %715 = vmatpush1.bf16.msra.mxu1 %v4201_v17  ;;  %v4198_v7 = vcombine.high %v356_v1, %v360_v2  ;;  %v364_v8 = vld [vmem:[%s5780_s16 + $0xd0] sm:$0xff]  ;;  %v4197_v10 = vcombine.low %v356_v1, %v360_v2  ;;  %v4184_v17 = vcombine.high %v5922_v3, %v5925_v4  ;;  %v349_v2 = vld [vmem:[%s5780_s16 + $0x58] sm:$0xff] }
  0xbc   : > { %4217 = vmatprep.subr.msk.bf16.mxu1 %vm683_vm0, %v4210_v18  ;;  %v368_v9 = vld [vmem:[%s5780_s16 + $0xf0] sm:$0xff] }
  0xbd   : > { %v4206_v11 = vcombine.high %v364_v8, %v368_v9  ;;  %v372_v12 = vld [vmem:[%s5780_s16 + $0x110] sm:$0x33]  ;;  %v4205_v13 = vcombine.low %v364_v8, %v368_v9  ;;  %v365_v8 = vld [vmem:[%s5780_s16 + $0xd8] sm:$0xff]  ;;  %p12815_p2 = scmp.ne.s32.totalorder %s12813_s12, 0 }
  0xbe   : > { %v4214_v14 = vcombine.high %v372_v12, %v372_v12  ;;  %v4213_v15 = vcombine.low %v372_v12, %v372_v12 }
  0xbf   : > { %717 = vmatpush1.bf16.msra.mxu1 %v685_v22  ;;  %p5319_p11 = pnand %p5318_p12, %p12815_p2 }
  0xc0   : > { %901 = vmatprep.subr.bf16.mxu1 %v4180_v23  ;;  %v697_v16 = vsel %vm683_vm0, %v4213_v15, 0 }
  0xc1   : > { %p5320_p8 = pneg %p5319_p11 }
  0xc2   : > { %4218 = vmatmul.mubr.msk.bf16.vlgmr.msra.gmra.mrb[0].mxu1 %vm634_vm1, %v5803_v26 }
  0xc3   : > { %902 = vmatpush1.bf16.msra.mxu1 %v4179_v27  ;;  %750 = vmatprep.mubr.bf16.mxu1 %v10627_v0 }
  0xc4   : > { %903 = vmatprep.subr.bf16.mxu1 %v4188_v28 }
  0xc7   : > { %904 = vmatpush1.bf16.msra.mxu1 %v4187_v33 }
  0xc8   : > { %905 = vmatprep.subr.bf16.mxu1 %v4196_v35 }
  0xca   : > { %4219 = vmatmul.mubr.msk.bf16.gmra.mrb[4].mxu1 %vm634_vm1, %v5821_v38 }
  0xcb   : > { %760 = vmatprep.mubr.bf16.mxu1 %v10627_v0  ;;  %906 = vmatpush1.bf16.msra.mxu1 %v4195_v39 }
  0xcc   : > { %907 = vmatprep.subr.bf16.mxu1 %v4204_v40 }
  0xcf   : > { %908 = vmatpush1.bf16.msra.mxu1 %v4203_v42 }
  0xd0   : > { %4234 = vmatprep.subr.msk.bf16.mxu1 %vm683_vm0, %v4212_v43 }
  0xd2   : > { %4220 = vmatmul.mubr.msk.bf16.gmra.mrb[8].mxu1 %vm634_vm1, %v5828_v45 }
  0xd3   : > { %770 = vmatprep.mubr.bf16.mxu1 %v10627_v0  ;;  %910 = vmatpush1.bf16.msra.mxu1 %v691_v46 }
  0xd4   : > { %1094 = vmatprep.subr.bf16.mxu1 %v4182_v47 }
  0xda   : > { %4221 = vmatmul.mubr.msk.bf16.gmra.mrb[12].mxu1 %vm634_vm1, %v5838_v48 }
  0xdb   : > { %780 = vmatprep.mubr.bf16.mxu1 %v10627_v0 }
  0xe2   : > { %4222 = vmatmul.mubr.msk.bf16.gmra.mrb[16].mxu1 %vm634_vm1, %v5844_v49 }
  0xe3   : > { %790 = vmatprep.mubr.bf16.mxu1 %v10627_v0 }
  0xea   : > { %4223 = vmatmul.mubr.msk.bf16.gmra.mrb[20].mxu1 %vm634_vm1, %v5850_v50 }
  0xeb   : > { %800 = vmatprep.mubr.bf16.mxu1 %v10627_v0 }
  0xf2   : > { %4224 = vmatmul.mubr.msk.bf16.gmra.mrb[24].mxu1 %vm634_vm1, %v5856_v51 }
  0xf3   : > { %810 = vmatprep.mubr.bf16.mxu1 %v10627_v0 }
  0xfa   : > { %4225 = vmatmul.mubr.msk.bf16.gmra.mrb[28].mxu1 %vm634_vm1, %v5862_v52 }
  0xfb   : > { %820 = vmatprep.mubr.bf16.mxu1 %v10627_v0 }
 0x102   : > { %4226 = vmatmul.mubr.msk.bf16.gmra.mrb[32].mxu1 %vm634_vm1, %v5868_v53 }
 0x103   : > { %830 = vmatprep.mubr.bf16.mxu1 %v10627_v0 }
 0x10a   : > { %4227 = vmatmul.mubr.msk.bf16.gmra.mrb[36].mxu1 %vm634_vm1, %v5874_v54 }
 0x10b   : > { %840 = vmatprep.mubr.bf16.mxu1 %v10627_v0 }
 0x112   : > { %4228 = vmatmul.mubr.msk.bf16.gmra.mrb[40].mxu1 %vm634_vm1, %v5880_v55 }
 0x113   : > { %850 = vmatprep.mubr.bf16.mxu1 %v10627_v0 }
 0x11a   : > { %4229 = vmatmul.mubr.msk.bf16.gmra.mrb[44].mxu1 %vm634_vm1, %v5886_v56 }
 0x11b   : > { %860 = vmatprep.mubr.bf16.mxu1 %v10627_v0 }
 0x122   : > { %4230 = vmatmul.mubr.msk.bf16.gmra.mrb[48].mxu1 %vm634_vm1, %v5892_v57 }
 0x123   : > { %870 = vmatprep.mubr.bf16.mxu1 %v10627_v0 }
 0x12a   : > { %4231 = vmatmul.mubr.msk.bf16.gmra.mrb[52].mxu1 %vm634_vm1, %v5898_v58 }
 0x12b   : > { %880 = vmatprep.mubr.bf16.mxu1 %v10627_v0 }
 0x132   : > { %4232 = vmatmul.mubr.msk.bf16.gmra.mrb[56].mxu1 %vm634_vm1, %v5904_v59 }
 0x133   : > { %890 = vmatprep.mubr.bf16.mxu1 %v10627_v0 }
 0x13a   : > { %4233 = vmatmul.mubr.msk.bf16.gmra.mrb[60].mxu1 %vm634_vm1, %v5910_v60 }
 0x13b   : > { %933 = vmatprep.mubr.bf16.mxu1 %v10627_v0 }
 0x142   : > { %4235 = vmatmul.mubr.msk.bf16.vlgmr.msra.gmra.mrb[64].mxu1 %vm634_vm1, %v5803_v26 }
 0x143   : > { %1095 = vmatpush1.bf16.msra.mxu1 %v4181_v34  ;;  %943 = vmatprep.mubr.bf16.mxu1 %v10627_v0 }
 0x144   : > { %1096 = vmatprep.subr.bf16.mxu1 %v4190_v63  ;;  %v369_v63 = vld [vmem:[%s5780_s16 + $0xf8] sm:$0xff] }
 0x147   : > { %1097 = vmatpush1.bf16.msra.mxu1 %v4189_v5  ;;  %v353_v5 = vld [vmem:[%s5780_s16 + $0x78] sm:$0xff] }
 0x148   : > { %1098 = vmatprep.subr.bf16.mxu1 %v4198_v7  ;;  %v4191_v15 = vcombine.low %v349_v2, %v353_v5 }
 0x14a   : > { %4236 = vmatmul.mubr.msk.bf16.gmra.mrb[68].mxu1 %vm634_vm1, %v5821_v38 }
 0x14b   : > { %953 = vmatprep.mubr.bf16.mxu1 %v10627_v0  ;;  %1099 = vmatpush1.bf16.msra.mxu1 %v4197_v10 }
 0x14c   : > { %1100 = vmatprep.subr.bf16.mxu1 %v4206_v11  ;;  %v4192_v11 = vcombine.high %v349_v2, %v353_v5  ;;  %v373_v5 = vld [vmem:[%s5780_s16 + $0x118] sm:$0x33] }
 0x14d   : > { %v4216_v47 = vcombine.high %v373_v5, %v373_v5  ;;  %v4215_v40 = vcombine.low %v373_v5, %v373_v5 }
 0x14f   : > { %1101 = vmatpush1.bf16.msra.mxu1 %v4205_v13  ;;  %v357_v13 = vld [vmem:[%s5780_s16 + $0x98] sm:$0xff] }
 0x150   : > { %4251 = vmatprep.subr.msk.bf16.mxu1 %vm683_vm0, %v4214_v14  ;;  %v361_v14 = vld [vmem:[%s5780_s16 + $0xb8] sm:$0xff]  ;;  %s3977_s16 = scalar_lea.sflag [#allocation4], %s5766_s28 }
 0x151   : > { %v4199_v3 = vcombine.low %v357_v13, %v361_v14 }
 0x152   : > { %4237 = vmatmul.mubr.msk.bf16.gmra.mrb[72].mxu1 %vm634_vm1, %v5828_v45 }
 0x153   : > { %963 = vmatprep.mubr.bf16.mxu1 %v10627_v0  ;;  %1103 = vmatpush1.bf16.msra.mxu1 %v697_v16  ;;  %v4200_v16 = vcombine.high %v357_v13, %v361_v14 }
 0x154   : > { %1287 = vmatprep.subr.bf16.mxu1 %v4184_v17 }
 0x15a   : > { %4238 = vmatmul.mubr.msk.bf16.gmra.mrb[76].mxu1 %vm634_vm1, %v5838_v48 }
 0x15b   : > { %973 = vmatprep.mubr.bf16.mxu1 %v10627_v0 }
 0x162   : > { %4239 = vmatmul.mubr.msk.bf16.gmra.mrb[80].mxu1 %vm634_vm1, %v5844_v49 }
 0x163   : > { %983 = vmatprep.mubr.bf16.mxu1 %v10627_v0 }
 0x16a   : > { %4240 = vmatmul.mubr.msk.bf16.gmra.mrb[84].mxu1 %vm634_vm1, %v5850_v50 }
 0x16b   : > { %993 = vmatprep.mubr.bf16.mxu1 %v10627_v0 }
 0x172   : > { %4241 = vmatmul.mubr.msk.bf16.gmra.mrb[88].mxu1 %vm634_vm1, %v5856_v51 }
 0x173   : > { %1003 = vmatprep.mubr.bf16.mxu1 %v10627_v0 }
 0x17a   : > { %4242 = vmatmul.mubr.msk.bf16.gmra.mrb[92].mxu1 %vm634_vm1, %v5862_v52 }
 0x17b   : > { %1013 = vmatprep.mubr.bf16.mxu1 %v10627_v0 }
 0x182   : > { %4243 = vmatmul.mubr.msk.bf16.gmra.mrb[96].mxu1 %vm634_vm1, %v5868_v53 }
 0x183   : > { %1023 = vmatprep.mubr.bf16.mxu1 %v10627_v0 }
 0x18a   : > { %4244 = vmatmul.mubr.msk.bf16.gmra.mrb[100].mxu1 %vm634_vm1, %v5874_v54 }
 0x18b   : > { %1033 = vmatprep.mubr.bf16.mxu1 %v10627_v0 }
 0x192   : > { %4245 = vmatmul.mubr.msk.bf16.gmra.mrb[104].mxu1 %vm634_vm1, %v5880_v55 }
 0x193   : > { %1043 = vmatprep.mubr.bf16.mxu1 %v10627_v0 }
 0x195   : > { %v5970_v18 = vpop.f32.mrb[0].mxu1 }
 0x196   : > { %11311 = vst [vmem:[#allocation34_spill] sm:$0xff] %v5970_v18  ;;  %v5972_v19 = vpop.f32.mrb[1].mxu1 }
 0x197   : > { %11312 = vst [vmem:[#allocation35_spill] sm:$0xff] %v5972_v19  ;;  %v5976_v21 = vpop.f32.mrb[2].mxu1 }
 0x198   : > { %11313 = vst [vmem:[#allocation36_spill] sm:$0xff] %v5976_v21  ;;  %v5978_v22 = vpop.f32.mrb[3].mxu1 }
 0x199   : > { %11314 = vst [vmem:[#allocation37_spill] sm:$0xff] %v5978_v22 }
 0x19a   : > { %4246 = vmatmul.mubr.msk.bf16.gmra.mrb[108].mxu1 %vm634_vm1, %v5886_v56 }
 0x19b   : > { %1053 = vmatprep.mubr.bf16.mxu1 %v10627_v0 }
 0x19d   : > { %v5985_v24 = vpop.f32.mrb[4].mxu1 }
 0x19e   : > { %11315 = vst [vmem:[#allocation38_spill] sm:$0xff] %v5985_v24  ;;  %v5987_v25 = vpop.f32.mrb[5].mxu1 }
 0x19f   : > { %11316 = vst [vmem:[#allocation39_spill] sm:$0xff] %v5987_v25  ;;  %v5991_v28 = vpop.f32.mrb[6].mxu1 }
 0x1a0   : > { %11317 = vst [vmem:[#allocation40_spill] sm:$0xff] %v5991_v28  ;;  %v5993_v29 = vpop.f32.mrb[7].mxu1 }
 0x1a1   : > { %11318 = vst [vmem:[#allocation41_spill] sm:$0xff] %v5993_v29 }
 0x1a2   : > { %4247 = vmatmul.mubr.msk.bf16.gmra.mrb[112].mxu1 %vm634_vm1, %v5892_v57 }
 0x1a3   : > { %1063 = vmatprep.mubr.bf16.mxu1 %v10627_v0 }
 0x1a5   : > { %v6000_v31 = vpop.f32.mrb[8].mxu1 }
 0x1a6   : > { %11319 = vst [vmem:[#allocation42_spill] sm:$0xff] %v6000_v31  ;;  %v6002_v32 = vpop.f32.mrb[9].mxu1 }
 0x1a7   : > { %11320 = vst [vmem:[#allocation43_spill] sm:$0xff] %v6002_v32  ;;  %v6006_v34 = vpop.f32.mrb[10].mxu1 }
 0x1a8   : > { %11321 = vst [vmem:[#allocation44_spill] sm:$0xff] %v6006_v34  ;;  %v6008_v35 = vpop.f32.mrb[11].mxu1 }
 0x1a9   : > { %11322 = vst [vmem:[#allocation45_spill] sm:$0xff] %v6008_v35 }
 0x1aa   : > { %4248 = vmatmul.mubr.msk.bf16.gmra.mrb[116].mxu1 %vm634_vm1, %v5898_v58 }
 0x1ab   : > { %1073 = vmatprep.mubr.bf16.mxu1 %v10627_v0 }
 0x1ad   : > { %v6015_v37 = vpop.f32.mrb[12].mxu1 }
 0x1ae   : > { %11323 = vst [vmem:[#allocation46_spill] sm:$0xff] %v6015_v37  ;;  %v6017_v39 = vpop.f32.mrb[13].mxu1 }
 0x1af   : > { %11324 = vst [vmem:[#allocation47_spill] sm:$0xff] %v6017_v39  ;;  %v6021_v41 = vpop.f32.mrb[14].mxu1 }
 0x1b0   : > { %11325 = vst [vmem:[#allocation48_spill] sm:$0xff] %v6021_v41  ;;  %v6023_v42 = vpop.f32.mrb[15].mxu1 }
 0x1b1   : > { %11326 = vst [vmem:[#allocation49_spill] sm:$0xff] %v6023_v42 }
 0x1b2   : > { %4249 = vmatmul.mubr.msk.bf16.gmra.mrb[120].mxu1 %vm634_vm1, %v5904_v59 }
 0x1b3   : > { %1083 = vmatprep.mubr.bf16.mxu1 %v10627_v0 }
 0x1b5   : > { %v6030_v44 = vpop.f32.mrb[16].mxu1 }
 0x1b6   : > { %11327 = vst [vmem:[#allocation50_spill] sm:$0xff] %v6030_v44  ;;  %v6032_v46 = vpop.f32.mrb[17].mxu1 }
 0x1b7   : > { %11328 = vst [vmem:[#allocation51_spill] sm:$0xff] %v6032_v46  ;;  %v6036_v61 = vpop.f32.mrb[18].mxu1 }
 0x1b8   : > { %11329 = vst [vmem:[#allocation52_spill] sm:$0xff] %v6036_v61  ;;  %v6038_v62 = vpop.f32.mrb[19].mxu1 }
 0x1b9   : > { %11330 = vst [vmem:[#allocation53_spill] sm:$0xff] %v6038_v62 }
 0x1ba   : > { %4250 = vmatmul.mubr.msk.bf16.gmra.mrb[124].mxu1 %vm634_vm1, %v5910_v60 }
 0x1bb   : > { %1126 = vmatprep.mubr.bf16.mxu1 %v10627_v0 }
 0x1bd   : > { %v6045_v1 = vpop.f32.mrb[20].mxu1 }
 0x1be   : > { %11331 = vst [vmem:[#allocation54_spill] sm:$0xff] %v6045_v1  ;;  %v6049_v7 = vpop.f32.mrb[21].mxu1 }
 0x1bf   : > { %11332 = vst [vmem:[#allocation55_spill] sm:$0xff] %v6049_v7  ;;  %v6053_v9 = vpop.f32.mrb[22].mxu1 }
 0x1c0   : > { %11333 = vst [vmem:[#allocation56_spill] sm:$0xff] %v6053_v9  ;;  %v6055_v10 = vpop.f32.mrb[23].mxu1 }
 0x1c1   : > { %11334 = vst [vmem:[#allocation57_spill] sm:$0xff] %v6055_v10 }
 0x1c2   : > { %4252 = vmatmul.mubr.msk.bf16.vlgmr.msra.gmra.mrb[128].mxu1 %vm634_vm1, %v5803_v26 }
 0x1c3   : > { %1288 = vmatpush1.bf16.msra.mxu1 %v4183_v6  ;;  %1136 = vmatprep.mubr.bf16.mxu1 %v10627_v0  ;;  %v4208_v6 = vcombine.high %v365_v8, %v369_v63 }
 0x1c4   : > { %1289 = vmatprep.subr.bf16.mxu1 %v4192_v11  ;;  %v4207_v11 = vcombine.low %v365_v8, %v369_v63 }
 0x1c5   : > { %v6067_v17 = vpop.f32.mrb[24].mxu1 }
 0x1c6   : > { %11335 = vst [vmem:[#allocation58_spill] sm:$0xff] %v6067_v17  ;;  %v6071_v12 = vpop.f32.mrb[25].mxu1 }
 0x1c7   : > { %11336 = vst [vmem:[#allocation59_spill] sm:$0xff] %v6071_v12  ;;  %v6075_v43 = vpop.f32.mrb[26].mxu1  ;;  %1290 = vmatpush1.bf16.msra.mxu1 %v4191_v15 }
 0x1c8   : > { %11337 = vst [vmem:[#allocation60_spill] sm:$0xff] %v6075_v43  ;;  %v6077_v4 = vpop.f32.mrb[27].mxu1  ;;  %1291 = vmatprep.subr.bf16.mxu1 %v4200_v16 }
 0x1c9   : > { %11338 = vst [vmem:[#allocation61_spill] sm:$0xff] %v6077_v4 }
 0x1ca   : > { %4253 = vmatmul.mubr.msk.bf16.gmra.mrb[132].mxu1 %vm634_vm1, %v5821_v38 }
 0x1cb   : > { %1146 = vmatprep.mubr.bf16.mxu1 %v10627_v0  ;;  %1292 = vmatpush1.bf16.msra.mxu1 %v4199_v3  ;;  %v703_v3 = vsel %vm683_vm0, %v4215_v40, 0 }
 0x1cc   : > { %1293 = vmatprep.subr.bf16.mxu1 %v4208_v6 }
 0x1cd   : > { %v6085_v15 = vpop.f32.mrb[28].mxu1 }
 0x1ce   : > { %11339 = vst [vmem:[#allocation62_spill] sm:$0xff] %v6085_v15  ;;  %v6087_v13 = vpop.f32.mrb[29].mxu1 }
 0x1cf   : > { %11340 = vst [vmem:[#allocation63_spill] sm:$0xff] %v6087_v13  ;;  %v6091_v16 = vpop.f32.mrb[30].mxu1  ;;  %1294 = vmatpush1.bf16.msra.mxu1 %v4207_v11 }
 0x1d0   : > { %11341 = vst [vmem:[#allocation64_spill] sm:$0xff] %v6091_v16  ;;  %v6093_v2 = vpop.f32.mrb[31].mxu1  ;;  %4268 = vmatprep.subr.msk.bf16.mxu1 %vm683_vm0, %v4216_v47 }
 0x1d1   : > { %11342 = vst [vmem:[#allocation65_spill] sm:$0xff] %v6093_v2 }
 0x1d2   : > { %4254 = vmatmul.mubr.msk.bf16.gmra.mrb[136].mxu1 %vm634_vm1, %v5828_v45 }
 0x1d3   : > { %1156 = vmatprep.mubr.bf16.mxu1 %v10627_v0  ;;  %1296 = vmatpush1.bf16.msra.mxu1 %v703_v3 }
 0x1d5   : > { %v6102_v8 = vpop.f32.mrb[32].mxu1 }
 0x1d6   : > { %11343 = vst [vmem:[#allocation66_spill] sm:$0xff] %v6102_v8  ;;  %v6104_v6 = vpop.f32.mrb[33].mxu1 }
 0x1d7   : > { %11344 = vst [vmem:[#allocation67_spill] sm:$0xff] %v6104_v6  ;;  %v6108_v11 = vpop.f32.mrb[34].mxu1 }
 0x1d8   : > { %11345 = vst [vmem:[#allocation68_spill] sm:$0xff] %v6108_v11  ;;  %v6110_v47 = vpop.f32.mrb[35].mxu1 }
 0x1d9   : > { %11346 = vst [vmem:[#allocation69_spill] sm:$0xff] %v6110_v47 }
 0x1da   : > { %4255 = vmatmul.mubr.msk.bf16.gmra.mrb[140].mxu1 %vm634_vm1, %v5838_v48 }
 0x1db   : > { %1166 = vmatprep.mubr.bf16.mxu1 %v10627_v0 }
 0x1dd   : > { %v6117_v3 = vpop.f32.mrb[36].mxu1 }
 0x1de   : > { %11347 = vst [vmem:[#allocation70_spill] sm:$0xff] %v6117_v3  ;;  %v6119_v63 = vpop.f32.mrb[37].mxu1 }
 0x1df   : > { %11348 = vst [vmem:[#allocation71_spill] sm:$0xff] %v6119_v63  ;;  %v6123_v5 = vpop.f32.mrb[38].mxu1 }
 0x1e0   : > { %11349 = vst [vmem:[#allocation72_spill] sm:$0xff] %v6123_v5  ;;  %v6125_v36 = vpop.f32.mrb[39].mxu1 }
 0x1e1   : > { %11350 = vst [vmem:[#allocation73_spill] sm:$0xff] %v6125_v36 }
 0x1e2   : > { %4256 = vmatmul.mubr.msk.bf16.gmra.mrb[144].mxu1 %vm634_vm1, %v5844_v49 }
 0x1e3   : > { %1176 = vmatprep.mubr.bf16.mxu1 %v10627_v0 }
 0x1e5   : > { %v6132_v40 = vpop.f32.mrb[40].mxu1 }
 0x1e6   : > { %11351 = vst [vmem:[#allocation74_spill] sm:$0xff] %v6132_v40  ;;  %v6134_v30 = vpop.f32.mrb[41].mxu1 }
 0x1e7   : > { %11352 = vst [vmem:[#allocation75_spill] sm:$0xff] %v6134_v30  ;;  %v6138_v14 = vpop.f32.mrb[42].mxu1 }
 0x1e8   : > { %11353 = vst [vmem:[#allocation76_spill] sm:$0xff] %v6138_v14  ;;  %v6140_v23 = vpop.f32.mrb[43].mxu1 }
 0x1e9   : > { %11354 = vst [vmem:[#allocation77_spill] sm:$0xff] %v6140_v23 }
 0x1ea   : > { %4257 = vmatmul.mubr.msk.bf16.gmra.mrb[148].mxu1 %vm634_vm1, %v5850_v50 }
 0x1eb   : > { %1186 = vmatprep.mubr.bf16.mxu1 %v10627_v0 }
 0x1ed   : > { %v6147_v33 = vpop.f32.mrb[44].mxu1 }
 0x1ee   : > { %11355 = vst [vmem:[#allocation78_spill] sm:$0xff] %v6147_v33  ;;  %v6149_v49 = vpop.f32.mrb[45].mxu1 }
 0x1ef   : > { %11356 = vst [vmem:[#allocation79_spill] sm:$0xff] %v6149_v49  ;;  %v6153_v27 = vpop.f32.mrb[46].mxu1 }
 0x1f0   : > { %11357 = vst [vmem:[#allocation80_spill] sm:$0xff] %v6153_v27  ;;  %v6155_v30 = vpop.f32.mrb[47].mxu1 }
 0x1f1   : > { %11358 = vst [vmem:[#allocation81_spill] sm:$0xff] %v6155_v30 }
 0x1f2   : > { %4258 = vmatmul.mubr.msk.bf16.gmra.mrb[152].mxu1 %vm634_vm1, %v5856_v51 }
 0x1f3   : > { %1196 = vmatprep.mubr.bf16.mxu1 %v10627_v0 }
 0x1f5   : > { %v6162_v20 = vpop.f32.mrb[48].mxu1 }
 0x1f6   : > { %11359 = vst [vmem:[#allocation82_spill] sm:$0xff] %v6162_v20  ;;  %v6164_v50 = vpop.f32.mrb[49].mxu1 }
 0x1f7   : > { %11360 = vst [vmem:[#allocation83_spill] sm:$0xff] %v6164_v50  ;;  %v6168_v36 = vpop.f32.mrb[50].mxu1 }
 0x1f8   : > { %11361 = vst [vmem:[#allocation84_spill] sm:$0xff] %v6168_v36  ;;  %v6170_v49 = vpop.f32.mrb[51].mxu1 }
 0x1f9   : > { %11362 = vst [vmem:[#allocation85_spill] sm:$0xff] %v6170_v49 }
 0x1fa   : > { %4259 = vmatmul.mubr.msk.bf16.gmra.mrb[156].mxu1 %vm634_vm1, %v5862_v52 }
 0x1fb   : > { %1206 = vmatprep.mubr.bf16.mxu1 %v10627_v0 }
 0x1fd   : > { %v6177_v40 = vpop.f32.mrb[52].mxu1 }
 0x1fe   : > { %11363 = vst [vmem:[#allocation86_spill] sm:$0xff] %v6177_v40  ;;  %v6179_v51 = vpop.f32.mrb[53].mxu1 }
 0x1ff   : > { %11364 = vst [vmem:[#allocation87_spill] sm:$0xff] %v6179_v51  ;;  %v6183_v23 = vpop.f32.mrb[54].mxu1 }
 0x200   : > { %11365 = vst [vmem:[#allocation88_spill] sm:$0xff] %v6183_v23  ;;  %v6185_v50 = vpop.f32.mrb[55].mxu1 }
 0x201   : > { %11366 = vst [vmem:[#allocation89_spill] sm:$0xff] %v6185_v50 }
 0x202   : > { %4260 = vmatmul.mubr.msk.bf16.gmra.mrb[160].mxu1 %vm634_vm1, %v5868_v53 }
 0x203   : > { %1216 = vmatprep.mubr.bf16.mxu1 %v10627_v0 }
 0x205   : > { %v6192_v33 = vpop.f32.mrb[56].mxu1 }
 0x206   : > { %11367 = vst [vmem:[#allocation90_spill] sm:$0xff] %v6192_v33  ;;  %v6194_v52 = vpop.f32.mrb[57].mxu1  ;;  %v11383_v33 = vmax.f32 %v5985_v24, %v5987_v25  ;;  %v11395_v25 = vmax.f32 %v6015_v37, %v6017_v39  ;;  %v11407_v39 = vmax.f32 %v6045_v1, %v6049_v7  ;;  %v11419_v7 = vmax.f32 %v6085_v15, %v6087_v13 }
 0x207   : > { %11368 = vst [vmem:[#allocation91_spill] sm:$0xff] %v6194_v52  ;;  %v6198_v30 = vpop.f32.mrb[58].mxu1  ;;  %v11431_v13 = vmax.f32 %v6117_v3, %v6119_v63  ;;  %v11440_v3 = vld [vmem:[#allocation75_spill] sm:$0xff]  ;;  %v11450_v63 = vld [vmem:[#allocation78_spill] sm:$0xff] }
 0x208   : > { %11369 = vst [vmem:[#allocation92_spill] sm:$0xff] %v6198_v30  ;;  %v6200_v51 = vpop.f32.mrb[59].mxu1 }
 0x209   : > { %11370 = vst [vmem:[#allocation93_spill] sm:$0xff] %v6200_v51 }
 0x20a   : > { %4261 = vmatmul.mubr.msk.bf16.gmra.mrb[164].mxu1 %vm634_vm1, %v5874_v54  ;;  %v11376_v54 = vmax.f32 %v5970_v18, %v5972_v19  ;;  %v11389_v19 = vmax.f32 %v6000_v31, %v6002_v32  ;;  %v11401_v32 = vmax.f32 %v6030_v44, %v6032_v46  ;;  %v11413_v46 = vmax.f32 %v6067_v17, %v6071_v12 }
 0x20b   : > { %1226 = vmatprep.mubr.bf16.mxu1 %v10627_v0  ;;  %v11425_v12 = vmax.f32 %v6102_v8, %v6104_v6  ;;  %v11439_v6 = vld [vmem:[#allocation74_spill] sm:$0xff] }
 0x20c   : > { %v11441_v15 = vmax.f32 %v11439_v6, %v11440_v3  ;;  %v11451_v6 = vld [vmem:[#allocation79_spill] sm:$0xff]  ;;  %v11461_v3 = vld [vmem:[#allocation82_spill] sm:$0xff] }
 0x20d   : > { %v6207_v20 = vpop.f32.mrb[60].mxu1 }
 0x20e   : > { %11371 = vst [vmem:[#allocation94_spill] sm:$0xff] %v6207_v20  ;;  %v6209_v53 = vpop.f32.mrb[61].mxu1 }
 0x20f   : > { %11372 = vst [vmem:[#allocation95_spill] sm:$0xff] %v6209_v53  ;;  %v6213_v49 = vpop.f32.mrb[62].mxu1 }
 0x210   : > { %11373 = vst [vmem:[#allocation96_spill] sm:$0xff] %v6213_v49  ;;  %v6215_v52 = vpop.f32.mrb[63].mxu1 }
 0x211   : > { %11374 = vst [vmem:[#allocation97_spill] sm:$0xff] %v6215_v52 }
 0x212   : > { %4262 = vmatmul.mubr.msk.bf16.gmra.mrb[168].mxu1 %vm634_vm1, %v5880_v55  ;;  %v11379_v55 = vmax.f32 %v5976_v21, %v5978_v22  ;;  %v11386_v22 = vmax.f32 %v5991_v28, %v5993_v29  ;;  %v11392_v29 = vmax.f32 %v6006_v34, %v6008_v35  ;;  %v11398_v35 = vmax.f32 %v6021_v41, %v6023_v42 }
 0x213   : > { %1236 = vmatprep.mubr.bf16.mxu1 %v10627_v0  ;;  %v11404_v42 = vmax.f32 %v6036_v61, %v6038_v62  ;;  %v11410_v62 = vmax.f32 %v6053_v9, %v6055_v10 }
 0x215   : > { %v6222_v40 = vpop.f32.mrb[64].mxu1 }
 0x216   : > { %11375 = vst [vmem:[#allocation98_spill] sm:$0xff] %v6222_v40  ;;  %v6228_v51 = vmax.f32 %v11376_v54, %v6222_v40  ;;  %v6230_v50 = vpop.f32.mrb[65].mxu1  ;;  %v11381_v54 = vmov 0  }
 0x217   : > { %11377 = vst [vmem:[#allocation99_spill] sm:$0xff] %v6230_v50  ;;  %v6232_v53 = vpop.f32.mrb[66].mxu1 }
 0x218   : > { %11378 = vst [vmem:[#allocation100_spill] sm:$0xff] %v6232_v53  ;;  %v6240_v0 = vmax.f32 %v11379_v55, %v6232_v53  ;;  %v6242_v52 = vpop.f32.mrb[67].mxu1 }
 0x219   : > { %11380 = vst [vmem:[#allocation101_spill] sm:$0xff] %v6242_v52 }
 0x21a   : > { %4263 = vmatmul.mubr.msk.bf16.gmra.mrb[172].mxu1 %vm634_vm1, %v5886_v56 }
 0x21b   : > { %1246 = vmatprep.mubr.bf16.mxu1 %v11381_v54 }
 0x21d   : > { %v6249_v40 = vpop.f32.mrb[68].mxu1 }
 0x21e   : > { %11382 = vst [vmem:[#allocation102_spill] sm:$0xff] %v6249_v40  ;;  %v6255_v18 = vmax.f32 %v11383_v33, %v6249_v40  ;;  %v6257_v55 = vpop.f32.mrb[69].mxu1 }
 0x21f   : > { %11384 = vst [vmem:[#allocation103_spill] sm:$0xff] %v6257_v55  ;;  %v6259_v53 = vpop.f32.mrb[70].mxu1 }
 0x220   : > { %11385 = vst [vmem:[#allocation104_spill] sm:$0xff] %v6259_v53  ;;  %v6267_v21 = vmax.f32 %v11386_v22, %v6259_v53  ;;  %v6269_v56 = vpop.f32.mrb[71].mxu1 }
 0x221   : > { %11387 = vst [vmem:[#allocation105_spill] sm:$0xff] %v6269_v56 }
 0x222   : > { %4264 = vmatmul.mubr.msk.bf16.gmra.mrb[176].mxu1 %vm634_vm1, %v5892_v57 }
 0x223   : > { %1256 = vmatprep.mubr.bf16.mxu1 %v11381_v54 }
 0x225   : > { %v6276_v33 = vpop.f32.mrb[72].mxu1 }
 0x226   : > { %11388 = vst [vmem:[#allocation106_spill] sm:$0xff] %v6276_v33  ;;  %v6282_v40 = vmax.f32 %v11389_v19, %v6276_v33  ;;  %v6284_v22 = vpop.f32.mrb[73].mxu1 }
 0x227   : > { %11390 = vst [vmem:[#allocation107_spill] sm:$0xff] %v6284_v22  ;;  %v6286_v53 = vpop.f32.mrb[74].mxu1 }
 0x228   : > { %11391 = vst [vmem:[#allocation108_spill] sm:$0xff] %v6286_v53  ;;  %v6294_v28 = vmax.f32 %v11392_v29, %v6286_v53  ;;  %v6296_v24 = vpop.f32.mrb[75].mxu1 }
 0x229   : > { %11393 = vst [vmem:[#allocation109_spill] sm:$0xff] %v6296_v24 }
 0x22a   : > { %4265 = vmatmul.mubr.msk.bf16.gmra.mrb[180].mxu1 %vm634_vm1, %v5898_v58 }
 0x22b   : > { %1266 = vmatprep.mubr.bf16.mxu1 %v11381_v54 }
 0x22d   : > { %v6303_v19 = vpop.f32.mrb[76].mxu1 }
 0x22e   : > { %11394 = vst [vmem:[#allocation110_spill] sm:$0xff] %v6303_v19  ;;  %v6309_v33 = vmax.f32 %v11395_v25, %v6303_v19  ;;  %v6311_v29 = vpop.f32.mrb[77].mxu1 }
 0x22f   : > { %11396 = vst [vmem:[#allocation111_spill] sm:$0xff] %v6311_v29  ;;  %v6313_v53 = vpop.f32.mrb[78].mxu1 }
 0x230   : > { %11397 = vst [vmem:[#allocation112_spill] sm:$0xff] %v6313_v53  ;;  %v6321_v34 = vmax.f32 %v11398_v35, %v6313_v53  ;;  %v6323_v31 = vpop.f32.mrb[79].mxu1 }
 0x231   : > { %11399 = vst [vmem:[#allocation113_spill] sm:$0xff] %v6323_v31 }
 0x232   : > { %4266 = vmatmul.mubr.msk.bf16.gmra.mrb[184].mxu1 %vm634_vm1, %v5904_v59 }
 0x233   : > { %1276 = vmatprep.mubr.bf16.mxu1 %v11381_v54 }
 0x235   : > { %v6330_v25 = vpop.f32.mrb[80].mxu1 }
 0x236   : > { %11400 = vst [vmem:[#allocation114_spill] sm:$0xff] %v6330_v25  ;;  %v6336_v19 = vmax.f32 %v11401_v32, %v6330_v25  ;;  %v6338_v35 = vpop.f32.mrb[81].mxu1 }
 0x237   : > { %11402 = vst [vmem:[#allocation115_spill] sm:$0xff] %v6338_v35  ;;  %v6340_v53 = vpop.f32.mrb[82].mxu1 }
 0x238   : > { %11403 = vst [vmem:[#allocation116_spill] sm:$0xff] %v6340_v53  ;;  %v6348_v41 = vmax.f32 %v11404_v42, %v6340_v53  ;;  %v6350_v37 = vpop.f32.mrb[83].mxu1 }
 0x239   : > { %11405 = vst [vmem:[#allocation117_spill] sm:$0xff] %v6350_v37 }
 0x23a   : > { %4267 = vmatmul.mubr.msk.bf16.gmra.mrb[188].mxu1 %vm634_vm1, %v5910_v60 }
 0x23b   : > { %1319 = vmatprep.mubr.bf16.mxu1 %v11381_v54 }
 0x23d   : > { %v6357_v32 = vpop.f32.mrb[84].mxu1 }
 0x23e   : > { %11406 = vst [vmem:[#allocation118_spill] sm:$0xff] %v6357_v32  ;;  %v6363_v25 = vmax.f32 %v11407_v39, %v6357_v32  ;;  %v6365_v42 = vpop.f32.mrb[85].mxu1 }
 0x23f   : > { %11408 = vst [vmem:[#allocation119_spill] sm:$0xff] %v6365_v42  ;;  %v6367_v53 = vpop.f32.mrb[86].mxu1 }
 0x240   : > { %11409 = vst [vmem:[#allocation120_spill] sm:$0xff] %v6367_v53  ;;  %v6375_v61 = vmax.f32 %v11410_v62, %v6367_v53  ;;  %v6377_v44 = vpop.f32.mrb[87].mxu1 }
 0x241   : > { %11411 = vst [vmem:[#allocation121_spill] sm:$0xff] %v6377_v44 }
 0x242   : > { %4269 = vmatmul.mubr.msk.bf16.vlgmr.msra.gmra.mrb[192].mxu1 %vm634_vm1, %v5803_v26  ;;  %v11416_v26 = vmax.f32 %v6075_v43, %v6077_v4 }
 0x243   : > { %1329 = vmatprep.mubr.bf16.mxu1 %v11381_v54 }
 0x245   : > { %v6384_v39 = vpop.f32.mrb[88].mxu1 }
 0x246   : > { %11412 = vst [vmem:[#allocation122_spill] sm:$0xff] %v6384_v39  ;;  %v6390_v32 = vmax.f32 %v11413_v46, %v6384_v39  ;;  %v6392_v62 = vpop.f32.mrb[89].mxu1 }
 0x247   : > { %11414 = vst [vmem:[#allocation123_spill] sm:$0xff] %v6392_v62  ;;  %v6394_v53 = vpop.f32.mrb[90].mxu1 }
 0x248   : > { %11415 = vst [vmem:[#allocation124_spill] sm:$0xff] %v6394_v53  ;;  %v6402_v10 = vmax.f32 %v11416_v26, %v6394_v53  ;;  %v6404_v9 = vpop.f32.mrb[91].mxu1 }
 0x249   : > { %11417 = vst [vmem:[#allocation125_spill] sm:$0xff] %v6404_v9 }
 0x24a   : > { %4270 = vmatmul.mubr.msk.bf16.gmra.mrb[196].mxu1 %vm634_vm1, %v5821_v38  ;;  %v11422_v38 = vmax.f32 %v6091_v16, %v6093_v2 }
 0x24b   : > { %1339 = vmatprep.mubr.bf16.mxu1 %v11381_v54 }
 0x24d   : > { %v6411_v46 = vpop.f32.mrb[92].mxu1 }
 0x24e   : > { %11418 = vst [vmem:[#allocation126_spill] sm:$0xff] %v6411_v46  ;;  %v6417_v39 = vmax.f32 %v11419_v7, %v6411_v46  ;;  %v6419_v26 = vpop.f32.mrb[93].mxu1 }
 0x24f   : > { %11420 = vst [vmem:[#allocation127_spill] sm:$0xff] %v6419_v26  ;;  %v6421_v53 = vpop.f32.mrb[94].mxu1 }
 0x250   : > { %11421 = vst [vmem:[#allocation128_spill] sm:$0xff] %v6421_v53  ;;  %v6429_v4 = vmax.f32 %v11422_v38, %v6421_v53  ;;  %v6431_v43 = vpop.f32.mrb[95].mxu1 }
 0x251   : > { %11423 = vst [vmem:[#allocation129_spill] sm:$0xff] %v6431_v43 }
 0x252   : > { %4271 = vmatmul.mubr.msk.bf16.gmra.mrb[200].mxu1 %vm634_vm1, %v5828_v45  ;;  %v11428_v45 = vmax.f32 %v6108_v11, %v6110_v47 }
 0x253   : > { %1349 = vmatprep.mubr.bf16.mxu1 %v11381_v54 }
 0x255   : > { %v6438_v7 = vpop.f32.mrb[96].mxu1 }
 0x256   : > { %11424 = vst [vmem:[#allocation130_spill] sm:$0xff] %v6438_v7  ;;  %v6444_v46 = vmax.f32 %v11425_v12, %v6438_v7  ;;  %v6446_v38 = vpop.f32.mrb[97].mxu1 }
 0x257   : > { %11426 = vst [vmem:[#allocation131_spill] sm:$0xff] %v6446_v38  ;;  %v6448_v53 = vpop.f32.mrb[98].mxu1 }
 0x258   : > { %11427 = vst [vmem:[#allocation132_spill] sm:$0xff] %v6448_v53  ;;  %v6456_v2 = vmax.f32 %v11428_v45, %v6448_v53  ;;  %v6458_v16 = vpop.f32.mrb[99].mxu1 }
 0x259   : > { %11429 = vst [vmem:[#allocation133_spill] sm:$0xff] %v6458_v16 }
 0x25a   : > { %4272 = vmatmul.mubr.msk.bf16.gmra.mrb[204].mxu1 %vm634_vm1, %v5838_v48  ;;  %v11434_v48 = vld [vmem:[#allocation73_spill] sm:$0xff] }
 0x25b   : > { %1359 = vmatprep.mubr.bf16.mxu1 %v11381_v54  ;;  %v11435_v47 = vmax.f32 %v6123_v5, %v11434_v48 }
 0x25d   : > { %v6465_v12 = vpop.f32.mrb[100].mxu1 }
 0x25e   : > { %11430 = vst [vmem:[#allocation134_spill] sm:$0xff] %v6465_v12  ;;  %v6471_v7 = vmax.f32 %v11431_v13, %v6465_v12  ;;  %v6473_v45 = vpop.f32.mrb[101].mxu1  ;;  %v11437_v13 = vld [vmem:[#allocation26_spill] sm:$0xff] }
 0x25f   : > { %11432 = vst [vmem:[#allocation135_spill] sm:$0xff] %v6473_v45  ;;  %v6475_v53 = vpop.f32.mrb[102].mxu1 }
 0x260   : > { %11433 = vst [vmem:[#allocation136_spill] sm:$0xff] %v6475_v53  ;;  %v6483_v11 = vmax.f32 %v11435_v47, %v6475_v53  ;;  %v6485_v8 = vpop.f32.mrb[103].mxu1 }
 0x261   : > { %11436 = vst [vmem:[#allocation137_spill] sm:$0xff] %v6485_v8 }
 0x262   : > { %4273 = vmatmul.mubr.msk.bf16.gmra.mrb[208].mxu1 %vm634_vm1, %v11437_v13  ;;  %v11445_v13 = vld [vmem:[#allocation77_spill] sm:$0xff] }
 0x263   : > { %1369 = vmatprep.mubr.bf16.mxu1 %v11381_v54  ;;  %v11446_v48 = vmax.f32 %v6138_v14, %v11445_v13 }
 0x265   : > { %v6492_v12 = vpop.f32.mrb[104].mxu1 }
 0x266   : > { %11438 = vst [vmem:[#allocation26_spill] sm:$0xff] %v6492_v12  ;;  %v6498_v17 = vmax.f32 %v11441_v15, %v6492_v12  ;;  %v6500_v47 = vpop.f32.mrb[105].mxu1  ;;  %v11448_v15 = vld [vmem:[#allocation27_spill] sm:$0xff] }
 0x267   : > { %11443 = vst [vmem:[#allocation139_spill] sm:$0xff] %v6500_v47  ;;  %v6502_v53 = vpop.f32.mrb[106].mxu1  ;;  %v11452_v47 = vmax.f32 %v11450_v63, %v11451_v6  ;;  %v11462_v63 = vld [vmem:[#allocation83_spill] sm:$0xff]  ;;  %v11472_v6 = vld [vmem:[#allocation86_spill] sm:$0xff] }
 0x268   : > { %11442 = vst [vmem:[#allocation138_spill] sm:$0xff] %v6498_v17  ;;  %11444 = vst [vmem:[#allocation140_spill] sm:$0xff] %v6502_v53  ;;  %v6510_v5 = vmax.f32 %v11446_v48, %v6502_v53  ;;  %v6512_v1 = vpop.f32.mrb[107].mxu1 }
 0x269   : > { %11447 = vst [vmem:[#allocation141_spill] sm:$0xff] %v6512_v1 }
 0x26a   : > { %4274 = vmatmul.mubr.msk.bf16.gmra.mrb[212].mxu1 %vm634_vm1, %v11448_v15  ;;  %v11456_v15 = vld [vmem:[#allocation81_spill] sm:$0xff] }
 0x26b   : > { %1379 = vmatprep.mubr.bf16.mxu1 %v11381_v54  ;;  %v11457_v13 = vmax.f32 %v6153_v27, %v11456_v15 }
 0x26d   : > { %v6519_v12 = vpop.f32.mrb[108].mxu1 }
 0x26e   : > { %11449 = vst [vmem:[#allocation27_spill] sm:$0xff] %v6519_v12  ;;  %v6525_v17 = vmax.f32 %v11452_v47, %v6519_v12  ;;  %v6527_v48 = vpop.f32.mrb[109].mxu1  ;;  %v11459_v47 = vld [vmem:[#allocation28_spill] sm:$0xff] }
 0x26f   : > { %11454 = vst [vmem:[#allocation143_spill] sm:$0xff] %v6527_v48  ;;  %v6529_v53 = vpop.f32.mrb[110].mxu1  ;;  %v11463_v48 = vmax.f32 %v11461_v3, %v11462_v63  ;;  %v11473_v3 = vld [vmem:[#allocation87_spill] sm:$0xff]  ;;  %v11483_v63 = vld [vmem:[#allocation90_spill] sm:$0xff] }
 0x270   : > { %11453 = vst [vmem:[#allocation142_spill] sm:$0xff] %v6525_v17  ;;  %11455 = vst [vmem:[#allocation144_spill] sm:$0xff] %v6529_v53  ;;  %v6537_v14 = vmax.f32 %v11457_v13, %v6529_v53  ;;  %v6539_v1 = vpop.f32.mrb[111].mxu1 }
 0x271   : > { %11458 = vst [vmem:[#allocation145_spill] sm:$0xff] %v6539_v1 }
 0x272   : > { %4275 = vmatmul.mubr.msk.bf16.gmra.mrb[216].mxu1 %vm634_vm1, %v11459_v47  ;;  %v11467_v47 = vld [vmem:[#allocation85_spill] sm:$0xff] }
 0x273   : > { %1389 = vmatprep.mubr.bf16.mxu1 %v11381_v54  ;;  %v11468_v15 = vmax.f32 %v6168_v36, %v11467_v47 }
 0x275   : > { %v6546_v12 = vpop.f32.mrb[112].mxu1 }
 0x276   : > { %11460 = vst [vmem:[#allocation28_spill] sm:$0xff] %v6546_v12  ;;  %v6552_v17 = vmax.f32 %v11463_v48, %v6546_v12  ;;  %v6554_v13 = vpop.f32.mrb[113].mxu1  ;;  %v11470_v48 = vld [vmem:[#allocation29_spill] sm:$0xff] }
 0x277   : > { %11465 = vst [vmem:[#allocation147_spill] sm:$0xff] %v6554_v13  ;;  %v6556_v53 = vpop.f32.mrb[114].mxu1  ;;  %v11474_v13 = vmax.f32 %v11472_v6, %v11473_v3  ;;  %v11484_v6 = vld [vmem:[#allocation91_spill] sm:$0xff] }
 0x278   : > { %11464 = vst [vmem:[#allocation146_spill] sm:$0xff] %v6552_v17  ;;  %11466 = vst [vmem:[#allocation148_spill] sm:$0xff] %v6556_v53  ;;  %v6564_v27 = vmax.f32 %v11468_v15, %v6556_v53  ;;  %v6566_v1 = vpop.f32.mrb[115].mxu1  ;;  %v11493_v3 = vld [vmem:[#allocation95_spill] sm:$0xff] }
 0x279   : > { %11469 = vst [vmem:[#allocation149_spill] sm:$0xff] %v6566_v1 }
 0x27a   : > { %4276 = vmatmul.mubr.msk.bf16.gmra.mrb[220].mxu1 %vm634_vm1, %v11470_v48  ;;  %v11478_v48 = vld [vmem:[#allocation89_spill] sm:$0xff] }
 0x27b   : > { %1399 = vmatprep.mubr.bf16.mxu1 %v11381_v54  ;;  %v11479_v47 = vmax.f32 %v6183_v23, %v11478_v48 }
 0x27d   : > { %v6573_v12 = vpop.f32.mrb[116].mxu1 }
 0x27e   : > { %11471 = vst [vmem:[#allocation29_spill] sm:$0xff] %v6573_v12  ;;  %v6579_v17 = vmax.f32 %v11474_v13, %v6573_v12  ;;  %v6581_v15 = vpop.f32.mrb[117].mxu1  ;;  %v11481_v13 = vld [vmem:[#allocation30_spill] sm:$0xff] }
 0x27f   : > { %11476 = vst [vmem:[#allocation151_spill] sm:$0xff] %v6581_v15  ;;  %v6583_v53 = vpop.f32.mrb[118].mxu1  ;;  %v11485_v15 = vmax.f32 %v11483_v63, %v11484_v6  ;;  %v11494_v63 = vmax.f32 %v6207_v20, %v11493_v3  ;;  %v11502_v6 = vmax.f32 %v6228_v51, %v6230_v50  ;;  %v11508_v3 = vmax.f32 %v6255_v18, %v6257_v55 }
 0x280   : > { %11475 = vst [vmem:[#allocation150_spill] sm:$0xff] %v6579_v17  ;;  %11477 = vst [vmem:[#allocation152_spill] sm:$0xff] %v6583_v53  ;;  %v6591_v36 = vmax.f32 %v11479_v47, %v6583_v53  ;;  %v6593_v1 = vpop.f32.mrb[119].mxu1  ;;  %v11512_v51 = vmax.f32 %v6282_v40, %v6284_v22  ;;  %v11517_v18 = vmax.f32 %v6309_v33, %v6311_v29 }
 0x281   : > { %11480 = vst [vmem:[#allocation153_spill] sm:$0xff] %v6593_v1  ;;  %v11523_v40 = vmax.f32 %v6336_v19, %v6338_v35  ;;  %v11529_v33 = vmax.f32 %v6363_v25, %v6365_v42  ;;  %v11532_v19 = vmax.f32 %v6375_v61, %v6377_v44 }
 0x282   : > { %4277 = vmatmul.mubr.msk.bf16.gmra.mrb[224].mxu1 %vm634_vm1, %v11481_v13  ;;  %v11488_v13 = vld [vmem:[#allocation93_spill] sm:$0xff] }
 0x283   : > { %1409 = vmatprep.mubr.bf16.mxu1 %v11381_v54  ;;  %v11489_v48 = vmax.f32 %v6198_v30, %v11488_v13 }
 0x285   : > { %v6600_v12 = vpop.f32.mrb[120].mxu1 }
 0x286   : > { %11482 = vst [vmem:[#allocation30_spill] sm:$0xff] %v6600_v12  ;;  %v6606_v17 = vmax.f32 %v11485_v15, %v6600_v12  ;;  %v6608_v47 = vpop.f32.mrb[121].mxu1  ;;  %v11491_v15 = vld [vmem:[#allocation31_spill] sm:$0xff] }
 0x287   : > { %11486 = vst [vmem:[#allocation154_spill] sm:$0xff] %v6608_v47  ;;  %v6610_v53 = vpop.f32.mrb[122].mxu1 }
 0x288   : > { %11487 = vst [vmem:[#allocation155_spill] sm:$0xff] %v6610_v53  ;;  %v6618_v23 = vmax.f32 %v11489_v48, %v6610_v53  ;;  %v6620_v1 = vpop.f32.mrb[123].mxu1 }
 0x289   : > { %11490 = vst [vmem:[#allocation156_spill] sm:$0xff] %v6620_v1 }
 0x28a   : > { %4278 = vmatmul.mubr.msk.bf16.gmra.mrb[228].mxu1 %vm634_vm1, %v11491_v15  ;;  %v11497_v15 = vld [vmem:[#allocation97_spill] sm:$0xff] }
 0x28b   : > { %1419 = vmatprep.mubr.bf16.mxu1 %v11381_v54  ;;  %v11498_v13 = vmax.f32 %v6213_v49, %v11497_v15 }
 0x28d   : > { %v6627_v12 = vpop.f32.mrb[124].mxu1 }
 0x28e   : > { %11492 = vst [vmem:[#allocation31_spill] sm:$0xff] %v6627_v12  ;;  %v6633_v47 = vmax.f32 %v11494_v63, %v6627_v12  ;;  %v6635_v48 = vpop.f32.mrb[125].mxu1  ;;  %v11500_v63 = vld [vmem:[#allocation32_spill] sm:$0xff] }
 0x28f   : > { %11495 = vst [vmem:[#allocation157_spill] sm:$0xff] %v6635_v48  ;;  %v6637_v53 = vpop.f32.mrb[126].mxu1 }
 0x290   : > { %11496 = vst [vmem:[#allocation158_spill] sm:$0xff] %v6637_v53  ;;  %v6645_v30 = vmax.f32 %v11498_v13, %v6637_v53  ;;  %v6647_v1 = vpop.f32.mrb[127].mxu1 }
 0x291   : > { %11499 = vst [vmem:[#allocation159_spill] sm:$0xff] %v6647_v1 }
 0x292   : > { %4279 = vmatmul.mubr.msk.bf16.gmra.mrb[232].mxu1 %vm634_vm1, %v11500_v63  ;;  %v11505_v63 = vmax.f32 %v6240_v0, %v6242_v52 }
 0x293   : > { %1429 = vmatprep.mubr.bf16.mxu1 %v11381_v54 }
 0x295   : > { %v6654_v12 = vpop.f32.mrb[128].mxu1 }
 0x296   : > { %11501 = vst [vmem:[#allocation32_spill] sm:$0xff] %v6654_v12  ;;  %v6660_v20 = vmax.f32 %v11502_v6, %v6654_v12  ;;  %v6662_v13 = vpop.f32.mrb[129].mxu1  ;;  %v11506_v6 = vld [vmem:[#allocation33_spill] sm:$0xff] }
 0x297   : > { %11503 = vst [vmem:[#allocation160_spill] sm:$0xff] %v6662_v13  ;;  %v6664_v53 = vpop.f32.mrb[130].mxu1 }
 0x298   : > { %11504 = vst [vmem:[#allocation161_spill] sm:$0xff] %v6664_v53  ;;  %v6672_v15 = vmax.f32 %v11505_v63, %v6664_v53  ;;  %v6674_v49 = vpop.f32.mrb[131].mxu1 }
 0x29a   : > { %4280 = vmatmul.mubr.msk.bf16.gmra.mrb[236].mxu1 %vm634_vm1, %v11506_v6  ;;  %v11510_v6 = vmax.f32 %v6267_v21, %v6269_v56 }
 0x29b   : > { %1439 = vmatprep.mubr.bf16.mxu1 %v11381_v54 }
 0x29d   : > { %v6681_v12 = vpop.f32.mrb[132].mxu1 }
 0x29e   : > { %11507 = vst [vmem:[#allocation33_spill] sm:$0xff] %v6681_v12  ;;  %v6687_v50 = vmax.f32 %v11508_v3, %v6681_v12  ;;  %v6689_v0 = vpop.f32.mrb[133].mxu1 }
 0x29f   : > { %v6691_v63 = vpop.f32.mrb[134].mxu1 }
 0x2a0   : > { %11509 = vst [vmem:[#allocation162_spill] sm:$0xff] %v6691_v63  ;;  %v6699_v53 = vmax.f32 %v11510_v6, %v6691_v63  ;;  %v6701_v52 = vpop.f32.mrb[135].mxu1 }
 0x2a2   : > { %4281 = vmatmul.mubr.msk.bf16.gmra.mrb[240].mxu1 %vm634_vm1, %v5892_v57  ;;  %v11515_v57 = vmax.f32 %v6294_v28, %v6296_v24 }
 0x2a3   : > { %1449 = vmatprep.mubr.bf16.mxu1 %v11381_v54 }
 0x2a5   : > { %v6708_v3 = vpop.f32.mrb[136].mxu1 }
 0x2a6   : > { %11511 = vst [vmem:[#allocation163_spill] sm:$0xff] %v6708_v3  ;;  %v6714_v12 = vmax.f32 %v11512_v51, %v6708_v3  ;;  %v6716_v21 = vpop.f32.mrb[137].mxu1 }
 0x2a7   : > { %11513 = vst [vmem:[#allocation164_spill] sm:$0xff] %v6716_v21  ;;  %v6718_v6 = vpop.f32.mrb[138].mxu1 }
 0x2a8   : > { %11514 = vst [vmem:[#allocation165_spill] sm:$0xff] %v6718_v6  ;;  %v6726_v63 = vmax.f32 %v11515_v57, %v6718_v6  ;;  %v6728_v56 = vpop.f32.mrb[139].mxu1 }
 0x2aa   : > { %4282 = vmatmul.mubr.msk.bf16.gmra.mrb[244].mxu1 %vm634_vm1, %v5898_v58  ;;  %v11520_v58 = vmax.f32 %v6321_v34, %v6323_v31 }
 0x2ab   : > { %1459 = vmatprep.mubr.bf16.mxu1 %v11381_v54 }
 0x2ad   : > { %v6735_v51 = vpop.f32.mrb[140].mxu1 }
 0x2ae   : > { %11516 = vst [vmem:[#allocation166_spill] sm:$0xff] %v6735_v51  ;;  %v6741_v3 = vmax.f32 %v11517_v18, %v6735_v51  ;;  %v6743_v28 = vpop.f32.mrb[141].mxu1 }
 0x2af   : > { %11518 = vst [vmem:[#allocation167_spill] sm:$0xff] %v6743_v28  ;;  %v6745_v57 = vpop.f32.mrb[142].mxu1 }
 0x2b0   : > { %11519 = vst [vmem:[#allocation168_spill] sm:$0xff] %v6745_v57  ;;  %v6753_v6 = vmax.f32 %v11520_v58, %v6745_v57  ;;  %v6755_v24 = vpop.f32.mrb[143].mxu1 }
 0x2b1   : > { %11521 = vst [vmem:[#allocation169_spill] sm:$0xff] %v6755_v24 }
 0x2b2   : > { %4283 = vmatmul.mubr.msk.bf16.gmra.mrb[248].mxu1 %vm634_vm1, %v5904_v59  ;;  %v11526_v59 = vmax.f32 %v6348_v41, %v6350_v37 }
 0x2b3   : > { %1469 = vmatprep.mubr.bf16.mxu1 %v11381_v54 }
 0x2b5   : > { %v6762_v18 = vpop.f32.mrb[144].mxu1 }
 0x2b6   : > { %11522 = vst [vmem:[#allocation170_spill] sm:$0xff] %v6762_v18  ;;  %v6768_v51 = vmax.f32 %v11523_v40, %v6762_v18  ;;  %v6770_v34 = vpop.f32.mrb[145].mxu1 }
 0x2b7   : > { %11524 = vst [vmem:[#allocation171_spill] sm:$0xff] %v6770_v34  ;;  %v6772_v58 = vpop.f32.mrb[146].mxu1 }
 0x2b8   : > { %11525 = vst [vmem:[#allocation172_spill] sm:$0xff] %v6772_v58  ;;  %v6780_v54 = vmax.f32 %v11526_v59, %v6772_v58  ;;  %v6782_v57 = vpop.f32.mrb[147].mxu1 }
 0x2b9   : > { %11527 = vst [vmem:[#allocation173_spill] sm:$0xff] %v6782_v57 }
 0x2ba   : > { %4284 = vmatmul.mubr.msk.bf16.gmra.mrb[252].mxu1 %vm634_vm1, %v5910_v60 }
 0x2bd   : > { %v6788_v40 = vpop.f32.mrb[148].mxu1 }
 0x2be   : > { %11528 = vst [vmem:[#allocation174_spill] sm:$0xff] %v6788_v40  ;;  %v6794_v18 = vmax.f32 %v11529_v33, %v6788_v40  ;;  %v6796_v35 = vpop.f32.mrb[149].mxu1  ;;  %v11535_v40 = vmax.f32 %v6390_v32, %v6392_v62 }
 0x2bf   : > { %11530 = vst [vmem:[#allocation175_spill] sm:$0xff] %v6796_v35  ;;  %v6798_v41 = vpop.f32.mrb[150].mxu1 }
 0x2c0   : > { %11531 = vst [vmem:[#allocation176_spill] sm:$0xff] %v6798_v41  ;;  %v6806_v60 = vmax.f32 %v11532_v19, %v6798_v41  ;;  %v6808_v58 = vpop.f32.mrb[151].mxu1  ;;  %v11538_v19 = vmax.f32 %v6402_v10, %v6404_v9 }
 0x2c1   : > { %11533 = vst [vmem:[#allocation177_spill] sm:$0xff] %v6808_v58 }
 0x2c5   : > { %v6812_v33 = vpop.f32.mrb[152].mxu1 }
 0x2c6   : > { %11534 = vst [vmem:[#allocation178_spill] sm:$0xff] %v6812_v33  ;;  %v6818_v42 = vmax.f32 %v11535_v40, %v6812_v33  ;;  %v6820_v59 = vpop.f32.mrb[153].mxu1  ;;  %v11541_v33 = vmax.f32 %v6417_v39, %v6419_v26 }
 0x2c7   : > { %11536 = vst [vmem:[#allocation179_spill] sm:$0xff] %v6820_v59  ;;  %v6822_v37 = vpop.f32.mrb[154].mxu1 }
 0x2c8   : > { %11537 = vst [vmem:[#allocation180_spill] sm:$0xff] %v6822_v37  ;;  %v6830_v25 = vmax.f32 %v11538_v19, %v6822_v37  ;;  %v6832_v41 = vpop.f32.mrb[155].mxu1  ;;  %v11544_v19 = vmax.f32 %v6429_v4, %v6431_v43 }
 0x2c9   : > { %11539 = vst [vmem:[#allocation181_spill] sm:$0xff] %v6832_v41 }
 0x2cd   : > { %v6836_v40 = vpop.f32.mrb[156].mxu1 }
 0x2ce   : > { %11540 = vst [vmem:[#allocation182_spill] sm:$0xff] %v6836_v40  ;;  %v6842_v62 = vmax.f32 %v11541_v33, %v6836_v40  ;;  %v6844_v61 = vpop.f32.mrb[157].mxu1  ;;  %v11547_v40 = vmax.f32 %v6444_v46, %v6446_v38 }
 0x2cf   : > { %11542 = vst [vmem:[#allocation183_spill] sm:$0xff] %v6844_v61  ;;  %v6846_v44 = vpop.f32.mrb[158].mxu1 }
 0x2d0   : > { %11543 = vst [vmem:[#allocation184_spill] sm:$0xff] %v6846_v44  ;;  %v6854_v32 = vmax.f32 %v11544_v19, %v6846_v44  ;;  %v6856_v37 = vpop.f32.mrb[159].mxu1  ;;  %v11550_v19 = vmax.f32 %v6456_v2, %v6458_v16 }
 0x2d1   : > { %11545 = vst [vmem:[#allocation185_spill] sm:$0xff] %v6856_v37 }
 0x2d5   : > { %v6860_v33 = vpop.f32.mrb[160].mxu1 }
 0x2d6   : > { %11546 = vst [vmem:[#allocation186_spill] sm:$0xff] %v6860_v33  ;;  %v6866_v26 = vmax.f32 %v11547_v40, %v6860_v33  ;;  %v6868_v10 = vpop.f32.mrb[161].mxu1  ;;  %v11553_v33 = vmax.f32 %v6471_v7, %v6473_v45  ;;  %v11560_v45 = vld [vmem:[#allocation139_spill] sm:$0xff] }
 0x2d7   : > { %11548 = vst [vmem:[#allocation187_spill] sm:$0xff] %v6868_v10  ;;  %v6870_v9 = vpop.f32.mrb[162].mxu1 }
 0x2d8   : > { %11549 = vst [vmem:[#allocation188_spill] sm:$0xff] %v6870_v9  ;;  %v6878_v39 = vmax.f32 %v11550_v19, %v6870_v9  ;;  %v6880_v44 = vpop.f32.mrb[163].mxu1  ;;  %v11556_v19 = vmax.f32 %v6483_v11, %v6485_v8 }
 0x2d9   : > { %11551 = vst [vmem:[#allocation189_spill] sm:$0xff] %v6880_v44 }
 0x2dd   : > { %v6884_v40 = vpop.f32.mrb[164].mxu1 }
 0x2de   : > { %11552 = vst [vmem:[#allocation190_spill] sm:$0xff] %v6884_v40  ;;  %v6890_v38 = vmax.f32 %v11553_v33, %v6884_v40  ;;  %v6892_v4 = vpop.f32.mrb[165].mxu1  ;;  %v11559_v40 = vld [vmem:[#allocation138_spill] sm:$0xff] }
 0x2df   : > { %11554 = vst [vmem:[#allocation191_spill] sm:$0xff] %v6892_v4  ;;  %v6894_v43 = vpop.f32.mrb[166].mxu1  ;;  %v11561_v16 = vmax.f32 %v11559_v40, %v11560_v45  ;;  %v11570_v45 = vld [vmem:[#allocation143_spill] sm:$0xff] }
 0x2e0   : > { %11555 = vst [vmem:[#allocation192_spill] sm:$0xff] %v6894_v43  ;;  %v6902_v46 = vmax.f32 %v11556_v19, %v6894_v43  ;;  %v6904_v9 = vpop.f32.mrb[167].mxu1  ;;  %v11564_v19 = vld [vmem:[#allocation141_spill] sm:$0xff] }
 0x2e1   : > { %11557 = vst [vmem:[#allocation193_spill] sm:$0xff] %v6904_v9  ;;  %v11565_v43 = vmax.f32 %v6510_v5, %v11564_v19  ;;  %v11574_v5 = vld [vmem:[#allocation145_spill] sm:$0xff] }
 0x2e5   : > { %v6908_v33 = vpop.f32.mrb[168].mxu1 }
 0x2e6   : > { %11558 = vst [vmem:[#allocation194_spill] sm:$0xff] %v6908_v33  ;;  %v6914_v31 = vmax.f32 %v11561_v16, %v6908_v33  ;;  %v6916_v2 = vpop.f32.mrb[169].mxu1  ;;  %v11569_v33 = vld [vmem:[#allocation142_spill] sm:$0xff] }
 0x2e7   : > { %11562 = vst [vmem:[#allocation138_spill] sm:$0xff] %v6916_v2  ;;  %v6918_v29 = vpop.f32.mrb[170].mxu1  ;;  %v11571_v22 = vmax.f32 %v11569_v33, %v11570_v45  ;;  %v11580_v45 = vld [vmem:[#allocation147_spill] sm:$0xff] }
 0x2e8   : > { %11563 = vst [vmem:[#allocation195_spill] sm:$0xff] %v6918_v29  ;;  %v6926_v7 = vmax.f32 %v11565_v43, %v6918_v29  ;;  %v6928_v8 = vpop.f32.mrb[171].mxu1  ;;  %v11575_v29 = vmax.f32 %v6537_v14, %v11574_v5 }
 0x2e9   : > { %11567 = vst [vmem:[#allocation197_spill] sm:$0xff] %v6928_v8 }
 0x2ea   : > { %11566 = vst [vmem:[#allocation196_spill] sm:$0xff] %v6926_v7 }
 0x2ed   : > { %v6932_v16 = vpop.f32.mrb[172].mxu1 }
 0x2ee   : > { %11568 = vst [vmem:[#allocation198_spill] sm:$0xff] %v6932_v16  ;;  %v6938_v55 = vmax.f32 %v11571_v22, %v6932_v16  ;;  %v6940_v11 = vpop.f32.mrb[173].mxu1  ;;  %v11579_v16 = vld [vmem:[#allocation146_spill] sm:$0xff] }
 0x2ef   : > { %11572 = vst [vmem:[#allocation142_spill] sm:$0xff] %v6940_v11  ;;  %v6942_v2 = vpop.f32.mrb[174].mxu1  ;;  %v11581_v8 = vmax.f32 %v11579_v16, %v11580_v45  ;;  %v11589_v45 = vld [vmem:[#allocation151_spill] sm:$0xff] }
 0x2f0   : > { %11573 = vst [vmem:[#allocation199_spill] sm:$0xff] %v6942_v2  ;;  %v6950_v40 = vmax.f32 %v11575_v29, %v6942_v2  ;;  %v6952_v19 = vpop.f32.mrb[175].mxu1  ;;  %v11584_v29 = vld [vmem:[#allocation149_spill] sm:$0xff] }
 0x2f1   : > { %11577 = vst [vmem:[#allocation201_spill] sm:$0xff] %v6952_v19  ;;  %v11585_v2 = vmax.f32 %v6564_v27, %v11584_v29 }
 0x2f2   : > { %11576 = vst [vmem:[#allocation200_spill] sm:$0xff] %v6950_v40 }
 0x2f5   : > { %v6956_v22 = vpop.f32.mrb[176].mxu1 }
 0x2f6   : > { %11578 = vst [vmem:[#allocation202_spill] sm:$0xff] %v6956_v22  ;;  %v6962_v7 = vmax.f32 %v11581_v8, %v6956_v22  ;;  %v6964_v43 = vpop.f32.mrb[177].mxu1  ;;  %v11588_v22 = vld [vmem:[#allocation150_spill] sm:$0xff] }
 0x2f7   : > { %11582 = vst [vmem:[#allocation146_spill] sm:$0xff] %v6964_v43  ;;  %v6966_v11 = vpop.f32.mrb[178].mxu1  ;;  %v11590_v19 = vmax.f32 %v11588_v22, %v11589_v45 }
 0x2f8   : > { %11583 = vst [vmem:[#allocation203_spill] sm:$0xff] %v6966_v11  ;;  %v6974_v33 = vmax.f32 %v11585_v2, %v6966_v11  ;;  %v6976_v5 = vpop.f32.mrb[179].mxu1  ;;  %v11593_v2 = vld [vmem:[#allocation153_spill] sm:$0xff] }
 0x2f9   : > { %11586 = vst [vmem:[#allocation204_spill] sm:$0xff] %v6976_v5  ;;  %v11594_v11 = vmax.f32 %v6591_v36, %v11593_v2 }
 0x2fd   : > { %v6980_v8 = vpop.f32.mrb[180].mxu1 }
 0x2fe   : > { %11587 = vst [vmem:[#allocation205_spill] sm:$0xff] %v6980_v8  ;;  %v6986_v40 = vmax.f32 %v11590_v19, %v6980_v8  ;;  %v6988_v14 = vpop.f32.mrb[181].mxu1  ;;  %v11597_v8 = vld [vmem:[#allocation154_spill] sm:$0xff] }
 0x2ff   : > { %11591 = vst [vmem:[#allocation150_spill] sm:$0xff] %v6988_v14  ;;  %v6990_v43 = vpop.f32.mrb[182].mxu1  ;;  %v11598_v45 = vmax.f32 %v6606_v17, %v11597_v8 }
 0x300   : > { %11592 = vst [vmem:[#allocation206_spill] sm:$0xff] %v6990_v43  ;;  %v6998_v16 = vmax.f32 %v11594_v11, %v6990_v43  ;;  %v7000_v29 = vpop.f32.mrb[183].mxu1  ;;  %v11601_v11 = vld [vmem:[#allocation156_spill] sm:$0xff] }
 0x301   : > { %11595 = vst [vmem:[#allocation207_spill] sm:$0xff] %v7000_v29  ;;  %v11602_v43 = vmax.f32 %v6618_v23, %v11601_v11 }
 0x305   : > { %v7004_v19 = vpop.f32.mrb[184].mxu1 }
 0x306   : > { %11596 = vst [vmem:[#allocation208_spill] sm:$0xff] %v7004_v19  ;;  %v7010_v5 = vmax.f32 %v11598_v45, %v7004_v19  ;;  %v7012_v27 = vpop.f32.mrb[185].mxu1  ;;  %v11605_v19 = vmax.f32 %v6633_v47, %v6635_v48 }
 0x307   : > { %11599 = vst [vmem:[#allocation209_spill] sm:$0xff] %v7012_v27  ;;  %v7014_v14 = vpop.f32.mrb[186].mxu1 }
 0x308   : > { %11600 = vst [vmem:[#allocation210_spill] sm:$0xff] %v7014_v14  ;;  %v7022_v22 = vmax.f32 %v11602_v43, %v7014_v14  ;;  %v7024_v2 = vpop.f32.mrb[187].mxu1  ;;  %v11608_v43 = vmax.f32 %v6645_v30, %v6647_v1  ;;  %v11612_v30 = vmax.f32 %v6672_v15, %v6674_v49  ;;  %v11616_v15 = vmax.f32 %v6699_v53, %v6701_v52 }
 0x309   : > { %11603 = vst [vmem:[#allocation211_spill] sm:$0xff] %v7024_v2  ;;  %v11619_v53 = vmax.f32 %v6726_v63, %v6728_v56  ;;  %v11624_v63 = vmax.f32 %v6753_v6, %v6755_v24  ;;  %v11630_v6 = vmax.f32 %v6780_v54, %v6782_v57  ;;  %v11636_v54 = vmax.f32 %v6806_v60, %v6808_v58 }
 0x30a   : > { %v11642_v60 = vmax.f32 %v6830_v25, %v6832_v41  ;;  %v11648_v25 = vmax.f32 %v6854_v32, %v6856_v37  ;;  %v11654_v32 = vmax.f32 %v6878_v39, %v6880_v44  ;;  %v11660_v39 = vmax.f32 %v6902_v46, %v6904_v9  ;;  %v11667_v46 = vld [vmem:[#allocation196_spill] sm:$0xff]  ;;  %v11739_v41 = vld [vmem:[#allocation45_spill] sm:$0xff] }
 0x30d   : > { %v7028_v45 = vpop.f32.mrb[188].mxu1 }
 0x30e   : > { %11604 = vst [vmem:[#allocation212_spill] sm:$0xff] %v7028_v45  ;;  %v7034_v8 = vmax.f32 %v11605_v19, %v7028_v45  ;;  %v7036_v36 = vpop.f32.mrb[189].mxu1  ;;  %v11611_v45 = vmax.f32 %v6660_v20, %v6662_v13  ;;  %v11615_v20 = vmax.f32 %v6687_v50, %v6689_v0  ;;  %v11618_v50 = vmax.f32 %v6714_v12, %v6716_v21 }
 0x30f   : > { %11606 = vst [vmem:[#allocation213_spill] sm:$0xff] %v7036_v36  ;;  %v7038_v27 = vpop.f32.mrb[190].mxu1 }
 0x310   : > { %11607 = vst [vmem:[#allocation214_spill] sm:$0xff] %v7038_v27  ;;  %v7046_v17 = vmax.f32 %v11608_v43, %v7038_v27  ;;  %v7048_v14 = vpop.f32.mrb[191].mxu1 }
 0x311   : > { %11609 = vst [vmem:[#allocation215_spill] sm:$0xff] %v7048_v14 }
 0x315   : > { %v7052_v19 = vpop.f32.mrb[192].mxu1 }
 0x316   : > { %11610 = vst [vmem:[#allocation216_spill] sm:$0xff] %v7052_v19  ;;  %v1485_v48 = vmax.f32 %v11611_v45, %v7052_v19  ;;  %v7058_v11 = vpop.f32.mrb[193].mxu1 }
 0x317   : > { %v7060_v23 = vpop.f32.mrb[194].mxu1 }
 0x318   : > { %v1494_v43 = vmax.f32 %v11612_v30, %v7060_v23  ;;  %v7066_v27 = vpop.f32.mrb[195].mxu1  ;;  %v1486_v47 = vmax.f32 %v1485_v48, %v7058_v11 }
 0x319   : > { %11613 = vst [vmem:[#allocation217_spill] sm:$0xff] %v7066_v27 }
 0x31a   : > { %1487 = vmax.xlane.f32.xlu0 %v1486_v47  ;;  %v1495_v1 = vmax.f32 %v1494_v43, %v7066_v27 }
 0x31d   : > { %v7070_v14 = vpop.f32.mrb[196].mxu1 }
 0x31e   : > { %11614 = vst [vmem:[#allocation218_spill] sm:$0xff] %v7070_v14  ;;  %v1503_v45 = vmax.f32 %v11615_v20, %v7070_v14  ;;  %1496 = vmax.xlane.f32.xlu0 %v1495_v1  ;;  %v7076_v19 = vpop.f32.mrb[197].mxu1 }
 0x31f   : > { %v7078_v13 = vpop.f32.mrb[198].mxu1 }
 0x320   : > { %v1512_v48 = vmax.f32 %v11616_v15, %v7078_v13  ;;  %v7084_v47 = vpop.f32.mrb[199].mxu1  ;;  %v1504_v30 = vmax.f32 %v1503_v45, %v7076_v19 }
 0x322   : > { %1505 = vmax.xlane.f32.xlu1 %v1504_v30  ;;  %v1513_v43 = vmax.f32 %v1512_v48, %v7084_v47 }
 0x325   : > { %v7088_v27 = vpop.f32.mrb[200].mxu1 }
 0x326   : > { %11617 = vst [vmem:[#allocation219_spill] sm:$0xff] %v7088_v27  ;;  %v1521_v1 = vmax.f32 %v11618_v50, %v7088_v27  ;;  %1514 = vmax.xlane.f32.xlu1 %v1513_v43  ;;  %v7094_v20 = vpop.f32.mrb[201].mxu1  ;;  %v11621_v43 = vmax.f32 %v6741_v3, %v6743_v28  ;;  %v11627_v3 = vmax.f32 %v6768_v51, %v6770_v34 }
 0x327   : > { %v7096_v14 = vpop.f32.mrb[202].mxu1  ;;  %v11633_v51 = vmax.f32 %v6794_v18, %v6796_v35  ;;  %v11639_v18 = vmax.f32 %v6818_v42, %v6820_v59  ;;  %v11645_v42 = vmax.f32 %v6842_v62, %v6844_v61  ;;  %v11651_v62 = vmax.f32 %v6866_v26, %v6868_v10 }
 0x328   : > { %v1530_v45 = vmax.f32 %v11619_v53, %v7096_v14  ;;  %v7102_v15 = vpop.f32.mrb[203].mxu1  ;;  %v1522_v48 = vmax.f32 %v1521_v1, %v7094_v20  ;;  %v11657_v26 = vmax.f32 %v6890_v38, %v6892_v4  ;;  %v11663_v38 = vld [vmem:[#allocation138_spill] sm:$0xff] }
 0x32a   : > { %1523 = vmax.xlane.f32.xlu0 %v1522_v48  ;;  %v1531_v30 = vmax.f32 %v1530_v45, %v7102_v15 }
 0x32c   : > { %1532 = vmax.xlane.f32.xlu1 %v1531_v30 }
 0x32d   : > { %v7106_v12 = vpop.f32.mrb[204].mxu1 }
 0x32e   : > { %11620 = vst [vmem:[#allocation220_spill] sm:$0xff] %v7106_v12  ;;  %v1539_v50 = vmax.f32 %v11621_v43, %v7106_v12  ;;  %v7112_v27 = vpop.f32.mrb[205].mxu1 }
 0x32f   : > { %11622 = vst [vmem:[#allocation221_spill] sm:$0xff] %v7112_v27  ;;  %v7114_v21 = vpop.f32.mrb[206].mxu1 }
 0x330   : > { %11623 = vst [vmem:[#allocation222_spill] sm:$0xff] %v7114_v21  ;;  %v1548_v1 = vmax.f32 %v11624_v63, %v7114_v21  ;;  %v7120_v53 = vpop.f32.mrb[207].mxu1  ;;  %v1540_v45 = vmax.f32 %v1539_v50, %v7112_v27 }
 0x331   : > { %11625 = vst [vmem:[#allocation223_spill] sm:$0xff] %v7120_v53 }
 0x332   : > { %1541 = vmax.xlane.f32.xlu0 %v1540_v45  ;;  %v1549_v48 = vmax.f32 %v1548_v1, %v7120_v53 }
 0x334   : > { %1550 = vmax.xlane.f32.xlu1 %v1549_v48 }
 0x335   : > { %v7124_v30 = vpop.f32.mrb[208].mxu1 }
 0x336   : > { %11626 = vst [vmem:[#allocation224_spill] sm:$0xff] %v7124_v30  ;;  %v1557_v43 = vmax.f32 %v11627_v3, %v7124_v30  ;;  %v7130_v12 = vpop.f32.mrb[209].mxu1 }
 0x337   : > { %11628 = vst [vmem:[#allocation225_spill] sm:$0xff] %v7130_v12  ;;  %v7132_v28 = vpop.f32.mrb[210].mxu1 }
 0x338   : > { %11629 = vst [vmem:[#allocation226_spill] sm:$0xff] %v7132_v28  ;;  %v1566_v50 = vmax.f32 %v11630_v6, %v7132_v28  ;;  %v7138_v63 = vpop.f32.mrb[211].mxu1  ;;  %v1558_v1 = vmax.f32 %v1557_v43, %v7130_v12 }
 0x339   : > { %11631 = vst [vmem:[#allocation227_spill] sm:$0xff] %v7138_v63 }
 0x33a   : > { %1559 = vmax.xlane.f32.xlu0 %v1558_v1  ;;  %v1567_v45 = vmax.f32 %v1566_v50, %v7138_v63 }
 0x33c   : > { %1568 = vmax.xlane.f32.xlu1 %v1567_v45 }
 0x33d   : > { %v7142_v48 = vpop.f32.mrb[212].mxu1 }
 0x33e   : > { %11632 = vst [vmem:[#allocation228_spill] sm:$0xff] %v7142_v48  ;;  %v1575_v3 = vmax.f32 %v11633_v51, %v7142_v48  ;;  %v7148_v30 = vpop.f32.mrb[213].mxu1 }
 0x33f   : > { %11634 = vst [vmem:[#allocation229_spill] sm:$0xff] %v7148_v30  ;;  %v7150_v34 = vpop.f32.mrb[214].mxu1 }
 0x340   : > { %11635 = vst [vmem:[#allocation230_spill] sm:$0xff] %v7150_v34  ;;  %v1584_v43 = vmax.f32 %v11636_v54, %v7150_v34  ;;  %v7156_v6 = vpop.f32.mrb[215].mxu1  ;;  %v1576_v50 = vmax.f32 %v1575_v3, %v7148_v30  ;;  %v11750_v30 = vld [vmem:[#allocation110_spill] sm:$0xff] }
 0x341   : > { %11637 = vst [vmem:[#allocation231_spill] sm:$0xff] %v7156_v6 }
 0x342   : > { %1577 = vmax.xlane.f32.xlu0 %v1576_v50  ;;  %v1585_v1 = vmax.f32 %v1584_v43, %v7156_v6 }
 0x344   : > { %1586 = vmax.xlane.f32.xlu1 %v1585_v1 }
 0x345   : > { %v7160_v45 = vpop.f32.mrb[216].mxu1 }
 0x346   : > { %11638 = vst [vmem:[#allocation232_spill] sm:$0xff] %v7160_v45  ;;  %v1593_v51 = vmax.f32 %v11639_v18, %v7160_v45  ;;  %v7166_v48 = vpop.f32.mrb[217].mxu1 }
 0x347   : > { %11640 = vst [vmem:[#allocation233_spill] sm:$0xff] %v7166_v48  ;;  %v7168_v35 = vpop.f32.mrb[218].mxu1 }
 0x348   : > { %11641 = vst [vmem:[#allocation234_spill] sm:$0xff] %v7168_v35  ;;  %v1602_v3 = vmax.f32 %v11642_v60, %v7168_v35  ;;  %v7174_v54 = vpop.f32.mrb[219].mxu1  ;;  %v1594_v43 = vmax.f32 %v1593_v51, %v7166_v48  ;;  %v11740_v48 = vld [vmem:[#allocation108_spill] sm:$0xff] }
 0x349   : > { %11643 = vst [vmem:[#allocation235_spill] sm:$0xff] %v7174_v54 }
 0x34a   : > { %1595 = vmax.xlane.f32.xlu0 %v1594_v43  ;;  %v1603_v50 = vmax.f32 %v1602_v3, %v7174_v54 }
 0x34c   : > { %1604 = vmax.xlane.f32.xlu1 %v1603_v50 }
 0x34d   : > { %v7178_v1 = vpop.f32.mrb[220].mxu1 }
 0x34e   : > { %11644 = vst [vmem:[#allocation236_spill] sm:$0xff] %v7178_v1  ;;  %v1611_v18 = vmax.f32 %v11645_v42, %v7178_v1  ;;  %v7184_v45 = vpop.f32.mrb[221].mxu1 }
 0x34f   : > { %11646 = vst [vmem:[#allocation237_spill] sm:$0xff] %v7184_v45  ;;  %v7186_v59 = vpop.f32.mrb[222].mxu1 }
 0x350   : > { %11647 = vst [vmem:[#allocation238_spill] sm:$0xff] %v7186_v59  ;;  %v1620_v51 = vmax.f32 %v11648_v25, %v7186_v59  ;;  %v7192_v60 = vpop.f32.mrb[223].mxu1  ;;  %v1612_v3 = vmax.f32 %v1611_v18, %v7184_v45 }
 0x351   : > { %11649 = vst [vmem:[#allocation239_spill] sm:$0xff] %v7192_v60 }
 0x352   : > { %1613 = vmax.xlane.f32.xlu0 %v1612_v3  ;;  %v1621_v43 = vmax.f32 %v1620_v51, %v7192_v60 }
 0x354   : > { %1622 = vmax.xlane.f32.xlu1 %v1621_v43 }
 0x355   : > { %v7196_v50 = vpop.f32.mrb[224].mxu1 }
 0x356   : > { %11650 = vst [vmem:[#allocation240_spill] sm:$0xff] %v7196_v50  ;;  %v1629_v42 = vmax.f32 %v11651_v62, %v7196_v50  ;;  %v7202_v1 = vpop.f32.mrb[225].mxu1 }
 0x357   : > { %11652 = vst [vmem:[#allocation241_spill] sm:$0xff] %v7202_v1  ;;  %v7204_v61 = vpop.f32.mrb[226].mxu1 }
 0x358   : > { %11653 = vst [vmem:[#allocation242_spill] sm:$0xff] %v7204_v61  ;;  %v1638_v18 = vmax.f32 %v11654_v32, %v7204_v61  ;;  %v7210_v25 = vpop.f32.mrb[227].mxu1  ;;  %v1630_v51 = vmax.f32 %v1629_v42, %v7202_v1 }
 0x359   : > { %11655 = vst [vmem:[#allocation243_spill] sm:$0xff] %v7210_v25 }
 0x35a   : > { %1631 = vmax.xlane.f32.xlu0 %v1630_v51  ;;  %v1639_v3 = vmax.f32 %v1638_v18, %v7210_v25 }
 0x35c   : > { %1640 = vmax.xlane.f32.xlu1 %v1639_v3 }
 0x35d   : > { %v7214_v43 = vpop.f32.mrb[228].mxu1 }
 0x35e   : > { %11656 = vst [vmem:[#allocation244_spill] sm:$0xff] %v7214_v43  ;;  %v1647_v62 = vmax.f32 %v11657_v26, %v7214_v43  ;;  %v7220_v50 = vpop.f32.mrb[229].mxu1  ;;  %v11664_v26 = vmax.f32 %v6914_v31, %v11663_v38  ;;  %v11672_v31 = vld [vmem:[#allocation142_spill] sm:$0xff] }
 0x35f   : > { %11658 = vst [vmem:[#allocation245_spill] sm:$0xff] %v7220_v50  ;;  %v7222_v10 = vpop.f32.mrb[230].mxu1 }
 0x360   : > { %11659 = vst [vmem:[#allocation246_spill] sm:$0xff] %v7222_v10  ;;  %v1656_v42 = vmax.f32 %v11660_v39, %v7222_v10  ;;  %v7228_v32 = vpop.f32.mrb[231].mxu1  ;;  %v1648_v18 = vmax.f32 %v1647_v62, %v7220_v50  ;;  %v11668_v39 = vld [vmem:[#allocation197_spill] sm:$0xff] }
 0x361   : > { %11661 = vst [vmem:[#allocation247_spill] sm:$0xff] %v7228_v32  ;;  %v11669_v10 = vmax.f32 %v11667_v46, %v11668_v39  ;;  %v11677_v46 = vld [vmem:[#allocation201_spill] sm:$0xff] }
 0x362   : > { %1649 = vmax.xlane.f32.xlu0 %v1648_v18  ;;  %v1657_v51 = vmax.f32 %v1656_v42, %v7228_v32 }
 0x364   : > { %1658 = vmax.xlane.f32.xlu1 %v1657_v51 }
 0x365   : > { %v7232_v3 = vpop.f32.mrb[232].mxu1 }
 0x366   : > { %11662 = vst [vmem:[#allocation248_spill] sm:$0xff] %v7232_v3  ;;  %v1665_v43 = vmax.f32 %v11664_v26, %v7232_v3  ;;  %v7238_v4 = vpop.f32.mrb[233].mxu1  ;;  %v11673_v26 = vmax.f32 %v6938_v55, %v11672_v31  ;;  %v11681_v55 = vld [vmem:[#allocation146_spill] sm:$0xff] }
 0x367   : > { %11665 = vst [vmem:[#allocation249_spill] sm:$0xff] %v7238_v4  ;;  %v7240_v25 = vpop.f32.mrb[234].mxu1 }
 0x368   : > { %11666 = vst [vmem:[#allocation250_spill] sm:$0xff] %v7240_v25  ;;  %v1674_v62 = vmax.f32 %v11669_v10, %v7240_v25  ;;  %v7246_v18 = vpop.f32.mrb[235].mxu1  ;;  %v1666_v42 = vmax.f32 %v1665_v43, %v7238_v4  ;;  %v11676_v10 = vld [vmem:[#allocation200_spill] sm:$0xff] }
 0x369   : > { %11670 = vst [vmem:[#allocation196_spill] sm:$0xff] %v7246_v18  ;;  %v11678_v25 = vmax.f32 %v11676_v10, %v11677_v46 }
 0x36a   : > { %1667 = vmax.xlane.f32.xlu0 %v1666_v42  ;;  %v1675_v51 = vmax.f32 %v1674_v62, %v7246_v18 }
 0x36c   : > { %1676 = vmax.xlane.f32.xlu1 %v1675_v51 }
 0x36d   : > { %v7250_v32 = vpop.f32.mrb[236].mxu1 }
 0x36e   : > { %11671 = vst [vmem:[#allocation251_spill] sm:$0xff] %v7250_v32  ;;  %v1683_v3 = vmax.f32 %v11673_v26, %v7250_v32  ;;  %v7256_v38 = vpop.f32.mrb[237].mxu1  ;;  %v11682_v26 = vmax.f32 %v6962_v7, %v11681_v55  ;;  %v11689_v7 = vld [vmem:[#allocation150_spill] sm:$0xff] }
 0x36f   : > { %11674 = vst [vmem:[#allocation252_spill] sm:$0xff] %v7256_v38  ;;  %v7258_v9 = vpop.f32.mrb[238].mxu1 }
 0x370   : > { %11675 = vst [vmem:[#allocation253_spill] sm:$0xff] %v7258_v9  ;;  %v1692_v43 = vmax.f32 %v11678_v25, %v7258_v9  ;;  %v7264_v42 = vpop.f32.mrb[239].mxu1  ;;  %v1684_v62 = vmax.f32 %v1683_v3, %v7256_v38  ;;  %v11685_v25 = vld [vmem:[#allocation204_spill] sm:$0xff] }
 0x371   : > { %11679 = vst [vmem:[#allocation200_spill] sm:$0xff] %v7264_v42  ;;  %v11686_v10 = vmax.f32 %v6974_v33, %v11685_v25 }
 0x372   : > { %1685 = vmax.xlane.f32.xlu0 %v1684_v62  ;;  %v1693_v51 = vmax.f32 %v1692_v43, %v7264_v42 }
 0x374   : > { %1694 = vmax.xlane.f32.xlu1 %v1693_v51 }
 0x375   : > { %v7268_v18 = vpop.f32.mrb[240].mxu1 }
 0x376   : > { %11680 = vst [vmem:[#allocation254_spill] sm:$0xff] %v7268_v18  ;;  %v1701_v32 = vmax.f32 %v11682_v26, %v7268_v18  ;;  %v7274_v31 = vpop.f32.mrb[241].mxu1  ;;  %v11690_v26 = vmax.f32 %v6986_v40, %v11689_v7 }
 0x377   : > { %11683 = vst [vmem:[#allocation255_spill] sm:$0xff] %v7274_v31  ;;  %v7276_v39 = vpop.f32.mrb[242].mxu1 }
 0x378   : > { %11684 = vst [vmem:[#allocation256_spill] sm:$0xff] %v7276_v39  ;;  %v1710_v3 = vmax.f32 %v11686_v10, %v7276_v39  ;;  %v7282_v62 = vpop.f32.mrb[243].mxu1  ;;  %v1702_v43 = vmax.f32 %v1701_v32, %v7274_v31  ;;  %v11693_v32 = vmax.f32 %v6998_v16, %v7000_v29  ;;  %v11714_v39 = vld [vmem:[#allocation35_spill] sm:$0xff] }
 0x379   : > { %11687 = vst [vmem:[#allocation257_spill] sm:$0xff] %v7282_v62 }
 0x37a   : > { %1703 = vmax.xlane.f32.xlu0 %v1702_v43  ;;  %v1711_v51 = vmax.f32 %v1710_v3, %v7282_v62 }
 0x37c   : > { %1712 = vmax.xlane.f32.xlu1 %v1711_v51 }
 0x37d   : > { %v7286_v42 = vpop.f32.mrb[244].mxu1 }
 0x37e   : > { %11688 = vst [vmem:[#allocation258_spill] sm:$0xff] %v7286_v42  ;;  %v7292_v18 = vmax.f32 %v11690_v26, %v7286_v42  ;;  %v7294_v55 = vpop.f32.mrb[245].mxu1  ;;  %v11696_v26 = vld [vmem:[#allocation209_spill] sm:$0xff] }
 0x37f   : > { %11691 = vst [vmem:[#allocation259_spill] sm:$0xff] %v7294_v55  ;;  %v7296_v33 = vpop.f32.mrb[246].mxu1  ;;  %v11697_v42 = vmax.f32 %v7010_v5, %v11696_v26 }
 0x380   : > { %11692 = vst [vmem:[#allocation260_spill] sm:$0xff] %v7296_v33  ;;  %v7302_v10 = vmax.f32 %v11693_v32, %v7296_v33  ;;  %v7304_v3 = vpop.f32.mrb[247].mxu1  ;;  %v11701_v32 = vmax.f32 %v7022_v22, %v7024_v2 }
 0x381   : > { %11694 = vst [vmem:[#allocation261_spill] sm:$0xff] %v7304_v3 }
 0x385   : > { %v7310_v51 = vpop.f32.mrb[248].mxu1 }
 0x386   : > { %11695 = vst [vmem:[#allocation262_spill] sm:$0xff] %v7310_v51  ;;  %v7316_v7 = vmax.f32 %v11697_v42, %v7310_v51  ;;  %v7318_v62 = vpop.f32.mrb[249].mxu1  ;;  %v11705_v51 = vmax.f32 %v7034_v8, %v7036_v36  ;;  %v11717_v8 = vld [vmem:[#allocation32_spill] sm:$0xff] }
 0x387   : > { %11699 = vst [vmem:[#allocation264_spill] sm:$0xff] %v7318_v62  ;;  %v7320_v16 = vpop.f32.mrb[250].mxu1 }
 0x388   : > { %11698 = vst [vmem:[#allocation263_spill] sm:$0xff] %v7316_v7  ;;  %11700 = vst [vmem:[#allocation265_spill] sm:$0xff] %v7320_v16  ;;  %v7326_v43 = vmax.f32 %v11701_v32, %v7320_v16  ;;  %v7328_v33 = vpop.f32.mrb[251].mxu1  ;;  %v11709_v32 = vld [vmem:[#allocation215_spill] sm:$0xff] }
 0x389   : > { %11703 = vst [vmem:[#allocation267_spill] sm:$0xff] %v7328_v33  ;;  %v11710_v16 = vmax.f32 %v7046_v17, %v11709_v32  ;;  %v11715_v17 = vld [vmem:[#allocation98_spill] sm:$0xff] }
 0x38a   : > { %11702 = vst [vmem:[#allocation266_spill] sm:$0xff] %v7326_v43  ;;  %v11769_v43 = vld [vmem:[#allocation109_spill] sm:$0xff] }
 0x38d   : > { %v7334_v42 = vpop.f32.mrb[252].mxu1 }
 0x38e   : > { %11704 = vst [vmem:[#allocation268_spill] sm:$0xff] %v7334_v42  ;;  %v7340_v26 = vmax.f32 %v11705_v51, %v7334_v42  ;;  %v7342_v29 = vpop.f32.mrb[253].mxu1  ;;  %v11713_v42 = vld [vmem:[#allocation34_spill] sm:$0xff] }
 0x38f   : > { %11707 = vst [vmem:[#allocation270_spill] sm:$0xff] %v7342_v29  ;;  %v7344_v22 = vpop.f32.mrb[254].mxu1  ;;  %v11756_v29 = vld [vmem:[#allocation105_spill] sm:$0xff] }
 0x390   : > { %11706 = vst [vmem:[#allocation269_spill] sm:$0xff] %v7340_v26  ;;  %11708 = vst [vmem:[#allocation271_spill] sm:$0xff] %v7344_v22  ;;  %v7350_v40 = vmax.f32 %v11710_v16, %v7344_v22  ;;  %v7352_v2 = vpop.f32.mrb[255].mxu1  ;;  %v11716_v22 = vld [vmem:[#allocation99_spill] sm:$0xff] }
 0x391   : > { %11712 = vst [vmem:[#allocation273_spill] sm:$0xff] %v7352_v2 }
 0x392   : > { %11711 = vst [vmem:[#allocation272_spill] sm:$0xff] %v7350_v40 }
 0x3a7   : > { %v7358_v51 = vpop.xlane.xlu0 %1487 }
 0x3a8   : > { %v1768_v36 = vsub.f32 %v11713_v42, %v7358_v51  ;;  %v1769_v25 = vsub.f32 %v11714_v39, %v7358_v51  ;;  %v1770_v16 = vsub.f32 %v11715_v17, %v7358_v51  ;;  %v1771_v32 = vsub.f32 %v11716_v22, %v7358_v51  ;;  %v11718_v42 = vld [vmem:[#allocation36_spill] sm:$0xff]  ;;  %v11719_v39 = vld [vmem:[#allocation37_spill] sm:$0xff] }
 0x3a9   : > { %v1772_v38 = vsub.f32 %v11717_v8, %v7358_v51  ;;  %v11720_v17 = vld [vmem:[#allocation100_spill] sm:$0xff] }
 0x3aa   : > { %v2024_v31 = vmul.f32 1.442695, %v1768_v36  ;;  %v2026_v9 = vmul.f32 1.442695, %v1769_v25  ;;  %v2028_v5 = vmul.f32 1.442695, %v1770_v16 }
 0x3ab   : > { %v7368_v46 = vpop.xlane.xlu0 %1496  ;;  %v2030_v4 = vmul.f32 1.442695, %v1771_v32  ;;  %v11721_v8 = vld [vmem:[#allocation160_spill] sm:$0xff]  ;;  %v2032_v1 = vmul.f32 1.442695, %v1772_v38 }
 0x3ac   : > { %v1776_v50 = vsub.f32 %v11718_v42, %v7368_v46  ;;  %v1777_v61 = vsub.f32 %v11719_v39, %v7368_v46  ;;  %v1778_v44 = vsub.f32 %v11720_v17, %v7368_v46  ;;  %4649 = vpow2.f32 %v2024_v31  ;;  %v11722_v42 = vld [vmem:[#allocation38_spill] sm:$0xff]  ;;  %v11723_v39 = vld [vmem:[#allocation39_spill] sm:$0xff]  ;;  %v11725_v38 = vld [vmem:[#allocation40_spill] sm:$0xff] }
 0x3ad   : > { %4651 = vpow2.f32 %v2026_v9  ;;  %v1773_v32 = vsub.f32 %v11721_v8, %v7358_v51  ;;  %v11724_v17 = vld [vmem:[#allocation102_spill] sm:$0xff] }
 0x3ae   : > { %v2040_v36 = vmul.f32 1.442695, %v1776_v50  ;;  %v2042_v25 = vmul.f32 1.442695, %v1777_v61  ;;  %4653 = vpow2.f32 %v2028_v5  ;;  %v2044_v22 = vmul.f32 1.442695, %v1778_v44 }
 0x3af   : > { %v7378_v16 = vpop.xlane.xlu1 %1505  ;;  %4655 = vpow2.f32 %v2030_v4  ;;  %v2034_v5 = vmul.f32 1.442695, %v1773_v32  ;;  %v11730_v32 = vld [vmem:[#allocation42_spill] sm:$0xff] }
 0x3b0   : > { %v1784_v60 = vsub.f32 %v11722_v42, %v7378_v16  ;;  %v1785_v59 = vsub.f32 %v11723_v39, %v7378_v16  ;;  %v1786_v31 = vsub.f32 %v11724_v17, %v7378_v16  ;;  %4657 = vpow2.f32 %v2040_v36  ;;  %v11726_v42 = vld [vmem:[#allocation41_spill] sm:$0xff]  ;;  %v11727_v39 = vld [vmem:[#allocation104_spill] sm:$0xff] }
 0x3b1   : > { %4659 = vpow2.f32 %v2042_v25 }
 0x3b2   : > { %v2056_v9 = vmul.f32 1.442695, %v1784_v60  ;;  %v2058_v44 = vmul.f32 1.442695, %v1785_v59  ;;  %4661 = vpow2.f32 %v2044_v22  ;;  %v2060_v61 = vmul.f32 1.442695, %v1786_v31 }
 0x3b3   : > { %v7388_v50 = vpop.xlane.xlu1 %1514  ;;  %4663 = vpow2.f32 %v2032_v1  ;;  %v11731_v31 = vld [vmem:[#allocation43_spill] sm:$0xff]  ;;  %v11732_v1 = vld [vmem:[#allocation106_spill] sm:$0xff] }
 0x3b4   : > { %v1792_v8 = vsub.f32 %v11725_v38, %v7388_v50  ;;  %v1793_v37 = vsub.f32 %v11726_v42, %v7388_v50  ;;  %v1794_v45 = vsub.f32 %v11727_v39, %v7388_v50  ;;  %4665 = vpow2.f32 %v2056_v9  ;;  %v11736_v39 = vld [vmem:[#allocation101_spill] sm:$0xff] }
 0x3b5   : > { %4667 = vpow2.f32 %v2058_v44  ;;  %v1795_v26 = vsub.f32 %v11756_v29, %v7388_v50 }
 0x3b6   : > { %v2072_v4 = vmul.f32 1.442695, %v1792_v8  ;;  %v2074_v60 = vmul.f32 1.442695, %v1793_v37  ;;  %v7396_v59 = vpop.eup %4649  ;;  %4669 = vpow2.f32 %v2060_v61  ;;  %v2076_v36 = vmul.f32 1.442695, %v1794_v45 }
 0x3b7   : > { %11728 = vst [vmem:[#allocation34_spill] sm:$0xff] %v7396_v59  ;;  %v7398_v25 = vpop.xlane.xlu0 %1523  ;;  %v7400_v22 = vpop.eup %4651  ;;  %4671 = vpow2.f32 %v2034_v5  ;;  %v11734_v45 = vld [vmem:[#allocation216_spill] sm:$0xff]  ;;  %v1775_v8 = vsub.f32 %v7058_v11, %v7358_v51 }
 0x3b8   : > { %11729 = vst [vmem:[#allocation35_spill] sm:$0xff] %v7400_v22  ;;  %v1800_v17 = vsub.f32 %v11730_v32, %v7398_v25  ;;  %v1801_v38 = vsub.f32 %v11731_v31, %v7398_v25  ;;  %v1802_v9 = vsub.f32 %v11732_v1, %v7398_v25  ;;  %v7408_v44 = vpop.eup %4653  ;;  %4673 = vpow2.f32 %v2072_v4  ;;  %v11738_v4 = vld [vmem:[#allocation44_spill] sm:$0xff] }
 0x3b9   : > { %11733 = vst [vmem:[#allocation98_spill] sm:$0xff] %v7408_v44  ;;  %v7410_v37 = vpop.xlane.xlu1 %1532  ;;  %v1774_v61 = vsub.f32 %v11734_v45, %v7358_v51  ;;  %v7416_v42 = vpop.eup %4655  ;;  %v1779_v32 = vsub.f32 %v11736_v39, %v7368_v46  ;;  %4675 = vpow2.f32 %v2074_v60 }
 0x3ba   : > { %11735 = vst [vmem:[#allocation99_spill] sm:$0xff] %v7416_v42  ;;  %v2088_v31 = vmul.f32 1.442695, %v1800_v17  ;;  %v2090_v1 = vmul.f32 1.442695, %v1801_v38  ;;  %v7420_v5 = vpop.eup %4657  ;;  %v1808_v35 = vsub.f32 %v11738_v4, %v7410_v37  ;;  %v1809_v45 = vsub.f32 %v11739_v41, %v7410_v37  ;;  %v11744_v41 = vld [vmem:[#allocation161_spill] sm:$0xff] }
 0x3bb   : > { %11737 = vst [vmem:[#allocation32_spill] sm:$0xff] %v7420_v5  ;;  %v2092_v54 = vmul.f32 1.442695, %v1802_v9  ;;  %v1810_v11 = vsub.f32 %v11740_v48, %v7410_v37  ;;  %v7428_v51 = vpop.eup %4659  ;;  %4677 = vpow2.f32 %v2076_v36  ;;  %v7432_v38 = vmul.f32 1.442695, %v1774_v61  ;;  %v11746_v36 = vld [vmem:[#allocation103_spill] sm:$0xff] }
 0x3bc   : > { %11741 = vst [vmem:[#allocation36_spill] sm:$0xff] %v7428_v51  ;;  %v7430_v6 = vpop.eup %4661  ;;  %4679 = vpow2.f32 %v2088_v31  ;;  %v2104_v60 = vmul.f32 1.442695, %v1808_v35  ;;  %v2106_v17 = vmul.f32 1.442695, %v1809_v45  ;;  %v1780_v48 = vsub.f32 %v11744_v41, %v7368_v46  ;;  %v11749_v45 = vld [vmem:[#allocation47_spill] sm:$0xff] }
 0x3bd   : > { %11742 = vst [vmem:[#allocation37_spill] sm:$0xff] %v7430_v6  ;;  %v7434_v9 = vpop.eup %4663  ;;  %v7436_v39 = vmul.f32 1.442695, %v1779_v32  ;;  %4681 = vpow2.f32 %v2090_v1  ;;  %v7438_v4 = vmul.f32 1.442695, %v1775_v8  ;;  %v1787_v58 = vsub.f32 %v11746_v36, %v7378_v16  ;;  %v11748_v8 = vld [vmem:[#allocation46_spill] sm:$0xff] }
 0x3be   : > { %11743 = vst [vmem:[#allocation100_spill] sm:$0xff] %v7434_v9  ;;  %v7442_v34 = vpop.eup %4665  ;;  %4683 = vpow2.f32 %v2092_v54  ;;  %v2108_v35 = vmul.f32 1.442695, %v1810_v11  ;;  %v1781_v61 = vsub.f32 %v6674_v49, %v7368_v46  ;;  %v2536_v49 = vadd.f32 %v7400_v22, %v7396_v59  ;;  %v11757_v59 = vld [vmem:[#allocation49_spill] sm:$0xff]  ;;  %v11758_v22 = vld [vmem:[#allocation112_spill] sm:$0xff] }
 0x3bf   : > { %11745 = vst [vmem:[#allocation160_spill] sm:$0xff] %v7442_v34  ;;  %v7446_v31 = vpop.xlane.xlu0 %1541  ;;  %v7450_v32 = vpop.eup %4667  ;;  %4685 = vpow2.f32 %v2104_v60  ;;  %v1782_v11 = vsub.f32 %v7060_v23, %v7368_v46  ;;  %v11752_v60 = vld [vmem:[#allocation217_spill] sm:$0xff] }
 0x3c0   : > { %11747 = vst [vmem:[#allocation38_spill] sm:$0xff] %v7450_v32  ;;  %v1816_v1 = vsub.f32 %v11748_v8, %v7446_v31  ;;  %v1817_v41 = vsub.f32 %v11749_v45, %v7446_v31  ;;  %v1818_v2 = vsub.f32 %v11750_v30, %v7446_v31  ;;  %v7458_v36 = vpop.eup %4669  ;;  %4687 = vpow2.f32 %v2106_v17  ;;  %v11754_v30 = vld [vmem:[#allocation48_spill] sm:$0xff] }
 0x3c1   : > { %11751 = vst [vmem:[#allocation39_spill] sm:$0xff] %v7458_v36  ;;  %v7460_v54 = vpop.xlane.xlu1 %1550  ;;  %v1783_v8 = vsub.f32 %v11752_v60, %v7368_v46  ;;  %v7468_v40 = vpop.eup %4671  ;;  %4689 = vpow2.f32 %v2108_v35  ;;  %v2537_v29 = vadd.f32 %v7408_v44, %v2536_v49  ;;  %v7491_v33 = vmul.f32 1.442695, %v1782_v11  ;;  %v11768_v44 = vld [vmem:[#allocation107_spill] sm:$0xff] }
 0x3c2   : > { %11753 = vst [vmem:[#allocation102_spill] sm:$0xff] %v7468_v40  ;;  %v2120_v45 = vmul.f32 1.442695, %v1816_v1  ;;  %v2122_v63 = vmul.f32 1.442695, %v1817_v41  ;;  %v1824_v57 = vsub.f32 %v11754_v30, %v7460_v54  ;;  %v7472_v17 = vpop.eup %4673  ;;  %v1825_v23 = vsub.f32 %v11757_v59, %v7460_v54 }
 0x3c3   : > { %v2124_v28 = vmul.f32 1.442695, %v1818_v2  ;;  %11755 = vst [vmem:[#allocation40_spill] sm:$0xff] %v7472_v17  ;;  %v1826_v46 = vsub.f32 %v11758_v22, %v7460_v54  ;;  %v7480_v60 = vpop.eup %4675  ;;  %v7482_v1 = vmul.f32 1.442695, %v1787_v58  ;;  %v1789_v49 = vsub.f32 %v6689_v0, %v7378_v16 }
 0x3c4   : > { %11759 = vst [vmem:[#allocation41_spill] sm:$0xff] %v7480_v60  ;;  %4691 = vpow2.f32 %v2120_v45  ;;  %v2136_v2 = vmul.f32 1.442695, %v1824_v57  ;;  %v7484_v41 = vmul.f32 1.442695, %v1780_v48  ;;  %v1811_v0 = vsub.f32 %v11769_v43, %v7410_v37 }
 0x3c5   : > { %4693 = vpow2.f32 %v2122_v63  ;;  %v2138_v30 = vmul.f32 1.442695, %v1825_v23  ;;  %v2140_v12 = vmul.f32 1.442695, %v1826_v46  ;;  %v7487_v35 = vpop.eup %4677  ;;  %v7489_v59 = vmul.f32 1.442695, %v1781_v61 }
 0x3c6   : > { %11760 = vst [vmem:[#allocation104_spill] sm:$0xff] %v7487_v35  ;;  %4695 = vpow2.f32 %v2124_v28  ;;  %v7493_v22 = vmul.f32 1.442695, %v1783_v8  ;;  %v7495_v58 = vpop.eup %4679  ;;  %v7497_v45 = vmul.f32 1.442695, %v1795_v26  ;;  %v11762_v63 = vld [vmem:[#allocation33_spill] sm:$0xff] }
 0x3c7   : > { %11761 = vst [vmem:[#allocation42_spill] sm:$0xff] %v7495_v58  ;;  %4697 = vpow2.f32 %v2136_v2  ;;  %v7499_v57 = vpop.xlane.xlu0 %1559  ;;  %v1788_v48 = vsub.f32 %v11762_v63, %v7378_v16  ;;  %v7505_v28 = vpop.eup %4681  ;;  %v11764_v61 = vld [vmem:[#allocation50_spill] sm:$0xff]  ;;  %v11765_v8 = vld [vmem:[#allocation51_spill] sm:$0xff]  ;;  %v1803_v63 = vsub.f32 %v11768_v44, %v7398_v25  ;;  %v11772_v44 = vld [vmem:[#allocation52_spill] sm:$0xff] }
 0x3c8   : > { %11763 = vst [vmem:[#allocation43_spill] sm:$0xff] %v7505_v28  ;;  %4699 = vpow2.f32 %v2138_v30  ;;  %v1832_v11 = vsub.f32 %v11764_v61, %v7499_v57  ;;  %v1833_v23 = vsub.f32 %v11765_v8, %v7499_v57  ;;  %v11766_v26 = vld [vmem:[#allocation114_spill] sm:$0xff]  ;;  %v7513_v2 = vpop.eup %4683  ;;  %v2538_v30 = vadd.f32 %v7416_v42, %v2537_v29  ;;  %v11774_v42 = vld [vmem:[#allocation111_spill] sm:$0xff] }
 0x3c9   : > { %v1834_v46 = vsub.f32 %v11766_v26, %v7499_v57  ;;  %11767 = vst [vmem:[#allocation106_spill] sm:$0xff] %v7513_v2  ;;  %4701 = vpow2.f32 %v2140_v12  ;;  %v7520_v53 = vpop.xlane.xlu1 %1568  ;;  %v7522_v61 = vpop.eup %4685  ;;  %v11773_v12 = vld [vmem:[#allocation53_spill] sm:$0xff]  ;;  %v2545_v29 = vadd.f32 %v7428_v51, %v7420_v5  ;;  %v1819_v7 = vsub.f32 %v11774_v42, %v7446_v31 }
 0x3ca   : > { %11770 = vst [vmem:[#allocation216_spill] sm:$0xff] %v7522_v61  ;;  %4703 = vpow2.f32 %v7432_v38  ;;  %v2152_v8 = vmul.f32 1.442695, %v1832_v11  ;;  %v2154_v21 = vmul.f32 1.442695, %v1833_v23  ;;  %v7525_v24 = vpop.eup %4687  ;;  %v1840_v62 = vsub.f32 %v11772_v44, %v7520_v53  ;;  %v11775_v38 = vld [vmem:[#allocation116_spill] sm:$0xff] }
 0x3cb   : > { %v2156_v26 = vmul.f32 1.442695, %v1834_v46  ;;  %11771 = vst [vmem:[#allocation101_spill] sm:$0xff] %v7525_v24  ;;  %4705 = vpow2.f32 %v7438_v4  ;;  %v1841_v43 = vsub.f32 %v11773_v12, %v7520_v53  ;;  %v1842_v11 = vsub.f32 %v11775_v38, %v7520_v53  ;;  %v11776_v23 = vld [vmem:[#allocation218_spill] sm:$0xff]  ;;  %v7540_v4 = vpop.eup %4689  ;;  %v11779_v5 = vld [vmem:[#allocation113_spill] sm:$0xff] }
 0x3cc   : > { %4707 = vpow2.f32 %v2152_v8  ;;  %v1790_v46 = vsub.f32 %v11776_v23, %v7378_v16  ;;  %11777 = vst [vmem:[#allocation44_spill] sm:$0xff] %v7540_v4  ;;  %v2539_v44 = vadd.f32 %v7434_v9, %v2538_v30  ;;  %v2168_v27 = vmul.f32 1.442695, %v1840_v62 }
 0x3cd   : > { %4709 = vpow2.f32 %v2154_v21  ;;  %v2170_v12 = vmul.f32 1.442695, %v1841_v43  ;;  %v1827_v51 = vsub.f32 %v11779_v5, %v7460_v54  ;;  %v2172_v42 = vmul.f32 1.442695, %v1842_v11 }
 0x3ce   : > { %v7543_v3 = vpop.eup %4691  ;;  %4711 = vpow2.f32 %v2156_v26  ;;  %v1791_v8 = vsub.f32 %v7076_v19, %v7378_v16  ;;  %v7551_v23 = vmul.f32 1.442695, %v1803_v63  ;;  %v7553_v4 = vmul.f32 1.442695, %v1811_v0 }
 0x3cf   : > { %11778 = vst [vmem:[#allocation45_spill] sm:$0xff] %v7543_v3  ;;  %v7549_v38 = vpop.eup %4693  ;;  %4713 = vpow2.f32 %v2168_v27  ;;  %v7556_v21 = vadd.f32 %v7430_v6, %v2545_v29  ;;  %v2064_v30 = vmul.f32 1.442695, %v1788_v48  ;;  %v2066_v5 = vmul.f32 1.442695, %v1789_v49  ;;  %v7567_v27 = vpop.xlane.xlu0 %1577  ;;  %v11785_v49 = vld [vmem:[#allocation162_spill] sm:$0xff] }
 0x3d0   : > { %11780 = vst [vmem:[#allocation108_spill] sm:$0xff] %v7549_v38  ;;  %v7558_v62 = vpop.eup %4695  ;;  %4715 = vpow2.f32 %v2170_v12  ;;  %v2068_v26 = vmul.f32 1.442695, %v1790_v46  ;;  %v7562_v11 = vmul.f32 1.442695, %v1819_v7  ;;  %v2540_v19 = vadd.f32 %v7468_v40, %v2539_v44  ;;  %11783 = vst [vmem:[#allocation46_spill] sm:$0xff] %v7567_v27 }
 0x3d1   : > { %11781 = vst [vmem:[#allocation161_spill] sm:$0xff] %v7558_v62  ;;  %v7560_v43 = vpop.eup %4697  ;;  %4717 = vpow2.f32 %v2172_v42  ;;  %v2554_v16 = vadd.f32 %v7450_v32, %v7442_v34  ;;  %v7571_v0 = vmul.f32 1.442695, %v1827_v51  ;;  %v2070_v48 = vmul.f32 1.442695, %v1791_v8  ;;  %v11787_v46 = vld [vmem:[#allocation115_spill] sm:$0xff] }
 0x3d2   : > { %11782 = vst [vmem:[#allocation103_spill] sm:$0xff] %v7560_v43  ;;  %v7569_v63 = vpop.eup %4699  ;;  %4719 = vpow2.f32 %v7436_v39  ;;  %v1796_v29 = vsub.f32 %v11785_v49, %v7388_v50  ;;  %v1835_v44 = vsub.f32 %v11787_v46, %v7499_v57  ;;  %v1797_v12 = vsub.f32 %v6701_v52, %v7388_v50  ;;  %v11789_v39 = vld [vmem:[#allocation54_spill] sm:$0xff]  ;;  %v7590_v49 = vpop.xlane.xlu1 %1586  ;;  %v11794_v6 = vld [vmem:[#allocation117_spill] sm:$0xff] }
 0x3d3   : > { %11784 = vst [vmem:[#allocation47_spill] sm:$0xff] %v7569_v63  ;;  %v7576_v7 = vpop.eup %4701  ;;  %4721 = vpow2.f32 %v7484_v41  ;;  %v1798_v51 = vsub.f32 %v7078_v13, %v7388_v50  ;;  %v1848_v8 = vsub.f32 %v11789_v39, %v7567_v27  ;;  %11790 = vst [vmem:[#allocation48_spill] sm:$0xff] %v7590_v49  ;;  %v1799_v46 = vsub.f32 %v7084_v47, %v7388_v50  ;;  %v11795_v50 = vld [vmem:[#allocation118_spill] sm:$0xff] }
 0x3d4   : > { %11786 = vst [vmem:[#allocation110_spill] sm:$0xff] %v7576_v7  ;;  %v7585_v42 = vpop.eup %4703  ;;  %4723 = vpow2.f32 %v7489_v59  ;;  %v2563_v41 = vadd.f32 %v7480_v60, %v7472_v17  ;;  %v7601_v13 = vadd.f32 %v7458_v36, %v2554_v16  ;;  %v11792_v59 = vld [vmem:[#allocation55_spill] sm:$0xff]  ;;  %v1843_v47 = vsub.f32 %v11794_v6, %v7520_v53 }
 0x3d5   : > { %11788 = vst [vmem:[#allocation217_spill] sm:$0xff] %v7585_v42  ;;  %v7596_v9 = vpop.eup %4705  ;;  %v2541_v52 = vadd.f32 %v7585_v42, %v2540_v19  ;;  %4725 = vpow2.f32 %v7491_v33  ;;  %v1849_v39 = vsub.f32 %v11792_v59, %v7567_v27  ;;  %v1850_v17 = vsub.f32 %v11795_v50, %v7567_v27  ;;  %v11798_v59 = vld [vmem:[#allocation56_spill] sm:$0xff] }
 0x3d6   : > { %11791 = vst [vmem:[#allocation105_spill] sm:$0xff] %v7596_v9  ;;  %v7605_v40 = vpop.eup %4707  ;;  %4727 = vpow2.f32 %v7493_v22  ;;  %v7612_v60 = vmul.f32 1.442695, %v1796_v29  ;;  %v7617_v16 = vmul.f32 1.442695, %v1835_v44  ;;  %v1856_v42 = vsub.f32 %v11798_v59, %v7590_v49  ;;  %v11800_v22 = vld [vmem:[#allocation57_spill] sm:$0xff] }
 0x3d7   : > { %11793 = vst [vmem:[#allocation49_spill] sm:$0xff] %v7605_v40  ;;  %v7614_v19 = vpop.eup %4709  ;;  %v2542_v33 = vadd.f32 %v7596_v9, %v2541_v52  ;;  %4729 = vpow2.f32 %v7482_v1  ;;  %v2184_v6 = vmul.f32 1.442695, %v1848_v8  ;;  %v1857_v50 = vsub.f32 %v11800_v22, %v7590_v49  ;;  %v11802_v44 = vld [vmem:[#allocation120_spill] sm:$0xff] }
 0x3d8   : > { %11796 = vst [vmem:[#allocation112_spill] sm:$0xff] %v7614_v19  ;;  %11797 = vst [vmem:[#allocation33_spill] sm:$0xff] %v7617_v16  ;;  %v7622_v36 = vpop.eup %4711  ;;  %4731 = vpow2.f32 %v2064_v30  ;;  %v2082_v29 = vmul.f32 1.442695, %v1797_v12  ;;  %v2186_v52 = vmul.f32 1.442695, %v1849_v39  ;;  %v1858_v9 = vsub.f32 %v11802_v44, %v7590_v49 }
 0x3d9   : > { %11799 = vst [vmem:[#allocation50_spill] sm:$0xff] %v7622_v36  ;;  %v7626_v34 = vpop.eup %4713  ;;  %2543 = vadd.xlane.f32.xlu0 %v2542_v33  ;;  %4733 = vpow2.f32 %v2066_v5  ;;  %v2084_v1 = vmul.f32 1.442695, %v1798_v51  ;;  %v7632_v59 = vmul.f32 1.442695, %v1843_v47  ;;  %v11805_v30 = vld [vmem:[#allocation119_spill] sm:$0xff] }
 0x3da   : > { %11801 = vst [vmem:[#allocation51_spill] sm:$0xff] %v7626_v34  ;;  %v7630_v32 = vpop.eup %4715  ;;  %4735 = vpow2.f32 %v2068_v26  ;;  %v1851_v8 = vsub.f32 %v11805_v30, %v7567_v27  ;;  %v2188_v16 = vmul.f32 1.442695, %v1850_v17  ;;  %v11807_v12 = vld [vmem:[#allocation121_spill] sm:$0xff]  ;;  %v2200_v39 = vmul.f32 1.442695, %v1856_v42 }
 0x3db   : > { %11803 = vst [vmem:[#allocation114_spill] sm:$0xff] %v7630_v32  ;;  %11804 = vst [vmem:[#allocation107_spill] sm:$0xff] %v7632_v59  ;;  %v7636_v22 = vpop.eup %4717  ;;  %4737 = vpow2.f32 %v2070_v48  ;;  %v1859_v5 = vsub.f32 %v11807_v12, %v7590_v49  ;;  %v11808_v33 = vld [vmem:[#allocation163_spill] sm:$0xff]  ;;  %v2202_v47 = vmul.f32 1.442695, %v1857_v50  ;;  %v11810_v26 = vld [vmem:[#allocation164_spill] sm:$0xff]  ;;  %v11813_v42 = vmax.f32 %v7292_v18, %v7294_v55  ;;  %v7664_v49 = vpop.xlane.xlu0 %1595 }
 0x3dc   : > { %11806 = vst [vmem:[#allocation109_spill] sm:$0xff] %v7636_v22  ;;  %v1804_v44 = vsub.f32 %v11808_v33, %v7398_v25  ;;  %v7642_v51 = vpop.eup %4719  ;;  %4739 = vpow2.f32 %v2184_v6  ;;  %v1805_v59 = vsub.f32 %v11810_v26, %v7398_v25  ;;  %v11811_v30 = vld [vmem:[#allocation219_spill] sm:$0xff]  ;;  %v2204_v12 = vmul.f32 1.442695, %v1858_v9 }
 0x3dd   : > { %11809 = vst [vmem:[#allocation52_spill] sm:$0xff] %v7642_v51  ;;  %v1806_v17 = vsub.f32 %v11811_v30, %v7398_v25  ;;  %v7648_v27 = vpop.eup %4721  ;;  %v2547_v48 = vadd.f32 %v7642_v51, %v7556_v21  ;;  %1721 = vmax.xlane.f32.xlu0 %v11813_v42  ;;  %4741 = vpow2.f32 %v2186_v52  ;;  %v1807_v6 = vsub.f32 %v7094_v20, %v7398_v25 }
 0x3de   : > { %11812 = vst [vmem:[#allocation53_spill] sm:$0xff] %v7648_v27  ;;  %v7657_v50 = vpop.eup %4723  ;;  %4743 = vpow2.f32 %v2188_v16  ;;  %v7659_v33 = vmul.f32 1.442695, %v1851_v8  ;;  %v2086_v26 = vmul.f32 1.442695, %v1799_v46  ;;  %v7662_v30 = vadd.f32 %v7487_v35, %v2563_v41  ;;  %v11824_v35 = vld [vmem:[#allocation165_spill] sm:$0xff] }
 0x3df   : > { %11814 = vst [vmem:[#allocation111_spill] sm:$0xff] %v7657_v50  ;;  %v7666_v21 = vpop.eup %4725  ;;  %v2548_v18 = vadd.f32 %v7648_v27, %v2547_v48  ;;  %4745 = vpow2.f32 %v2200_v39  ;;  %v7669_v9 = vmul.f32 1.442695, %v1859_v5  ;;  %v2096_v52 = vmul.f32 1.442695, %v1804_v44  ;;  %v11818_v48 = vld [vmem:[#allocation58_spill] sm:$0xff]  ;;  %v7680_v5 = vpop.xlane.xlu1 %1604 }
 0x3e0   : > { %11815 = vst [vmem:[#allocation116_spill] sm:$0xff] %v7666_v21  ;;  %v7671_v20 = vpop.eup %4727  ;;  %4747 = vpow2.f32 %v2202_v47  ;;  %v2098_v25 = vmul.f32 1.442695, %v1805_v59  ;;  %v2100_v16 = vmul.f32 1.442695, %v1806_v17  ;;  %v2572_v46 = vadd.f32 %v7505_v28, %v7495_v58  ;;  %v11820_v47 = vld [vmem:[#allocation59_spill] sm:$0xff] }
 0x3e1   : > { %11816 = vst [vmem:[#allocation218_spill] sm:$0xff] %v7671_v20  ;;  %v7675_v41 = vpop.eup %4729  ;;  %v2549_v8 = vadd.f32 %v7657_v50, %v2548_v18  ;;  %4749 = vpow2.f32 %v2204_v12  ;;  %v2102_v42 = vmul.f32 1.442695, %v1807_v6  ;;  %v1864_v39 = vsub.f32 %v11818_v48, %v7664_v49  ;;  %v11821_v27 = vld [vmem:[#allocation122_spill] sm:$0xff]  ;;  %v11823_v48 = vld [vmem:[#allocation123_spill] sm:$0xff] }
 0x3e2   : > { %11817 = vst [vmem:[#allocation113_spill] sm:$0xff] %v7675_v41  ;;  %v7682_v44 = vpop.eup %4731  ;;  %v2556_v59 = vadd.f32 %v7675_v41, %v7601_v13  ;;  %4751 = vpow2.f32 %v7497_v45  ;;  %v1865_v17 = vsub.f32 %v11820_v47, %v7664_v49  ;;  %v1866_v18 = vsub.f32 %v11821_v27, %v7664_v49  ;;  %v11826_v27 = vld [vmem:[#allocation60_spill] sm:$0xff] }
 0x3e3   : > { %11819 = vst [vmem:[#allocation162_spill] sm:$0xff] %v7682_v44  ;;  %v7691_v12 = vpop.eup %4733  ;;  %v2550_v6 = vadd.f32 %v7666_v21, %v2549_v8  ;;  %4753 = vpow2.f32 %v7612_v60  ;;  %v1867_v50 = vsub.f32 %v11823_v48, %v7664_v49  ;;  %v1812_v13 = vsub.f32 %v11824_v35, %v7410_v37  ;;  %v11828_v48 = vld [vmem:[#allocation61_spill] sm:$0xff]  ;;  %v11829_v35 = vld [vmem:[#allocation124_spill] sm:$0xff] }
 0x3e4   : > { %11822 = vst [vmem:[#allocation115_spill] sm:$0xff] %v7691_v12  ;;  %v7699_v41 = vpop.eup %4735  ;;  %v2557_v45 = vadd.f32 %v7682_v44, %v2556_v59  ;;  %4755 = vpow2.f32 %v2082_v29  ;;  %v7703_v47 = vadd.f32 %v7513_v2, %v2572_v46  ;;  %v1872_v51 = vsub.f32 %v11826_v27, %v7680_v5  ;;  %v11832_v27 = vld [vmem:[#allocation125_spill] sm:$0xff] }
 0x3e5   : > { %11825 = vst [vmem:[#allocation54_spill] sm:$0xff] %v7699_v41  ;;  %v7707_v8 = vpop.eup %4737  ;;  %v2551_v60 = vadd.f32 %v7671_v20, %v2550_v6  ;;  %4757 = vpow2.f32 %v2084_v1  ;;  %v1873_v21 = vsub.f32 %v11828_v48, %v7680_v5  ;;  %v1874_v58 = vsub.f32 %v11829_v35, %v7680_v5 }
 0x3e6   : > { %11827 = vst [vmem:[#allocation55_spill] sm:$0xff] %v7707_v8  ;;  %v7714_v28 = vpop.eup %4739  ;;  %v2558_v29 = vadd.f32 %v7691_v12, %v2557_v45  ;;  %4759 = vpow2.f32 %v2086_v26  ;;  %v2216_v46 = vmul.f32 1.442695, %v1864_v39  ;;  %v2218_v59 = vmul.f32 1.442695, %v1865_v17 }
 0x3e7   : > { %11830 = vst [vmem:[#allocation117_spill] sm:$0xff] %v7714_v28  ;;  %v7717_v44 = vpop.eup %4741  ;;  %2552 = vadd.xlane.f32.xlu1 %v2551_v60  ;;  %4761 = vpow2.f32 %v7551_v23  ;;  %v2220_v6 = vmul.f32 1.442695, %v1866_v18  ;;  %v7720_v1 = vmul.f32 1.442695, %v1867_v50  ;;  %v1875_v48 = vsub.f32 %v11832_v27, %v7680_v5 }
 0x3e8   : > { %11831 = vst [vmem:[#allocation118_spill] sm:$0xff] %v7717_v44  ;;  %v7724_v20 = vpop.eup %4743  ;;  %v2559_v35 = vadd.f32 %v7699_v41, %v2558_v29  ;;  %4763 = vpow2.f32 %v2096_v52  ;;  %v2232_v45 = vmul.f32 1.442695, %v1872_v51  ;;  %v1813_v26 = vsub.f32 %v6728_v56, %v7410_v37  ;;  %v11839_v29 = vld [vmem:[#allocation166_spill] sm:$0xff]  ;;  %v11842_v41 = vld [vmem:[#allocation220_spill] sm:$0xff] }
 0x3e9   : > { %11833 = vst [vmem:[#allocation56_spill] sm:$0xff] %v7724_v20  ;;  %v7729_v39 = vpop.eup %4745  ;;  %4765 = vpow2.f32 %v2098_v25  ;;  %v2234_v17 = vmul.f32 1.442695, %v1873_v21  ;;  %v2236_v23 = vmul.f32 1.442695, %v1874_v58  ;;  %v1814_v50 = vsub.f32 %v7096_v14, %v7410_v37  ;;  %v11837_v25 = vld [vmem:[#allocation261_spill] sm:$0xff] }
 0x3ea   : > { %11834 = vst [vmem:[#allocation57_spill] sm:$0xff] %v7729_v39  ;;  %v7733_v18 = vpop.eup %4747  ;;  %v2560_v60 = vadd.f32 %v7707_v8, %v2559_v35  ;;  %4767 = vpow2.f32 %v2100_v16  ;;  %v1815_v52 = vsub.f32 %v7102_v15, %v7410_v37  ;;  %v2581_v51 = vadd.f32 %v7525_v24, %v7522_v61  ;;  %v11841_v37 = vld [vmem:[#allocation167_spill] sm:$0xff]  ;;  %v11882_v24 = vld [vmem:[#allocation225_spill] sm:$0xff] }
 0x3eb   : > { %11835 = vst [vmem:[#allocation120_spill] sm:$0xff] %v7733_v18  ;;  %v7740_v56 = vpop.eup %4749  ;;  %v11838_v21 = vmax.f32 %v7302_v10, %v11837_v25  ;;  %4769 = vpow2.f32 %v2102_v42  ;;  %v7745_v58 = vmul.f32 1.442695, %v1875_v48  ;;  %v2112_v14 = vmul.f32 1.442695, %v1812_v13  ;;  %v7755_v10 = vpop.xlane.xlu0 %1613 }
 0x3ec   : > { %11836 = vst [vmem:[#allocation119_spill] sm:$0xff] %v7740_v56  ;;  %v1820_v27 = vsub.f32 %v11839_v29, %v7446_v31  ;;  %v7749_v16 = vpop.eup %4751  ;;  %2561 = vadd.xlane.f32.xlu0 %v2560_v60  ;;  %4771 = vpow2.f32 %v2216_v46  ;;  %v2114_v15 = vmul.f32 1.442695, %v1813_v26  ;;  %v1821_v35 = vsub.f32 %v11841_v37, %v7446_v31  ;;  %v11846_v29 = vld [vmem:[#allocation44_spill] sm:$0xff] }
 0x3ed   : > { %1730 = vmax.xlane.f32.xlu1 %v11838_v21  ;;  %11840 = vst [vmem:[#allocation121_spill] sm:$0xff] %v7749_v16  ;;  %v1822_v8 = vsub.f32 %v11842_v41, %v7446_v31  ;;  %v7757_v42 = vpop.eup %4753  ;;  %v2565_v13 = vadd.f32 %v7749_v16, %v7662_v30  ;;  %4773 = vpow2.f32 %v2218_v59  ;;  %v2116_v48 = vmul.f32 1.442695, %v1814_v50  ;;  %v11844_v21 = vld [vmem:[#allocation221_spill] sm:$0xff]  ;;  %v11848_v59 = vld [vmem:[#allocation62_spill] sm:$0xff]  ;;  %v11853_v16 = vld [vmem:[#allocation63_spill] sm:$0xff] }
 0x3ee   : > { %11843 = vst [vmem:[#allocation163_spill] sm:$0xff] %v7757_v42  ;;  %v1823_v60 = vsub.f32 %v11844_v21, %v7446_v31  ;;  %v7763_v46 = vpop.eup %4755  ;;  %4775 = vpow2.f32 %v2220_v6  ;;  %v2118_v26 = vmul.f32 1.442695, %v1815_v52  ;;  %v7766_v37 = vadd.f32 %v11846_v29, %v2581_v51  ;;  %v11850_v21 = vld [vmem:[#allocation263_spill] sm:$0xff]  ;;  %v11851_v6 = vld [vmem:[#allocation264_spill] sm:$0xff] }
 0x3ef   : > { %11845 = vst [vmem:[#allocation164_spill] sm:$0xff] %v7763_v46  ;;  %v2590_v41 = vadd.f32 %v7549_v38, %v7543_v3  ;;  %v7770_v12 = vpop.eup %4757  ;;  %v2566_v2 = vadd.f32 %v7757_v42, %v2565_v13  ;;  %4777 = vpow2.f32 %v2232_v45  ;;  %v2128_v30 = vmul.f32 1.442695, %v1820_v27  ;;  %v7782_v38 = vpop.xlane.xlu1 %1622 }
 0x3f0   : > { %11847 = vst [vmem:[#allocation219_spill] sm:$0xff] %v7770_v12  ;;  %v1880_v50 = vsub.f32 %v11848_v59, %v7755_v10  ;;  %v7775_v31 = vpop.eup %4759  ;;  %v11852_v52 = vmax.f32 %v11850_v21, %v11851_v6  ;;  %4779 = vpow2.f32 %v2234_v17  ;;  %v2130_v51 = vmul.f32 1.442695, %v1821_v35  ;;  %v11855_v59 = vld [vmem:[#allocation126_spill] sm:$0xff] }
 0x3f1   : > { %11849 = vst [vmem:[#allocation58_spill] sm:$0xff] %v7775_v31  ;;  %v2132_v29 = vmul.f32 1.442695, %v1822_v8  ;;  %v1881_v3 = vsub.f32 %v11853_v16, %v7755_v10  ;;  %v7784_v13 = vpop.eup %4761  ;;  %v2567_v45 = vadd.f32 %v7763_v46, %v2566_v2  ;;  %4781 = vpow2.f32 %v2236_v23  ;;  %v11857_v16 = vld [vmem:[#allocation127_spill] sm:$0xff] }
 0x3f2   : > { %1739 = vmax.xlane.f32.xlu0 %v11852_v52  ;;  %11854 = vst [vmem:[#allocation59_spill] sm:$0xff] %v7784_v13  ;;  %v2134_v27 = vmul.f32 1.442695, %v1823_v60  ;;  %v1882_v42 = vsub.f32 %v11855_v59, %v7755_v10  ;;  %v7789_v61 = vpop.eup %4763  ;;  %v2574_v17 = vadd.f32 %v7784_v13, %v7703_v47  ;;  %4783 = vpow2.f32 %v7553_v4  ;;  %v11859_v60 = vld [vmem:[#allocation64_spill] sm:$0xff] }
 0x3f3   : > { %11856 = vst [vmem:[#allocation122_spill] sm:$0xff] %v7789_v61  ;;  %v7795_v8 = vadd.f32 %v7558_v62, %v2590_v41  ;;  %v1883_v35 = vsub.f32 %v11857_v16, %v7755_v10  ;;  %v7799_v21 = vpop.eup %4765  ;;  %v2568_v2 = vadd.f32 %v7770_v12, %v2567_v45  ;;  %4785 = vpow2.f32 %v2112_v14  ;;  %v11861_v41 = vld [vmem:[#allocation65_spill] sm:$0xff]  ;;  %v11863_v14 = vld [vmem:[#allocation128_spill] sm:$0xff] }
 0x3f4   : > { %11858 = vst [vmem:[#allocation123_spill] sm:$0xff] %v7799_v21  ;;  %v2248_v23 = vmul.f32 1.442695, %v1880_v50  ;;  %v1888_v52 = vsub.f32 %v11859_v60, %v7782_v38  ;;  %v7804_v59 = vpop.eup %4767  ;;  %v2575_v47 = vadd.f32 %v7789_v61, %v2574_v17  ;;  %4787 = vpow2.f32 %v2114_v15  ;;  %v11864_v45 = vld [vmem:[#allocation129_spill] sm:$0xff] }
 0x3f5   : > { %11860 = vst [vmem:[#allocation165_spill] sm:$0xff] %v7804_v59  ;;  %v2250_v4 = vmul.f32 1.442695, %v1881_v3  ;;  %v1889_v46 = vsub.f32 %v11861_v41, %v7782_v38  ;;  %v7809_v62 = vpop.eup %4769  ;;  %v2569_v16 = vadd.f32 %v7775_v31, %v2568_v2  ;;  %4789 = vpow2.f32 %v2116_v48  ;;  %v11867_v2 = vld [vmem:[#allocation168_spill] sm:$0xff]  ;;  %v11868_v31 = vld [vmem:[#allocation169_spill] sm:$0xff] }
 0x3f6   : > { %11862 = vst [vmem:[#allocation60_spill] sm:$0xff] %v7809_v62  ;;  %v1890_v50 = vsub.f32 %v11863_v14, %v7782_v38  ;;  %v1891_v60 = vsub.f32 %v11864_v45, %v7782_v38  ;;  %v7816_v12 = vpop.eup %4771  ;;  %v2576_v17 = vadd.f32 %v7799_v21, %v2575_v47  ;;  %4791 = vpow2.f32 %v2118_v26  ;;  %v11870_v26 = vld [vmem:[#allocation222_spill] sm:$0xff] }
 0x3f7   : > { %11865 = vst [vmem:[#allocation61_spill] sm:$0xff] %v7816_v12  ;;  %v2252_v3 = vmul.f32 1.442695, %v1882_v42  ;;  %v7819_v15 = vmul.f32 1.442695, %v1883_v35  ;;  %v7821_v41 = vpop.eup %4773  ;;  %2570 = vadd.xlane.f32.xlu1 %v2569_v16  ;;  %4793 = vpow2.f32 %v7562_v11  ;;  %v1828_v14 = vsub.f32 %v11867_v2, %v7460_v54  ;;  %v11872_v16 = vld [vmem:[#allocation223_spill] sm:$0xff] }
 0x3f8   : > { %11866 = vst [vmem:[#allocation124_spill] sm:$0xff] %v7821_v41  ;;  %v2264_v48 = vmul.f32 1.442695, %v1888_v52  ;;  %v1829_v45 = vsub.f32 %v11868_v31, %v7460_v54  ;;  %v7828_v61 = vpop.eup %4775  ;;  %v2577_v47 = vadd.f32 %v7804_v59, %v2576_v17  ;;  %4795 = vpow2.f32 %v2128_v30  ;;  %v11874_v30 = vld [vmem:[#allocation170_spill] sm:$0xff] }
 0x3f9   : > { %11869 = vst [vmem:[#allocation125_spill] sm:$0xff] %v7828_v61  ;;  %v2266_v42 = vmul.f32 1.442695, %v1889_v46  ;;  %v1830_v35 = vsub.f32 %v11870_v26, %v7460_v54  ;;  %v7833_v21 = vpop.eup %4777  ;;  %4797 = vpow2.f32 %v2130_v51  ;;  %v2268_v11 = vmul.f32 1.442695, %v1890_v50  ;;  %v11876_v51 = vld [vmem:[#allocation266_spill] sm:$0xff] }
 0x3fa   : > { %11871 = vst [vmem:[#allocation166_spill] sm:$0xff] %v7833_v21  ;;  %v7835_v52 = vmul.f32 1.442695, %v1891_v60  ;;  %v1831_v2 = vsub.f32 %v11872_v16, %v7460_v54  ;;  %v7839_v13 = vpop.eup %4779  ;;  %v2578_v31 = vadd.f32 %v7809_v62, %v2577_v47  ;;  %4799 = vpow2.f32 %v2132_v29  ;;  %v11877_v50 = vld [vmem:[#allocation267_spill] sm:$0xff]  ;;  %v11880_v47 = vld [vmem:[#allocation224_spill] sm:$0xff]  ;;  %v7855_v62 = vpop.xlane.xlu0 %1631 }
 0x3fb   : > { %11873 = vst [vmem:[#allocation167_spill] sm:$0xff] %v7839_v13  ;;  %v2599_v46 = vadd.f32 %v7569_v63, %v7560_v43  ;;  %v1836_v17 = vsub.f32 %v11874_v30, %v7499_v57  ;;  %v7846_v26 = vpop.eup %4781  ;;  %v11878_v60 = vmax.f32 %v11876_v51, %v11877_v50  ;;  %4801 = vpow2.f32 %v2134_v27  ;;  %v11879_v54 = vld [vmem:[#allocation171_spill] sm:$0xff] }
 0x3fc   : > { %11875 = vst [vmem:[#allocation220_spill] sm:$0xff] %v7846_v26  ;;  %v2144_v59 = vmul.f32 1.442695, %v1828_v14  ;;  %v1837_v16 = vsub.f32 %v11879_v54, %v7499_v57  ;;  %v1838_v29 = vsub.f32 %v11880_v47, %v7499_v57  ;;  %v7857_v43 = vpop.eup %4783  ;;  %2579 = vadd.xlane.f32.xlu0 %v2578_v31  ;;  %4803 = vpow2.f32 %v2248_v23 }
 0x3fd   : > { %1748 = vmax.xlane.f32.xlu1 %v11878_v60  ;;  %11881 = vst [vmem:[#allocation221_spill] sm:$0xff] %v7857_v43  ;;  %v2146_v30 = vmul.f32 1.442695, %v1829_v45  ;;  %v2148_v63 = vmul.f32 1.442695, %v1830_v35  ;;  %v1839_v51 = vsub.f32 %v11882_v24, %v7499_v57  ;;  %v7861_v60 = vpop.eup %4785  ;;  %v2583_v27 = vadd.f32 %v7857_v43, %v7766_v37  ;;  %v11885_v35 = vld [vmem:[#allocation66_spill] sm:$0xff] }
 0x3fe   : > { %11883 = vst [vmem:[#allocation62_spill] sm:$0xff] %v7861_v60  ;;  %4805 = vpow2.f32 %v2250_v4  ;;  %v2150_v14 = vmul.f32 1.442695, %v1831_v2  ;;  %v2608_v54 = vadd.f32 %v7614_v19, %v7605_v40  ;;  %v7867_v47 = vpop.eup %4787  ;;  %v7870_v23 = vadd.f32 %v7576_v7, %v2599_v46  ;;  %v11888_v40 = vld [vmem:[#allocation269_spill] sm:$0xff]  ;;  %v11889_v19 = vld [vmem:[#allocation270_spill] sm:$0xff]  ;;  %v11891_v46 = vld [vmem:[#allocation67_spill] sm:$0xff] }
 0x3ff   : > { %11884 = vst [vmem:[#allocation263_spill] sm:$0xff] %v7867_v47  ;;  %4807 = vpow2.f32 %v2252_v3  ;;  %v2160_v45 = vmul.f32 1.442695, %v1836_v17  ;;  %v1896_v24 = vsub.f32 %v11885_v35, %v7855_v62  ;;  %v7874_v57 = vpop.eup %4789  ;;  %v2584_v31 = vadd.f32 %v7861_v60, %v2583_v27  ;;  %v11892_v35 = vld [vmem:[#allocation130_spill] sm:$0xff]  ;;  %v11896_v27 = vld [vmem:[#allocation172_spill] sm:$0xff] }
 0x400   : > { %11886 = vst [vmem:[#allocation63_spill] sm:$0xff] %v7874_v57  ;;  %4809 = vpow2.f32 %v2264_v48  ;;  %v2162_v37 = vmul.f32 1.442695, %v1837_v16  ;;  %v2164_v4 = vmul.f32 1.442695, %v1838_v29  ;;  %v7877_v2 = vpop.eup %4791  ;;  %v11890_v43 = vmax.f32 %v11888_v40, %v11889_v19  ;;  %v11894_v29 = vld [vmem:[#allocation131_spill] sm:$0xff] }
 0x401   : > { %11887 = vst [vmem:[#allocation126_spill] sm:$0xff] %v7877_v2  ;;  %4811 = vpow2.f32 %v2266_v42  ;;  %v2166_v3 = vmul.f32 1.442695, %v1839_v51  ;;  %v1897_v17 = vsub.f32 %v11891_v46, %v7855_v62  ;;  %v1898_v7 = vsub.f32 %v11892_v35, %v7855_v62  ;;  %v7886_v50 = vpop.eup %4793 }
 0x402   : > { %1757 = vmax.xlane.f32.xlu0 %v11890_v43  ;;  %11893 = vst [vmem:[#allocation127_spill] sm:$0xff] %v7886_v50  ;;  %v2585_v48 = vadd.f32 %v7867_v47, %v2584_v31  ;;  %4813 = vpow2.f32 %v2268_v11  ;;  %v7890_v16 = vadd.f32 %v7622_v36, %v2608_v54  ;;  %v1899_v40 = vsub.f32 %v11894_v29, %v7855_v62  ;;  %v7894_v43 = vpop.eup %4795  ;;  %v11898_v54 = vld [vmem:[#allocation173_spill] sm:$0xff]  ;;  %v11899_v29 = vld [vmem:[#allocation226_spill] sm:$0xff]  ;;  %v7911_v36 = vpop.xlane.xlu1 %1640 }
 0x403   : > { %11895 = vst [vmem:[#allocation64_spill] sm:$0xff] %v7894_v43  ;;  %v2592_v42 = vadd.f32 %v7886_v50, %v7795_v8  ;;  %4815 = vpow2.f32 %v7571_v0  ;;  %v2280_v51 = vmul.f32 1.442695, %v1896_v24  ;;  %v1844_v46 = vsub.f32 %v11896_v27, %v7520_v53  ;;  %v7901_v35 = vpop.eup %4797 }
 0x404   : > { %11897 = vst [vmem:[#allocation65_spill] sm:$0xff] %v7901_v35  ;;  %v2586_v11 = vadd.f32 %v7874_v57, %v2585_v48  ;;  %4817 = vpow2.f32 %v2144_v59  ;;  %v1845_v31 = vsub.f32 %v11898_v54, %v7520_v53  ;;  %v1846_v60 = vsub.f32 %v11899_v29, %v7520_v53  ;;  %v7908_v47 = vpop.eup %4799  ;;  %v11902_v54 = vld [vmem:[#allocation227_spill] sm:$0xff] }
 0x405   : > { %11900 = vst [vmem:[#allocation128_spill] sm:$0xff] %v7908_v47  ;;  %v2593_v8 = vadd.f32 %v7894_v43, %v2592_v42  ;;  %4819 = vpow2.f32 %v2146_v30  ;;  %v2282_v0 = vmul.f32 1.442695, %v1897_v17  ;;  %v2284_v24 = vmul.f32 1.442695, %v1898_v7  ;;  %v7913_v27 = vpop.eup %4801  ;;  %v11905_v42 = vld [vmem:[#allocation33_spill] sm:$0xff] }
 0x406   : > { %11901 = vst [vmem:[#allocation129_spill] sm:$0xff] %v7913_v27  ;;  %v2587_v48 = vadd.f32 %v7877_v2, %v2586_v11  ;;  %4821 = vpow2.f32 %v2148_v63  ;;  %v7916_v59 = vmul.f32 1.442695, %v1899_v40  ;;  %v1847_v57 = vsub.f32 %v11902_v54, %v7520_v53  ;;  %v7920_v29 = vpop.eup %4803  ;;  %v11906_v11 = vld [vmem:[#allocation68_spill] sm:$0xff] }
 0x407   : > { %11903 = vst [vmem:[#allocation168_spill] sm:$0xff] %v7920_v29  ;;  %v2594_v50 = vadd.f32 %v7901_v35, %v2593_v8  ;;  %4823 = vpow2.f32 %v2150_v14  ;;  %v2176_v30 = vmul.f32 1.442695, %v1844_v46  ;;  %v2617_v7 = vadd.f32 %v7630_v32, %v7626_v34  ;;  %v11908_v14 = vld [vmem:[#allocation69_spill] sm:$0xff]  ;;  %v11909_v8 = vld [vmem:[#allocation132_spill] sm:$0xff] }
 0x408   : > { %v7925_v17 = vpop.eup %4805  ;;  %2588 = vadd.xlane.f32.xlu1 %v2587_v48  ;;  %4825 = vpow2.f32 %v11905_v42  ;;  %v2178_v63 = vmul.f32 1.442695, %v1845_v31  ;;  %v2180_v40 = vmul.f32 1.442695, %v1846_v60  ;;  %v1904_v2 = vsub.f32 %v11906_v11, %v7911_v36  ;;  %v11911_v60 = vld [vmem:[#allocation133_spill] sm:$0xff]  ;;  %v11912_v42 = vld [vmem:[#allocation46_spill] sm:$0xff] }
 0x409   : > { %11904 = vst [vmem:[#allocation169_spill] sm:$0xff] %v7925_v17  ;;  %v7930_v53 = vpop.eup %4807  ;;  %v2595_v54 = vadd.f32 %v7908_v47, %v2594_v50  ;;  %4827 = vpow2.f32 %v2160_v45  ;;  %v1905_v46 = vsub.f32 %v11908_v14, %v7911_v36  ;;  %v1906_v34 = vsub.f32 %v11909_v8, %v7911_v36  ;;  %v11913_v11 = vld [vmem:[#allocation174_spill] sm:$0xff]  ;;  %v11915_v45 = vld [vmem:[#allocation175_spill] sm:$0xff]  ;;  %v11916_v8 = vld [vmem:[#allocation228_spill] sm:$0xff] }
 0x40a   : > { %11907 = vst [vmem:[#allocation222_spill] sm:$0xff] %v7930_v53  ;;  %v7937_v32 = vpop.eup %4809  ;;  %4829 = vpow2.f32 %v2162_v37  ;;  %v2182_v48 = vmul.f32 1.442695, %v1847_v57  ;;  %v1907_v31 = vsub.f32 %v11911_v60, %v7911_v36  ;;  %v1852_v43 = vsub.f32 %v11913_v11, %v11912_v42  ;;  %v11918_v57 = vld [vmem:[#allocation272_spill] sm:$0xff]  ;;  %v11919_v37 = vld [vmem:[#allocation273_spill] sm:$0xff] }
 0x40b   : > { %11910 = vst [vmem:[#allocation223_spill] sm:$0xff] %v7937_v32  ;;  %v7943_v35 = vpop.eup %4811  ;;  %v2596_v50 = vadd.f32 %v7913_v27, %v2595_v54  ;;  %4831 = vpow2.f32 %v2164_v4  ;;  %v1853_v14 = vsub.f32 %v11915_v45, %v11912_v42  ;;  %v1854_v47 = vsub.f32 %v11916_v8, %v11912_v42  ;;  %v11921_v54 = vld [vmem:[#allocation229_spill] sm:$0xff]  ;;  %v7960_v27 = vpop.xlane.xlu0 %1649 }
 0x40c   : > { %11914 = vst [vmem:[#allocation170_spill] sm:$0xff] %v7943_v35  ;;  %v7950_v19 = vpop.eup %4813  ;;  %v11920_v6 = vmax.f32 %v11918_v57, %v11919_v37  ;;  %4833 = vpow2.f32 %v2166_v3  ;;  %v7956_v60 = vadd.f32 %v7636_v22, %v2617_v7  ;;  %v2296_v11 = vmul.f32 1.442695, %v1904_v2 }
 0x40d   : > { %11917 = vst [vmem:[#allocation266_spill] sm:$0xff] %v7950_v19  ;;  %v1855_v4 = vsub.f32 %v11921_v54, %v11912_v42  ;;  %v7962_v45 = vpop.eup %4815  ;;  %2597 = vadd.xlane.f32.xlu0 %v2596_v50  ;;  %4835 = vpow2.f32 %v2280_v51  ;;  %v2298_v8 = vmul.f32 1.442695, %v1905_v46  ;;  %v2300_v25 = vmul.f32 1.442695, %v1906_v34  ;;  %v11926_v51 = vld [vmem:[#allocation70_spill] sm:$0xff] }
 0x40e   : > { %1766 = vmax.xlane.f32.xlu1 %v11920_v6  ;;  %11922 = vst [vmem:[#allocation171_spill] sm:$0xff] %v7962_v45  ;;  %v2626_v57 = vadd.f32 %v7717_v44, %v7714_v28  ;;  %v7966_v6 = vpop.eup %4817  ;;  %v2601_v3 = vadd.f32 %v7962_v45, %v7870_v23  ;;  %4837 = vpow2.f32 %v2282_v0  ;;  %v7970_v2 = vmul.f32 1.442695, %v1907_v31  ;;  %v11928_v44 = vld [vmem:[#allocation107_spill] sm:$0xff] }
 0x40f   : > { %11923 = vst [vmem:[#allocation224_spill] sm:$0xff] %v7966_v6  ;;  %v2192_v7 = vmul.f32 1.442695, %v1852_v43  ;;  %v7972_v42 = vpop.eup %4819  ;;  %4839 = vpow2.f32 %v2284_v24  ;;  %v2194_v54 = vmul.f32 1.442695, %v1853_v14  ;;  %v1912_v34 = vsub.f32 %v11926_v51, %v7960_v27  ;;  %v11929_v23 = vld [vmem:[#allocation71_spill] sm:$0xff] }
 0x410   : > { %11924 = vst [vmem:[#allocation225_spill] sm:$0xff] %v7970_v2  ;;  %11925 = vst [vmem:[#allocation66_spill] sm:$0xff] %v7972_v42  ;;  %v2196_v50 = vmul.f32 1.442695, %v1854_v47  ;;  %v7976_v46 = vpop.eup %4821  ;;  %v2602_v28 = vadd.f32 %v7966_v6, %v2601_v3  ;;  %4841 = vpow2.f32 %v11928_v44  ;;  %v2198_v22 = vmul.f32 1.442695, %v1855_v4 }
 0x411   : > { %11927 = vst [vmem:[#allocation269_spill] sm:$0xff] %v7976_v46  ;;  %v1913_v0 = vsub.f32 %v11929_v23, %v7960_v27  ;;  %v7982_v31 = vpop.eup %4823  ;;  %4843 = vpow2.f32 %v2176_v30  ;;  %v7985_v43 = vadd.f32 %v7724_v20, %v2626_v57  ;;  %v11931_v47 = vld [vmem:[#allocation134_spill] sm:$0xff]  ;;  %v11932_v14 = vld [vmem:[#allocation135_spill] sm:$0xff]  ;;  %v11934_v4 = vld [vmem:[#allocation48_spill] sm:$0xff] }
 0x412   : > { %11930 = vst [vmem:[#allocation67_spill] sm:$0xff] %v7982_v31  ;;  %v1914_v24 = vsub.f32 %v11931_v47, %v7960_v27  ;;  %v1915_v51 = vsub.f32 %v11932_v14, %v7960_v27  ;;  %v7991_v45 = vpop.eup %4825  ;;  %v2603_v44 = vadd.f32 %v7972_v42, %v2602_v28  ;;  %4845 = vpow2.f32 %v2178_v63  ;;  %v11935_v3 = vld [vmem:[#allocation176_spill] sm:$0xff]  ;;  %v11936_v6 = vld [vmem:[#allocation177_spill] sm:$0xff]  ;;  %v11938_v14 = vld [vmem:[#allocation230_spill] sm:$0xff] }
 0x413   : > { %11933 = vst [vmem:[#allocation130_spill] sm:$0xff] %v7991_v45  ;;  %v1860_v23 = vsub.f32 %v11935_v3, %v11934_v4  ;;  %v1861_v30 = vsub.f32 %v11936_v6, %v11934_v4  ;;  %v7998_v37 = vpop.eup %4827  ;;  %v2610_v57 = vadd.f32 %v7991_v45, %v7890_v16  ;;  %4847 = vpow2.f32 %v2180_v40  ;;  %v11939_v3 = vld [vmem:[#allocation231_spill] sm:$0xff] }
 0x414   : > { %11937 = vst [vmem:[#allocation131_spill] sm:$0xff] %v7998_v37  ;;  %v2312_v47 = vmul.f32 1.442695, %v1912_v34  ;;  %v1862_v20 = vsub.f32 %v11938_v14, %v11934_v4  ;;  %v8004_v55 = vpop.eup %4829  ;;  %v2604_v28 = vadd.f32 %v7976_v46, %v2603_v44  ;;  %4849 = vpow2.f32 %v2182_v48  ;;  %v8014_v34 = vpop.xlane.xlu1 %1658  ;;  %v11952_v46 = vld [vmem:[#allocation232_spill] sm:$0xff] }
 0x415   : > { %v2314_v63 = vmul.f32 1.442695, %v1913_v0  ;;  %v1863_v42 = vsub.f32 %v11939_v3, %v11934_v4  ;;  %v8009_v6 = vpop.eup %4831  ;;  %v2611_v2 = vadd.f32 %v7998_v37, %v2610_v57  ;;  %4851 = vpow2.f32 %v2296_v11 }
 0x416   : > { %11940 = vst [vmem:[#allocation172_spill] sm:$0xff] %v8009_v6  ;;  %v2316_v16 = vmul.f32 1.442695, %v1914_v24  ;;  %v8012_v40 = vmul.f32 1.442695, %v1915_v51  ;;  %v8016_v14 = vpop.eup %4833  ;;  %v2605_v45 = vadd.f32 %v7982_v31, %v2604_v28  ;;  %4853 = vpow2.f32 %v2298_v8  ;;  %v11944_v8 = vld [vmem:[#allocation72_spill] sm:$0xff] }
 0x417   : > { %11941 = vst [vmem:[#allocation173_spill] sm:$0xff] %v8016_v14  ;;  %v2208_v48 = vmul.f32 1.442695, %v1860_v23  ;;  %v2210_v0 = vmul.f32 1.442695, %v1861_v30  ;;  %v8019_v44 = vpop.eup %4835  ;;  %v2612_v4 = vadd.f32 %v8004_v55, %v2611_v2  ;;  %4855 = vpow2.f32 %v2300_v25  ;;  %v11945_v30 = vld [vmem:[#allocation73_spill] sm:$0xff] }
 0x418   : > { %11942 = vst [vmem:[#allocation226_spill] sm:$0xff] %v8019_v44  ;;  %v8022_v3 = vmul.f32 1.442695, %v1862_v20  ;;  %v2635_v11 = vadd.f32 %v7733_v18, %v7729_v39  ;;  %v8026_v24 = vpop.eup %4837  ;;  %2606 = vadd.xlane.f32.xlu1 %v2605_v45  ;;  %4857 = vpow2.f32 %v7659_v33  ;;  %v2214_v51 = vmul.f32 1.442695, %v1863_v42  ;;  %v11947_v25 = vld [vmem:[#allocation136_spill] sm:$0xff] }
 0x419   : > { %11943 = vst [vmem:[#allocation227_spill] sm:$0xff] %v8026_v24  ;;  %v1920_v23 = vsub.f32 %v11944_v8, %v8014_v34  ;;  %v1921_v57 = vsub.f32 %v11945_v30, %v8014_v34  ;;  %v8033_v28 = vpop.eup %4839  ;;  %v2613_v20 = vadd.f32 %v8009_v6, %v2612_v4  ;;  %4859 = vpow2.f32 %v2192_v7  ;;  %v11948_v39 = vld [vmem:[#allocation137_spill] sm:$0xff]  ;;  %v11950_v33 = vld [vmem:[#allocation178_spill] sm:$0xff]  ;;  %v11951_v8 = vld [vmem:[#allocation179_spill] sm:$0xff] }
 0x41a   : > { %11946 = vst [vmem:[#allocation33_spill] sm:$0xff] %v8033_v28  ;;  %v1922_v2 = vsub.f32 %v11947_v25, %v8014_v34  ;;  %v1923_v45 = vsub.f32 %v11948_v39, %v8014_v34  ;;  %v8040_v18 = vpop.eup %4841  ;;  %4861 = vpow2.f32 %v2194_v54  ;;  %v1868_v42 = vsub.f32 %v11950_v33, %v7664_v49  ;;  %v11954_v39 = vld [vmem:[#allocation233_spill] sm:$0xff] }
 0x41b   : > { %11949 = vst [vmem:[#allocation68_spill] sm:$0xff] %v8040_v18  ;;  %v1869_v30 = vsub.f32 %v11951_v8, %v7664_v49  ;;  %v1870_v31 = vsub.f32 %v11952_v46, %v7664_v49  ;;  %v8048_v4 = vpop.eup %4843  ;;  %v2614_v7 = vadd.f32 %v8016_v14, %v2613_v20  ;;  %v2619_v25 = vadd.f32 %v8040_v18, %v7956_v60  ;;  %v8065_v14 = vpop.xlane.xlu0 %1667 }
 0x41c   : > { %11953 = vst [vmem:[#allocation69_spill] sm:$0xff] %v8048_v4  ;;  %4863 = vpow2.f32 %v2196_v50  ;;  %v1871_v54 = vsub.f32 %v11954_v39, %v7664_v49  ;;  %v8055_v6 = vpop.eup %4845  ;;  %v8058_v33 = vadd.f32 %v7740_v56, %v2635_v11  ;;  %v2328_v8 = vmul.f32 1.442695, %v1920_v23  ;;  %v11968_v56 = vld [vmem:[#allocation234_spill] sm:$0xff] }
 0x41d   : > { %11955 = vst [vmem:[#allocation132_spill] sm:$0xff] %v8055_v6  ;;  %4865 = vpow2.f32 %v2198_v22  ;;  %v2644_v46 = vadd.f32 %v7821_v41, %v7816_v12  ;;  %v8062_v37 = vpop.eup %4847  ;;  %2615 = vadd.xlane.f32.xlu0 %v2614_v7  ;;  %v2620_v20 = vadd.f32 %v8048_v4, %v2619_v25  ;;  %v2330_v60 = vmul.f32 1.442695, %v1921_v57 }
 0x41e   : > { %11956 = vst [vmem:[#allocation133_spill] sm:$0xff] %v8062_v37  ;;  %4867 = vpow2.f32 %v2312_v47  ;;  %v2332_v50 = vmul.f32 1.442695, %v1922_v2  ;;  %v8067_v49 = vpop.eup %4849  ;;  %v8069_v22 = vmul.f32 1.442695, %v1923_v45  ;;  %v11961_v45 = vld [vmem:[#allocation75_spill] sm:$0xff]  ;;  %v1878_v4 = vsub.f32 %v11968_v56, %v7680_v5 }
 0x41f   : > { %11957 = vst [vmem:[#allocation46_spill] sm:$0xff] %v8067_v49  ;;  %4869 = vpow2.f32 %v2314_v63  ;;  %v2224_v11 = vmul.f32 1.442695, %v1868_v42  ;;  %v2226_v23 = vmul.f32 1.442695, %v1869_v30  ;;  %v8071_v39 = vpop.eup %4851  ;;  %v2621_v12 = vadd.f32 %v8055_v6, %v2620_v20  ;;  %v11960_v63 = vld [vmem:[#allocation74_spill] sm:$0xff]  ;;  %v8115_v6 = vpop.xlane.xlu1 %1676 }
 0x420   : > { %11958 = vst [vmem:[#allocation174_spill] sm:$0xff] %v8071_v39  ;;  %4871 = vpow2.f32 %v2316_v16  ;;  %v8074_v7 = vmul.f32 1.442695, %v1870_v31  ;;  %v8076_v25 = vmul.f32 1.442695, %v1871_v54  ;;  %v8078_v47 = vpop.eup %4853  ;;  %v8082_v57 = vadd.f32 %v7828_v61, %v2644_v46  ;;  %v11963_v16 = vld [vmem:[#allocation26_spill] sm:$0xff] }
 0x421   : > { %11959 = vst [vmem:[#allocation175_spill] sm:$0xff] %v8078_v47  ;;  %4873 = vpow2.f32 %v7669_v9  ;;  %v1928_v2 = vsub.f32 %v11960_v63, %v8065_v14  ;;  %v1929_v42 = vsub.f32 %v11961_v45, %v8065_v14  ;;  %v8088_v30 = vpop.eup %4855  ;;  %v2622_v31 = vadd.f32 %v8062_v37, %v2621_v12  ;;  %v11964_v20 = vld [vmem:[#allocation139_spill] sm:$0xff]  ;;  %v11966_v46 = vld [vmem:[#allocation180_spill] sm:$0xff]  ;;  %v11967_v61 = vld [vmem:[#allocation181_spill] sm:$0xff] }
 0x422   : > { %11962 = vst [vmem:[#allocation228_spill] sm:$0xff] %v8088_v30  ;;  %4875 = vpow2.f32 %v2208_v48  ;;  %v1930_v54 = vsub.f32 %v11963_v16, %v8065_v14  ;;  %v1931_v9 = vsub.f32 %v11964_v20, %v8065_v14  ;;  %v8095_v41 = vpop.eup %4857  ;;  %v1876_v63 = vsub.f32 %v11966_v46, %v7680_v5 }
 0x423   : > { %11965 = vst [vmem:[#allocation272_spill] sm:$0xff] %v8095_v41  ;;  %4877 = vpow2.f32 %v2210_v0  ;;  %v1877_v45 = vsub.f32 %v11967_v61, %v7680_v5  ;;  %v8103_v12 = vpop.eup %4859  ;;  %v2623_v48 = vadd.f32 %v8067_v49, %v2622_v31  ;;  %v2628_v16 = vadd.f32 %v8095_v41, %v7985_v43  ;;  %v11970_v0 = vld [vmem:[#allocation235_spill] sm:$0xff] }
 0x424   : > { %11969 = vst [vmem:[#allocation229_spill] sm:$0xff] %v8103_v12  ;;  %4879 = vpow2.f32 %v8022_v3  ;;  %v1879_v20 = vsub.f32 %v11970_v0, %v7680_v5  ;;  %v8111_v37 = vpop.eup %4861  ;;  %v2344_v46 = vmul.f32 1.442695, %v1928_v2  ;;  %v2346_v61 = vmul.f32 1.442695, %v1929_v42 }
 0x425   : > { %11971 = vst [vmem:[#allocation70_spill] sm:$0xff] %v8111_v37  ;;  %4881 = vpow2.f32 %v2214_v51  ;;  %v2653_v56 = vadd.f32 %v7839_v13, %v7833_v21  ;;  %2624 = vadd.xlane.f32.xlu1 %v2623_v48  ;;  %v2629_v43 = vadd.f32 %v8103_v12, %v2628_v16  ;;  %v2348_v3 = vmul.f32 1.442695, %v1930_v54  ;;  %v11975_v48 = vld [vmem:[#allocation76_spill] sm:$0xff]  ;;  %v11985_v12 = vld [vmem:[#allocation237_spill] sm:$0xff] }
 0x426   : > { %v8117_v18 = vpop.eup %4863  ;;  %4883 = vpow2.f32 %v2328_v8  ;;  %v8120_v31 = vmul.f32 1.442695, %v1931_v9  ;;  %v2240_v51 = vmul.f32 1.442695, %v1876_v63  ;;  %v2242_v2 = vmul.f32 1.442695, %v1877_v45 }
 0x427   : > { %11972 = vst [vmem:[#allocation107_spill] sm:$0xff] %v8117_v18  ;;  %v8122_v5 = vpop.eup %4865  ;;  %4885 = vpow2.f32 %v2330_v60  ;;  %v8124_v42 = vmul.f32 1.442695, %v1878_v4  ;;  %v2630_v21 = vadd.f32 %v8111_v37, %v2629_v43  ;;  %v8129_v13 = vmul.f32 1.442695, %v1879_v20  ;;  %v11977_v4 = vld [vmem:[#allocation77_spill] sm:$0xff] }
 0x428   : > { %11973 = vst [vmem:[#allocation71_spill] sm:$0xff] %v8122_v5  ;;  %v8126_v0 = vpop.eup %4867  ;;  %4887 = vpow2.f32 %v2332_v50  ;;  %v1936_v8 = vsub.f32 %v11975_v48, %v8115_v6  ;;  %v8137_v60 = vadd.f32 %v7846_v26, %v2653_v56  ;;  %v1937_v9 = vsub.f32 %v11977_v4, %v8115_v6  ;;  %v11978_v63 = vld [vmem:[#allocation140_spill] sm:$0xff]  ;;  %v11980_v20 = vld [vmem:[#allocation141_spill] sm:$0xff]  ;;  %v11981_v48 = vld [vmem:[#allocation182_spill] sm:$0xff] }
 0x429   : > { %11974 = vst [vmem:[#allocation134_spill] sm:$0xff] %v8126_v0  ;;  %v8133_v54 = vpop.eup %4869  ;;  %4889 = vpow2.f32 %v7720_v1  ;;  %v1938_v45 = vsub.f32 %v11978_v63, %v8115_v6  ;;  %v2631_v50 = vadd.f32 %v8117_v18, %v2630_v21  ;;  %v1939_v43 = vsub.f32 %v11980_v20, %v8115_v6  ;;  %v11983_v56 = vld [vmem:[#allocation183_spill] sm:$0xff]  ;;  %v11984_v26 = vld [vmem:[#allocation236_spill] sm:$0xff]  ;;  %v8158_v21 = vpop.xlane.xlu0 %1685 }
 0x42a   : > { %11976 = vst [vmem:[#allocation135_spill] sm:$0xff] %v8133_v54  ;;  %v8143_v16 = vpop.eup %4871  ;;  %4891 = vpow2.f32 %v2224_v11  ;;  %v1884_v1 = vsub.f32 %v11981_v48, %v7755_v10  ;;  %v1885_v4 = vsub.f32 %v11983_v56, %v7755_v10  ;;  %v1886_v63 = vsub.f32 %v11984_v26, %v7755_v10 }
 0x42b   : > { %11979 = vst [vmem:[#allocation48_spill] sm:$0xff] %v8143_v16  ;;  %v8150_v49 = vpop.eup %4873  ;;  %4893 = vpow2.f32 %v2226_v23  ;;  %v1887_v37 = vsub.f32 %v11985_v12, %v7755_v10  ;;  %v2632_v20 = vadd.f32 %v8122_v5, %v2631_v50  ;;  %v2662_v23 = vadd.f32 %v7925_v17, %v7920_v29 }
 0x42c   : > { %11982 = vst [vmem:[#allocation176_spill] sm:$0xff] %v8150_v49  ;;  %v8160_v11 = vpop.eup %4875  ;;  %v2637_v48 = vadd.f32 %v8150_v49, %v8058_v33  ;;  %4895 = vpow2.f32 %v8074_v7  ;;  %v2360_v26 = vmul.f32 1.442695, %v1936_v8  ;;  %v2362_v10 = vmul.f32 1.442695, %v1937_v9  ;;  %v11989_v33 = vld [vmem:[#allocation78_spill] sm:$0xff] }
 0x42d   : > { %11986 = vst [vmem:[#allocation177_spill] sm:$0xff] %v8160_v11  ;;  %v8168_v56 = vpop.eup %4877  ;;  %4897 = vpow2.f32 %v8076_v25  ;;  %v2364_v12 = vmul.f32 1.442695, %v1938_v45  ;;  %2633 = vadd.xlane.f32.xlu0 %v2632_v20  ;;  %v8174_v5 = vmul.f32 1.442695, %v1939_v43  ;;  %v1944_v7 = vsub.f32 %v11989_v33, %v8158_v21  ;;  %v11995_v20 = vld [vmem:[#allocation143_spill] sm:$0xff] }
 0x42e   : > { %11987 = vst [vmem:[#allocation230_spill] sm:$0xff] %v8168_v56  ;;  %v8171_v18 = vpop.eup %4879  ;;  %v2638_v50 = vadd.f32 %v8160_v11, %v2637_v48  ;;  %4899 = vpow2.f32 %v2344_v46  ;;  %v2256_v29 = vmul.f32 1.442695, %v1884_v1  ;;  %v2258_v17 = vmul.f32 1.442695, %v1885_v4  ;;  %v11994_v4 = vld [vmem:[#allocation27_spill] sm:$0xff] }
 0x42f   : > { %11988 = vst [vmem:[#allocation231_spill] sm:$0xff] %v8171_v18  ;;  %v8178_v49 = vpop.eup %4881  ;;  %4901 = vpow2.f32 %v2346_v61  ;;  %v8180_v25 = vmul.f32 1.442695, %v1886_v63  ;;  %v8185_v45 = vmul.f32 1.442695, %v1887_v37  ;;  %v8188_v46 = vadd.f32 %v7930_v53, %v2662_v23  ;;  %v11993_v61 = vld [vmem:[#allocation79_spill] sm:$0xff] }
 0x430   : > { %11990 = vst [vmem:[#allocation72_spill] sm:$0xff] %v8178_v49  ;;  %v8182_v8 = vpop.eup %4883  ;;  %v2639_v9 = vadd.f32 %v8168_v56, %v2638_v50  ;;  %4903 = vpow2.f32 %v2348_v3  ;;  %v1945_v1 = vsub.f32 %v11993_v61, %v8158_v21  ;;  %v1946_v63 = vsub.f32 %v11994_v4, %v8158_v21  ;;  %v11997_v23 = vld [vmem:[#allocation184_spill] sm:$0xff]  ;;  %v11999_v61 = vld [vmem:[#allocation185_spill] sm:$0xff]  ;;  %v12001_v56 = vld [vmem:[#allocation239_spill] sm:$0xff] }
 0x431   : > { %11991 = vst [vmem:[#allocation73_spill] sm:$0xff] %v8182_v8  ;;  %v8190_v43 = vpop.eup %4885  ;;  %4905 = vpow2.f32 %v7745_v58  ;;  %v1947_v48 = vsub.f32 %v11995_v20, %v8158_v21  ;;  %v8202_v3 = vmul.f32 1.442695, %v1944_v7  ;;  %v1892_v33 = vsub.f32 %v11997_v23, %v7782_v38  ;;  %v8206_v58 = vpop.xlane.xlu1 %1694  ;;  %v12000_v20 = vld [vmem:[#allocation238_spill] sm:$0xff] }
 0x432   : > { %11992 = vst [vmem:[#allocation136_spill] sm:$0xff] %v8190_v43  ;;  %v8199_v50 = vpop.eup %4887  ;;  %v2640_v37 = vadd.f32 %v8171_v18, %v2639_v9  ;;  %4907 = vpow2.f32 %v2240_v51  ;;  %v1893_v4 = vsub.f32 %v11999_v61, %v7782_v38  ;;  %v1894_v11 = vsub.f32 %v12000_v20, %v7782_v38 }
 0x433   : > { %11996 = vst [vmem:[#allocation137_spill] sm:$0xff] %v8199_v50  ;;  %v8208_v53 = vpop.eup %4889  ;;  %4909 = vpow2.f32 %v2242_v2  ;;  %v1895_v9 = vsub.f32 %v12001_v56, %v7782_v38  ;;  %v2671_v2 = vadd.f32 %v7943_v35, %v7937_v32  ;;  %v2378_v61 = vmul.f32 1.442695, %v1945_v1  ;;  %v12004_v38 = vld [vmem:[#allocation80_spill] sm:$0xff] }
 0x434   : > { %11998 = vst [vmem:[#allocation178_spill] sm:$0xff] %v8208_v53  ;;  %v8216_v51 = vpop.eup %4891  ;;  %v2641_v7 = vadd.f32 %v8178_v49, %v2640_v37  ;;  %v2646_v23 = vadd.f32 %v8208_v53, %v8082_v57  ;;  %4911 = vpow2.f32 %v8124_v42  ;;  %v2380_v20 = vmul.f32 1.442695, %v1946_v63  ;;  %v12006_v42 = vld [vmem:[#allocation81_spill] sm:$0xff] }
 0x435   : > { %12002 = vst [vmem:[#allocation179_spill] sm:$0xff] %v8216_v51  ;;  %v8224_v18 = vpop.eup %4893  ;;  %4913 = vpow2.f32 %v8129_v13  ;;  %v1952_v56 = vsub.f32 %v12004_v38, %v8206_v58  ;;  %v8232_v57 = vmul.f32 1.442695, %v1947_v48  ;;  %v1953_v32 = vsub.f32 %v12006_v42, %v8206_v58 }
 0x436   : > { %12003 = vst [vmem:[#allocation232_spill] sm:$0xff] %v8224_v18  ;;  %v8229_v41 = vpop.eup %4895  ;;  %2642 = vadd.xlane.f32.xlu1 %v2641_v7  ;;  %v2647_v37 = vadd.f32 %v8216_v51, %v2646_v23  ;;  %4915 = vpow2.f32 %v2360_v26  ;;  %v2272_v13 = vmul.f32 1.442695, %v1892_v33  ;;  %v2274_v1 = vmul.f32 1.442695, %v1893_v4 }
 0x437   : > { %12005 = vst [vmem:[#allocation233_spill] sm:$0xff] %v8229_v41  ;;  %v8236_v35 = vpop.eup %4897  ;;  %4917 = vpow2.f32 %v2362_v10  ;;  %v8238_v63 = vmul.f32 1.442695, %v1894_v11  ;;  %v8243_v7 = vmul.f32 1.442695, %v1895_v9  ;;  %v8246_v26 = vadd.f32 %v7950_v19, %v2671_v2  ;;  %v12010_v10 = vld [vmem:[#allocation144_spill] sm:$0xff]  ;;  %v8264_v19 = vpop.xlane.xlu0 %1703 }
 0x438   : > { %12007 = vst [vmem:[#allocation74_spill] sm:$0xff] %v8236_v35  ;;  %v8240_v53 = vpop.eup %4899  ;;  %v2648_v38 = vadd.f32 %v8224_v18, %v2647_v37  ;;  %4919 = vpow2.f32 %v2364_v12  ;;  %v1954_v33 = vsub.f32 %v12010_v10, %v8206_v58  ;;  %v12011_v11 = vld [vmem:[#allocation145_spill] sm:$0xff]  ;;  %v8255_v23 = vmul.f32 1.442695, %v1952_v56  ;;  %v12013_v2 = vld [vmem:[#allocation186_spill] sm:$0xff]  ;;  %v12015_v10 = vld [vmem:[#allocation187_spill] sm:$0xff] }
 0x439   : > { %12008 = vst [vmem:[#allocation75_spill] sm:$0xff] %v8240_v53  ;;  %v8248_v48 = vpop.eup %4901  ;;  %4921 = vpow2.f32 %v7819_v15  ;;  %v1955_v4 = vsub.f32 %v12011_v11, %v8206_v58  ;;  %v8260_v9 = vmul.f32 1.442695, %v1953_v32  ;;  %v1900_v37 = vsub.f32 %v12013_v2, %v7855_v62  ;;  %v12016_v56 = vld [vmem:[#allocation240_spill] sm:$0xff]  ;;  %v12017_v18 = vld [vmem:[#allocation241_spill] sm:$0xff] }
 0x43a   : > { %12009 = vst [vmem:[#allocation26_spill] sm:$0xff] %v8248_v48  ;;  %v8257_v42 = vpop.eup %4903  ;;  %v2649_v12 = vadd.f32 %v8229_v41, %v2648_v38  ;;  %4923 = vpow2.f32 %v2256_v29  ;;  %v1901_v11 = vsub.f32 %v12015_v10, %v7855_v62  ;;  %v1902_v51 = vsub.f32 %v12016_v56, %v7855_v62  ;;  %v12020_v56 = vld [vmem:[#allocation82_spill] sm:$0xff] }
 0x43b   : > { %12012 = vst [vmem:[#allocation139_spill] sm:$0xff] %v8257_v42  ;;  %v8266_v15 = vpop.eup %4905  ;;  %4925 = vpow2.f32 %v2258_v17  ;;  %v1903_v38 = vsub.f32 %v12017_v18, %v7855_v62  ;;  %v2680_v17 = vadd.f32 %v8026_v24, %v8019_v44  ;;  %v2396_v10 = vmul.f32 1.442695, %v1954_v33  ;;  %v12021_v18 = vld [vmem:[#allocation83_spill] sm:$0xff]  ;;  %v12023_v44 = vld [vmem:[#allocation28_spill] sm:$0xff] }
 0x43c   : > { %12014 = vst [vmem:[#allocation180_spill] sm:$0xff] %v8266_v15  ;;  %v8274_v29 = vpop.eup %4907  ;;  %v2650_v32 = vadd.f32 %v8236_v35, %v2649_v12  ;;  %v2655_v2 = vadd.f32 %v8266_v15, %v8137_v60  ;;  %4927 = vpow2.f32 %v8180_v25  ;;  %v1960_v62 = vsub.f32 %v12020_v56, %v8264_v19 }
 0x43d   : > { %12018 = vst [vmem:[#allocation181_spill] sm:$0xff] %v8274_v29  ;;  %v8282_v41 = vpop.eup %4909  ;;  %4929 = vpow2.f32 %v8185_v45  ;;  %v1961_v49 = vsub.f32 %v12021_v18, %v8264_v19  ;;  %v8293_v25 = vmul.f32 1.442695, %v1955_v4  ;;  %v1962_v24 = vsub.f32 %v12023_v44, %v8264_v19  ;;  %v12027_v44 = vld [vmem:[#allocation147_spill] sm:$0xff] }
 0x43e   : > { %12019 = vst [vmem:[#allocation234_spill] sm:$0xff] %v8282_v41  ;;  %v8289_v12 = vpop.eup %4911  ;;  %2651 = vadd.xlane.f32.xlu0 %v2650_v32  ;;  %v2656_v60 = vadd.f32 %v8274_v29, %v2655_v2  ;;  %4931 = vpow2.f32 %v8202_v3  ;;  %v2288_v33 = vmul.f32 1.442695, %v1900_v37  ;;  %v2290_v56 = vmul.f32 1.442695, %v1901_v11 }
 0x43f   : > { %12022 = vst [vmem:[#allocation235_spill] sm:$0xff] %v8289_v12  ;;  %v8297_v45 = vpop.eup %4913  ;;  %4933 = vpow2.f32 %v2378_v61  ;;  %v8299_v15 = vmul.f32 1.442695, %v1902_v51  ;;  %v8304_v2 = vmul.f32 1.442695, %v1903_v38  ;;  %v8307_v3 = vadd.f32 %v8033_v28, %v2680_v17  ;;  %v12029_v17 = vld [vmem:[#allocation188_spill] sm:$0xff]  ;;  %v8325_v28 = vpop.xlane.xlu1 %1712 }
 0x440   : > { %12024 = vst [vmem:[#allocation76_spill] sm:$0xff] %v8297_v45  ;;  %v8301_v18 = vpop.eup %4915  ;;  %v2657_v32 = vadd.f32 %v8282_v41, %v2656_v60  ;;  %4935 = vpow2.f32 %v2380_v20  ;;  %v1963_v61 = vsub.f32 %v12027_v44, %v8264_v19  ;;  %v8314_v37 = vmul.f32 1.442695, %v1960_v62  ;;  %v12031_v62 = vld [vmem:[#allocation189_spill] sm:$0xff]  ;;  %v12033_v41 = vld [vmem:[#allocation243_spill] sm:$0xff] }
 0x441   : > { %12025 = vst [vmem:[#allocation77_spill] sm:$0xff] %v8301_v18  ;;  %v8309_v4 = vpop.eup %4917  ;;  %4937 = vpow2.f32 %v7835_v52  ;;  %v8316_v51 = vmul.f32 1.442695, %v1961_v49  ;;  %v8321_v38 = vmul.f32 1.442695, %v1962_v24  ;;  %v1908_v60 = vsub.f32 %v12029_v17, %v7911_v36  ;;  %v12032_v49 = vld [vmem:[#allocation242_spill] sm:$0xff] }
 0x442   : > { %12026 = vst [vmem:[#allocation140_spill] sm:$0xff] %v8309_v4  ;;  %v8318_v11 = vpop.eup %4919  ;;  %v2658_v20 = vadd.f32 %v8289_v12, %v2657_v32  ;;  %4939 = vpow2.f32 %v2272_v13  ;;  %v1909_v44 = vsub.f32 %v12031_v62, %v7911_v36  ;;  %v1910_v29 = vsub.f32 %v12032_v49, %v7911_v36  ;;  %v12037_v49 = vld [vmem:[#allocation85_spill] sm:$0xff] }
 0x443   : > { %12028 = vst [vmem:[#allocation141_spill] sm:$0xff] %v8318_v11  ;;  %v8327_v52 = vpop.eup %4921  ;;  %4941 = vpow2.f32 %v2274_v1  ;;  %v1911_v32 = vsub.f32 %v12033_v41, %v7911_v36  ;;  %v2689_v1 = vadd.f32 %v8078_v47, %v8071_v39  ;;  %v8346_v62 = vmul.f32 1.442695, %v1963_v61  ;;  %v12036_v36 = vld [vmem:[#allocation84_spill] sm:$0xff] }
 0x444   : > { %12030 = vst [vmem:[#allocation182_spill] sm:$0xff] %v8327_v52  ;;  %v8335_v13 = vpop.eup %4923  ;;  %v2659_v24 = vadd.f32 %v8297_v45, %v2658_v20  ;;  %v2664_v17 = vadd.f32 %v8327_v52, %v8188_v46  ;;  %4943 = vpow2.f32 %v8238_v63  ;;  %v1968_v41 = vsub.f32 %v12036_v36, %v8325_v28  ;;  %v12038_v39 = vld [vmem:[#allocation148_spill] sm:$0xff] }
 0x445   : > { %12034 = vst [vmem:[#allocation183_spill] sm:$0xff] %v8335_v13  ;;  %v8343_v12 = vpop.eup %4925  ;;  %4945 = vpow2.f32 %v8243_v7  ;;  %v1969_v20 = vsub.f32 %v12037_v49, %v8325_v28  ;;  %v2304_v63 = vmul.f32 1.442695, %v1908_v60  ;;  %v1970_v47 = vsub.f32 %v12038_v39, %v8325_v28  ;;  %v12040_v60 = vld [vmem:[#allocation149_spill] sm:$0xff] }
 0x446   : > { %12035 = vst [vmem:[#allocation236_spill] sm:$0xff] %v8343_v12  ;;  %v8352_v45 = vpop.eup %4927  ;;  %2660 = vadd.xlane.f32.xlu1 %v2659_v24  ;;  %v2665_v46 = vadd.f32 %v8335_v13, %v2664_v17  ;;  %4947 = vpow2.f32 %v8255_v23  ;;  %v2306_v61 = vmul.f32 1.442695, %v1909_v44  ;;  %v8361_v36 = vmul.f32 1.442695, %v1910_v29  ;;  %v12042_v44 = vld [vmem:[#allocation190_spill] sm:$0xff] }
 0x447   : > { %v8358_v7 = vpop.eup %4929  ;;  %4949 = vpow2.f32 %v8260_v9  ;;  %v8363_v52 = vmul.f32 1.442695, %v1911_v32  ;;  %v8369_v23 = vadd.f32 %v8088_v30, %v2689_v1  ;;  %v1971_v39 = vsub.f32 %v12040_v60, %v8325_v28 }
 0x448   : > { %v8365_v49 = vpop.eup %4931  ;;  %v2666_v24 = vadd.f32 %v8343_v12, %v2665_v46  ;;  %4951 = vpow2.f32 %v2396_v10  ;;  %v8376_v9 = vmul.f32 1.442695, %v1968_v41  ;;  %v8378_v29 = vmul.f32 1.442695, %v1969_v20  ;;  %v12044_v46 = vld [vmem:[#allocation191_spill] sm:$0xff]  ;;  %v12047_v20 = vld [vmem:[#allocation245_spill] sm:$0xff] }
 0x449   : > { %12039 = vst [vmem:[#allocation237_spill] sm:$0xff] %v8365_v49  ;;  %v8373_v17 = vpop.eup %4933  ;;  %4953 = vpow2.f32 %v7916_v59  ;;  %v1916_v32 = vsub.f32 %v12042_v44, %v7960_v27  ;;  %v8385_v1 = vmul.f32 1.442695, %v1970_v47  ;;  %v1917_v60 = vsub.f32 %v12044_v46, %v7960_v27  ;;  %v12046_v59 = vld [vmem:[#allocation244_spill] sm:$0xff] }
 0x44a   : > { %12041 = vst [vmem:[#allocation78_spill] sm:$0xff] %v8373_v17  ;;  %v8382_v13 = vpop.eup %4935  ;;  %v2667_v10 = vadd.f32 %v8352_v45, %v2666_v24  ;;  %4955 = vpow2.f32 %v2288_v33  ;;  %v1918_v41 = vsub.f32 %v12046_v59, %v7960_v27  ;;  %v1919_v12 = vsub.f32 %v12047_v20, %v7960_v27  ;;  %v12051_v20 = vld [vmem:[#allocation193_spill] sm:$0xff] }
 0x44b   : > { %12043 = vst [vmem:[#allocation79_spill] sm:$0xff] %v8382_v13  ;;  %v8389_v30 = vpop.eup %4937  ;;  %4957 = vpow2.f32 %v2290_v56  ;;  %v2698_v44 = vadd.f32 %v8133_v54, %v8126_v0  ;;  %v12049_v56 = vld [vmem:[#allocation192_spill] sm:$0xff]  ;;  %v8408_v27 = vmul.f32 1.442695, %v1971_v39  ;;  %v8410_v59 = vmul.f32 1.442695, %v1916_v32 }
 0x44c   : > { %12045 = vst [vmem:[#allocation27_spill] sm:$0xff] %v8389_v30  ;;  %v8397_v35 = vpop.eup %4939  ;;  %v2668_v47 = vadd.f32 %v8358_v7, %v2667_v10  ;;  %v2673_v33 = vadd.f32 %v8389_v30, %v8246_v26  ;;  %4959 = vpow2.f32 %v8299_v15  ;;  %v1924_v24 = vsub.f32 %v12049_v56, %v8014_v34  ;;  %v12052_v56 = vld [vmem:[#allocation246_spill] sm:$0xff] }
 0x44d   : > { %12048 = vst [vmem:[#allocation143_spill] sm:$0xff] %v8397_v35  ;;  %v8405_v46 = vpop.eup %4941  ;;  %4961 = vpow2.f32 %v8304_v2  ;;  %v1925_v0 = vsub.f32 %v12051_v20, %v8014_v34  ;;  %v8418_v15 = vmul.f32 1.442695, %v1917_v60  ;;  %v1926_v54 = vsub.f32 %v12052_v56, %v8014_v34  ;;  %v12053_v20 = vld [vmem:[#allocation247_spill] sm:$0xff] }
 0x44e   : > { %12050 = vst [vmem:[#allocation184_spill] sm:$0xff] %v8405_v46  ;;  %v8414_v10 = vpop.eup %4943  ;;  %2669 = vadd.xlane.f32.xlu0 %v2668_v47  ;;  %v2674_v26 = vadd.f32 %v8397_v35, %v2673_v33  ;;  %4963 = vpow2.f32 %v8314_v37  ;;  %v8425_v39 = vmul.f32 1.442695, %v1918_v41  ;;  %v8427_v32 = vmul.f32 1.442695, %v1919_v12  ;;  %v12057_v41 = vld [vmem:[#allocation194_spill] sm:$0xff] }
 0x44f   : > { %v8422_v2 = vpop.eup %4945  ;;  %4965 = vpow2.f32 %v8316_v51  ;;  %v1927_v47 = vsub.f32 %v12053_v20, %v8014_v34  ;;  %v8436_v60 = vadd.f32 %v8143_v16, %v2698_v44  ;;  %v8438_v33 = vmul.f32 1.442695, %v1924_v24  ;;  %v12056_v51 = vld [vmem:[#allocation225_spill] sm:$0xff]  ;;  %v12059_v24 = vld [vmem:[#allocation138_spill] sm:$0xff] }
 0x450   : > { %v8431_v30 = vpop.eup %4947  ;;  %v2675_v37 = vadd.f32 %v8405_v46, %v2674_v26  ;;  %4967 = vpow2.f32 %v8321_v38  ;;  %v8443_v12 = vmul.f32 1.442695, %v1925_v0  ;;  %v2707_v34 = vadd.f32 %v8190_v43, %v8182_v8 }
 0x451   : > { %12054 = vst [vmem:[#allocation185_spill] sm:$0xff] %v8431_v30  ;;  %v8440_v56 = vpop.eup %4949  ;;  %4969 = vpow2.f32 %v12056_v51  ;;  %v1932_v20 = vsub.f32 %v12057_v41, %v8065_v14  ;;  %v8452_v44 = vmul.f32 1.442695, %v1926_v54  ;;  %v1933_v16 = vsub.f32 %v12059_v24, %v8065_v14  ;;  %v12060_v51 = vld [vmem:[#allocation248_spill] sm:$0xff]  ;;  %v12061_v41 = vld [vmem:[#allocation249_spill] sm:$0xff]  ;;  %v12062_v24 = vld [vmem:[#allocation195_spill] sm:$0xff] }
 0x452   : > { %12055 = vst [vmem:[#allocation238_spill] sm:$0xff] %v8440_v56  ;;  %v8449_v26 = vpop.eup %4951  ;;  %v2676_v38 = vadd.f32 %v8414_v10, %v2675_v37  ;;  %4971 = vpow2.f32 %v2304_v63  ;;  %v8458_v0 = vmul.f32 1.442695, %v1927_v47  ;;  %v1934_v8 = vsub.f32 %v12060_v51, %v8065_v14 }
 0x453   : > { %12058 = vst [vmem:[#allocation239_spill] sm:$0xff] %v8449_v26  ;;  %v8456_v35 = vpop.eup %4953  ;;  %4973 = vpow2.f32 %v2306_v61  ;;  %v1935_v43 = vsub.f32 %v12061_v41, %v8065_v14  ;;  %v2716_v61 = vadd.f32 %v8248_v48, %v8240_v53  ;;  %v8476_v37 = vadd.f32 %v8199_v50, %v2707_v34  ;;  %v12063_v41 = vld [vmem:[#allocation197_spill] sm:$0xff] }
 0x454   : > { %v8464_v46 = vpop.eup %4955  ;;  %v2677_v63 = vadd.f32 %v8422_v2, %v2676_v38  ;;  %v2682_v54 = vadd.f32 %v8456_v35, %v8307_v3  ;;  %4975 = vpow2.f32 %v8361_v36  ;;  %v8478_v14 = vmul.f32 1.442695, %v1932_v20 }
 0x455   : > { %v8472_v47 = vpop.eup %4957  ;;  %4977 = vpow2.f32 %v8363_v52  ;;  %v1940_v38 = vsub.f32 %v12062_v24, %v8115_v6  ;;  %v8486_v36 = vmul.f32 1.442695, %v1933_v16  ;;  %v1941_v52 = vsub.f32 %v12063_v41, %v8115_v6  ;;  %v12064_v24 = vld [vmem:[#allocation250_spill] sm:$0xff] }
 0x456   : > { %v8482_v51 = vpop.eup %4959  ;;  %2678 = vadd.xlane.f32.xlu1 %v2677_v63  ;;  %v2683_v3 = vadd.f32 %v8464_v46, %v2682_v54  ;;  %4979 = vpow2.f32 %v8376_v9  ;;  %v8493_v34 = vmul.f32 1.442695, %v1934_v8  ;;  %v8495_v20 = vmul.f32 1.442695, %v1935_v43  ;;  %v12066_v54 = vld [vmem:[#allocation196_spill] sm:$0xff] }
 0x457   : > { %v8490_v53 = vpop.eup %4961  ;;  %4981 = vpow2.f32 %v8378_v29  ;;  %v1942_v63 = vsub.f32 %v12064_v24, %v8115_v6  ;;  %v8504_v16 = vadd.f32 %v8257_v42, %v2716_v61  ;;  %v1943_v41 = vsub.f32 %v12066_v54, %v8115_v6  ;;  %v12068_v24 = vld [vmem:[#allocation198_spill] sm:$0xff] }
 0x458   : > { %v8499_v48 = vpop.eup %4963  ;;  %v2684_v9 = vadd.f32 %v8472_v47, %v2683_v3  ;;  %4983 = vpow2.f32 %v8385_v1  ;;  %v8511_v8 = vmul.f32 1.442695, %v1940_v38  ;;  %v2725_v43 = vadd.f32 %v8309_v4, %v8301_v18  ;;  %v12070_v6 = vld [vmem:[#allocation142_spill] sm:$0xff]  ;;  %v12071_v18 = vld [vmem:[#allocation251_spill] sm:$0xff]  ;;  %v12072_v4 = vld [vmem:[#allocation252_spill] sm:$0xff] }
 0x459   : > { %12065 = vst [vmem:[#allocation80_spill] sm:$0xff] %v8499_v48  ;;  %v8508_v29 = vpop.eup %4965  ;;  %4985 = vpow2.f32 %v8012_v40  ;;  %v1948_v3 = vsub.f32 %v12068_v24, %v8158_v21  ;;  %v8521_v61 = vmul.f32 1.442695, %v1941_v52  ;;  %v1949_v54 = vsub.f32 %v12070_v6, %v8158_v21  ;;  %v12075_v6 = vld [vmem:[#allocation199_spill] sm:$0xff] }
 0x45a   : > { %12067 = vst [vmem:[#allocation81_spill] sm:$0xff] %v8508_v29  ;;  %v8517_v50 = vpop.eup %4967  ;;  %v2685_v1 = vadd.f32 %v8482_v51, %v2684_v9  ;;  %4987 = vpow2.f32 %v8410_v59  ;;  %v8528_v38 = vmul.f32 1.442695, %v1942_v63  ;;  %v1950_v24 = vsub.f32 %v12071_v18, %v8158_v21 }
 0x45b   : > { %12069 = vst [vmem:[#allocation144_spill] sm:$0xff] %v8517_v50  ;;  %v8525_v40 = vpop.eup %4969  ;;  %4989 = vpow2.f32 %v8418_v15  ;;  %v1951_v42 = vsub.f32 %v12072_v4, %v8158_v21  ;;  %v2734_v15 = vadd.f32 %v8373_v17, %v8365_v49  ;;  %v8545_v18 = vmul.f32 1.442695, %v1943_v41  ;;  %v12077_v49 = vld [vmem:[#allocation201_spill] sm:$0xff] }
 0x45c   : > { %v8534_v9 = vpop.eup %4971  ;;  %v2686_v59 = vadd.f32 %v8490_v53, %v2685_v1  ;;  %v2691_v52 = vadd.f32 %v8525_v40, %v8369_v23  ;;  %4991 = vpow2.f32 %v8425_v39  ;;  %v8548_v21 = vadd.f32 %v8318_v11, %v2725_v43 }
 0x45d   : > { %12073 = vst [vmem:[#allocation145_spill] sm:$0xff] %v8534_v9  ;;  %v8542_v63 = vpop.eup %4973  ;;  %4993 = vpow2.f32 %v8427_v32  ;;  %v8550_v4 = vmul.f32 1.442695, %v1948_v3  ;;  %v8556_v39 = vmul.f32 1.442695, %v1949_v54  ;;  %v1956_v32 = vsub.f32 %v12075_v6, %v8206_v58 }
 0x45e   : > { %v8552_v1 = vpop.eup %4975  ;;  %2687 = vadd.xlane.f32.xlu0 %v2686_v59  ;;  %v2692_v23 = vadd.f32 %v8534_v9, %v2691_v52  ;;  %4995 = vpow2.f32 %v8069_v22  ;;  %v8563_v43 = vmul.f32 1.442695, %v1950_v24  ;;  %v8565_v3 = vmul.f32 1.442695, %v1951_v42  ;;  %v12079_v52 = vld [vmem:[#allocation253_spill] sm:$0xff] }
 0x45f   : > { %12074 = vst [vmem:[#allocation186_spill] sm:$0xff] %v8552_v1  ;;  %v8560_v41 = vpop.eup %4977  ;;  %4997 = vpow2.f32 %v8438_v33  ;;  %v1957_v59 = vsub.f32 %v12077_v49, %v8206_v58  ;;  %v8574_v54 = vadd.f32 %v8382_v13, %v2734_v15  ;;  %v1958_v6 = vsub.f32 %v12079_v52, %v8206_v58  ;;  %v12081_v49 = vld [vmem:[#allocation200_spill] sm:$0xff] }
 0x460   : > { %12076 = vst [vmem:[#allocation187_spill] sm:$0xff] %v8560_v41  ;;  %v8569_v17 = vpop.eup %4979  ;;  %v2693_v22 = vadd.f32 %v8542_v63, %v2692_v23  ;;  %4999 = vpow2.f32 %v8443_v12  ;;  %v1959_v33 = vsub.f32 %v12081_v49, %v8206_v58  ;;  %v3246_v24 = vlaneseq }
 0x461   : > { %12078 = vst [vmem:[#allocation240_spill] sm:$0xff] %v8569_v17  ;;  %v8582_v42 = vpop.eup %4981  ;;  %5001 = vpow2.f32 %v8452_v44  ;;  %v8591_v15 = vmul.f32 1.442695, %v1956_v32  ;;  %v5469_v52 = vmov 1966171168   ;;  %v2743_v58 = vadd.f32 %v8440_v56, %v8431_v30  ;;  %v12085_v32 = vld [vmem:[#allocation202_spill] sm:$0xff] }
 0x462   : > { %12080 = vst [vmem:[#allocation241_spill] sm:$0xff] %v8582_v42  ;;  %v8587_v23 = vpop.eup %4983  ;;  %v2694_v12 = vadd.f32 %v8552_v1, %v2693_v22  ;;  %5003 = vpow2.f32 %v8458_v0  ;;  %v3244_v13 = vunpack.c.l.s4 %v5469_v52  ;;  %v8596_v9 = vmul.f32 1.442695, %v1957_v59 }
 0x463   : > { %12082 = vst [vmem:[#allocation82_spill] sm:$0xff] %v8587_v23  ;;  %v8593_v11 = vpop.eup %4985  ;;  %5005 = vpow2.f32 %v8120_v31  ;;  %v3247_v44 = vshrl.u32 %v3246_v24, 7  ;;  %v1964_v31 = vsub.f32 %v12085_v32, %v8264_v19  ;;  %v8611_v52 = vmul.f32 1.442695, %v1958_v6  ;;  %v12087_v24 = vld [vmem:[#allocation146_spill] sm:$0xff] }
 0x464   : > { %12083 = vst [vmem:[#allocation83_spill] sm:$0xff] %v8593_v11  ;;  %v8600_v49 = vpop.eup %4987  ;;  %v2695_v22 = vadd.f32 %v8560_v41, %v2694_v12  ;;  %v2700_v0 = vadd.f32 %v8593_v11, %v8436_v60  ;;  %5007 = vpow2.f32 %v8478_v14  ;;  %v1965_v30 = vsub.f32 %v12087_v24, %v8264_v19  ;;  %v12089_v32 = vld [vmem:[#allocation254_spill] sm:$0xff] }
 0x465   : > { %12084 = vst [vmem:[#allocation28_spill] sm:$0xff] %v8600_v49  ;;  %v8608_v59 = vpop.eup %4989  ;;  %5009 = vpow2.f32 %v8486_v36  ;;  %v3245_v56 = vunpack.c.0.s8 %v3244_v13  ;;  %v8619_v14 = vmul.f32 1.442695, %v1959_v33  ;;  %v1966_v11 = vsub.f32 %v12089_v32, %v8264_v19  ;;  %v5226_v36 = vld.sshfl [vmem:[%s270_s13] sm:$0xff pattern:$0x75316420] }
 0x466   : > { %12086 = vst [vmem:[#allocation147_spill] sm:$0xff] %v8608_v59  ;;  %v8615_v12 = vpop.eup %4991  ;;  %2696 = vadd.xlane.f32.xlu1 %v2695_v22  ;;  %v2701_v60 = vadd.f32 %v8600_v49, %v2700_v0  ;;  %5011 = vpow2.f32 %v8493_v34  ;;  %v8630_v13 = vadd.f32 %v8449_v26, %v2743_v58  ;;  %v12091_v22 = vld [vmem:[#allocation255_spill] sm:$0xff]  ;;  %v8640_v32 = vmul.f32 1.442695, %v1964_v31 }
 0x467   : > { %12088 = vst [vmem:[#allocation188_spill] sm:$0xff] %v8615_v12  ;;  %v8626_v6 = vpop.eup %4993  ;;  %5013 = vpow2.f32 %v8495_v20  ;;  %v1967_v0 = vsub.f32 %v12091_v22, %v8264_v19  ;;  %v8634_v24 = vsub.s32 %v3245_v56, %v3247_v44  ;;  %v2752_v49 = vadd.f32 %v8508_v29, %v8499_v48  ;;  %v8644_v20 = vpop.xlane.xlu0 %2543 }
 0x468   : > { %12090 = vst [vmem:[#allocation189_spill] sm:$0xff] %v8626_v6  ;;  %v8636_v34 = vpop.eup %4995  ;;  %v2702_v33 = vadd.f32 %v8608_v59, %v2701_v60  ;;  %5015 = vpow2.f32 %v8174_v5  ;;  %v8651_v56 = vmul.f32 1.442695, %v1965_v30  ;;  %v8657_v31 = vmul.f32 1.442695, %v1966_v11  ;;  %v12095_v60 = vld [vmem:[#allocation203_spill] sm:$0xff] }
 0x469   : > { %12092 = vst [vmem:[#allocation242_spill] sm:$0xff] %v8636_v34  ;;  %v8646_v58 = vpop.eup %4997  ;;  %v2709_v19 = vadd.f32 %v8636_v34, %v8476_v37  ;;  %5017 = vpow2.f32 %v8511_v8  ;;  %v1972_v22 = vsub.f32 %v12095_v60, %v8325_v28  ;;  %v12097_v30 = vld [vmem:[#allocation204_spill] sm:$0xff]  ;;  %v8676_v60 = vadd.f32 %v8517_v50, %v2752_v49 }
 0x46a   : > { %12093 = vst [vmem:[#allocation243_spill] sm:$0xff] %v8646_v58  ;;  %v8653_v44 = vpop.eup %4999  ;;  %v2703_v5 = vadd.f32 %v8615_v12, %v2702_v33  ;;  %5019 = vpow2.f32 %v8521_v61  ;;  %v1973_v37 = vsub.f32 %v12097_v30, %v8325_v28  ;;  %v12098_v8 = vld [vmem:[#allocation256_spill] sm:$0xff]  ;;  %v8673_v61 = vmul.f32 1.442695, %v1967_v0  ;;  %v12101_v30 = vld [vmem:[#allocation257_spill] sm:$0xff]  ;;  %v12195_v12 = vld [vmem:[#allocation159_spill] sm:$0xff] }
 0x46b   : > { %12094 = vst [vmem:[#allocation84_spill] sm:$0xff] %v8653_v44  ;;  %v8661_v48 = vpop.eup %5001  ;;  %v2710_v29 = vadd.f32 %v8646_v58, %v2709_v19  ;;  %5021 = vpow2.f32 %v8528_v38  ;;  %v1974_v26 = vsub.f32 %v12098_v8, %v8325_v28  ;;  %v1975_v8 = vsub.f32 %v12101_v30, %v8325_v28  ;;  %v8684_v58 = vpop.xlane.xlu0 %1721 }
 0x46c   : > { %12096 = vst [vmem:[#allocation85_spill] sm:$0xff] %v8661_v48  ;;  %v8669_v33 = vpop.eup %5003  ;;  %v2704_v11 = vadd.f32 %v8626_v6, %v2703_v5  ;;  %5023 = vpow2.f32 %v8545_v18  ;;  %v3257_v34 = vcombine.high %v5226_v36, %v5226_v36  ;;  %v8691_v49 = vmul.f32 1.442695, %v1972_v22 }
 0x46d   : > { %12099 = vst [vmem:[#allocation148_spill] sm:$0xff] %v8669_v33  ;;  %v8678_v19 = vpop.eup %5005  ;;  %v2711_v38 = vadd.f32 %v8653_v44, %v2710_v29  ;;  %5025 = vpow2.f32 %v8232_v57  ;;  %v2761_v29 = vadd.f32 %v8582_v42, %v8569_v17  ;;  %v8699_v0 = vmul.f32 1.442695, %v1973_v37 }
 0x46e   : > { %12100 = vst [vmem:[#allocation149_spill] sm:$0xff] %v8678_v19  ;;  %v8686_v5 = vpop.eup %5007  ;;  %2705 = vadd.xlane.f32.xlu0 %v2704_v11  ;;  %v2718_v18 = vadd.f32 %v8678_v19, %v8504_v16  ;;  %5027 = vpow2.f32 %v8550_v4  ;;  %v8701_v30 = vmul.f32 1.442695, %v1974_v26  ;;  %v12105_v4 = vld [vmem:[#allocation86_spill] sm:$0xff]  ;;  %v8710_v17 = vrot.slane %v5226_v36, %v8634_v24  ;;  %v12108_v36 = vld [vmem:[#allocation87_spill] sm:$0xff] }
 0x46f   : > { %12102 = vst [vmem:[#allocation190_spill] sm:$0xff] %v8686_v5  ;;  %v8695_v57 = vpop.eup %5009  ;;  %v2712_v28 = vadd.f32 %v8661_v48, %v2711_v38  ;;  %5029 = vpow2.f32 %v8556_v39  ;;  %v1976_v22 = vsub.f32 %v12105_v4, %v8684_v58  ;;  %v8716_v26 = vmul.f32 1.442695, %v1975_v8 }
 0x470   : > { %12103 = vst [vmem:[#allocation191_spill] sm:$0xff] %v8695_v57  ;;  %v8703_v11 = vpop.eup %5011  ;;  %v2719_v16 = vadd.f32 %v8686_v5, %v2718_v18  ;;  %5031 = vpow2.f32 %v8563_v43  ;;  %v3279_v37 = vrot.slane %v3257_v34, %v8634_v24  ;;  %v8724_v18 = vadd.f32 %v8587_v23, %v2761_v29  ;;  %v12110_v34 = vld [vmem:[#allocation29_spill] sm:$0xff] }
 0x471   : > { %12104 = vst [vmem:[#allocation244_spill] sm:$0xff] %v8703_v11  ;;  %v8712_v42 = vpop.eup %5013  ;;  %v2713_v39 = vadd.f32 %v8669_v33, %v2712_v28  ;;  %5033 = vpow2.f32 %v8565_v3  ;;  %v1977_v4 = vsub.f32 %v12108_v36, %v8684_v58  ;;  %v1978_v8 = vsub.f32 %v12110_v34, %v8684_v58 }
 0x472   : > { %12106 = vst [vmem:[#allocation245_spill] sm:$0xff] %v8712_v42  ;;  %v8719_v38 = vpop.eup %5015  ;;  %v2720_v43 = vadd.f32 %v8695_v57, %v2719_v16  ;;  %5035 = vpow2.f32 %v8293_v25  ;;  %v3289_v28 = vcombine.high %v3279_v37, %v3279_v37  ;;  %3299 = vmatprep.subr.bf16.mxu0 %v3279_v37  ;;  %v12112_v16 = vld [vmem:[#allocation151_spill] sm:$0xff]  ;;  %v12114_v37 = vld [vmem:[#allocation205_spill] sm:$0xff] }
 0x473   : > { %12107 = vst [vmem:[#allocation192_spill] sm:$0xff] %v8719_v38  ;;  %v8728_v50 = vpop.eup %5017  ;;  %2714 = vadd.xlane.f32.xlu1 %v2713_v39  ;;  %v2727_v3 = vadd.f32 %v8719_v38, %v8548_v21  ;;  %5037 = vpow2.f32 %v8591_v15  ;;  %v1979_v36 = vsub.f32 %v12112_v16, %v8684_v58  ;;  %v8741_v39 = vmul.f32 1.442695, %v1976_v22  ;;  %3300 = vmatpush1.bf16.xpose.msra.mxu0 %v8710_v17  ;;  %v12117_v38 = vld [vmem:[#allocation258_spill] sm:$0xff] }
 0x474   : > { %12109 = vst [vmem:[#allocation193_spill] sm:$0xff] %v8728_v50  ;;  %v8735_v25 = vpop.eup %5019  ;;  %v2721_v29 = vadd.f32 %v8703_v11, %v2720_v43  ;;  %5039 = vpow2.f32 %v8596_v9  ;;  %v1980_v34 = vsub.f32 %v12114_v37, %v8684_v58  ;;  %v12115_v43 = vld [vmem:[#allocation150_spill] sm:$0xff]  ;;  %3460 = vmatprep.subr.bf16.mxu0 %v3289_v28  ;;  %v8756_v16 = vpop.xlane.xlu1 %2552  ;;  %v8766_v28 = vmul.f32 1.442695, %v1977_v4 }
 0x475   : > { %12111 = vst [vmem:[#allocation246_spill] sm:$0xff] %v8735_v25  ;;  %v8744_v21 = vpop.eup %5021  ;;  %v2728_v15 = vadd.f32 %v8728_v50, %v2727_v3  ;;  %5041 = vpow2.f32 %v8611_v52  ;;  %v1981_v23 = vsub.f32 %v12115_v43, %v8684_v58  ;;  %v1982_v3 = vsub.f32 %v12117_v38, %v8684_v58  ;;  %v12118_v52 = vld [vmem:[#allocation259_spill] sm:$0xff] }
 0x476   : > { %12113 = vst [vmem:[#allocation247_spill] sm:$0xff] %v8744_v21  ;;  %v8752_v9 = vpop.eup %5023  ;;  %v2722_v22 = vadd.f32 %v8712_v42, %v2721_v29  ;;  %5043 = vpow2.f32 %v8619_v14  ;;  %v1983_v50 = vsub.f32 %v12118_v52, %v8684_v58  ;;  %v8768_v43 = vmul.f32 1.442695, %v1978_v8  ;;  %v12139_v42 = vld [vmem:[#allocation154_spill] sm:$0xff] }
 0x477   : > { %12116 = vst [vmem:[#allocation225_spill] sm:$0xff] %v8752_v9  ;;  %v8762_v11 = vpop.eup %5025  ;;  %v2729_v37 = vadd.f32 %v8735_v25, %v2728_v15  ;;  %5045 = vpow2.f32 %v8346_v62  ;;  %v8775_v38 = vmul.f32 1.442695, %v1979_v36  ;;  %v8783_v4 = vmul.f32 1.442695, %v1980_v34  ;;  %v12124_v34 = vld [vmem:[#allocation88_spill] sm:$0xff] }
 0x478   : > { %12119 = vst [vmem:[#allocation194_spill] sm:$0xff] %v8762_v11  ;;  %v8770_v29 = vpop.eup %5027  ;;  %2723 = vadd.xlane.f32.xlu0 %v2722_v22  ;;  %v2736_v14 = vadd.f32 %v8762_v11, %v8574_v54  ;;  %5047 = vpow2.f32 %v8640_v32  ;;  %v8785_v8 = vmul.f32 1.442695, %v1981_v23  ;;  %v8793_v36 = vmul.f32 1.442695, %v1982_v3 }
 0x479   : > { %12120 = vst [vmem:[#allocation138_spill] sm:$0xff] %v8770_v29  ;;  %v8779_v15 = vpop.eup %5029  ;;  %v2730_v62 = vadd.f32 %v8744_v21, %v2729_v37  ;;  %5049 = vpow2.f32 %v8651_v56  ;;  %v8795_v52 = vmul.f32 1.442695, %v1983_v50  ;;  %v2562_v23 = vpop.xlane.xlu0 %2561  ;;  %v12127_v50 = vld [vmem:[#allocation152_spill] sm:$0xff] }
 0x47a   : > { %12121 = vst [vmem:[#allocation248_spill] sm:$0xff] %v8779_v15  ;;  %v8787_v22 = vpop.eup %5031  ;;  %v2737_v54 = vadd.f32 %v8770_v29, %v2736_v14  ;;  %5051 = vpow2.f32 %v8657_v31  ;;  %v8791_v32 = vpop.xlane.xlu1 %1730  ;;  %v12125_v14 = vld [vmem:[#allocation89_spill] sm:$0xff] }
 0x47b   : > { %12122 = vst [vmem:[#allocation249_spill] sm:$0xff] %v8787_v22  ;;  %v8797_v58 = vpop.eup %5033  ;;  %v2731_v56 = vadd.f32 %v8752_v9, %v2730_v62  ;;  %5053 = vpow2.f32 %v8673_v61  ;;  %v1984_v37 = vsub.f32 %v12124_v34, %v8791_v32  ;;  %v1985_v29 = vsub.f32 %v12125_v14, %v8791_v32  ;;  %v12128_v62 = vld [vmem:[#allocation153_spill] sm:$0xff] }
 0x47c   : > { %12123 = vst [vmem:[#allocation195_spill] sm:$0xff] %v8797_v58  ;;  %v8805_v31 = vpop.eup %5035  ;;  %v2738_v3 = vadd.f32 %v8779_v15, %v2737_v54  ;;  %5055 = vpow2.f32 %v8408_v27  ;;  %v1986_v11 = vsub.f32 %v12127_v50, %v8791_v32  ;;  %v1987_v21 = vsub.f32 %v12128_v62, %v8791_v32 }
 0x47d   : > { %12126 = vst [vmem:[#allocation197_spill] sm:$0xff] %v8805_v31  ;;  %v8813_v61 = vpop.eup %5037  ;;  %2732 = vadd.xlane.f32.xlu1 %v2731_v56  ;;  %v2745_v34 = vadd.f32 %v8805_v31, %v8630_v13  ;;  %5057 = vpow2.f32 %v8691_v49  ;;  %v2456_v14 = vmul.f32 1.442695, %v1984_v37  ;;  %v2458_v9 = vmul.f32 1.442695, %v1985_v29  ;;  %v12132_v49 = vld [vmem:[#allocation206_spill] sm:$0xff] }
 0x47e   : > { %12129 = vst [vmem:[#allocation250_spill] sm:$0xff] %v8813_v61  ;;  %v8818_v25 = vpop.eup %5039  ;;  %v2739_v27 = vadd.f32 %v8787_v22, %v2738_v3  ;;  %5059 = vpow2.f32 %v8699_v0  ;;  %v2460_v54 = vmul.f32 1.442695, %v1986_v11  ;;  %v8822_v50 = vmul.f32 1.442695, %v1987_v21  ;;  %v12133_v29 = vld [vmem:[#allocation207_spill] sm:$0xff] }
 0x47f   : > { %12130 = vst [vmem:[#allocation196_spill] sm:$0xff] %v8818_v25  ;;  %v8824_v62 = vpop.eup %5041  ;;  %v2746_v56 = vadd.f32 %v8813_v61, %v2745_v34  ;;  %5061 = vpow2.f32 %v8701_v30  ;;  %v1740_v13 = vpop.xlane.xlu0 %1739  ;;  %v1988_v37 = vsub.f32 %v12132_v49, %v8791_v32  ;;  %v1989_v31 = vsub.f32 %v12133_v29, %v8791_v32  ;;  %v12135_v11 = vld [vmem:[#allocation90_spill] sm:$0xff]  ;;  %v12136_v3 = vld [vmem:[#allocation91_spill] sm:$0xff] }
 0x480   : > { %12131 = vst [vmem:[#allocation198_spill] sm:$0xff] %v8824_v62  ;;  %v8832_v15 = vpop.eup %5043  ;;  %v2740_v0 = vadd.f32 %v8797_v58, %v2739_v27  ;;  %5063 = vpow2.f32 %v8716_v26  ;;  %v1992_v21 = vsub.f32 %v12135_v11, %v1740_v13  ;;  %v1993_v22 = vsub.f32 %v12136_v3, %v1740_v13  ;;  %v12138_v49 = vld [vmem:[#allocation30_spill] sm:$0xff] }
 0x481   : > { %12134 = vst [vmem:[#allocation142_spill] sm:$0xff] %v8832_v15  ;;  %v8838_v34 = vpop.eup %5045  ;;  %v2747_v30 = vadd.f32 %v8818_v25, %v2746_v56  ;;  %5065 = vrcp.f32 %v8644_v20  ;;  %v1994_v61 = vsub.f32 %v12138_v49, %v1740_v13  ;;  %v1995_v29 = vsub.f32 %v12139_v42, %v1740_v13 }
 0x482   : > { %12137 = vst [vmem:[#allocation251_spill] sm:$0xff] %v8838_v34  ;;  %v8844_v5 = vpop.eup %5047  ;;  %2741 = vadd.xlane.f32.xlu0 %v2740_v0  ;;  %v2754_v26 = vadd.f32 %v8838_v34, %v8676_v60  ;;  %5067 = vrcp.f32 %v8756_v16  ;;  %v2472_v27 = vmul.f32 1.442695, %v1992_v21  ;;  %v2474_v11 = vmul.f32 1.442695, %v1993_v22  ;;  %v12143_v60 = vld [vmem:[#allocation260_spill] sm:$0xff] }
 0x483   : > { %12140 = vst [vmem:[#allocation252_spill] sm:$0xff] %v8844_v5  ;;  %v8849_v3 = vpop.eup %5049  ;;  %v2748_v56 = vadd.f32 %v8824_v62, %v2747_v30  ;;  %5069 = vpow2.f32 %v8741_v39  ;;  %v2476_v20 = vmul.f32 1.442695, %v1994_v61  ;;  %v8853_v49 = vmul.f32 1.442695, %v1995_v29  ;;  %v12144_v22 = vld [vmem:[#allocation261_spill] sm:$0xff] }
 0x484   : > { %12141 = vst [vmem:[#allocation199_spill] sm:$0xff] %v8849_v3  ;;  %v8855_v42 = vpop.eup %5051  ;;  %v2755_v0 = vadd.f32 %v8844_v5, %v2754_v26  ;;  %5071 = vpow2.f32 %v8766_v28  ;;  %v1990_v16 = vsub.f32 %v12143_v60, %v8791_v32  ;;  %v1991_v21 = vsub.f32 %v12144_v22, %v8791_v32  ;;  %v2571_v26 = vpop.xlane.xlu1 %2570 }
 0x485   : > { %12142 = vst [vmem:[#allocation201_spill] sm:$0xff] %v8855_v42  ;;  %v8863_v34 = vpop.eup %5053  ;;  %v2749_v30 = vadd.f32 %v8832_v15, %v2748_v56  ;;  %5073 = vpow2.f32 %v8768_v43  ;;  %v8867_v39 = vmul.f32 1.442695, %v1988_v37  ;;  %v8869_v61 = vmul.f32 1.442695, %v1989_v31  ;;  %v12148_v37 = vld [vmem:[#allocation208_spill] sm:$0xff] }
 0x486   : > { %12145 = vst [vmem:[#allocation253_spill] sm:$0xff] %v8863_v34  ;;  %v8871_v29 = vpop.eup %5055  ;;  %v2756_v28 = vadd.f32 %v8849_v3, %v2755_v0  ;;  %5075 = vrcp.f32 %v2562_v23  ;;  %v8874_v60 = vmul.f32 1.442695, %v1990_v16  ;;  %v8876_v5 = vmul.f32 1.442695, %v1991_v21  ;;  %v12149_v56 = vld [vmem:[#allocation209_spill] sm:$0xff] }
 0x487   : > { %12146 = vst [vmem:[#allocation200_spill] sm:$0xff] %v8871_v29  ;;  %v8878_v32 = vpop.eup %5057  ;;  %2750 = vadd.xlane.f32.xlu1 %v2749_v30  ;;  %v2763_v43 = vadd.f32 %v8871_v29, %v8724_v18  ;;  %5077 = vpow2.f32 %v2456_v14  ;;  %v1996_v31 = vsub.f32 %v12148_v37, %v1740_v13  ;;  %v1997_v22 = vsub.f32 %v12149_v56, %v1740_v13  ;;  %v12151_v0 = vld [vmem:[#allocation262_spill] sm:$0xff]  ;;  %v12152_v21 = vld [vmem:[#allocation264_spill] sm:$0xff] }
 0x488   : > { %12147 = vst [vmem:[#allocation202_spill] sm:$0xff] %v8878_v32  ;;  %v8884_v62 = vpop.eup %5059  ;;  %v2757_v23 = vadd.f32 %v8855_v42, %v2756_v28  ;;  %5079 = vpow2.f32 %v2458_v9  ;;  %v1998_v16 = vsub.f32 %v12151_v0, %v1740_v13  ;;  %v1999_v3 = vsub.f32 %v12152_v21, %v1740_v13  ;;  %v12156_v21 = vld [vmem:[#allocation93_spill] sm:$0xff]  ;;  %v12159_v42 = vld [vmem:[#allocation35_spill] sm:$0xff] }
 0x489   : > { %12150 = vst [vmem:[#allocation146_spill] sm:$0xff] %v8884_v62  ;;  %v8889_v15 = vpop.eup %5061  ;;  %v2764_v30 = vadd.f32 %v8878_v32, %v2763_v43  ;;  %5081 = vpow2.f32 %v2460_v54  ;;  %v8892_v18 = vmul.f32 1.442695, %v1996_v31  ;;  %v8894_v14 = vmul.f32 1.442695, %v1997_v22  ;;  %v2580_v54 = vpop.xlane.xlu0 %2579  ;;  %v12155_v31 = vld [vmem:[#allocation92_spill] sm:$0xff] }
 0x48a   : > { %12153 = vst [vmem:[#allocation254_spill] sm:$0xff] %v8889_v15  ;;  %v8896_v37 = vpop.eup %5063  ;;  %v2758_v56 = vadd.f32 %v8863_v34, %v2757_v23  ;;  %5083 = vrcp.f32 %v2571_v26  ;;  %v8899_v28 = vpop.xlane.xlu1 %1748  ;;  %v8901_v9 = vmul.f32 1.442695, %v1998_v16  ;;  %v8903_v0 = vmul.f32 1.442695, %v1999_v3  ;;  %v12157_v26 = vld [vmem:[#allocation155_spill] sm:$0xff] }
 0x48b   : > { %12154 = vst [vmem:[#allocation255_spill] sm:$0xff] %v8896_v37  ;;  %v8905_v13 = vpop.eup %5065  ;;  %v2765_v43 = vadd.f32 %v8884_v62, %v2764_v30  ;;  %5085 = vpow2.f32 %v2472_v27  ;;  %v2000_v22 = vsub.f32 %v12155_v31, %v8899_v28  ;;  %v2001_v32 = vsub.f32 %v12156_v21, %v8899_v28  ;;  %v12158_v16 = vld [vmem:[#allocation156_spill] sm:$0xff] }
 0x48c   : > { %v8912_v23 = vpop.eup %5067  ;;  %2759 = vadd.xlane.f32.xlu0 %v2758_v56  ;;  %5087 = vpow2.f32 %v2474_v11  ;;  %v2002_v3 = vsub.f32 %v12157_v26, %v8899_v28  ;;  %v2003_v29 = vsub.f32 %v12158_v16, %v8899_v28  ;;  %v2857_v27 = vmul.f32 %v8905_v13, %v12159_v42  ;;  %v12162_v26 = vld [vmem:[#allocation36_spill] sm:$0xff] }
 0x48d   : > { %v8920_v30 = vpop.eup %5069  ;;  %v2766_v31 = vadd.f32 %v8889_v15, %v2765_v43  ;;  %5089 = vpow2.f32 %v2476_v20  ;;  %v2488_v62 = vmul.f32 1.442695, %v2000_v22  ;;  %v2490_v21 = vmul.f32 1.442695, %v2001_v32  ;;  %v12164_v43 = vld [vmem:[#allocation34_spill] sm:$0xff]  ;;  %v12165_v32 = vld [vmem:[#allocation32_spill] sm:$0xff] }
 0x48e   : > { %12160 = vst [vmem:[#allocation203_spill] sm:$0xff] %v8920_v30  ;;  %v8923_v34 = vpop.eup %5071  ;;  %5091 = vrcp.f32 %v2580_v54  ;;  %v2492_v11 = vmul.f32 1.442695, %v2002_v3  ;;  %v8925_v56 = vmul.f32 1.442695, %v2003_v29  ;;  %v2865_v25 = vmul.f32 %v8912_v23, %v12162_v26  ;;  %v12166_v3 = vld [vmem:[#allocation94_spill] sm:$0xff] }
 0x48f   : > { %12161 = vst [vmem:[#allocation204_spill] sm:$0xff] %v8923_v34  ;;  %v8929_v16 = vpop.eup %5073  ;;  %v2767_v42 = vadd.f32 %v8896_v37, %v2766_v31  ;;  %5093 = vpow2.f32 %v2488_v62  ;;  %v8932_v58 = vpop.xlane.xlu0 %1757  ;;  %v2856_v20 = vmul.f32 %v8905_v13, %v12164_v43  ;;  %v2864_v22 = vmul.f32 %v8912_v23, %v12165_v32  ;;  %v12167_v15 = vld [vmem:[#allocation95_spill] sm:$0xff]  ;;  %v12170_v37 = vld [vmem:[#allocation157_spill] sm:$0xff] }
 0x490   : > { %12163 = vst [vmem:[#allocation256_spill] sm:$0xff] %v8929_v16  ;;  %v8938_v54 = vpop.eup %5075  ;;  %5095 = vpow2.f32 %v2490_v21  ;;  %v3113_v29 = vpack.c.bf16 %v2865_v25, %v2857_v27  ;;  %v2008_v26 = vsub.f32 %v12166_v3, %v8932_v58  ;;  %v2009_v57 = vsub.f32 %v12167_v15, %v8932_v58  ;;  %v12169_v62 = vld [vmem:[#allocation31_spill] sm:$0xff]  ;;  %v12172_v21 = vld [vmem:[#allocation38_spill] sm:$0xff]  ;;  %v12173_v15 = vld [vmem:[#allocation160_spill] sm:$0xff] }
 0x491   : > { %v8944_v31 = vpop.eup %5077  ;;  %2768 = vadd.xlane.f32.xlu1 %v2767_v42  ;;  %5097 = vpow2.f32 %v2492_v11  ;;  %v2010_v43 = vsub.f32 %v12169_v62, %v8932_v58  ;;  %v2011_v32 = vsub.f32 %v12170_v37, %v8932_v58  ;;  %v3112_v19 = vpack.c.bf16 %v2864_v22, %v2856_v20  ;;  %v12175_v22 = vld [vmem:[#allocation210_spill] sm:$0xff] }
 0x492   : > { %12168 = vst [vmem:[#allocation257_spill] sm:$0xff] %v8944_v31  ;;  %v8950_v48 = vpop.eup %5079  ;;  %3331 = vmatprep.mubr.bf16.mxu0 %v3113_v29  ;;  %v2504_v25 = vmul.f32 1.442695, %v2008_v26  ;;  %v2506_v27 = vmul.f32 1.442695, %v2009_v57  ;;  %v2873_v3 = vmul.f32 %v8938_v54, %v12172_v21  ;;  %v2872_v33 = vmul.f32 %v8938_v54, %v12173_v15  ;;  %v12176_v26 = vld [vmem:[#allocation211_spill] sm:$0xff] }
 0x493   : > { %12171 = vst [vmem:[#allocation86_spill] sm:$0xff] %v8950_v48  ;;  %v8956_v42 = vpop.eup %5081  ;;  %v2508_v11 = vmul.f32 1.442695, %v2010_v43  ;;  %v8958_v44 = vmul.f32 1.442695, %v2011_v32  ;;  %3332 = vmatmul.mubr.bf16.vlgmr.msra.gmra.mrb[0].mxu0 %v3112_v19  ;;  %5099 = vpow2.f32 %v8775_v38  ;;  %v2770_v37 = vadd.f32 %v8923_v34, %v8920_v30  ;;  %v12179_v43 = vld [vmem:[#allocation41_spill] sm:$0xff] }
 0x494   : > { %12174 = vst [vmem:[#allocation87_spill] sm:$0xff] %v8956_v42  ;;  %v8963_v20 = vpop.eup %5083  ;;  %5101 = vpow2.f32 %v2504_v25  ;;  %v2779_v57 = vadd.f32 %v8950_v48, %v8944_v31  ;;  %v2004_v29 = vsub.f32 %v12175_v22, %v8899_v28  ;;  %v2005_v62 = vsub.f32 %v12176_v26, %v8899_v28  ;;  %v12180_v25 = vld [vmem:[#allocation40_spill] sm:$0xff] }
 0x495   : > { %v12177_v19 = vcombine.high %v8710_v17, %v8710_v17  ;;  %v8974_v38 = vpop.eup %5085  ;;  %5103 = vpow2.f32 %v2506_v27  ;;  %v2881_v32 = vmul.f32 %v8963_v20, %v12179_v43  ;;  %v2880_v21 = vmul.f32 %v8963_v20, %v12180_v25  ;;  %v2589_v22 = vpop.xlane.xlu1 %2588  ;;  %v12182_v17 = vld [vmem:[#allocation265_spill] sm:$0xff]  ;;  %v12183_v27 = vld [vmem:[#allocation267_spill] sm:$0xff] }
 0x496   : > { %12178 = vst [vmem:[#allocation29_spill] sm:$0xff] %v8974_v38  ;;  %v2771_v15 = vadd.f32 %v8929_v16, %v2770_v37  ;;  %v8981_v31 = vpop.eup %5087  ;;  %5105 = vpow2.f32 %v2508_v11  ;;  %v8984_v26 = vadd.f32 %v8956_v42, %v2779_v57  ;;  %v2007_v48 = vsub.f32 %v12183_v27, %v8899_v28 }
 0x497   : > { %3461 = vmatpush1.bf16.xpose.msra.mxu0 %v12177_v19  ;;  %12181 = vst [vmem:[#allocation151_spill] sm:$0xff] %v8981_v31  ;;  %v2006_v19 = vsub.f32 %v12182_v17, %v8899_v28  ;;  %v8990_v30 = vpop.eup %5089  ;;  %5107 = vrcp.f32 %v2589_v22  ;;  %v3121_v43 = vpack.c.bf16 %v2881_v32, %v2873_v3  ;;  %v3120_v25 = vpack.c.bf16 %v2880_v21, %v2872_v33  ;;  %v12186_v28 = vld [vmem:[#allocation43_spill] sm:$0xff]  ;;  %v12187_v3 = vld [vmem:[#allocation42_spill] sm:$0xff] }
 0x498   : > { %12184 = vst [vmem:[#allocation205_spill] sm:$0xff] %v8990_v30  ;;  %v2788_v37 = vadd.f32 %v8981_v31, %v8974_v38  ;;  %v8994_v16 = vpop.eup %5091  ;;  %5109 = vpow2.f32 %v8783_v4  ;;  %v8997_v11 = vmul.f32 1.442695, %v2004_v29  ;;  %v8999_v57 = vmul.f32 1.442695, %v2005_v62  ;;  %v12194_v31 = vld [vmem:[#allocation158_spill] sm:$0xff] }
 0x499   : > { %v9001_v17 = vmul.f32 1.442695, %v2006_v19  ;;  %v9003_v42 = vpop.eup %5093  ;;  %3339 = vmatprep.mubr.bf16.mxu0 %v3121_v43  ;;  %5111 = vpow2.f32 %v8785_v8  ;;  %v9008_v33 = vmul.f32 %v8994_v16, %v12186_v28  ;;  %v9012_v32 = vmul.f32 %v8994_v16, %v12187_v3  ;;  %v12189_v8 = vld [vmem:[#allocation212_spill] sm:$0xff]  ;;  %v12190_v19 = vld [vmem:[#allocation213_spill] sm:$0xff] }
 0x49a   : > { %12185 = vst [vmem:[#allocation150_spill] sm:$0xff] %v9003_v42  ;;  %v9015_v4 = vadd.f32 %v8990_v30, %v2788_v37  ;;  %v9017_v29 = vpop.eup %5095  ;;  %5113 = vpow2.f32 %v8793_v36  ;;  %v9020_v21 = vmul.f32 1.442695, %v2007_v48  ;;  %v2012_v22 = vsub.f32 %v12189_v8, %v8932_v58  ;;  %v2598_v28 = vpop.xlane.xlu0 %2597  ;;  %v12192_v3 = vld [vmem:[#allocation96_spill] sm:$0xff]  ;;  %v12193_v37 = vld [vmem:[#allocation97_spill] sm:$0xff] }
 0x49b   : > { %12188 = vst [vmem:[#allocation258_spill] sm:$0xff] %v9017_v29  ;;  %v1767_v62 = vpop.xlane.xlu1 %1766  ;;  %v2013_v27 = vsub.f32 %v12190_v19, %v8932_v58  ;;  %v9026_v43 = vpop.eup %5097  ;;  %3340 = vmatmul.mubr.bf16.gmra.mrb[4].mxu0 %v3120_v25  ;;  %5115 = vrcp.f32 %v2598_v28  ;;  %v2797_v48 = vadd.f32 %v9017_v29, %v9003_v42  ;;  %v12196_v36 = vld [vmem:[#allocation268_spill] sm:$0xff]  ;;  %v12197_v19 = vld [vmem:[#allocation270_spill] sm:$0xff]  ;;  %v12206_v29 = vld [vmem:[#allocation101_spill] sm:$0xff] }
 0x49c   : > { %12191 = vst [vmem:[#allocation259_spill] sm:$0xff] %v9026_v43  ;;  %v2016_v38 = vsub.f32 %v12192_v3, %v1767_v62  ;;  %v2017_v30 = vsub.f32 %v12193_v37, %v1767_v62  ;;  %v2018_v34 = vsub.f32 %v12194_v31, %v1767_v62  ;;  %v2019_v6 = vsub.f32 %v12195_v12, %v1767_v62 }
 0x49d   : > { %v2014_v8 = vsub.f32 %v12196_v36, %v8932_v58  ;;  %v2015_v59 = vsub.f32 %v12197_v19, %v8932_v58  ;;  %v9038_v1 = vpop.eup %5099  ;;  %5117 = vpow2.f32 %v8795_v52  ;;  %v9048_v28 = vadd.f32 %v9026_v43, %v2797_v48  ;;  %v12203_v19 = vld [vmem:[#allocation215_spill] sm:$0xff]  ;;  %v12205_v43 = vld [vmem:[#allocation273_spill] sm:$0xff] }
 0x49e   : > { %12198 = vst [vmem:[#allocation88_spill] sm:$0xff] %v9038_v1  ;;  %v2520_v3 = vmul.f32 1.442695, %v2016_v38  ;;  %v2522_v41 = vmul.f32 1.442695, %v2017_v30  ;;  %v9041_v31 = vpop.eup %5101  ;;  %v2772_v25 = vadd.f32 %v9038_v1, %v2771_v15  ;;  %5119 = vpow2.f32 %v8822_v50  ;;  %v12202_v38 = vld [vmem:[#allocation214_spill] sm:$0xff] }
 0x49f   : > { %v2524_v37 = vmul.f32 1.442695, %v2018_v34  ;;  %12199 = vst [vmem:[#allocation89_spill] sm:$0xff] %v9041_v31  ;;  %v9043_v12 = vmul.f32 1.442695, %v2019_v6  ;;  %v9050_v36 = vpop.eup %5103  ;;  %v2020_v15 = vsub.f32 %v12202_v38, %v1767_v62 }
 0x4a0   : > { %12200 = vst [vmem:[#allocation152_spill] sm:$0xff] %v9050_v36  ;;  %5121 = vpow2.f32 %v2520_v3  ;;  %v9052_v58 = vmul.f32 1.442695, %v2012_v22  ;;  %v9054_v30 = vmul.f32 1.442695, %v2013_v27  ;;  %v9058_v52 = vpop.eup %5105  ;;  %v2806_v50 = vadd.f32 %v9050_v36, %v9041_v31  ;;  %v12204_v3 = vld [vmem:[#allocation271_spill] sm:$0xff] }
 0x4a1   : > { %v9056_v34 = vmul.f32 1.442695, %v2014_v8  ;;  %12201 = vst [vmem:[#allocation153_spill] sm:$0xff] %v9058_v52  ;;  %5123 = vpow2.f32 %v2522_v41  ;;  %v9060_v6 = vmul.f32 1.442695, %v2015_v59  ;;  %v9065_v48 = vpop.eup %5107  ;;  %v2021_v22 = vsub.f32 %v12203_v19, %v1767_v62  ;;  %v12207_v59 = vld [vmem:[#allocation216_spill] sm:$0xff] }
 0x4a2   : > { %5125 = vpow2.f32 %v2524_v37  ;;  %v2022_v27 = vsub.f32 %v12204_v3, %v1767_v62  ;;  %v2023_v8 = vsub.f32 %v12205_v43, %v1767_v62  ;;  %v9070_v42 = vpop.eup %5109  ;;  %v2897_v41 = vmul.f32 %v9065_v48, %v12206_v29  ;;  %v12234_v36 = vld [vmem:[#allocation106_spill] sm:$0xff] }
 0x4a3   : > { %v2896_v1 = vmul.f32 %v9065_v48, %v12207_v59  ;;  %5127 = vpow2.f32 %v8867_v39  ;;  %v9078_v38 = vadd.f32 %v9058_v52, %v2806_v50  ;;  %v9080_v37 = vpop.eup %5111  ;;  %v2773_v19 = vadd.f32 %v9070_v42, %v2772_v25 }
 0x4a4   : > { %5129 = vpow2.f32 %v8869_v61  ;;  %v9084_v62 = vmul.f32 1.442695, %v2020_v15  ;;  %v9086_v43 = vmul.f32 1.442695, %v2021_v22  ;;  %v9088_v3 = vpop.eup %5113  ;;  %v3129_v29 = vpack.c.bf16 %v2897_v41, %v9008_v33  ;;  %v12208_v61 = vld [vmem:[#allocation99_spill] sm:$0xff]  ;;  %v12212_v33 = vld [vmem:[#allocation98_spill] sm:$0xff] }
 0x4a5   : > { %v3128_v59 = vpack.c.bf16 %v2896_v1, %v9012_v32  ;;  %5131 = vpow2.f32 %v8874_v60  ;;  %v9093_v39 = vmul.f32 1.442695, %v2022_v27  ;;  %v2774_v50 = vadd.f32 %v9080_v37, %v2773_v19  ;;  %v9103_v22 = vpop.eup %5115  ;;  %v2607_v52 = vpop.xlane.xlu1 %2606  ;;  %v12210_v1 = vld [vmem:[#allocation52_spill] sm:$0xff] }
 0x4a6   : > { %5133 = vpow2.f32 %v8876_v5  ;;  %v9097_v25 = vmul.f32 1.442695, %v2023_v8  ;;  %v9101_v15 = vmul.f32 %v8905_v13, %v12208_v61  ;;  %3347 = vmatprep.mubr.bf16.mxu0 %v3129_v29  ;;  %v9108_v60 = vmul.f32 %v8912_v23, %v12210_v1  ;;  %v12214_v5 = vld [vmem:[#allocation37_spill] sm:$0xff]  ;;  %v12216_v19 = vld [vmem:[#allocation108_spill] sm:$0xff] }
 0x4a7   : > { %5135 = vpow2.f32 %v8853_v49  ;;  %v9112_v32 = vmul.f32 %v8905_v13, %v12212_v33  ;;  %v9116_v27 = vmul.f32 %v8912_v23, %v12214_v5  ;;  %v9118_v8 = vpop.eup %5117  ;;  %v2775_v41 = vadd.f32 %v9088_v3, %v2774_v50  ;;  %3348 = vmatmul.mubr.bf16.gmra.mrb[8].mxu0 %v3128_v59  ;;  %v12217_v29 = vld [vmem:[#allocation45_spill] sm:$0xff] }
 0x4a8   : > { %12209 = vst [vmem:[#allocation206_spill] sm:$0xff] %v9101_v15  ;;  %12211 = vst [vmem:[#allocation207_spill] sm:$0xff] %v9108_v60  ;;  %5137 = vrcp.f32 %v2607_v52  ;;  %v9123_v49 = vmul.f32 %v9103_v22, %v12216_v19  ;;  %v9127_v61 = vmul.f32 %v9103_v22, %v12217_v29  ;;  %v9129_v1 = vpop.eup %5119  ;;  %v12218_v50 = vld [vmem:[#allocation113_spill] sm:$0xff]  ;;  %v12224_v52 = vld [vmem:[#allocation39_spill] sm:$0xff] }
 0x4a9   : > { %12213 = vst [vmem:[#allocation90_spill] sm:$0xff] %v9112_v32  ;;  %12215 = vst [vmem:[#allocation91_spill] sm:$0xff] %v9116_v27  ;;  %5139 = vpow2.f32 %v8892_v18  ;;  %v9138_v59 = vmul.f32 %v8938_v54, %v12218_v50  ;;  %v2776_v19 = vadd.f32 %v9118_v8, %v2775_v41  ;;  %v2781_v29 = vadd.f32 %v9129_v1, %v8984_v26  ;;  %v12221_v18 = vld [vmem:[#allocation121_spill] sm:$0xff]  ;;  %v12226_v32 = vld [vmem:[#allocation104_spill] sm:$0xff] }
 0x4aa   : > { %v9140_v5 = vpop.eup %5121  ;;  %5141 = vpow2.f32 %v8894_v14  ;;  %v9148_v31 = vmul.f32 %v8963_v20, %v12221_v18  ;;  %v9155_v50 = vmul.f32 %v8938_v54, %v12224_v52  ;;  %v9159_v41 = vmul.f32 %v8963_v20, %v12226_v32  ;;  %v12228_v27 = vld [vmem:[#allocation59_spill] sm:$0xff]  ;;  %v2616_v18 = vpop.xlane.xlu0 %2615  ;;  %v12231_v15 = vld [vmem:[#allocation221_spill] sm:$0xff] }
 0x4ab   : > { %12219 = vst [vmem:[#allocation30_spill] sm:$0xff] %v9138_v59  ;;  %12220 = vst [vmem:[#allocation154_spill] sm:$0xff] %v9140_v5  ;;  %v9150_v33 = vpop.eup %5123  ;;  %5143 = vpow2.f32 %v8901_v9  ;;  %v9163_v26 = vmul.f32 %v8994_v16, %v12228_v27  ;;  %2777 = vadd.xlane.f32.xlu0 %v2776_v19  ;;  %v9174_v32 = vmul.f32 %v9065_v48, %v12231_v15 }
 0x4ac   : > { %12222 = vst [vmem:[#allocation260_spill] sm:$0xff] %v9148_v31  ;;  %12223 = vst [vmem:[#allocation261_spill] sm:$0xff] %v9150_v33  ;;  %v9165_v14 = vpop.eup %5125  ;;  %5145 = vpow2.f32 %v8903_v0  ;;  %v2815_v9 = vadd.f32 %v9150_v33, %v9140_v5  ;;  %v9182_v19 = vmul.f32 %v8994_v16, %v12234_v36  ;;  %v12236_v0 = vld [vmem:[#allocation44_spill] sm:$0xff] }
 0x4ad   : > { %12225 = vst [vmem:[#allocation208_spill] sm:$0xff] %v9155_v50  ;;  %12227 = vst [vmem:[#allocation209_spill] sm:$0xff] %v9159_v41  ;;  %v9176_v60 = vpop.eup %5127  ;;  %5147 = vrcp.f32 %v2616_v18  ;;  %v9186_v5 = vmul.f32 %v9065_v48, %v12236_v0  ;;  %v12239_v0 = vld [vmem:[#allocation127_spill] sm:$0xff]  ;;  %v12243_v18 = vld [vmem:[#allocation102_spill] sm:$0xff] }
 0x4ae   : > { %12229 = vst [vmem:[#allocation262_spill] sm:$0xff] %v9163_v26  ;;  %12230 = vst [vmem:[#allocation264_spill] sm:$0xff] %v9165_v14  ;;  %v9188_v33 = vpop.eup %5129  ;;  %v2782_v52 = vadd.f32 %v9176_v60, %v2781_v29  ;;  %5149 = vpow2.f32 %v8925_v56  ;;  %v9193_v15 = vadd.f32 %v9165_v14, %v2815_v9  ;;  %v9204_v50 = vmul.f32 %v9103_v22, %v12239_v0  ;;  %v12241_v29 = vld [vmem:[#allocation161_spill] sm:$0xff]  ;;  %v12245_v26 = vld [vmem:[#allocation111_spill] sm:$0xff] }
 0x4af   : > { %12232 = vst [vmem:[#allocation92_spill] sm:$0xff] %v9174_v32  ;;  %12233 = vst [vmem:[#allocation93_spill] sm:$0xff] %v9176_v60  ;;  %v9197_v27 = vpop.eup %5131  ;;  %5151 = vpow2.f32 %v8997_v11  ;;  %v9208_v56 = vmul.f32 %v9103_v22, %v12241_v29  ;;  %v9216_v11 = vmul.f32 %v8905_v13, %v12243_v18  ;;  %v9220_v36 = vmul.f32 %v8912_v23, %v12245_v26  ;;  %v12248_v29 = vld [vmem:[#allocation100_spill] sm:$0xff]  ;;  %v12255_v14 = vld [vmem:[#allocation103_spill] sm:$0xff] }
 0x4b0   : > { %12235 = vst [vmem:[#allocation155_spill] sm:$0xff] %v9182_v19  ;;  %12237 = vst [vmem:[#allocation156_spill] sm:$0xff] %v9186_v5  ;;  %v9210_v9 = vpop.eup %5133  ;;  %v2783_v41 = vadd.f32 %v9188_v33, %v2782_v52  ;;  %5153 = vpow2.f32 %v8999_v57  ;;  %v9227_v19 = vmul.f32 %v8905_v13, %v12248_v29  ;;  %v12250_v5 = vld [vmem:[#allocation53_spill] sm:$0xff]  ;;  %v12252_v57 = vld [vmem:[#allocation115_spill] sm:$0xff] }
 0x4b1   : > { %12238 = vst [vmem:[#allocation35_spill] sm:$0xff] %v9197_v27  ;;  %12240 = vst [vmem:[#allocation36_spill] sm:$0xff] %v9204_v50  ;;  %v9222_v0 = vpop.eup %5135  ;;  %5155 = vpow2.f32 %v9001_v17  ;;  %v9231_v52 = vmul.f32 %v8912_v23, %v12250_v5  ;;  %v9235_v18 = vmul.f32 %v8938_v54, %v12252_v57  ;;  %v12254_v5 = vld [vmem:[#allocation47_spill] sm:$0xff]  ;;  %v12296_v50 = vld [vmem:[#allocation132_spill] sm:$0xff] }
 0x4b2   : > { %12242 = vst [vmem:[#allocation34_spill] sm:$0xff] %v9208_v56  ;;  %12244 = vst [vmem:[#allocation32_spill] sm:$0xff] %v9216_v11  ;;  %v9237_v32 = vpop.eup %5137  ;;  %v2784_v26 = vadd.f32 %v9197_v27, %v2783_v41  ;;  %v2790_v59 = vadd.f32 %v9222_v0, %v9015_v4  ;;  %5157 = vpow2.f32 %v9020_v21  ;;  %v12256_v60 = vld [vmem:[#allocation171_spill] sm:$0xff]  ;;  %v2625_v21 = vpop.xlane.xlu1 %2624  ;;  %v12258_v11 = vld [vmem:[#allocation110_spill] sm:$0xff] }
 0x4b3   : > { %12246 = vst [vmem:[#allocation94_spill] sm:$0xff] %v9220_v36  ;;  %12247 = vst [vmem:[#allocation95_spill] sm:$0xff] %v9222_v0  ;;  %v9245_v29 = vpop.eup %5139  ;;  %v2913_v31 = vmul.f32 %v9237_v32, %v12254_v5  ;;  %v2912_v57 = vmul.f32 %v9237_v32, %v12255_v14  ;;  %5159 = vpow2.f32 %v8958_v44  ;;  %v9254_v41 = vmul.f32 %v9237_v32, %v12256_v60 }
 0x4b4   : > { %12249 = vst [vmem:[#allocation31_spill] sm:$0xff] %v9227_v19  ;;  %12251 = vst [vmem:[#allocation157_spill] sm:$0xff] %v9231_v52  ;;  %v9256_v4 = vpop.eup %5141  ;;  %v2785_v0 = vadd.f32 %v9210_v9, %v2784_v26  ;;  %v2791_v17 = vadd.f32 %v9245_v29, %v2790_v59  ;;  %5161 = vpow2.f32 %v9052_v58  ;;  %v9263_v5 = vmul.f32 %v9237_v32, %v12258_v11  ;;  %v12268_v58 = vld [vmem:[#allocation130_spill] sm:$0xff]  ;;  %v12274_v52 = vld [vmem:[#allocation263_spill] sm:$0xff] }
 0x4b5   : > { %12253 = vst [vmem:[#allocation38_spill] sm:$0xff] %v9235_v18  ;;  %12257 = vst [vmem:[#allocation160_spill] sm:$0xff] %v9254_v41  ;;  %v9265_v14 = vpop.eup %5143  ;;  %5163 = vrcp.f32 %v2625_v21  ;;  %v3137_v44 = vpack.c.bf16 %v2913_v31, %v9123_v49  ;;  %v3136_v60 = vpack.c.bf16 %v2912_v57, %v9127_v61  ;;  %v12260_v31 = vld [vmem:[#allocation164_spill] sm:$0xff]  ;;  %v12262_v61 = vld [vmem:[#allocation162_spill] sm:$0xff] }
 0x4b6   : > { %12259 = vst [vmem:[#allocation210_spill] sm:$0xff] %v9263_v5  ;;  %v9271_v27 = vpop.eup %5145  ;;  %2786 = vadd.xlane.f32.xlu1 %v2785_v0  ;;  %v2792_v59 = vadd.f32 %v9256_v4, %v2791_v17  ;;  %5165 = vpow2.f32 %v9054_v30  ;;  %v9284_v49 = vmul.f32 %v8963_v20, %v12260_v31  ;;  %v9288_v0 = vmul.f32 %v8938_v54, %v12262_v61  ;;  %v12264_v30 = vld [vmem:[#allocation163_spill] sm:$0xff]  ;;  %v12267_v31 = vld [vmem:[#allocation49_spill] sm:$0xff]  ;;  %v12292_v5 = vld [vmem:[#allocation68_spill] sm:$0xff] }
 0x4b7   : > { %v9279_v26 = vpop.eup %5147  ;;  %3355 = vmatprep.mubr.bf16.mxu0 %v3137_v44  ;;  %5167 = vpow2.f32 %v9056_v34  ;;  %v9292_v17 = vmul.f32 %v8963_v20, %v12264_v30  ;;  %v12266_v34 = vld [vmem:[#allocation112_spill] sm:$0xff] }
 0x4b8   : > { %12261 = vst [vmem:[#allocation211_spill] sm:$0xff] %v9284_v49  ;;  %12263 = vst [vmem:[#allocation41_spill] sm:$0xff] %v9288_v0  ;;  %v9294_v57 = vpop.eup %5149  ;;  %v2793_v21 = vadd.f32 %v9265_v14, %v2792_v59  ;;  %3356 = vmatmul.mubr.bf16.gmra.mrb[12].mxu0 %v3136_v60  ;;  %5169 = vpow2.f32 %v9060_v6  ;;  %v9300_v44 = vmul.f32 %v9279_v26, %v12266_v34  ;;  %v12270_v6 = vld [vmem:[#allocation50_spill] sm:$0xff] }
 0x4b9   : > { %12265 = vst [vmem:[#allocation40_spill] sm:$0xff] %v9292_v17  ;;  %v9304_v11 = vmul.f32 %v9279_v26, %v12267_v31  ;;  %v9306_v61 = vpop.eup %5151  ;;  %v2799_v30 = vadd.f32 %v9294_v57, %v9048_v28  ;;  %5171 = vpow2.f32 %v9043_v12  ;;  %v9313_v60 = vmul.f32 %v9279_v26, %v12268_v58  ;;  %v12276_v12 = vld [vmem:[#allocation122_spill] sm:$0xff] }
 0x4ba   : > { %v9317_v59 = vmul.f32 %v9279_v26, %v12270_v6  ;;  %v9319_v34 = vpop.eup %5153  ;;  %v2794_v31 = vadd.f32 %v9271_v27, %v2793_v21  ;;  %5173 = vpow2.f32 %v9084_v62  ;;  %v12272_v6 = vld [vmem:[#allocation123_spill] sm:$0xff]  ;;  %v9337_v21 = vmul.f32 %v9065_v48, %v12274_v52  ;;  %v2634_v36 = vpop.xlane.xlu0 %2633 }
 0x4bb   : > { %12269 = vst [vmem:[#allocation265_spill] sm:$0xff] %v9313_v60  ;;  %v9327_v28 = vpop.eup %5155  ;;  %v2800_v58 = vadd.f32 %v9306_v61, %v2799_v30  ;;  %5175 = vpow2.f32 %v9086_v43  ;;  %v9333_v19 = vmul.f32 %v8994_v16, %v12272_v6  ;;  %v9344_v0 = vmul.f32 %v8994_v16, %v12276_v12  ;;  %v12278_v30 = vld [vmem:[#allocation62_spill] sm:$0xff]  ;;  %v12280_v6 = vld [vmem:[#allocation65_spill] sm:$0xff] }
 0x4bc   : > { %12271 = vst [vmem:[#allocation267_spill] sm:$0xff] %v9317_v59  ;;  %12275 = vst [vmem:[#allocation42_spill] sm:$0xff] %v9337_v21  ;;  %v9339_v62 = vpop.eup %5157  ;;  %2795 = vadd.xlane.f32.xlu0 %v2794_v31  ;;  %5177 = vpow2.f32 %v9093_v39  ;;  %v9348_v43 = vmul.f32 %v9065_v48, %v12278_v30  ;;  %v9352_v17 = vmul.f32 %v9103_v22, %v12280_v6  ;;  %v12282_v31 = vld [vmem:[#allocation66_spill] sm:$0xff] }
 0x4bd   : > { %12273 = vst [vmem:[#allocation43_spill] sm:$0xff] %v9333_v19  ;;  %12277 = vst [vmem:[#allocation212_spill] sm:$0xff] %v9344_v0  ;;  %v9354_v52 = vpop.eup %5159  ;;  %5179 = vrcp.f32 %v2634_v36  ;;  %v2801_v18 = vadd.f32 %v9319_v34, %v2800_v58  ;;  %v9361_v12 = vmul.f32 %v9237_v32, %v12282_v31  ;;  %v12285_v36 = vld [vmem:[#allocation64_spill] sm:$0xff]  ;;  %v12290_v6 = vld [vmem:[#allocation114_spill] sm:$0xff] }
 0x4be   : > { %12279 = vst [vmem:[#allocation213_spill] sm:$0xff] %v9348_v43  ;;  %12281 = vst [vmem:[#allocation96_spill] sm:$0xff] %v9352_v17  ;;  %v9363_v49 = vpop.eup %5161  ;;  %v2808_v30 = vadd.f32 %v9354_v52, %v9078_v38  ;;  %5181 = vpow2.f32 %v9097_v25  ;;  %v9372_v58 = vmul.f32 %v9103_v22, %v12285_v36  ;;  %v12287_v19 = vld [vmem:[#allocation224_spill] sm:$0xff]  ;;  %v9385_v38 = vmul.f32 %v9279_v26, %v8004_v55  ;;  %v12291_v43 = vld [vmem:[#allocation51_spill] sm:$0xff] }
 0x4bf   : > { %12283 = vst [vmem:[#allocation97_spill] sm:$0xff] %v9361_v12  ;;  %12284 = vst [vmem:[#allocation158_spill] sm:$0xff] %v9363_v49  ;;  %v9374_v56 = vpop.eup %5163  ;;  %v2802_v39 = vadd.f32 %v9327_v28, %v2801_v18  ;;  %v9381_v21 = vmul.f32 %v9237_v32, %v12287_v19  ;;  %v12294_v55 = vld [vmem:[#allocation109_spill] sm:$0xff] }
 0x4c0   : > { %12286 = vst [vmem:[#allocation159_spill] sm:$0xff] %v9372_v58  ;;  %12289 = vst [vmem:[#allocation270_spill] sm:$0xff] %v9385_v38  ;;  %v9387_v25 = vpop.eup %5165  ;;  %v2809_v36 = vadd.f32 %v9363_v49, %v2808_v30  ;;  %v2929_v0 = vmul.f32 %v9374_v56, %v12290_v6  ;;  %v2928_v18 = vmul.f32 %v9374_v56, %v12291_v43  ;;  %v12298_v58 = vld [vmem:[#allocation131_spill] sm:$0xff]  ;;  %v12302_v30 = vld [vmem:[#allocation105_spill] sm:$0xff] }
 0x4c1   : > { %12288 = vst [vmem:[#allocation268_spill] sm:$0xff] %v9381_v21  ;;  %v9396_v31 = vmul.f32 %v9374_v56, %v12292_v5  ;;  %v9398_v19 = vpop.eup %5167  ;;  %v2803_v17 = vadd.f32 %v9339_v62, %v2802_v39  ;;  %v9403_v12 = vmul.f32 %v9374_v56, %v12294_v55  ;;  %v9409_v6 = vmul.f32 %v9374_v56, %v12296_v50  ;;  %v12304_v39 = vld [vmem:[#allocation218_spill] sm:$0xff] }
 0x4c2   : > { %v9411_v43 = vpop.eup %5169  ;;  %v2810_v5 = vadd.f32 %v9387_v25, %v2809_v36  ;;  %v3145_v41 = vpack.c.bf16 %v2929_v0, %v9300_v44  ;;  %v3144_v49 = vpack.c.bf16 %v2928_v18, %v9304_v11  ;;  %v9426_v21 = vmul.f32 %v9279_v26, %v12298_v58  ;;  %v12300_v36 = vld [vmem:[#allocation69_spill] sm:$0xff] }
 0x4c3   : > { %12293 = vst [vmem:[#allocation214_spill] sm:$0xff] %v9396_v31  ;;  %12295 = vst [vmem:[#allocation215_spill] sm:$0xff] %v9403_v12  ;;  %v9418_v55 = vpop.eup %5171  ;;  %2804 = vadd.xlane.f32.xlu1 %v2803_v17  ;;  %v9430_v0 = vmul.f32 %v9374_v56, %v12300_v36  ;;  %v2643_v44 = vpop.xlane.xlu1 %2642  ;;  %v9439_v50 = vmul.f32 %v8905_v13, %v12302_v30  ;;  %v9443_v58 = vmul.f32 %v8912_v23, %v12304_v39  ;;  %v12319_v36 = vld [vmem:[#allocation54_spill] sm:$0xff]  ;;  %v12323_v12 = vld [vmem:[#allocation56_spill] sm:$0xff] }
 0x4c4   : > { %12297 = vst [vmem:[#allocation271_spill] sm:$0xff] %v9409_v6  ;;  %12299 = vst [vmem:[#allocation273_spill] sm:$0xff] %v9426_v21  ;;  %v9432_v11 = vpop.eup %5173  ;;  %v2811_v18 = vadd.f32 %v9398_v19, %v2810_v5  ;;  %3363 = vmatprep.mubr.bf16.mxu0 %v3145_v41  ;;  %v2817_v17 = vadd.f32 %v9418_v55, %v9193_v15  ;;  %5183 = vrcp.f32 %v2643_v44  ;;  %v12306_v5 = vld [vmem:[#allocation217_spill] sm:$0xff]  ;;  %v12308_v15 = vld [vmem:[#allocation116_spill] sm:$0xff] }
 0x4c5   : > { %12301 = vst [vmem:[#allocation101_spill] sm:$0xff] %v9430_v0  ;;  %12303 = vst [vmem:[#allocation216_spill] sm:$0xff] %v9439_v50  ;;  %v9445_v38 = vpop.eup %5175  ;;  %3364 = vmatmul.mubr.bf16.gmra.mrb[16].mxu0 %v3144_v49  ;;  %v9451_v41 = vmul.f32 %v8905_v13, %v12306_v5  ;;  %v9455_v6 = vmul.f32 %v8912_v23, %v12308_v15  ;;  %v12311_v21 = vld [vmem:[#allocation55_spill] sm:$0xff]  ;;  %v12313_v5 = vld [vmem:[#allocation58_spill] sm:$0xff] }
 0x4c6   : > { %12305 = vst [vmem:[#allocation99_spill] sm:$0xff] %v9443_v58  ;;  %v9457_v30 = vpop.eup %5177  ;;  %v2812_v39 = vadd.f32 %v9411_v43, %v2811_v18  ;;  %v2818_v59 = vadd.f32 %v9432_v11, %v2817_v17  ;;  %v9467_v13 = vmul.f32 %v8938_v54, %v12311_v21  ;;  %v9471_v23 = vmul.f32 %v8963_v20, %v12313_v5  ;;  %v12315_v15 = vld [vmem:[#allocation219_spill] sm:$0xff]  ;;  %v12318_v50 = vld [vmem:[#allocation118_spill] sm:$0xff]  ;;  %v12321_v21 = vld [vmem:[#allocation117_spill] sm:$0xff] }
 0x4c7   : > { %12307 = vst [vmem:[#allocation52_spill] sm:$0xff] %v9451_v41  ;;  %12309 = vst [vmem:[#allocation98_spill] sm:$0xff] %v9455_v6  ;;  %v5180_v44 = vpop.eup %5179  ;;  %v9475_v18 = vmul.f32 %v8963_v20, %v12315_v15  ;;  %v9483_v41 = vmul.f32 %v8938_v54, %v12319_v36  ;;  %v12322_v0 = vld [vmem:[#allocation272_spill] sm:$0xff]  ;;  %v12326_v36 = vld [vmem:[#allocation126_spill] sm:$0xff] }
 0x4c8   : > { %12310 = vst [vmem:[#allocation37_spill] sm:$0xff] %v9457_v30  ;;  %12312 = vst [vmem:[#allocation108_spill] sm:$0xff] %v9467_v13  ;;  %v9477_v17 = vpop.eup %5181  ;;  %2813 = vadd.xlane.f32.xlu0 %v2812_v39  ;;  %v2819_v49 = vadd.f32 %v9445_v38, %v2818_v59  ;;  %v2937_v58 = vmul.f32 %v5180_v44, %v12318_v50  ;;  %v2936_v6 = vmul.f32 %v5180_v44, %v12321_v21  ;;  %v12324_v50 = vld [vmem:[#allocation60_spill] sm:$0xff]  ;;  %v12330_v21 = vld [vmem:[#allocation63_spill] sm:$0xff] }
 0x4c9   : > { %12314 = vst [vmem:[#allocation45_spill] sm:$0xff] %v9471_v23  ;;  %12316 = vst [vmem:[#allocation113_spill] sm:$0xff] %v9475_v18  ;;  %v9487_v5 = vmul.f32 %v5180_v44, %v12322_v0  ;;  %v9490_v60 = vmul.f32 %v5180_v44, %v12323_v12  ;;  %v9499_v54 = vmul.f32 %v8994_v16, %v12324_v50  ;;  %v12328_v0 = vld [vmem:[#allocation165_spill] sm:$0xff]  ;;  %v12334_v59 = vld [vmem:[#allocation67_spill] sm:$0xff] }
 0x4ca   : > { %12317 = vst [vmem:[#allocation121_spill] sm:$0xff] %v9477_v17  ;;  %12320 = vst [vmem:[#allocation39_spill] sm:$0xff] %v9483_v41  ;;  %v2820_v39 = vadd.f32 %v9457_v30, %v2819_v49  ;;  %v9503_v15 = vmul.f32 %v9065_v48, %v12326_v36  ;;  %v9507_v12 = vmul.f32 %v8994_v16, %v12328_v0  ;;  %v12332_v49 = vld [vmem:[#allocation129_spill] sm:$0xff]  ;;  %v12336_v16 = vld [vmem:[#allocation128_spill] sm:$0xff] }
 0x4cb   : > { %12325 = vst [vmem:[#allocation104_spill] sm:$0xff] %v9499_v54  ;;  %v9511_v20 = vmul.f32 %v9065_v48, %v12330_v21  ;;  %v9515_v13 = vmul.f32 %v9103_v22, %v12332_v49  ;;  %v9519_v50 = vmul.f32 %v9237_v32, %v12334_v59  ;;  %v2652_v41 = vpop.xlane.xlu0 %2651  ;;  %v9526_v0 = vmul.f32 %v9103_v22, %v12336_v16  ;;  %v12338_v48 = vld [vmem:[#allocation269_spill] sm:$0xff]  ;;  %v12340_v49 = vld [vmem:[#allocation70_spill] sm:$0xff]  ;;  %v12354_v22 = vld [vmem:[#allocation107_spill] sm:$0xff] }
 0x4cc   : > { %12327 = vst [vmem:[#allocation59_spill] sm:$0xff] %v9503_v15  ;;  %12329 = vst [vmem:[#allocation221_spill] sm:$0xff] %v9507_v12  ;;  %v2821_v36 = vadd.f32 %v9477_v17, %v2820_v39  ;;  %v9530_v21 = vmul.f32 %v9237_v32, %v12338_v48  ;;  %v9533_v23 = vmul.f32 %v5180_v44, %v12340_v49  ;;  %v12342_v31 = vld [vmem:[#allocation229_spill] sm:$0xff]  ;;  %5185 = vrcp.f32 %v2652_v41  ;;  %v12344_v16 = vld [vmem:[#allocation46_spill] sm:$0xff] }
 0x4cd   : > { %12331 = vst [vmem:[#allocation106_spill] sm:$0xff] %v9511_v20  ;;  %12333 = vst [vmem:[#allocation44_spill] sm:$0xff] %v9515_v13  ;;  %v9536_v59 = vmul.f32 %v5180_v44, %v12342_v31  ;;  %v9546_v32 = vmul.f32 %v9374_v56, %v12344_v16  ;;  %v12346_v48 = vld [vmem:[#allocation133_spill] sm:$0xff]  ;;  %v12350_v12 = vld [vmem:[#allocation172_spill] sm:$0xff] }
 0x4ce   : > { %12335 = vst [vmem:[#allocation127_spill] sm:$0xff] %v9519_v50  ;;  %12337 = vst [vmem:[#allocation161_spill] sm:$0xff] %v9526_v0  ;;  %2822 = vadd.xlane.f32.xlu1 %v2821_v36  ;;  %v9550_v49 = vmul.f32 %v9374_v56, %v12346_v48  ;;  %v5184_v31 = vpop.eup %5183  ;;  %v12348_v54 = vld [vmem:[#allocation173_spill] sm:$0xff]  ;;  %v9558_v41 = vmul.f32 %v9279_v26, %v12350_v12  ;;  %v12352_v36 = vld [vmem:[#allocation71_spill] sm:$0xff]  ;;  %v9564_v0 = vmul.f32 %v5180_v44, %v12354_v22 }
 0x4cf   : > { %12339 = vst [vmem:[#allocation102_spill] sm:$0xff] %v9530_v21  ;;  %12341 = vst [vmem:[#allocation111_spill] sm:$0xff] %v9533_v23  ;;  %v9554_v39 = vmul.f32 %v9279_v26, %v12348_v54  ;;  %v9561_v18 = vmul.f32 %v5180_v44, %v12352_v36  ;;  %v12356_v16 = vld [vmem:[#allocation120_spill] sm:$0xff]  ;;  %v12357_v13 = vld [vmem:[#allocation57_spill] sm:$0xff] }
 0x4d0   : > { %12343 = vst [vmem:[#allocation100_spill] sm:$0xff] %v9536_v59  ;;  %12345 = vst [vmem:[#allocation53_spill] sm:$0xff] %v9546_v32  ;;  %v2945_v21 = vmul.f32 %v5184_v31, %v12356_v16  ;;  %v2944_v56 = vmul.f32 %v5184_v31, %v12357_v13  ;;  %v12358_v48 = vld [vmem:[#allocation176_spill] sm:$0xff]  ;;  %v12359_v20 = vld [vmem:[#allocation119_spill] sm:$0xff] }
 0x4d1   : > { %12347 = vst [vmem:[#allocation115_spill] sm:$0xff] %v9550_v49  ;;  %12349 = vst [vmem:[#allocation47_spill] sm:$0xff] %v9554_v39  ;;  %v9569_v50 = vmul.f32 %v5184_v31, %v12358_v48  ;;  %v9572_v54 = vmul.f32 %v5184_v31, %v12359_v20  ;;  %v12360_v15 = vld [vmem:[#allocation230_spill] sm:$0xff]  ;;  %v12362_v26 = vld [vmem:[#allocation177_spill] sm:$0xff] }
 0x4d2   : > { %12351 = vst [vmem:[#allocation103_spill] sm:$0xff] %v9558_v41  ;;  %12353 = vst [vmem:[#allocation171_spill] sm:$0xff] %v9561_v18  ;;  %v9575_v30 = vmul.f32 %v5184_v31, %v12360_v15  ;;  %v9578_v12 = vmul.f32 %v5184_v31, %v12362_v26  ;;  %v3153_v36 = vpack.c.bf16 %v2945_v21, %v2937_v58  ;;  %v12364_v26 = vld [vmem:[#allocation72_spill] sm:$0xff]  ;;  %v12366_v44 = vld [vmem:[#allocation231_spill] sm:$0xff] }
 0x4d3   : > { %12355 = vst [vmem:[#allocation110_spill] sm:$0xff] %v9564_v0  ;;  %v3152_v13 = vpack.c.bf16 %v2944_v56, %v2936_v6  ;;  %v9593_v17 = vmul.f32 %v5184_v31, %v12364_v26  ;;  %v9596_v39 = vmul.f32 %v5184_v31, %v12366_v44  ;;  %v2661_v58 = vpop.xlane.xlu1 %2660  ;;  %v12368_v15 = vld [vmem:[#allocation124_spill] sm:$0xff]  ;;  %v12369_v20 = vld [vmem:[#allocation61_spill] sm:$0xff]  ;;  %v12370_v16 = vld [vmem:[#allocation178_spill] sm:$0xff] }
 0x4d4   : > { %12361 = vst [vmem:[#allocation164_spill] sm:$0xff] %v9575_v30  ;;  %12363 = vst [vmem:[#allocation162_spill] sm:$0xff] %v9578_v12  ;;  %3371 = vmatprep.mubr.bf16.mxu0 %v3153_v36  ;;  %5187 = vrcp.f32 %v2661_v58  ;;  %v12371_v31 = vld [vmem:[#allocation125_spill] sm:$0xff]  ;;  %v12373_v36 = vld [vmem:[#allocation232_spill] sm:$0xff] }
 0x4d5   : > { %12365 = vst [vmem:[#allocation163_spill] sm:$0xff] %v9593_v17  ;;  %12367 = vst [vmem:[#allocation112_spill] sm:$0xff] %v9596_v39  ;;  %3372 = vmatmul.mubr.bf16.gmra.mrb[20].mxu0 %v3152_v13  ;;  %v12375_v6 = vld [vmem:[#allocation179_spill] sm:$0xff]  ;;  %v12377_v21 = vld [vmem:[#allocation74_spill] sm:$0xff] }
 0x4d6   : > { %v5186_v56 = vpop.eup %5185  ;;  %v12382_v17 = vld [vmem:[#allocation166_spill] sm:$0xff] }
 0x4d7   : > { %v2953_v48 = vmul.f32 %v5186_v56, %v12368_v15  ;;  %v2952_v26 = vmul.f32 %v5186_v56, %v12369_v20  ;;  %v9605_v41 = vmul.f32 %v5186_v56, %v12370_v16  ;;  %v9608_v44 = vmul.f32 %v5186_v56, %v12371_v31  ;;  %v12379_v15 = vld [vmem:[#allocation233_spill] sm:$0xff]  ;;  %v12381_v20 = vld [vmem:[#allocation167_spill] sm:$0xff]  ;;  %v12383_v31 = vld [vmem:[#allocation180_spill] sm:$0xff] }
 0x4d8   : > { %v9611_v13 = vmul.f32 %v5186_v56, %v12373_v36  ;;  %v9614_v18 = vmul.f32 %v5186_v56, %v12375_v6  ;;  %v9617_v0 = vmul.f32 %v5186_v56, %v12377_v21  ;;  %v9620_v39 = vmul.f32 %v5186_v56, %v12379_v15  ;;  %v12384_v36 = vld [vmem:[#allocation220_spill] sm:$0xff]  ;;  %v12388_v6 = vld [vmem:[#allocation181_spill] sm:$0xff]  ;;  %v12392_v56 = vld [vmem:[#allocation235_spill] sm:$0xff] }
 0x4d9   : > { %12372 = vst [vmem:[#allocation49_spill] sm:$0xff] %v9608_v44  ;;  %v12390_v21 = vld [vmem:[#allocation76_spill] sm:$0xff] }
 0x4da   : > { %12374 = vst [vmem:[#allocation130_spill] sm:$0xff] %v9611_v13  ;;  %12376 = vst [vmem:[#allocation50_spill] sm:$0xff] %v9614_v18 }
 0x4db   : > { %v2670_v22 = vpop.xlane.xlu0 %2669  ;;  %12378 = vst [vmem:[#allocation123_spill] sm:$0xff] %v9617_v0  ;;  %12380 = vst [vmem:[#allocation263_spill] sm:$0xff] %v9620_v39 }
 0x4dc   : > { %5189 = vrcp.f32 %v2670_v22  ;;  %v12386_v22 = vld [vmem:[#allocation234_spill] sm:$0xff] }
 0x4de   : > { %v5188_v58 = vpop.eup %5187 }
 0x4df   : > { %v2961_v16 = vmul.f32 %v5188_v58, %v12381_v20  ;;  %v2960_v49 = vmul.f32 %v5188_v58, %v12382_v17  ;;  %v9625_v32 = vmul.f32 %v5188_v58, %v12383_v31  ;;  %v9628_v59 = vmul.f32 %v5188_v58, %v12384_v36  ;;  %v12394_v36 = vld [vmem:[#allocation169_spill] sm:$0xff]  ;;  %v12395_v31 = vld [vmem:[#allocation168_spill] sm:$0xff] }
 0x4e0   : > { %v9631_v12 = vmul.f32 %v5188_v58, %v12386_v22  ;;  %v9634_v23 = vmul.f32 %v5188_v58, %v12388_v6  ;;  %v9637_v30 = vmul.f32 %v5188_v58, %v12390_v21  ;;  %v9640_v15 = vmul.f32 %v5188_v58, %v12392_v56  ;;  %v12396_v6 = vld [vmem:[#allocation182_spill] sm:$0xff]  ;;  %v12398_v58 = vld [vmem:[#allocation236_spill] sm:$0xff] }
 0x4e1   : > { %12385 = vst [vmem:[#allocation122_spill] sm:$0xff] %v9628_v59  ;;  %v3161_v17 = vpack.c.bf16 %v2961_v16, %v2953_v48  ;;  %v3160_v20 = vpack.c.bf16 %v2960_v49, %v2952_v26  ;;  %v5225_v16 = vld [vmem:[%s270_s13] sm:$0xff]  ;;  %v12397_v21 = vld [vmem:[#allocation222_spill] sm:$0xff]  ;;  %s5470_s13 = smov [#allocation8]  }
 0x4e2   : > { %12387 = vst [vmem:[#allocation62_spill] sm:$0xff] %v9631_v12  ;;  %12389 = vst [vmem:[#allocation65_spill] sm:$0xff] %v9634_v23  ;;  %v3242_v56 = vcombine.high %v5225_v16, %v5225_v16  ;;  %s5321_s19 = sshll.u32 %s5470_s13, 4  ;;  %s5322_s19 = int_to_ptr.vmem [resolvable:$false] %s5321_s19 }
 0x4e3   : > { %12391 = vst [vmem:[#allocation66_spill] sm:$0xff] %v9637_v30  ;;  %12393 = vst [vmem:[#allocation64_spill] sm:$0xff] %v9640_v15  ;;  %v2679_v48 = vpop.xlane.xlu1 %2678  ;;  %3379 = vmatprep.mubr.bf16.mxu0 %v3161_v17  ;;  %v12405_v15 = vld [vmem:[#allocation223_spill] sm:$0xff]  ;;  %s5323_s9 = scalar_lea.vmem %s5322_s19, 8192  ;;  %p5324_p10 = scmp.lt.s32.totalorder %s10474_s29, %s5322_s19 }
 0x4e4   : > { %5191 = vrcp.f32 %v2679_v48  ;;  %3380 = vmatmul.mubr.bf16.gmra.mrb[24].mxu0 %v3160_v20  ;;  %v12400_v20 = vld [vmem:[#allocation183_spill] sm:$0xff]  ;;  %p5325_p9 = scmp.lt.s32.totalorder %s5323_s9, %s5317_s8 }
 0x4e6   : > { %v5190_v49 = vpop.eup %5189  ;;  %p5326_p6 = por %p5325_p9, %p5324_p10 }
 0x4e7   : > { %v2969_v22 = vmul.f32 %v5190_v49, %v12394_v36  ;;  %v2968_v13 = vmul.f32 %v5190_v49, %v12395_v31  ;;  %v9659_v18 = vmul.f32 %v5190_v49, %v12396_v6  ;;  %v9662_v0 = vmul.f32 %v5190_v49, %v12397_v21  ;;  %v12404_v31 = vld [vmem:[#allocation170_spill] sm:$0xff]  ;;  %v12406_v21 = vld [vmem:[#allocation27_spill] sm:$0xff] }
 0x4e8   : > { %v9665_v39 = vmul.f32 %v5190_v49, %v12398_v58  ;;  %v9668_v48 = vmul.f32 %v5190_v49, %v12400_v20  ;;  %v9671_v16 = vmul.f32 %v5190_v49, %v8358_v7  ;;  %v9674_v36 = vmul.f32 %v5190_v49, %v8352_v45  ;;  %v12407_v58 = vld [vmem:[#allocation266_spill] sm:$0xff]  ;;  %v12410_v20 = vld [vmem:[#allocation143_spill] sm:$0xff]  ;;  %p5327_p4 = pnand %p5326_p6, %p5320_p8 }
 0x4ea   : > { %12399 = vst [vmem:[#allocation224_spill] sm:$0xff] %v9665_v39  ;;  %12401 = vst [vmem:[#allocation114_spill] sm:$0xff] %v9668_v48  ;;  %v12429_v48 = vld [vmem:[#allocation187_spill] sm:$0xff] }
 0x4eb   : > { %v2688_v26 = vpop.xlane.xlu0 %2687  ;;  %12402 = vst [vmem:[#allocation51_spill] sm:$0xff] %v9671_v16  ;;  %12403 = vst [vmem:[#allocation68_spill] sm:$0xff] %v9674_v36 }
 0x4ec   : > { %5193 = vrcp.f32 %v2688_v26  ;;  %v12408_v26 = vld [vmem:[#allocation184_spill] sm:$0xff] }
 0x4ee   : > { %v5192_v17 = vpop.eup %5191 }
 0x4ef   : > { %v2977_v6 = vmul.f32 %v5192_v17, %v12404_v31  ;;  %v2976_v30 = vmul.f32 %v5192_v17, %v12405_v15  ;;  %v9679_v23 = vmul.f32 %v5192_v17, %v12406_v21  ;;  %v9682_v12 = vmul.f32 %v5192_v17, %v12407_v58 }
 0x4f0   : > { %v9685_v44 = vmul.f32 %v5192_v17, %v12408_v26  ;;  %v9688_v59 = vmul.f32 %v5192_v17, %v12410_v20  ;;  %v9691_v7 = vmul.f32 %v5192_v17, %v8422_v2  ;;  %v9694_v45 = vmul.f32 %v5192_v17, %v8414_v10  ;;  %v12414_v2 = vld [vmem:[#allocation227_spill] sm:$0xff]  ;;  %v12415_v26 = vld [vmem:[#allocation226_spill] sm:$0xff] }
 0x4f1   : > { %v3169_v49 = vpack.c.bf16 %v2977_v6, %v2969_v22  ;;  %v3168_v15 = vpack.c.bf16 %v2976_v30, %v2968_v13  ;;  %v9709_v30 = vrot.slane %v3242_v56, %v8634_v24 }
 0x4f2   : > { %12409 = vst [vmem:[#allocation109_spill] sm:$0xff] %v9685_v44  ;;  %12411 = vst [vmem:[#allocation132_spill] sm:$0xff] %v9688_v59 }
 0x4f3   : > { %12412 = vst [vmem:[#allocation131_spill] sm:$0xff] %v9691_v7  ;;  %12413 = vst [vmem:[#allocation69_spill] sm:$0xff] %v9694_v45  ;;  %v2697_v22 = vpop.xlane.xlu1 %2696  ;;  %3387 = vmatprep.mubr.bf16.mxu0 %v3169_v49  ;;  %v3258_v13 = vcombine.high %v9709_v30, %v9709_v30  ;;  %v12424_v45 = vld [vmem:[#allocation228_spill] sm:$0xff]  ;;  %v12427_v7 = vld [vmem:[#allocation145_spill] sm:$0xff] }
 0x4f4   : > { %5195 = vrcp.f32 %v2697_v22  ;;  %3388 = vmatmul.mubr.bf16.gmra.mrb[28].mxu0 %v3168_v15  ;;  %v12416_v22 = vld [vmem:[#allocation33_spill] sm:$0xff] }
 0x4f5   : > { %v9714_v17 = vrot.slane %v3258_v13, %v8634_v24 }
 0x4f6   : > { %v5194_v6 = vpop.eup %5193 }
 0x4f7   : > { %3621 = vmatprep.subr.bf16.mxu0 %v9714_v17  ;;  %v2985_v10 = vmul.f32 %v5194_v6, %v12414_v2  ;;  %v2984_v49 = vmul.f32 %v5194_v6, %v12415_v26  ;;  %v9720_v56 = vmul.f32 %v5194_v6, %v8456_v35  ;;  %v9723_v15 = vmul.f32 %v5194_v6, %v12416_v22  ;;  %v12422_v26 = vld [vmem:[#allocation175_spill] sm:$0xff]  ;;  %v12423_v35 = vld [vmem:[#allocation174_spill] sm:$0xff] }
 0x4f8   : > { %v9726_v21 = vmul.f32 %v5194_v6, %v8472_v47  ;;  %v9729_v13 = vmul.f32 %v5194_v6, %v8464_v46  ;;  %v9732_v31 = vmul.f32 %v5194_v6, %v8490_v53  ;;  %v9735_v2 = vmul.f32 %v5194_v6, %v8482_v51  ;;  %v12431_v6 = vld [vmem:[#allocation186_spill] sm:$0xff] }
 0x4f9   : > { %12417 = vst [vmem:[#allocation105_spill] sm:$0xff] %v9723_v15 }
 0x4fa   : > { %12418 = vst [vmem:[#allocation218_spill] sm:$0xff] %v9726_v21  ;;  %12419 = vst [vmem:[#allocation217_spill] sm:$0xff] %v9729_v13 }
 0x4fb   : > { %v2706_v20 = vpop.xlane.xlu0 %2705  ;;  %12420 = vst [vmem:[#allocation116_spill] sm:$0xff] %v9732_v31  ;;  %12421 = vst [vmem:[#allocation55_spill] sm:$0xff] %v9735_v2 }
 0x4fc   : > { %5197 = vrcp.f32 %v2706_v20 }
 0x4fe   : > { %v5196_v58 = vpop.eup %5195 }
 0x4ff   : > { %v2993_v20 = vmul.f32 %v5196_v58, %v12422_v26  ;;  %v2992_v36 = vmul.f32 %v5196_v58, %v12423_v35  ;;  %v9740_v22 = vmul.f32 %v5196_v58, %v8525_v40  ;;  %v9743_v16 = vmul.f32 %v5196_v58, %v12424_v45 }
 0x500   : > { %v2715_v47 = vpop.xlane.xlu1 %2714  ;;  %v9746_v46 = vmul.f32 %v5196_v58, %v8542_v63  ;;  %v9749_v53 = vmul.f32 %v5196_v58, %v12427_v7  ;;  %v9752_v51 = vmul.f32 %v5196_v58, %v12429_v48  ;;  %v9755_v26 = vmul.f32 %v5196_v58, %v12431_v6  ;;  %v12434_v6 = vld [vmem:[#allocation134_spill] sm:$0xff]  ;;  %v12435_v63 = vld [vmem:[#allocation83_spill] sm:$0xff]  ;;  %v12437_v7 = vld [vmem:[#allocation48_spill] sm:$0xff] }
 0x501   : > { %12425 = vst [vmem:[#allocation58_spill] sm:$0xff] %v9743_v16  ;;  %5199 = vrcp.f32 %v2715_v47  ;;  %v3177_v35 = vpack.c.bf16 %v2993_v20, %v2985_v10  ;;  %v3176_v40 = vpack.c.bf16 %v2992_v36, %v2984_v49  ;;  %v12433_v49 = vld [vmem:[#allocation135_spill] sm:$0xff] }
 0x502   : > { %12426 = vst [vmem:[#allocation219_spill] sm:$0xff] %v9746_v46  ;;  %12428 = vst [vmem:[#allocation118_spill] sm:$0xff] %v9749_v53  ;;  %v12439_v48 = vld [vmem:[#allocation147_spill] sm:$0xff] }
 0x503   : > { %12430 = vst [vmem:[#allocation54_spill] sm:$0xff] %v9752_v51  ;;  %12432 = vst [vmem:[#allocation117_spill] sm:$0xff] %v9755_v26  ;;  %3395 = vmatprep.mubr.bf16.mxu0 %v3177_v35  ;;  %v12448_v51 = vld [vmem:[#allocation73_spill] sm:$0xff] }
 0x504   : > { %3396 = vmatmul.mubr.bf16.gmra.mrb[32].mxu0 %v3176_v40  ;;  %v12441_v40 = vld [vmem:[#allocation28_spill] sm:$0xff] }
 0x505   : > { %v2724_v36 = vpop.xlane.xlu0 %2723 }
 0x506   : > { %v5198_v10 = vpop.eup %5197  ;;  %5201 = vrcp.f32 %v2724_v36  ;;  %v12443_v36 = vld [vmem:[#allocation189_spill] sm:$0xff] }
 0x507   : > { %v3001_v20 = vmul.f32 %v5198_v10, %v12433_v49  ;;  %v3000_v59 = vmul.f32 %v5198_v10, %v12434_v6  ;;  %v9772_v45 = vmul.f32 %v5198_v10, %v12435_v63  ;;  %v9775_v13 = vmul.f32 %v5198_v10, %v12437_v7  ;;  %v12445_v49 = vld [vmem:[#allocation188_spill] sm:$0xff]  ;;  %v12449_v7 = vld [vmem:[#allocation242_spill] sm:$0xff] }
 0x508   : > { %v9778_v35 = vmul.f32 %v5198_v10, %v12439_v48  ;;  %v9781_v58 = vmul.f32 %v5198_v10, %v12441_v40  ;;  %v9784_v2 = vmul.f32 %v5198_v10, %v12443_v36  ;;  %v9787_v26 = vmul.f32 %v5198_v10, %v12445_v49  ;;  %v12447_v6 = vld [vmem:[#allocation136_spill] sm:$0xff]  ;;  %v12451_v48 = vld [vmem:[#allocation137_spill] sm:$0xff]  ;;  %v12455_v40 = vld [vmem:[#allocation243_spill] sm:$0xff] }
 0x509   : > { %12436 = vst [vmem:[#allocation272_spill] sm:$0xff] %v9772_v45  ;;  %12438 = vst [vmem:[#allocation56_spill] sm:$0xff] %v9775_v13  ;;  %v12457_v36 = vld [vmem:[#allocation148_spill] sm:$0xff]  ;;  %v12459_v10 = vld [vmem:[#allocation85_spill] sm:$0xff] }
 0x50a   : > { %v2733_v47 = vpop.xlane.xlu1 %2732  ;;  %12440 = vst [vmem:[#allocation60_spill] sm:$0xff] %v9778_v35  ;;  %12442 = vst [vmem:[#allocation126_spill] sm:$0xff] %v9781_v58  ;;  %v12465_v35 = vld [vmem:[#allocation139_spill] sm:$0xff] }
 0x50b   : > { %v5200_v31 = vpop.eup %5199  ;;  %5203 = vrcp.f32 %v2733_v47  ;;  %12444 = vst [vmem:[#allocation165_spill] sm:$0xff] %v9784_v2  ;;  %12446 = vst [vmem:[#allocation63_spill] sm:$0xff] %v9787_v26  ;;  %v12453_v47 = vld [vmem:[#allocation84_spill] sm:$0xff]  ;;  %v12467_v58 = vld [vmem:[#allocation191_spill] sm:$0xff] }
 0x50c   : > { %v3009_v63 = vmul.f32 %v5200_v31, %v12447_v6  ;;  %v3008_v53 = vmul.f32 %v5200_v31, %v12448_v51  ;;  %v9792_v21 = vmul.f32 %v5200_v31, %v12449_v7  ;;  %v9795_v46 = vmul.f32 %v5200_v31, %v12451_v48  ;;  %v12463_v7 = vld [vmem:[#allocation149_spill] sm:$0xff] }
 0x50d   : > { %v9798_v39 = vmul.f32 %v5200_v31, %v12453_v47  ;;  %v9801_v44 = vmul.f32 %v5200_v31, %v12455_v40  ;;  %v9804_v15 = vmul.f32 %v5200_v31, %v12457_v36  ;;  %v9807_v49 = vmul.f32 %v5200_v31, %v12459_v10  ;;  %v12462_v10 = vld [vmem:[#allocation75_spill] sm:$0xff]  ;;  %v12469_v31 = vld [vmem:[#allocation190_spill] sm:$0xff] }
 0x50e   : > { %12450 = vst [vmem:[#allocation129_spill] sm:$0xff] %v9792_v21  ;;  %12452 = vst [vmem:[#allocation67_spill] sm:$0xff] %v9795_v46  ;;  %v3185_v6 = vpack.c.bf16 %v3009_v63, %v3001_v20  ;;  %v3184_v51 = vpack.c.bf16 %v3008_v53, %v3000_v59  ;;  %v12461_v53 = vld [vmem:[#allocation26_spill] sm:$0xff] }
 0x50f   : > { %12454 = vst [vmem:[#allocation128_spill] sm:$0xff] %v9798_v39  ;;  %12456 = vst [vmem:[#allocation269_spill] sm:$0xff] %v9801_v44  ;;  %v2742_v16 = vpop.xlane.xlu0 %2741 }
 0x510   : > { %12458 = vst [vmem:[#allocation70_spill] sm:$0xff] %v9804_v15  ;;  %12460 = vst [vmem:[#allocation229_spill] sm:$0xff] %v9807_v49  ;;  %v5202_v59 = vpop.eup %5201  ;;  %5205 = vrcp.f32 %v2742_v16  ;;  %3403 = vmatprep.mubr.bf16.mxu0 %v3185_v6  ;;  %v12471_v6 = vld [vmem:[#allocation245_spill] sm:$0xff] }
 0x511   : > { %3404 = vmatmul.mubr.bf16.gmra.mrb[36].mxu0 %v3184_v51  ;;  %v3017_v20 = vmul.f32 %v5202_v59, %v12461_v53  ;;  %v3016_v48 = vmul.f32 %v5202_v59, %v12462_v10  ;;  %v9824_v47 = vmul.f32 %v5202_v59, %v12463_v7  ;;  %v9827_v40 = vmul.f32 %v5202_v59, %v12465_v35  ;;  %v12473_v53 = vld [vmem:[#allocation244_spill] sm:$0xff]  ;;  %v12476_v49 = vld [vmem:[#allocation77_spill] sm:$0xff] }
 0x512   : > { %v9830_v36 = vmul.f32 %v5202_v59, %v12467_v58  ;;  %v9833_v16 = vmul.f32 %v5202_v59, %v12469_v31  ;;  %v9836_v51 = vmul.f32 %v5202_v59, %v12471_v6  ;;  %v9839_v26 = vmul.f32 %v5202_v59, %v12473_v53  ;;  %v12475_v10 = vld [vmem:[#allocation140_spill] sm:$0xff]  ;;  %v12478_v58 = vld [vmem:[#allocation141_spill] sm:$0xff]  ;;  %v12486_v59 = vld [vmem:[#allocation247_spill] sm:$0xff] }
 0x513   : > { %12464 = vst [vmem:[#allocation46_spill] sm:$0xff] %v9824_v47  ;;  %12466 = vst [vmem:[#allocation133_spill] sm:$0xff] %v9827_v40  ;;  %v12477_v35 = vld [vmem:[#allocation192_spill] sm:$0xff]  ;;  %v12482_v31 = vld [vmem:[#allocation193_spill] sm:$0xff] }
 0x514   : > { %v2751_v63 = vpop.xlane.xlu1 %2750  ;;  %12468 = vst [vmem:[#allocation173_spill] sm:$0xff] %v9830_v36  ;;  %12470 = vst [vmem:[#allocation172_spill] sm:$0xff] %v9833_v16  ;;  %v12484_v6 = vld [vmem:[#allocation225_spill] sm:$0xff]  ;;  %v12492_v36 = vld [vmem:[#allocation79_spill] sm:$0xff] }
 0x515   : > { %v5204_v2 = vpop.eup %5203  ;;  %5207 = vrcp.f32 %v2751_v63  ;;  %12472 = vst [vmem:[#allocation71_spill] sm:$0xff] %v9836_v51  ;;  %12474 = vst [vmem:[#allocation107_spill] sm:$0xff] %v9839_v26  ;;  %v12480_v63 = vld [vmem:[#allocation246_spill] sm:$0xff]  ;;  %v12494_v16 = vld [vmem:[#allocation248_spill] sm:$0xff] }
 0x516   : > { %v3025_v7 = vmul.f32 %v5204_v2, %v12475_v10  ;;  %v3024_v15 = vmul.f32 %v5204_v2, %v12476_v49  ;;  %v9844_v44 = vmul.f32 %v5204_v2, %v12477_v35  ;;  %v9847_v39 = vmul.f32 %v5204_v2, %v12478_v58  ;;  %v12490_v35 = vld [vmem:[#allocation194_spill] sm:$0xff] }
 0x517   : > { %v9850_v13 = vmul.f32 %v5204_v2, %v12480_v63  ;;  %v9853_v46 = vmul.f32 %v5204_v2, %v12482_v31  ;;  %v9856_v45 = vmul.f32 %v5204_v2, %v12484_v6  ;;  %v9859_v53 = vmul.f32 %v5204_v2, %v12486_v59  ;;  %v12489_v59 = vld [vmem:[#allocation237_spill] sm:$0xff]  ;;  %v12496_v2 = vld [vmem:[#allocation138_spill] sm:$0xff] }
 0x518   : > { %12479 = vst [vmem:[#allocation120_spill] sm:$0xff] %v9847_v39  ;;  %v3193_v10 = vpack.c.bf16 %v3025_v7, %v3017_v20  ;;  %v3192_v49 = vpack.c.bf16 %v3024_v15, %v3016_v48  ;;  %v12488_v48 = vld [vmem:[#allocation78_spill] sm:$0xff] }
 0x519   : > { %12481 = vst [vmem:[#allocation57_spill] sm:$0xff] %v9850_v13  ;;  %12483 = vst [vmem:[#allocation176_spill] sm:$0xff] %v9853_v46  ;;  %v2760_v21 = vpop.xlane.xlu0 %2759 }
 0x51a   : > { %12485 = vst [vmem:[#allocation119_spill] sm:$0xff] %v9856_v45  ;;  %12487 = vst [vmem:[#allocation230_spill] sm:$0xff] %v9859_v53  ;;  %v5206_v15 = vpop.eup %5205  ;;  %3411 = vmatprep.mubr.bf16.mxu0 %v3193_v10  ;;  %5209 = vrcp.f32 %v2760_v21  ;;  %v12498_v21 = vld [vmem:[#allocation195_spill] sm:$0xff]  ;;  %v12503_v53 = vld [vmem:[#allocation185_spill] sm:$0xff] }
 0x51b   : > { %3412 = vmatmul.mubr.bf16.gmra.mrb[40].mxu0 %v3192_v49  ;;  %v3033_v20 = vmul.f32 %v5206_v15, %v12488_v48  ;;  %v3032_v58 = vmul.f32 %v5206_v15, %v12489_v59  ;;  %v9876_v63 = vmul.f32 %v5206_v15, %v12490_v35  ;;  %v9879_v31 = vmul.f32 %v5206_v15, %v12492_v36  ;;  %v12500_v48 = vld [vmem:[#allocation249_spill] sm:$0xff]  ;;  %v12502_v59 = vld [vmem:[#allocation238_spill] sm:$0xff] }
 0x51c   : > { %v9882_v6 = vmul.f32 %v5206_v15, %v12494_v16  ;;  %v9885_v10 = vmul.f32 %v5206_v15, %v12496_v2  ;;  %v9888_v49 = vmul.f32 %v5206_v15, %v12498_v21  ;;  %v9891_v26 = vmul.f32 %v5206_v15, %v12500_v48  ;;  %v12504_v36 = vld [vmem:[#allocation197_spill] sm:$0xff]  ;;  %v12506_v16 = vld [vmem:[#allocation239_spill] sm:$0xff]  ;;  %v12510_v2 = vld [vmem:[#allocation250_spill] sm:$0xff] }
 0x51d   : > { %12491 = vst [vmem:[#allocation177_spill] sm:$0xff] %v9876_v63  ;;  %12493 = vst [vmem:[#allocation72_spill] sm:$0xff] %v9879_v31  ;;  %v12512_v21 = vld [vmem:[#allocation142_spill] sm:$0xff] }
 0x51e   : > { %v2769_v7 = vpop.xlane.xlu1 %2768  ;;  %12495 = vst [vmem:[#allocation231_spill] sm:$0xff] %v9882_v6  ;;  %12497 = vst [vmem:[#allocation124_spill] sm:$0xff] %v9885_v10  ;;  %v12514_v15 = vld [vmem:[#allocation198_spill] sm:$0xff]  ;;  %v12520_v10 = vld [vmem:[#allocation199_spill] sm:$0xff] }
 0x51f   : > { %v5208_v51 = vpop.eup %5207  ;;  %5211 = vrcp.f32 %v2769_v7  ;;  %12499 = vst [vmem:[#allocation61_spill] sm:$0xff] %v9888_v49  ;;  %12501 = vst [vmem:[#allocation178_spill] sm:$0xff] %v9891_v26  ;;  %v12508_v7 = vld [vmem:[#allocation196_spill] sm:$0xff] }
 0x520   : > { %v3041_v35 = vmul.f32 %v5208_v51, %v12502_v59  ;;  %v3040_v45 = vmul.f32 %v5208_v51, %v12503_v53  ;;  %v9896_v46 = vmul.f32 %v5208_v51, %v12504_v36  ;;  %v9899_v13 = vmul.f32 %v5208_v51, %v12506_v16  ;;  %v12518_v16 = vld [vmem:[#allocation251_spill] sm:$0xff] }
 0x521   : > { %v9902_v40 = vmul.f32 %v5208_v51, %v12508_v7  ;;  %v9905_v39 = vmul.f32 %v5208_v51, %v12510_v2  ;;  %v9908_v47 = vmul.f32 %v5208_v51, %v12512_v21  ;;  %v9911_v48 = vmul.f32 %v5208_v51, %v12514_v15  ;;  %v12519_v7 = vld [vmem:[#allocation144_spill] sm:$0xff] }
 0x522   : > { %12505 = vst [vmem:[#allocation125_spill] sm:$0xff] %v9896_v46  ;;  %12507 = vst [vmem:[#allocation232_spill] sm:$0xff] %v9899_v13  ;;  %v3201_v59 = vpack.c.bf16 %v3041_v35, %v3033_v20  ;;  %v3200_v53 = vpack.c.bf16 %v3040_v45, %v3032_v58  ;;  %v12516_v58 = vld [vmem:[#allocation81_spill] sm:$0xff]  ;;  %v12517_v35 = vld [vmem:[#allocation80_spill] sm:$0xff] }
 0x523   : > { %12509 = vst [vmem:[#allocation179_spill] sm:$0xff] %v9902_v40  ;;  %12511 = vst [vmem:[#allocation74_spill] sm:$0xff] %v9905_v39  ;;  %v12521_v21 = vld [vmem:[#allocation252_spill] sm:$0xff]  ;;  %v12530_v40 = vld [vmem:[#allocation82_spill] sm:$0xff] }
 0x524   : > { %12513 = vst [vmem:[#allocation233_spill] sm:$0xff] %v9908_v47  ;;  %12515 = vst [vmem:[#allocation167_spill] sm:$0xff] %v9911_v48  ;;  %3419 = vmatprep.mubr.bf16.mxu0 %v3201_v59  ;;  %v5210_v45 = vpop.eup %5209  ;;  %v12523_v59 = vld [vmem:[#allocation253_spill] sm:$0xff]  ;;  %v12529_v47 = vld [vmem:[#allocation200_spill] sm:$0xff] }
 0x525   : > { %3420 = vmatmul.mubr.bf16.gmra.mrb[44].mxu0 %v3200_v53  ;;  %v3049_v20 = vmul.f32 %v5210_v45, %v12516_v58  ;;  %v3048_v15 = vmul.f32 %v5210_v45, %v12517_v35  ;;  %v9928_v36 = vmul.f32 %v5210_v45, %v12518_v16  ;;  %v9931_v6 = vmul.f32 %v5210_v45, %v12519_v7  ;;  %v12525_v53 = vld [vmem:[#allocation201_spill] sm:$0xff]  ;;  %v12528_v16 = vld [vmem:[#allocation240_spill] sm:$0xff] }
 0x526   : > { %v9934_v39 = vmul.f32 %v5210_v45, %v12520_v10  ;;  %v9937_v49 = vmul.f32 %v5210_v45, %v12521_v21  ;;  %v9940_v51 = vmul.f32 %v5210_v45, %v12523_v59  ;;  %v9943_v58 = vmul.f32 %v5210_v45, %v12525_v53  ;;  %v12527_v35 = vld [vmem:[#allocation241_spill] sm:$0xff]  ;;  %v12531_v10 = vld [vmem:[#allocation146_spill] sm:$0xff]  ;;  %v12534_v59 = vld [vmem:[#allocation255_spill] sm:$0xff] }
 0x527   : > { %v12532_v21 = vld [vmem:[#allocation202_spill] sm:$0xff] }
 0x528   : > { %12522 = vst [vmem:[#allocation166_spill] sm:$0xff] %v9937_v49  ;;  %12524 = vst [vmem:[#allocation180_spill] sm:$0xff] %v9940_v51  ;;  %v12536_v45 = vld [vmem:[#allocation254_spill] sm:$0xff] }
 0x529   : > { %v5212_v2 = vpop.eup %5211  ;;  %12526 = vst [vmem:[#allocation220_spill] sm:$0xff] %v9943_v58  ;;  %v12547_v58 = vld [vmem:[#allocation87_spill] sm:$0xff] }
 0x52a   : > { %v3057_v26 = vmul.f32 %v5212_v2, %v12527_v35  ;;  %v3056_v48 = vmul.f32 %v5212_v2, %v12528_v16  ;;  %v9948_v7 = vmul.f32 %v5212_v2, %v12529_v47  ;;  %v9951_v31 = vmul.f32 %v5212_v2, %v12530_v40 }
 0x52b   : > { %v9954_v13 = vmul.f32 %v5212_v2, %v12531_v10  ;;  %v9957_v63 = vmul.f32 %v5212_v2, %v12532_v21  ;;  %v9960_v46 = vmul.f32 %v5212_v2, %v12534_v59  ;;  %v9963_v53 = vmul.f32 %v5212_v2, %v12536_v45  ;;  %v12538_v45 = vld [vmem:[#allocation204_spill] sm:$0xff]  ;;  %v12539_v10 = vld [vmem:[#allocation203_spill] sm:$0xff] }
 0x52c   : > { %v3209_v35 = vpack.c.bf16 %v3057_v26, %v3049_v20  ;;  %v3208_v16 = vpack.c.bf16 %v3056_v48, %v3048_v15  ;;  %v12540_v21 = vld [vmem:[#allocation88_spill] sm:$0xff] }
 0x52d   : > { %12533 = vst [vmem:[#allocation234_spill] sm:$0xff] %v9957_v63  ;;  %12535 = vst [vmem:[#allocation181_spill] sm:$0xff] %v9960_v46  ;;  %v12541_v59 = vld [vmem:[#allocation256_spill] sm:$0xff]  ;;  %v12548_v46 = vld [vmem:[#allocation93_spill] sm:$0xff] }
 0x52e   : > { %12537 = vst [vmem:[#allocation76_spill] sm:$0xff] %v9963_v53  ;;  %3427 = vmatprep.mubr.bf16.mxu0 %v3209_v35  ;;  %v12554_v63 = vld [vmem:[#allocation95_spill] sm:$0xff] }
 0x52f   : > { %3428 = vmatmul.mubr.bf16.gmra.mrb[48].mxu0 %v3208_v16 }
 0x538   : > { %v2778_v26 = vpop.xlane.xlu0 %2777 }
 0x539   : > { %5213 = vrcp.f32 %v2778_v26 }
 0x543   : > { %v2787_v48 = vpop.xlane.xlu1 %2786  ;;  %v5214_v20 = vpop.eup %5213 }
 0x544   : > { %5215 = vrcp.f32 %v2787_v48  ;;  %v3065_v40 = vmul.f32 %v5214_v20, %v12538_v45  ;;  %v3064_v47 = vmul.f32 %v5214_v20, %v12539_v10  ;;  %v9980_v49 = vmul.f32 %v5214_v20, %v12540_v21  ;;  %v12545_v10 = vld [vmem:[#allocation86_spill] sm:$0xff]  ;;  %v12546_v21 = vld [vmem:[#allocation257_spill] sm:$0xff] }
 0x545   : > { %v9983_v51 = vmul.f32 %v5214_v20, %v12541_v59  ;;  %v9986_v35 = vmul.f32 %v5214_v20, %v9080_v37  ;;  %v9989_v16 = vmul.f32 %v5214_v20, %v9070_v42  ;;  %v9992_v26 = vmul.f32 %v5214_v20, %v9118_v8 }
 0x546   : > { %v9995_v48 = vmul.f32 %v5214_v20, %v9088_v3  ;;  %v12550_v20 = vld [vmem:[#allocation35_spill] sm:$0xff] }
 0x547   : > { %12542 = vst [vmem:[#allocation235_spill] sm:$0xff] %v9989_v16  ;;  %12543 = vst [vmem:[#allocation169_spill] sm:$0xff] %v9992_v26  ;;  %v12566_v26 = vld [vmem:[#allocation158_spill] sm:$0xff] }
 0x548   : > { %12544 = vst [vmem:[#allocation168_spill] sm:$0xff] %v9995_v48 }
 0x549   : > { %v2796_v15 = vpop.xlane.xlu0 %2795 }
 0x54a   : > { %5217 = vrcp.f32 %v2796_v15 }
 0x54e   : > { %v5216_v2 = vpop.eup %5215 }
 0x54f   : > { %v3073_v15 = vmul.f32 %v5216_v2, %v12545_v10  ;;  %v3072_v45 = vmul.f32 %v5216_v2, %v12546_v21  ;;  %v10000_v59 = vmul.f32 %v5216_v2, %v9129_v1  ;;  %v10003_v53 = vmul.f32 %v5216_v2, %v12547_v58  ;;  %v12555_v58 = vld [vmem:[#allocation205_spill] sm:$0xff] }
 0x550   : > { %v2805_v37 = vpop.xlane.xlu1 %2804  ;;  %v10006_v42 = vmul.f32 %v5216_v2, %v9188_v33  ;;  %v10009_v8 = vmul.f32 %v5216_v2, %v12548_v46  ;;  %v10012_v3 = vmul.f32 %v5216_v2, %v9210_v9  ;;  %v10015_v10 = vmul.f32 %v5216_v2, %v12550_v20 }
 0x551   : > { %5219 = vrcp.f32 %v2805_v37  ;;  %v3217_v21 = vpack.c.bf16 %v3073_v15, %v3065_v40  ;;  %v3216_v1 = vpack.c.bf16 %v3072_v45, %v3064_v47  ;;  %v12552_v15 = vld [vmem:[#allocation151_spill] sm:$0xff]  ;;  %v12553_v37 = vld [vmem:[#allocation29_spill] sm:$0xff]  ;;  %v12559_v40 = vld [vmem:[#allocation150_spill] sm:$0xff] }
 0x552   : > { %12549 = vst [vmem:[#allocation182_spill] sm:$0xff] %v10012_v3  ;;  %12551 = vst [vmem:[#allocation222_spill] sm:$0xff] %v10015_v10  ;;  %v12560_v10 = vld [vmem:[#allocation259_spill] sm:$0xff] }
 0x553   : > { %3435 = vmatprep.mubr.bf16.mxu0 %v3217_v21 }
 0x554   : > { %3436 = vmatmul.mubr.bf16.gmra.mrb[52].mxu0 %v3216_v1  ;;  %v5218_v2 = vpop.eup %5217 }
 0x555   : > { %v2814_v47 = vpop.xlane.xlu0 %2813  ;;  %v3081_v45 = vmul.f32 %v5218_v2, %v12552_v15  ;;  %v3080_v20 = vmul.f32 %v5218_v2, %v12553_v37  ;;  %v10032_v33 = vmul.f32 %v5218_v2, %v12554_v63  ;;  %v10035_v46 = vmul.f32 %v5218_v2, %v12555_v58  ;;  %v12558_v63 = vld [vmem:[#allocation258_spill] sm:$0xff] }
 0x556   : > { %5221 = vrcp.f32 %v2814_v47  ;;  %v10038_v21 = vmul.f32 %v5218_v2, %v9256_v4  ;;  %v10041_v1 = vmul.f32 %v5218_v2, %v9245_v29  ;;  %v10044_v47 = vmul.f32 %v5218_v2, %v9271_v27 }
 0x557   : > { %v10047_v15 = vmul.f32 %v5218_v2, %v9265_v14 }
 0x558   : > { %12556 = vst [vmem:[#allocation236_spill] sm:$0xff] %v10044_v47  ;;  %v12570_v47 = vld [vmem:[#allocation121_spill] sm:$0xff] }
 0x559   : > { %12557 = vst [vmem:[#allocation183_spill] sm:$0xff] %v10047_v15 }
 0x55b   : > { %v5220_v16 = vpop.eup %5219  ;;  %v2823_v9 = vpop.xlane.xlu1 %2822 }
 0x55c   : > { %5223 = vrcp.f32 %v2823_v9  ;;  %v3089_v37 = vmul.f32 %v5220_v16, %v12558_v63  ;;  %v3088_v58 = vmul.f32 %v5220_v16, %v12559_v40  ;;  %v10052_v48 = vmul.f32 %v5220_v16, %v9294_v57  ;;  %v12564_v63 = vld [vmem:[#allocation89_spill] sm:$0xff] }
 0x55d   : > { %v10055_v4 = vmul.f32 %v5220_v16, %v12560_v10  ;;  %v10058_v29 = vmul.f32 %v5220_v16, %v9319_v34  ;;  %v10061_v27 = vmul.f32 %v5220_v16, %v9306_v61  ;;  %v10064_v14 = vmul.f32 %v5220_v16, %v9339_v62  ;;  %v12565_v10 = vld [vmem:[#allocation153_spill] sm:$0xff] }
 0x55e   : > { %v3225_v9 = vpack.c.bf16 %v3089_v37, %v3081_v45  ;;  %v3224_v2 = vpack.c.bf16 %v3088_v58, %v3080_v20  ;;  %v10069_v57 = vmul.f32 %v5220_v16, %v9327_v28  ;;  %v12563_v28 = vld [vmem:[#allocation152_spill] sm:$0xff] }
 0x55f   : > { %12561 = vst [vmem:[#allocation170_spill] sm:$0xff] %v10064_v14  ;;  %v12571_v14 = vld [vmem:[#allocation37_spill] sm:$0xff] }
 0x560   : > { %12562 = vst [vmem:[#allocation223_spill] sm:$0xff] %v10069_v57  ;;  %3443 = vmatprep.mubr.bf16.mxu0 %v3225_v9  ;;  %v5222_v20 = vpop.eup %5221 }
 0x561   : > { %3444 = vmatmul.mubr.bf16.gmra.mrb[56].mxu0 %v3224_v2  ;;  %v3097_v16 = vmul.f32 %v5222_v20, %v12563_v28  ;;  %v3096_v37 = vmul.f32 %v5222_v20, %v12564_v63  ;;  %v3099_v58 = vmul.f32 %v5222_v20, %v9354_v52  ;;  %v3098_v34 = vmul.f32 %v5222_v20, %v12565_v10  ;;  %v12567_v28 = vld [vmem:[#allocation261_spill] sm:$0xff]  ;;  %v12568_v63 = vld [vmem:[#allocation154_spill] sm:$0xff]  ;;  %v12569_v10 = vld [vmem:[#allocation264_spill] sm:$0xff] }
 0x562   : > { %v10086_v61 = vmul.f32 %v5222_v20, %v9387_v25  ;;  %v10089_v62 = vmul.f32 %v5222_v20, %v12566_v26  ;;  %v10092_v9 = vmul.f32 %v5222_v20, %v9411_v43  ;;  %v10095_v2 = vmul.f32 %v5222_v20, %v9398_v19 }
 0x566   : > { %v5224_v40 = vpop.eup %5223 }
 0x567   : > { %v3105_v45 = vmul.f32 %v5224_v40, %v12567_v28  ;;  %v3104_v15 = vmul.f32 %v5224_v40, %v12568_v63  ;;  %v3107_v52 = vmul.f32 %v5224_v40, %v9418_v55  ;;  %v3106_v57 = vmul.f32 %v5224_v40, %v12569_v10 }
 0x568   : > { %v10102_v25 = vmul.f32 %v5224_v40, %v9445_v38  ;;  %v10105_v26 = vmul.f32 %v5224_v40, %v9432_v11  ;;  %v10108_v43 = vmul.f32 %v5224_v40, %v12570_v47  ;;  %v10111_v19 = vmul.f32 %v5224_v40, %v12571_v14  ;;  %v12572_v14 = vld [vmem:[#allocation207_spill] sm:$0xff]  ;;  %v12573_v40 = vld [vmem:[#allocation206_spill] sm:$0xff]  ;;  %v12597_v11 = vld [vmem:[#allocation265_spill] sm:$0xff] }
 0x569   : > { %v3233_v20 = vpack.c.bf16 %v3105_v45, %v3097_v16  ;;  %v3232_v28 = vpack.c.bf16 %v3104_v15, %v3096_v37  ;;  %v3235_v3 = vpack.c.bf16 %v3107_v52, %v3099_v58  ;;  %v3234_v63 = vpack.c.bf16 %v3106_v57, %v3098_v34  ;;  %v12575_v57 = vld [vmem:[#allocation91_spill] sm:$0xff]  ;;  %v12576_v34 = vld [vmem:[#allocation90_spill] sm:$0xff]  ;;  %v12578_v58 = vld [vmem:[#allocation260_spill] sm:$0xff] }
 0x56a   : > { %v3237_v55 = vpack.c.bf16 %v10102_v25, %v10086_v61  ;;  %v3236_v38 = vpack.c.bf16 %v10105_v26, %v10089_v62  ;;  %v12574_v45 = vpack.c.bf16 %v12572_v14, %v12573_v40  ;;  %v3272_v15 = vrot.slane %v9709_v30, %v8634_v24  ;;  %v12579_v52 = vld [vmem:[#allocation30_spill] sm:$0xff]  ;;  %v12584_v40 = vld [vmem:[#allocation92_spill] sm:$0xff]  ;;  %v12730_v25 = vld [vmem:[#allocation59_spill] sm:$0xff] }
 0x56b   : > { %3451 = vmatprep.mubr.bf16.mxu0 %v3233_v20  ;;  %v12577_v16 = vpack.c.bf16 %v12575_v57, %v12576_v34  ;;  %v3290_v37 = vcombine.high %v9714_v17, %v9714_v17  ;;  %v12580_v10 = vpack.c.bf16 %v12578_v58, %v12579_v52  ;;  %v12581_v20 = vld [vmem:[#allocation209_spill] sm:$0xff]  ;;  %v12587_v30 = vld [vmem:[#allocation156_spill] sm:$0xff]  ;;  %v12588_v57 = vld [vmem:[#allocation155_spill] sm:$0xff] }
 0x56c   : > { %3452 = vmatmul.mubr.bf16.gmra.mrb[60].mxu0 %v3232_v28  ;;  %v12582_v28 = vld [vmem:[#allocation208_spill] sm:$0xff]  ;;  %v12589_v34 = vpack.c.bf16 %v12587_v30, %v12588_v57  ;;  %v12593_v58 = vld [vmem:[#allocation210_spill] sm:$0xff]  ;;  %v12606_v57 = vld [vmem:[#allocation49_spill] sm:$0xff] }
 0x56d   : > { %3492 = vmatprep.mubr.bf16.mxu0 %v12574_v45  ;;  %v12583_v14 = vpack.c.bf16 %v12581_v20, %v12582_v28  ;;  %v12585_v45 = vld [vmem:[#allocation262_spill] sm:$0xff]  ;;  %v12591_v17 = vld [vmem:[#allocation36_spill] sm:$0xff]  ;;  %v12599_v28 = vld [vmem:[#allocation215_spill] sm:$0xff] }
 0x56e   : > { %v12586_v24 = vpack.c.bf16 %v12584_v40, %v12585_v45  ;;  %v12594_v52 = vld [vmem:[#allocation34_spill] sm:$0xff]  ;;  %v12602_v45 = vpack.c.bf16 %v9569_v50, %v9487_v5  ;;  %v12609_v5 = vpack.c.bf16 %v9682_v12, %v9662_v0  ;;  %v12622_v12 = vld [vmem:[#allocation120_spill] sm:$0xff] }
 0x56f   : > { %v12605_v30 = vld [vmem:[#allocation122_spill] sm:$0xff] }
 0x570   : > { %v12611_v50 = vld [vmem:[#allocation58_spill] sm:$0xff] }
 0x571   : > { %v12733_v26 = vld [vmem:[#allocation106_spill] sm:$0xff] }
 0x574   : > { %3493 = vmatmul.mubr.bf16.vlgmr.msra.gmra.mrb[0].mxu0 %v12577_v16  ;;  %v12590_v16 = vld [vmem:[#allocation160_spill] sm:$0xff] }
 0x575   : > { %3500 = vmatprep.mubr.bf16.mxu0 %v12580_v10  ;;  %3622 = vmatpush1.bf16.xpose.msra.mxu0 %v3272_v15  ;;  %v12592_v47 = vpack.c.bf16 %v12590_v16, %v12591_v17  ;;  %v12595_v10 = vpack.c.bf16 %v12593_v58, %v12594_v52  ;;  %v12615_v16 = vld [vmem:[#allocation272_spill] sm:$0xff]  ;;  %v12617_v58 = vld [vmem:[#allocation67_spill] sm:$0xff] }
 0x576   : > { %3782 = vmatprep.subr.bf16.mxu0 %v3290_v37  ;;  %v12596_v37 = vld [vmem:[#allocation214_spill] sm:$0xff]  ;;  %v12618_v52 = vld [vmem:[#allocation56_spill] sm:$0xff] }
 0x577   : > { %v12598_v20 = vpack.c.bf16 %v12596_v37, %v12597_v11  ;;  %v12607_v11 = vpack.c.bf16 %v12605_v30, %v12606_v57  ;;  %v12626_v37 = vld [vmem:[#allocation177_spill] sm:$0xff]  ;;  %v12635_v30 = vpack.c.bf16 %v10052_v48, %v10032_v33  ;;  %v12641_v57 = vld [vmem:[#allocation31_spill] sm:$0xff]  ;;  %v12646_v48 = vld [vmem:[#allocation40_spill] sm:$0xff] }
 0x578   : > { %v12647_v33 = vld [vmem:[#allocation41_spill] sm:$0xff] }
 0x57c   : > { %3501 = vmatmul.mubr.bf16.gmra.mrb[4].mxu0 %v12583_v14  ;;  %v12600_v14 = vld [vmem:[#allocation267_spill] sm:$0xff] }
 0x57d   : > { %3508 = vmatprep.mubr.bf16.mxu0 %v12586_v24  ;;  %v12601_v40 = vpack.c.bf16 %v12599_v28, %v12600_v14  ;;  %v12603_v24 = vpack.c.bf16 %v9572_v54, %v9490_v60  ;;  %v12610_v60 = vpack.c.bf16 %v9740_v22, %v9720_v56  ;;  %v12612_v54 = vld [vmem:[#allocation105_spill] sm:$0xff]  ;;  %v12628_v28 = vld [vmem:[#allocation232_spill] sm:$0xff] }
 0x57e   : > { %v12625_v22 = vld [vmem:[#allocation125_spill] sm:$0xff]  ;;  %v12629_v14 = vld [vmem:[#allocation72_spill] sm:$0xff] }
 0x584   : > { %3509 = vmatmul.mubr.bf16.gmra.mrb[8].mxu0 %v12589_v34  ;;  %v12608_v34 = vpack.c.bf16 %v9679_v23, %v9659_v18  ;;  %v12619_v23 = vpack.c.bf16 %v12617_v58, %v12618_v52  ;;  %v12620_v18 = vld [vmem:[#allocation46_spill] sm:$0xff]  ;;  %v12661_v58 = vld [vmem:[#allocation271_spill] sm:$0xff] }
 0x585   : > { %3516 = vmatprep.mubr.bf16.mxu0 %v12592_v47  ;;  %v12604_v47 = vpack.c.bf16 %v9625_v32, %v9605_v41  ;;  %v12613_v32 = vpack.c.bf16 %v12611_v50, %v12612_v54  ;;  %v12614_v41 = vld [vmem:[#allocation129_spill] sm:$0xff]  ;;  %v12621_v0 = vpack.c.bf16 %v9844_v44, %v12620_v18  ;;  %v12632_v44 = vpack.c.bf16 %v9951_v31, %v9931_v6  ;;  %v12637_v31 = vld [vmem:[#allocation94_spill] sm:$0xff]  ;;  %v12638_v6 = vld [vmem:[#allocation32_spill] sm:$0xff] }
 0x586   : > { %v12616_v17 = vpack.c.bf16 %v12614_v41, %v12615_v16  ;;  %v12655_v50 = vld [vmem:[#allocation97_spill] sm:$0xff]  ;;  %v12656_v54 = vld [vmem:[#allocation96_spill] sm:$0xff]  ;;  %v12659_v16 = vld [vmem:[#allocation159_spill] sm:$0xff] }
 0x587   : > { %v12658_v41 = vld [vmem:[#allocation268_spill] sm:$0xff]  ;;  %v12662_v52 = vld [vmem:[#allocation270_spill] sm:$0xff]  ;;  %v12664_v18 = vld [vmem:[#allocation101_spill] sm:$0xff] }
 0x58c   : > { %3517 = vmatmul.mubr.bf16.gmra.mrb[12].mxu0 %v12595_v10  ;;  %v12623_v10 = vld [vmem:[#allocation133_spill] sm:$0xff] }
 0x58d   : > { %3524 = vmatprep.mubr.bf16.mxu0 %v12598_v20  ;;  %v12624_v56 = vpack.c.bf16 %v12622_v12, %v12623_v10  ;;  %v12627_v20 = vpack.c.bf16 %v12625_v22, %v12626_v37  ;;  %v12667_v10 = vld [vmem:[#allocation164_spill] sm:$0xff]  ;;  %v12670_v37 = vld [vmem:[#allocation162_spill] sm:$0xff] }
 0x594   : > { %3525 = vmatmul.mubr.bf16.gmra.mrb[16].mxu0 %v12601_v40  ;;  %v12630_v40 = vpack.c.bf16 %v12628_v28, %v12629_v14  ;;  %v12673_v14 = vld [vmem:[#allocation62_spill] sm:$0xff] }
 0x595   : > { %3532 = vmatprep.mubr.bf16.mxu0 %v12602_v45  ;;  %v12631_v45 = vpack.c.bf16 %v9948_v7, %v9928_v36  ;;  %v12636_v36 = vpack.c.bf16 %v10055_v4, %v10035_v46  ;;  %v12639_v7 = vpack.c.bf16 %v12637_v31, %v12638_v6  ;;  %v12648_v46 = vpack.c.bf16 %v12646_v48, %v12647_v33  ;;  %v12650_v4 = vld [vmem:[#allocation43_spill] sm:$0xff]  ;;  %v12682_v6 = vld [vmem:[#allocation132_spill] sm:$0xff] }
 0x596   : > { %v12691_v48 = vld [vmem:[#allocation128_spill] sm:$0xff] }
 0x597   : > { %v12692_v33 = vld [vmem:[#allocation60_spill] sm:$0xff] }
 0x59c   : > { %3533 = vmatmul.mubr.bf16.gmra.mrb[20].mxu0 %v12603_v24  ;;  %v12633_v24 = vpack.c.bf16 %v10000_v59, %v9980_v49  ;;  %v3288_v49 = vcombine.high %v3272_v15, %v3272_v15  ;;  %v12640_v59 = vld [vmem:[#allocation157_spill] sm:$0xff] }
 0x59d   : > { %3540 = vmatprep.mubr.bf16.mxu0 %v12604_v47  ;;  %v12634_v47 = vpack.c.bf16 %v10003_v53, %v9983_v51  ;;  %v12643_v51 = vld [vmem:[#allocation211_spill] sm:$0xff]  ;;  %v12644_v53 = vld [vmem:[#allocation38_spill] sm:$0xff] }
 0x5a4   : > { %3541 = vmatmul.mubr.bf16.gmra.mrb[24].mxu0 %v12607_v11  ;;  %v12642_v11 = vpack.c.bf16 %v12640_v59, %v12641_v57  ;;  %v12685_v59 = vld [vmem:[#allocation219_spill] sm:$0xff]  ;;  %v12686_v57 = vld [vmem:[#allocation218_spill] sm:$0xff] }
 0x5a5   : > { %3548 = vmatprep.mubr.bf16.mxu0 %v12608_v34  ;;  %v12645_v34 = vpack.c.bf16 %v12643_v51, %v12644_v53  ;;  %v12688_v51 = vld [vmem:[#allocation118_spill] sm:$0xff]  ;;  %v12689_v53 = vld [vmem:[#allocation217_spill] sm:$0xff] }
 0x5ac   : > { %3549 = vmatmul.mubr.bf16.gmra.mrb[28].mxu0 %v12609_v5  ;;  %v12652_v5 = vld [vmem:[#allocation213_spill] sm:$0xff] }
 0x5ad   : > { %3556 = vmatprep.mubr.bf16.mxu0 %v12610_v60  ;;  %v12653_v60 = vld [vmem:[#allocation212_spill] sm:$0xff] }
 0x5ae   : > { %v12654_v15 = vpack.c.bf16 %v12652_v5, %v12653_v60  ;;  %v12697_v5 = vld [vmem:[#allocation57_spill] sm:$0xff] }
 0x5af   : > { %v12698_v60 = vld [vmem:[#allocation173_spill] sm:$0xff] }
 0x5b4   : > { %3557 = vmatmul.mubr.bf16.gmra.mrb[32].mxu0 %v12613_v32  ;;  %v12657_v32 = vpack.c.bf16 %v12655_v50, %v12656_v54  ;;  %v12700_v50 = vld [vmem:[#allocation176_spill] sm:$0xff] }
 0x5b5   : > { %3564 = vmatprep.mubr.bf16.mxu0 %v12616_v17  ;;  %v12660_v17 = vpack.c.bf16 %v12658_v41, %v12659_v16  ;;  %v12701_v54 = vld [vmem:[#allocation172_spill] sm:$0xff]  ;;  %v12703_v41 = vld [vmem:[#allocation179_spill] sm:$0xff] }
 0x5b6   : > { %v12704_v16 = vld [vmem:[#allocation231_spill] sm:$0xff] }
 0x5bc   : > { %3565 = vmatmul.mubr.bf16.gmra.mrb[36].mxu0 %v12619_v23  ;;  %v12663_v23 = vpack.c.bf16 %v12661_v58, %v12662_v52  ;;  %v12706_v58 = vld [vmem:[#allocation74_spill] sm:$0xff]  ;;  %v12707_v52 = vld [vmem:[#allocation124_spill] sm:$0xff] }
 0x5bd   : > { %3572 = vmatprep.mubr.bf16.mxu0 %v12621_v0  ;;  %v12665_v0 = vld [vmem:[#allocation273_spill] sm:$0xff] }
 0x5be   : > { %v12666_v12 = vpack.c.bf16 %v12664_v18, %v12665_v0  ;;  %v12709_v18 = vpack.c.bf16 %v9954_v13, %v9934_v39  ;;  %v12710_v0 = vld [vmem:[#allocation234_spill] sm:$0xff]  ;;  %v12717_v39 = vpack.c.bf16 %v10061_v27, %v10041_v1  ;;  %v12718_v13 = vld [vmem:[#allocation99_spill] sm:$0xff]  ;;  %v12727_v27 = vld [vmem:[#allocation113_spill] sm:$0xff] }
 0x5c4   : > { %3573 = vmatmul.mubr.bf16.gmra.mrb[40].mxu0 %v12624_v56  ;;  %v12668_v56 = vld [vmem:[#allocation111_spill] sm:$0xff] }
 0x5c5   : > { %3580 = vmatprep.mubr.bf16.mxu0 %v12627_v20  ;;  %v12669_v22 = vpack.c.bf16 %v12667_v10, %v12668_v56  ;;  %v12671_v20 = vld [vmem:[#allocation100_spill] sm:$0xff]  ;;  %v12713_v56 = vpack.c.bf16 %v10006_v42, %v9986_v35 }
 0x5c6   : > { %v12672_v28 = vpack.c.bf16 %v12670_v37, %v12671_v20  ;;  %v12716_v20 = vpack.c.bf16 %v10058_v29, %v10038_v21  ;;  %v12719_v35 = vld [vmem:[#allocation216_spill] sm:$0xff]  ;;  %v12724_v29 = vld [vmem:[#allocation45_spill] sm:$0xff] }
 0x5c7   : > { %v12720_v42 = vpack.c.bf16 %v12718_v13, %v12719_v35  ;;  %v12778_v13 = vld [vmem:[#allocation119_spill] sm:$0xff] }
 0x5c8   : > { %v12779_v35 = vld [vmem:[#allocation71_spill] sm:$0xff] }
 0x5cc   : > { %3581 = vmatmul.mubr.bf16.gmra.mrb[44].mxu0 %v12630_v40  ;;  %v12674_v40 = vld [vmem:[#allocation130_spill] sm:$0xff] }
 0x5cd   : > { %3588 = vmatprep.mubr.bf16.mxu0 %v12631_v45  ;;  %v12675_v45 = vpack.c.bf16 %v12673_v14, %v12674_v40  ;;  %v12725_v14 = vld [vmem:[#allocation108_spill] sm:$0xff]  ;;  %v12728_v40 = vld [vmem:[#allocation39_spill] sm:$0xff] }
 0x5ce   : > { %v12726_v1 = vpack.c.bf16 %v12724_v29, %v12725_v14  ;;  %v12729_v61 = vpack.c.bf16 %v12727_v27, %v12728_v40  ;;  %v12784_v29 = vld [vmem:[#allocation233_spill] sm:$0xff]  ;;  %v12787_v27 = vld [vmem:[#allocation167_spill] sm:$0xff]  ;;  %v12788_v40 = vld [vmem:[#allocation178_spill] sm:$0xff] }
 0x5cf   : > { %v12785_v14 = vld [vmem:[#allocation61_spill] sm:$0xff] }
 0x5d4   : > { %3589 = vmatmul.mubr.bf16.gmra.mrb[48].mxu0 %v12632_v44  ;;  %v12676_v44 = vld [vmem:[#allocation65_spill] sm:$0xff] }
 0x5d5   : > { %3596 = vmatprep.mubr.bf16.mxu0 %v12633_v24  ;;  %v12677_v24 = vld [vmem:[#allocation50_spill] sm:$0xff] }
 0x5dc   : > { %3597 = vmatmul.mubr.bf16.gmra.mrb[52].mxu0 %v12634_v47  ;;  %v12678_v47 = vpack.c.bf16 %v12676_v44, %v12677_v24  ;;  %v12736_v44 = vld [vmem:[#allocation127_spill] sm:$0xff]  ;;  %v12737_v24 = vld [vmem:[#allocation44_spill] sm:$0xff] }
 0x5dd   : > { %3604 = vmatprep.mubr.bf16.mxu0 %v12635_v30  ;;  %v12679_v30 = vld [vmem:[#allocation109_spill] sm:$0xff] }
 0x5e4   : > { %3605 = vmatmul.mubr.bf16.gmra.mrb[56].mxu0 %v12636_v36  ;;  %v12680_v36 = vld [vmem:[#allocation224_spill] sm:$0xff] }
 0x5e5   : > { %3612 = vmatprep.mubr.bf16.mxu0 %v3235_v3  ;;  %v12649_v3 = vld [vmem:[#allocation42_spill] sm:$0xff]  ;;  %v12681_v31 = vpack.c.bf16 %v12679_v30, %v12680_v36  ;;  %v12740_v36 = vld [vmem:[#allocation161_spill] sm:$0xff] }
 0x5e6   : > { %v12739_v30 = vld [vmem:[#allocation102_spill] sm:$0xff] }
 0x5ec   : > { %3613 = vmatmul.mubr.bf16.gmra.mrb[60].mxu0 %v3234_v63  ;;  %v12651_v63 = vpack.c.bf16 %v12649_v3, %v12650_v4  ;;  %v12694_v3 = vld [vmem:[#allocation269_spill] sm:$0xff]  ;;  %v12695_v4 = vld [vmem:[#allocation126_spill] sm:$0xff] }
 0x5ed   : > { %3653 = vmatprep.mubr.bf16.mxu0 %v12639_v7  ;;  %v12683_v7 = vld [vmem:[#allocation114_spill] sm:$0xff] }
 0x5f4   : > { %3654 = vmatmul.mubr.bf16.vlgmr.msra.gmra.mrb[0].mxu0 %v12642_v11  ;;  %v12687_v11 = vpack.c.bf16 %v12685_v59, %v12686_v57  ;;  %v12745_v59 = vld [vmem:[#allocation115_spill] sm:$0xff] }
 0x5f5   : > { %3661 = vmatprep.mubr.bf16.mxu0 %v12645_v34  ;;  %3783 = vmatpush1.bf16.xpose.msra.mxu0 %v3288_v49  ;;  %v12684_v49 = vpack.c.bf16 %v12682_v6, %v12683_v7  ;;  %v12690_v34 = vpack.c.bf16 %v12688_v51, %v12689_v53  ;;  %v12742_v6 = vld [vmem:[#allocation53_spill] sm:$0xff]  ;;  %v12743_v7 = vld [vmem:[#allocation47_spill] sm:$0xff] }
 0x5f6   : > { %v12746_v57 = vld [vmem:[#allocation103_spill] sm:$0xff] }
 0x5f7   : > { %v12748_v51 = vld [vmem:[#allocation163_spill] sm:$0xff] }
 0x5f8   : > { %v12749_v53 = vld [vmem:[#allocation171_spill] sm:$0xff] }
 0x5fc   : > { %3662 = vmatmul.mubr.bf16.gmra.mrb[4].mxu0 %v12648_v46  ;;  %v12693_v46 = vpack.c.bf16 %v12691_v48, %v12692_v33  ;;  %v12751_v48 = vld [vmem:[#allocation112_spill] sm:$0xff]  ;;  %v12752_v33 = vld [vmem:[#allocation110_spill] sm:$0xff] }
 0x5fd   : > { %3669 = vmatprep.mubr.bf16.mxu0 %v12651_v63  ;;  %v12696_v63 = vpack.c.bf16 %v12694_v3, %v12695_v4  ;;  %v12754_v3 = vld [vmem:[#allocation66_spill] sm:$0xff]  ;;  %v12755_v4 = vld [vmem:[#allocation123_spill] sm:$0xff] }
 0x604   : > { %3670 = vmatmul.mubr.bf16.gmra.mrb[8].mxu0 %v12654_v15  ;;  %v12699_v15 = vpack.c.bf16 %v12697_v5, %v12698_v60  ;;  %v12757_v5 = vld [vmem:[#allocation64_spill] sm:$0xff]  ;;  %v12758_v60 = vld [vmem:[#allocation263_spill] sm:$0xff] }
 0x605   : > { %3677 = vmatprep.mubr.bf16.mxu0 %v12657_v32  ;;  %v12702_v32 = vpack.c.bf16 %v12700_v50, %v12701_v54  ;;  %v12760_v50 = vld [vmem:[#allocation131_spill] sm:$0xff] }
 0x606   : > { %v12761_v54 = vld [vmem:[#allocation51_spill] sm:$0xff] }
 0x60c   : > { %3678 = vmatmul.mubr.bf16.gmra.mrb[12].mxu0 %v12660_v17  ;;  %v12705_v17 = vpack.c.bf16 %v12703_v41, %v12704_v16  ;;  %v12763_v41 = vld [vmem:[#allocation69_spill] sm:$0xff]  ;;  %v12764_v16 = vld [vmem:[#allocation68_spill] sm:$0xff] }
 0x60d   : > { %3685 = vmatprep.mubr.bf16.mxu0 %v12663_v23  ;;  %v12708_v23 = vpack.c.bf16 %v12706_v58, %v12707_v52  ;;  %v12766_v58 = vld [vmem:[#allocation54_spill] sm:$0xff]  ;;  %v12767_v52 = vld [vmem:[#allocation116_spill] sm:$0xff] }
 0x614   : > { %3686 = vmatmul.mubr.bf16.gmra.mrb[16].mxu0 %v12666_v12  ;;  %v12711_v12 = vld [vmem:[#allocation166_spill] sm:$0xff] }
 0x615   : > { %3693 = vmatprep.mubr.bf16.mxu0 %v12669_v22  ;;  %v12712_v10 = vpack.c.bf16 %v12710_v0, %v12711_v12  ;;  %v12714_v22 = vld [vmem:[#allocation235_spill] sm:$0xff] }
 0x616   : > { %v12715_v37 = vpack.c.bf16 %v10009_v8, %v12714_v22  ;;  %v12721_v8 = vld [vmem:[#allocation98_spill] sm:$0xff]  ;;  %v12770_v0 = vld [vmem:[#allocation55_spill] sm:$0xff] }
 0x61c   : > { %3694 = vmatmul.mubr.bf16.gmra.mrb[20].mxu0 %v12672_v28  ;;  %v12722_v28 = vld [vmem:[#allocation52_spill] sm:$0xff] }
 0x61d   : > { %3701 = vmatprep.mubr.bf16.mxu0 %v12675_v45  ;;  %v12723_v21 = vpack.c.bf16 %v12721_v8, %v12722_v28  ;;  %v12781_v8 = vld [vmem:[#allocation230_spill] sm:$0xff]  ;;  %v12782_v28 = vld [vmem:[#allocation107_spill] sm:$0xff] }
 0x624   : > { %3702 = vmatmul.mubr.bf16.gmra.mrb[24].mxu0 %v12678_v47  ;;  %v12738_v47 = vpack.c.bf16 %v12736_v44, %v12737_v24  ;;  %v12796_v44 = vld [vmem:[#allocation182_spill] sm:$0xff]  ;;  %v12797_v24 = vld [vmem:[#allocation169_spill] sm:$0xff] }
 0x625   : > { %3709 = vmatprep.mubr.bf16.mxu0 %v12681_v31  ;;  %v12741_v31 = vpack.c.bf16 %v12739_v30, %v12740_v36  ;;  %v12799_v30 = vld [vmem:[#allocation222_spill] sm:$0xff]  ;;  %v12800_v36 = vld [vmem:[#allocation168_spill] sm:$0xff] }
 0x62c   : > { %3710 = vmatmul.mubr.bf16.gmra.mrb[28].mxu0 %v12684_v49  ;;  %v12744_v49 = vpack.c.bf16 %v12742_v6, %v12743_v7  ;;  %v12802_v6 = vld [vmem:[#allocation170_spill] sm:$0xff]  ;;  %v12803_v7 = vld [vmem:[#allocation236_spill] sm:$0xff] }
 0x62d   : > { %3717 = vmatprep.mubr.bf16.mxu0 %v12687_v11  ;;  %v12747_v11 = vpack.c.bf16 %v12745_v59, %v12746_v57  ;;  %v12805_v59 = vld [vmem:[#allocation223_spill] sm:$0xff] }
 0x62e   : > { %v12806_v57 = vld [vmem:[#allocation183_spill] sm:$0xff] }
 0x634   : > { %3718 = vmatmul.mubr.bf16.gmra.mrb[32].mxu0 %v12690_v34  ;;  %v12750_v34 = vpack.c.bf16 %v12748_v51, %v12749_v53  ;;  %v12808_v51 = vpack.c.bf16 %v10108_v43, %v10092_v9  ;;  %v12809_v53 = vpack.c.bf16 %v10111_v19, %v10095_v2 }
 0x635   : > { %3725 = vmatprep.mubr.bf16.mxu0 %v12693_v46  ;;  %v12753_v46 = vpack.c.bf16 %v12751_v48, %v12752_v33 }
 0x63c   : > { %3726 = vmatmul.mubr.bf16.gmra.mrb[36].mxu0 %v12696_v63  ;;  %v12756_v63 = vpack.c.bf16 %v12754_v3, %v12755_v4 }
 0x63d   : > { %3733 = vmatprep.mubr.bf16.mxu0 %v12699_v15  ;;  %v12759_v15 = vpack.c.bf16 %v12757_v5, %v12758_v60 }
 0x644   : > { %3734 = vmatmul.mubr.bf16.gmra.mrb[40].mxu0 %v12702_v32  ;;  %v12762_v32 = vpack.c.bf16 %v12760_v50, %v12761_v54 }
 0x645   : > { %3741 = vmatprep.mubr.bf16.mxu0 %v12705_v17  ;;  %v12765_v17 = vpack.c.bf16 %v12763_v41, %v12764_v16 }
 0x64c   : > { %3742 = vmatmul.mubr.bf16.gmra.mrb[44].mxu0 %v12708_v23  ;;  %v12768_v23 = vpack.c.bf16 %v12766_v58, %v12767_v52 }
 0x64d   : > { %3749 = vmatprep.mubr.bf16.mxu0 %v12709_v18  ;;  %v12769_v18 = vld [vmem:[#allocation117_spill] sm:$0xff] }
 0x64e   : > { %v12771_v12 = vpack.c.bf16 %v12769_v18, %v12770_v0 }
 0x654   : > { %3750 = vmatmul.mubr.bf16.gmra.mrb[48].mxu0 %v12712_v10  ;;  %v12772_v10 = vld [vmem:[#allocation70_spill] sm:$0xff] }
 0x655   : > { %3757 = vmatprep.mubr.bf16.mxu0 %v12713_v56  ;;  %v12773_v56 = vld [vmem:[#allocation165_spill] sm:$0xff] }
 0x656   : > { %v12774_v22 = vpack.c.bf16 %v12772_v10, %v12773_v56 }
 0x65c   : > { %3758 = vmatmul.mubr.bf16.gmra.mrb[52].mxu0 %v12715_v37  ;;  %v12775_v37 = vld [vmem:[#allocation229_spill] sm:$0xff] }
 0x65d   : > { %3765 = vmatprep.mubr.bf16.mxu0 %v12716_v20  ;;  %v12776_v20 = vld [vmem:[#allocation63_spill] sm:$0xff] }
 0x664   : > { %3766 = vmatmul.mubr.bf16.gmra.mrb[56].mxu0 %v12717_v39  ;;  %v12777_v39 = vpack.c.bf16 %v12775_v37, %v12776_v20 }
 0x665   : > { %3773 = vmatprep.mubr.bf16.mxu0 %v3237_v55  ;;  %v12731_v55 = vld [vmem:[#allocation104_spill] sm:$0xff] }
 0x666   : > { %v12732_v62 = vpack.c.bf16 %v12730_v25, %v12731_v55  ;;  %v12790_v25 = vld [vmem:[#allocation181_spill] sm:$0xff]  ;;  %v12791_v55 = vld [vmem:[#allocation180_spill] sm:$0xff] }
 0x66c   : > { %3774 = vmatmul.mubr.bf16.gmra.mrb[60].mxu0 %v3236_v38  ;;  %v12734_v38 = vld [vmem:[#allocation221_spill] sm:$0xff] }
 0x66d   : > { %3814 = vmatprep.mubr.bf16.mxu0 %v12720_v42  ;;  %v12735_v45 = vpack.c.bf16 %v12733_v26, %v12734_v38  ;;  %v12780_v42 = vpack.c.bf16 %v12778_v13, %v12779_v35  ;;  %v12793_v26 = vld [vmem:[#allocation76_spill] sm:$0xff] }
 0x66e   : > { %v12794_v38 = vld [vmem:[#allocation220_spill] sm:$0xff] }
 0x674   : > { %3815 = vmatmul.mubr.bf16.vlgmr.msra.gmra.mrb[0].mxu0 %v12723_v21  ;;  %v12783_v21 = vpack.c.bf16 %v12781_v8, %v12782_v28 }
 0x675   : > { %3822 = vmatprep.mubr.bf16.mxu0 %v12726_v1  ;;  %v12786_v1 = vpack.c.bf16 %v12784_v29, %v12785_v14 }
 0x67c   : > { %3823 = vmatmul.mubr.bf16.gmra.mrb[4].mxu0 %v12729_v61  ;;  %v12789_v61 = vpack.c.bf16 %v12787_v27, %v12788_v40 }
 0x67d   : > { %3830 = vmatprep.mubr.bf16.mxu0 %v12732_v62  ;;  %v12792_v62 = vpack.c.bf16 %v12790_v25, %v12791_v55 }
 0x684   : > { %3831 = vmatmul.mubr.bf16.gmra.mrb[8].mxu0 %v12735_v45  ;;  %v12795_v45 = vpack.c.bf16 %v12793_v26, %v12794_v38 }
 0x685   : > { %3838 = vmatprep.mubr.bf16.mxu0 %v12738_v47  ;;  %v12798_v47 = vpack.c.bf16 %v12796_v44, %v12797_v24 }
 0x68c   : > { %3839 = vmatmul.mubr.bf16.gmra.mrb[12].mxu0 %v12741_v31  ;;  %v12801_v31 = vpack.c.bf16 %v12799_v30, %v12800_v36 }
 0x68d   : > { %3846 = vmatprep.mubr.bf16.mxu0 %v12744_v49  ;;  %v12804_v49 = vpack.c.bf16 %v12802_v6, %v12803_v7 }
 0x694   : > { %3847 = vmatmul.mubr.bf16.gmra.mrb[16].mxu0 %v12747_v11  ;;  %v12807_v11 = vpack.c.bf16 %v12805_v59, %v12806_v57 }
 0x695   : > { %3854 = vmatprep.mubr.bf16.mxu0 %v12750_v34 }
 0x69c   : > { %3855 = vmatmul.mubr.bf16.gmra.mrb[20].mxu0 %v12753_v46 }
 0x69d   : > { %3862 = vmatprep.mubr.bf16.mxu0 %v12756_v63 }
 0x6a4   : > { %3863 = vmatmul.mubr.bf16.gmra.mrb[24].mxu0 %v12759_v15 }
 0x6a5   : > { %3870 = vmatprep.mubr.bf16.mxu0 %v12762_v32 }
 0x6ac   : > { %3871 = vmatmul.mubr.bf16.gmra.mrb[28].mxu0 %v12765_v17 }
 0x6ad   : > { %3878 = vmatprep.mubr.bf16.mxu0 %v12768_v23 }
 0x6b4   : > { %3879 = vmatmul.mubr.bf16.gmra.mrb[32].mxu0 %v12771_v12 }
 0x6b5   : > { %3886 = vmatprep.mubr.bf16.mxu0 %v12774_v22 }
 0x6bc   : > { %3887 = vmatmul.mubr.bf16.gmra.mrb[36].mxu0 %v12777_v39 }
 0x6bd   : > { %3894 = vmatprep.mubr.bf16.mxu0 %v12780_v42 }
 0x6c4   : > { %3895 = vmatmul.mubr.bf16.gmra.mrb[40].mxu0 %v12783_v21 }
 0x6c5   : > { %3902 = vmatprep.mubr.bf16.mxu0 %v12786_v1 }
 0x6cc   : > { %3903 = vmatmul.mubr.bf16.gmra.mrb[44].mxu0 %v12789_v61 }
 0x6cd   : > { %3910 = vmatprep.mubr.bf16.mxu0 %v12792_v62 }
 0x6d4   : > { %3911 = vmatmul.mubr.bf16.gmra.mrb[48].mxu0 %v12795_v45 }
 0x6d5   : > { %3918 = vmatprep.mubr.bf16.mxu0 %v12798_v47 }
 0x6dc   : > { %3919 = vmatmul.mubr.bf16.gmra.mrb[52].mxu0 %v12801_v31 }
 0x6dd   : > { %3926 = vmatprep.mubr.bf16.mxu0 %v12804_v49 }
 0x6e4   : > { %3927 = vmatmul.mubr.bf16.gmra.mrb[56].mxu0 %v12807_v11 }
 0x6e5   : > { %3934 = vmatprep.mubr.bf16.mxu0 %v12808_v51 }
 0x6ec   : > { %3935 = vmatmul.mubr.bf16.gmra.mrb[60].mxu0 %v12809_v53 }
 0x747   : > { %v3816_v34 = vpop.f32.mrb[0].mxu0 }
 0x748   : > { %3944 = vst.msk [vmem:[%s10408_s6] sm:$0xff] %vm3943_vm2, %v3816_v34  ;;  %v3818_v48 = vpop.f32.mrb[1].mxu0 }
 0x749   : > { %v3819_v9 = vpop.f32.mrb[2].mxu0 }
 0x74a   : > { %3945 = vst.msk [vmem:[%s10408_s6 + $0x8] sm:$0xff] %vm3943_vm2, %v3819_v9  ;;  %v3821_v2 = vpop.f32.mrb[3].mxu0 }
 0x74f   : > { %v3824_v43 = vpop.f32.mrb[4].mxu0 }
 0x750   : > { %3946 = vst.msk [vmem:[%s10408_s6 + $0x10] sm:$0xff] %vm3943_vm2, %v3824_v43  ;;  %v3826_v19 = vpop.f32.mrb[5].mxu0 }
 0x751   : > { %v3827_v33 = vpop.f32.mrb[6].mxu0 }
 0x752   : > { %3947 = vst.msk [vmem:[%s10408_s6 + $0x18] sm:$0xff] %vm3943_vm2, %v3827_v33  ;;  %v3829_v46 = vpop.f32.mrb[7].mxu0 }
 0x757   : > { %v3832_v3 = vpop.f32.mrb[8].mxu0 }
 0x758   : > { %3948 = vst.msk [vmem:[%s10408_s6 + $0x20] sm:$0xff] %vm3943_vm2, %v3832_v3  ;;  %v3834_v4 = vpop.f32.mrb[9].mxu0 }
 0x759   : > { %v3835_v63 = vpop.f32.mrb[10].mxu0 }
 0x75a   : > { %3949 = vst.msk [vmem:[%s10408_s6 + $0x28] sm:$0xff] %vm3943_vm2, %v3835_v63  ;;  %v3837_v5 = vpop.f32.mrb[11].mxu0 }
 0x75f   : > { %v3840_v60 = vpop.f32.mrb[12].mxu0 }
 0x760   : > { %3950 = vst.msk [vmem:[%s10408_s6 + $0x30] sm:$0xff] %vm3943_vm2, %v3840_v60  ;;  %v3842_v15 = vpop.f32.mrb[13].mxu0 }
 0x761   : > { %v3843_v50 = vpop.f32.mrb[14].mxu0 }
 0x762   : > { %3951 = vst.msk [vmem:[%s10408_s6 + $0x38] sm:$0xff] %vm3943_vm2, %v3843_v50  ;;  %v3845_v54 = vpop.f32.mrb[15].mxu0 }
 0x767   : > { %v3848_v32 = vpop.f32.mrb[16].mxu0 }
 0x768   : > { %3952 = vst.msk [vmem:[%s10408_s6 + $0x40] sm:$0xff] %vm3943_vm2, %v3848_v32  ;;  %v3850_v41 = vpop.f32.mrb[17].mxu0 }
 0x769   : > { %v3851_v16 = vpop.f32.mrb[18].mxu0 }
 0x76a   : > { %3953 = vst.msk [vmem:[%s10408_s6 + $0x48] sm:$0xff] %vm3943_vm2, %v3851_v16  ;;  %v3853_v17 = vpop.f32.mrb[19].mxu0 }
 0x76f   : > { %v3856_v58 = vpop.f32.mrb[20].mxu0 }
 0x770   : > { %3954 = vst.msk [vmem:[%s10408_s6 + $0x50] sm:$0xff] %vm3943_vm2, %v3856_v58  ;;  %v3858_v52 = vpop.f32.mrb[21].mxu0 }
 0x771   : > { %v3859_v23 = vpop.f32.mrb[22].mxu0 }
 0x772   : > { %3955 = vst.msk [vmem:[%s10408_s6 + $0x58] sm:$0xff] %vm3943_vm2, %v3859_v23  ;;  %v3861_v18 = vpop.f32.mrb[23].mxu0 }
 0x777   : > { %v3864_v0 = vpop.f32.mrb[24].mxu0 }
 0x778   : > { %3956 = vst.msk [vmem:[%s10408_s6 + $0x60] sm:$0xff] %vm3943_vm2, %v3864_v0  ;;  %v3866_v12 = vpop.f32.mrb[25].mxu0 }
 0x779   : > { %v3867_v10 = vpop.f32.mrb[26].mxu0 }
 0x77a   : > { %3957 = vst.msk [vmem:[%s10408_s6 + $0x68] sm:$0xff] %vm3943_vm2, %v3867_v10  ;;  %v3869_v56 = vpop.f32.mrb[27].mxu0 }
 0x77f   : > { %v3872_v22 = vpop.f32.mrb[28].mxu0 }
 0x780   : > { %3958 = vst.msk [vmem:[%s10408_s6 + $0x70] sm:$0xff] %vm3943_vm2, %v3872_v22  ;;  %v3874_v37 = vpop.f32.mrb[29].mxu0 }
 0x781   : > { %v3875_v20 = vpop.f32.mrb[30].mxu0 }
 0x782   : > { %3959 = vst.msk [vmem:[%s10408_s6 + $0x78] sm:$0xff] %vm3943_vm2, %v3875_v20  ;;  %v3877_v39 = vpop.f32.mrb[31].mxu0 }
 0x787   : > { %v3880_v13 = vpop.f32.mrb[32].mxu0 }
 0x788   : > { %3960 = vst.msk [vmem:[%s10408_s6 + $0x80] sm:$0xff] %vm3943_vm2, %v3880_v13  ;;  %v3882_v35 = vpop.f32.mrb[33].mxu0 }
 0x789   : > { %v3883_v42 = vpop.f32.mrb[34].mxu0 }
 0x78a   : > { %3961 = vst.msk [vmem:[%s10408_s6 + $0x88] sm:$0xff] %vm3943_vm2, %v3883_v42  ;;  %v3885_v8 = vpop.f32.mrb[35].mxu0 }
 0x78f   : > { %v3888_v28 = vpop.f32.mrb[36].mxu0 }
 0x790   : > { %3962 = vst.msk [vmem:[%s10408_s6 + $0x90] sm:$0xff] %vm3943_vm2, %v3888_v28  ;;  %v3890_v21 = vpop.f32.mrb[37].mxu0 }
 0x791   : > { %v3891_v29 = vpop.f32.mrb[38].mxu0 }
 0x792   : > { %3963 = vst.msk [vmem:[%s10408_s6 + $0x98] sm:$0xff] %vm3943_vm2, %v3891_v29  ;;  %v3893_v14 = vpop.f32.mrb[39].mxu0 }
 0x797   : > { %v3896_v1 = vpop.f32.mrb[40].mxu0 }
 0x798   : > { %3964 = vst.msk [vmem:[%s10408_s6 + $0xa0] sm:$0xff] %vm3943_vm2, %v3896_v1  ;;  %v3898_v27 = vpop.f32.mrb[41].mxu0 }
 0x799   : > { %v3899_v40 = vpop.f32.mrb[42].mxu0 }
 0x79a   : > { %3965 = vst.msk [vmem:[%s10408_s6 + $0xa8] sm:$0xff] %vm3943_vm2, %v3899_v40  ;;  %v3901_v61 = vpop.f32.mrb[43].mxu0 }
 0x79f   : > { %v3904_v25 = vpop.f32.mrb[44].mxu0 }
 0x7a0   : > { %3966 = vst.msk [vmem:[%s10408_s6 + $0xb0] sm:$0xff] %vm3943_vm2, %v3904_v25  ;;  %v3906_v55 = vpop.f32.mrb[45].mxu0 }
 0x7a1   : > { %v3907_v62 = vpop.f32.mrb[46].mxu0 }
 0x7a2   : > { %3967 = vst.msk [vmem:[%s10408_s6 + $0xb8] sm:$0xff] %vm3943_vm2, %v3907_v62  ;;  %v3909_v26 = vpop.f32.mrb[47].mxu0 }
 0x7a7   : > { %v3912_v38 = vpop.f32.mrb[48].mxu0 }
 0x7a8   : > { %3968 = vst.msk [vmem:[%s10408_s6 + $0xc0] sm:$0xff] %vm3943_vm2, %v3912_v38  ;;  %v3914_v45 = vpop.f32.mrb[49].mxu0 }
 0x7a9   : > { %v3915_v44 = vpop.f32.mrb[50].mxu0 }
 0x7aa   : > { %3969 = vst.msk [vmem:[%s10408_s6 + $0xc8] sm:$0xff] %vm3943_vm2, %v3915_v44  ;;  %v3917_v24 = vpop.f32.mrb[51].mxu0 }
 0x7af   : > { %v3920_v47 = vpop.f32.mrb[52].mxu0 }
 0x7b0   : > { %3970 = vst.msk [vmem:[%s10408_s6 + $0xd0] sm:$0xff] %vm3943_vm2, %v3920_v47  ;;  %v3922_v30 = vpop.f32.mrb[53].mxu0 }
 0x7b1   : > { %v3923_v36 = vpop.f32.mrb[54].mxu0 }
 0x7b2   : > { %3971 = vst.msk [vmem:[%s10408_s6 + $0xd8] sm:$0xff] %vm3943_vm2, %v3923_v36  ;;  %v3925_v31 = vpop.f32.mrb[55].mxu0 }
 0x7b7   : > { %v3928_v6 = vpop.f32.mrb[56].mxu0 }
 0x7b8   : > { %3972 = vst.msk [vmem:[%s10408_s6 + $0xe0] sm:$0xff] %vm3943_vm2, %v3928_v6  ;;  %v3930_v7 = vpop.f32.mrb[57].mxu0 }
 0x7b9   : > { %v3931_v49 = vpop.f32.mrb[58].mxu0 }
 0x7ba   : > { %3973 = vst.msk [vmem:[%s10408_s6 + $0xe8] sm:$0xff] %vm3943_vm2, %v3931_v49  ;;  %v3933_v59 = vpop.f32.mrb[59].mxu0 }
 0x7bf   : > { %v3936_v57 = vpop.f32.mrb[60].mxu0 }
 0x7c0   : > { %3974 = vst.msk [vmem:[%s10408_s6 + $0xf0] sm:$0xff] %vm3943_vm2, %v3936_v57  ;;  %v3938_v11 = vpop.f32.mrb[61].mxu0 }
 0x7c1   : > { %v3939_v51 = vpop.f32.mrb[62].mxu0 }
 0x7c2   : > { %3975 = vst.msk [vmem:[%s10408_s6 + $0xf8] sm:$0xff] %vm3943_vm2, %v3939_v51  ;;  %v3941_v53 = vpop.f32.mrb[63].mxu0 }
 0x7c3   : > { %5330 = shalt.err (!%p5327_p4)
}
 0x7c4   : > { %s5331_s6 = scalar_lea.hbm %s10481_s15, 4096  ;;  %s5335_s20 = scalar_lea.hbm %s12814_s30, 65536 }
 0x7c5   : > { %p5332_p1 = scmp.ne.s32.totalorder %s10481_s15, %s5331_s6  ;;  %p5336_p5 = scmp.lt.u32.totalorder %s10481_s15, %s12814_s30 }
 0x7c6   : > { %p5337_p3 = scmp.lt.u32.totalorder %s5335_s20, %s5331_s6  ;;  %p5339_p12 = scmp.lt.u32.totalorder %s5331_s6, %s10481_s15 }
 0x7c7   : > { %p5333_p13 = pnand %p5332_p1, %p12815_p2 }
 0x7c8   : > { %p5338_p7 = por %p5337_p3, %p5336_p5 }
 0x7c9   : > { %p5334_p0 = pneg %p5333_p13 }
 0x7ca   : > { %p5340_p11 = por %p5339_p12, %p5338_p7 }
 0x7cc   : > { %p5341_p8 = pnand %p5340_p11, %p5334_p0 }
 0x7ce   : > { %5344 = shalt.err (!%p5341_p8)
}
 0x7cf   : > { %s5471_s10 = smov 128   ;;  %s5472_s5 = smov 8  }
 0x7d0   : > { %4494 = dma.vmem_to_hbm [thread:$0]  (%p12815_p2), %s10474_s29, 4096, %s10481_s15, %s3977_s16, %s5471_s10, %s5471_s10, %s5472_s5  }
 0x7d1 PF: > { %s12816_s4 = sld [smem:[#allocation13_spill]]  ;;  %p4511_p10 = scmp.ge.s32.totalorder %s5459_s24, 2 }
 0x7d2   : > { %s12817_s7 = sld [smem:[#allocation24_spill]] }
 0x7d7   : > { %s4009_s3 = sand.u32 1, %s12816_s4  }
 0x7d8   : > { %p12818_p9 = scmp.ne.s32.totalorder %s12817_s7, 0  ;;  %s4010_s8 = scalar_lea.sflag [#allocation4], %s4009_s3 }
 0x7da   : > { %p4507_p6 = pnand %p4511_p10, %p12818_p9 }
 0x7dc   : > { %5406 = dma.done.wait (!%p4507_p6), %s4010_s8, 4096  }
 0x7dd   : > { %5408 = vsyncadd (!%p4507_p6), %s4010_s8, 4294963200  ;;  %s22_s24 = sadd.s32 1, %s5459_s24   ;;  %s12820_s12 = sld [smem:[#allocation12_spill]] }
 0x7de   : > { %p10514_p4 = scmp.ge.s32.totalorder %s22_s24, 18   ;;  %s12821_s15 = sld [smem:[#allocation14_spill]] }
 0x7df   : > { %s12822_s28 = sld [smem:[#allocation20_spill]]  ;;  %s12823_s29 = sld [smem:[#allocation21_spill]] }
 0x7e0   : > { %s12824_s9 = sld [smem:[#allocation25_spill]]  ;;  %s12826_s13 = smov %s5419_s14 }
 0x7e1   : > { %s12827_s14 = smov %s5683_s18  ;;  %s12828_s16 = smov %s5431_s17 }
 0x7e2   : > { %s12829_s17 = smov %s5686_s27  ;;  %s12830_s18 = smov %s5447_s21 }
 0x7e3   : > { %s12831_s19 = smov %s5451_s22  ;;  %s12832_s20 = smov %s5455_s23 }
 0x7e4   :  { %21 = sbr.rel (!%p10514_p4) target bundleno = 15 (0xf), region = 101 }
 0x7e5   : > { %s12833_s21 = smov %s12822_s28  ;;  %s12834_s22 = smov %s12823_s29 }
 0x7e6   : > { %s12835_s23 = smov %s12824_s9 }
 0x7eb   :  { %4015 = vsyncpa [#allocation3], 1 }
 0x7ec   :  { %4017 = vsyncpa [#allocation3 + $0x1], 1 }
 0x7ed   :  { %4018 = vsyncpa [#allocation6], 1 }
 0x7ee   :  { %4020 = vsyncpa [#allocation6 + $0x1], 1 }
 0x7ef   :  { %4021 = vsyncpa [#allocation4], 1 }
 0x7f0   :  { %4023 = vsyncpa [#allocation4 + $0x1], 1 }

// kernel: augmented_conv_forward_pallas.5
= control target key start
LH: loop header
LB: loop body
LE: loop exit
PB: predicated region body
PF: predicated region fallthrough
CT: control target
= control target key end

     0   :  { %s2027_s0 = inlined_call_operand.hbm [shape: f32[2,1024,4], index: 0, kind: input, shape index: {}]   ;;  %s2028_s1 = inlined_call_operand.hbm [shape: bf16[1,4,4], index: 1, kind: input, shape index: {}]   ;;  %s2029_s2 = inlined_call_operand.hbm [shape: f32[1,4], index: 2, kind: input, shape index: {}]   ;;  %s2030_s3 = inlined_call_operand.hbm [shape: f32[2,1024,4], index: 3, kind: output, shape index: {}]  }
   0x1   :  { %2041 = sst [smem:[#allocation16_spill]] %s2028_s1 }
   0x2   :  { %2042 = sst [smem:[#allocation17_spill]] %s2029_s2 }
   0x3   :  { %8 = vsyncpa [#allocation3], 0 }
   0x4   :  { %10 = vsyncpa [#allocation3 + $0x1], 0 }
   0x5   :  { %11 = vsyncpa [#allocation6], 0 }
   0x6   :  { %12 = vsyncpa [#allocation4], 0 }
   0x7   :  { %14 = vsyncpa [#allocation4 + $0x1], 0  ;;  %s1441_s12 = smov 0   ;;  %s1443_s13 = smov 0  }
   0x8   :  { %s1445_s14 = smov 0   ;;  %s1447_s15 = smov 0  }
   0x9   :  { %s1449_s16 = smov 0   ;;  %s1451_s17 = smov 0  }
   0xa   :  { %s1453_s18 = smov 0   ;;  %s1455_s19 = smov 0  }
   0xb   :  { %s1457_s20 = smov 0   ;;  %s1459_s21 = smov 0  }
   0xc   :  { %s1461_s22 = smov 0  }
   0xd LB: > { %2043 = sst [smem:[#allocation12_spill]] %s1403_s20  ;;  %s914_s23 = sadd.s32 4294967295, %s1411_s22   ;;  %s1411_s22 = sphi %s1461_s22, %s20_s22   ;;  %s1407_s21 = sphi %s1459_s21, %s2074_s21   ;;  %s1403_s20 = sphi %s1457_s20, %s2065_s20   ;;  %s1399_s19 = sphi %s1455_s19, %s2073_s19   ;;  %s1395_s18 = sphi %s1453_s18, %s2064_s18   ;;  %s1391_s17 = sphi %s1451_s17, %s2072_s17   ;;  %s1387_s16 = sphi %s1449_s16, %s2071_s16   ;;  %s1383_s15 = sphi %s1447_s15, %s2070_s15   ;;  %s1379_s14 = sphi %s1445_s14, %s2069_s14   ;;  %s1375_s13 = sphi %s1443_s13, %s2068_s13   ;;  %s1371_s12 = sphi %s1441_s12, %s2067_s12  }
   0xe   : > { %p46_p0 = scmp.ne.s32.totalorder %s1391_s17, %s1387_s16  ;;  %p47_p1 = scmp.eq.s32.totalorder %s1411_s22, 0 }
   0xf   : > { %p52_p2 = scmp.ne.s32.totalorder %s1387_s16, %s1383_s15  ;;  %s915_s24 = sadd.s32 4294967294, %s1411_s22  }
  0x10   : > { %p1500_p3 = scmp.eq.s32.totalorder %s914_s23, 0  ;;  %p1504_p4 = por %p47_p1, %p46_p0 }
  0x11   : > { %p119_p5 = scmp.ne.s32.totalorder %s1379_s14, %s1375_s13  ;;  %p120_p7 = scmp.eq.s32.totalorder %s914_s23, 3 }
  0x12   : > { %s2044_s25 = scalar_select %p1500_p3, 1, 0 }
  0x13   : > { %p1512_p6 = por %p1500_p3, %p52_p2  ;;  %p125_p8 = scmp.ne.s32.totalorder %s1375_s13, %s1371_s12 }
  0x14   : > { %p126_p9 = scmp.eq.s32.totalorder %s915_s24, 3  ;;  %p1518_p10 = por %p120_p7, %p119_p5 }
  0x15   : > { %s2046_s27 = scalar_select %p1512_p6, 1, 0 }
  0x16   : > { %s2047_s28 = scalar_select %p1518_p10, 1, 0 }
  0x17   : > { %p916_p11 = scmp.ge.s32.totalorder %s1411_s22, 1  ;;  %p1523_p12 = por %p126_p9, %p125_p8 }
  0x18   : > { %p133_p13 = scmp.lt.s32.totalorder %s1411_s22, 5  ;;  %s1413_s4 = smov [#allocation5]  }
  0x19   : > { %s2048_s29 = scalar_select %p1523_p12, 1, 0 }
  0x1a   : > { %p1528_p0 = pnand %p916_p11, %p133_p13  ;;  %s146_s5 = sshll.u32 %s1413_s4, 4  ;;  %s147_s5 = int_to_ptr.vmem [resolvable:$true] %s146_s5 }
  0x1b   : > { %2049 = sst [smem:[#allocation13_spill]] %s2048_s29  ;;  %p1101_p2 = scmp.lt.s32.totalorder %s1411_s22, 4 }
  0x1c   : > { %s2050_s30 = scalar_select %p1528_p0, 1, 0 }
  0x1d   : > { %p1084_p1 = pneg %p1528_p0  ;;  %p1543_p7 = pnand %p1101_p2, %p1504_p4 }
  0x1e   : > { %s1414_s8 = smov [#allocation7]   ;;  %s2053_s1 = sld [smem:[#allocation16_spill]] }
  0x1f   : > { %p1537_p5 = pnand %p1084_p1, %p1500_p3  ;;  %s157_s9 = sshll.u32 %s1414_s8, 4  ;;  %s158_s9 = int_to_ptr.vmem [resolvable:$true] %s157_s9 }
  0x20   : > { %s2052_s7 = scalar_select %p1543_p7, 1, 0 }
  0x21   : > { %p1201_p9 = pneg %p1537_p5 }
  0x24   : > { %s1199_s15 = scalar_lea.hbm %s2053_s1, 32 }
  0x25   : > { %p1200_p8 = scmp.ne.s32.totalorder %s2053_s1, %s1199_s15  ;;  %p1206_p4 = scmp.lt.u32.totalorder %s1199_s15, %s2053_s1 }
  0x27   : > { %p1202_p11 = pnand %p1201_p9, %p1200_p8 }
  0x29   : > { %p1203_p13 = pneg %p1202_p11 }
  0x2b   : > { %p1208_p1 = pnand %p1206_p4, %p1203_p13 }
  0x2d   : > { %1211 = shalt.err (!%p1208_p1)
}
  0x2e   : > { %s1212_s8 = scalar_lea.vmem %s147_s5, 32  ;;  %p1220_p3 = scmp.lt.s32.totalorder %s147_s5, %s147_s5 }
  0x2f   : > { %p1213_p2 = scmp.ne.s32.totalorder %s147_s5, %s1212_s8  ;;  %p1221_p6 = scmp.lt.s32.totalorder %s1212_s8, %s1212_s8 }
  0x31   : > { %p1215_p12 = pnand %p1213_p2, %p1201_p9  ;;  %p1222_p0 = por %p1221_p6, %p1220_p3 }
  0x33   : > { %p1216_p10 = pneg %p1215_p12 }
  0x35   : > { %p1223_p7 = pnand %p1222_p0, %p1216_p10 }
  0x37   : > { %1226 = shalt.err (!%p1223_p7)
}
  0x38   : > { %1087 = dma.hbm_to_vmem [thread:$0]  (!%p1537_p5), %s2053_s1, 32, %s147_s5, [#allocation6]  }
  0x39   : > { %s2054_s2 = sld [smem:[#allocation17_spill]] }
  0x3f   : > { %s1227_s24 = scalar_lea.hbm %s2054_s2, 16 }
  0x40   : > { %p1228_p12 = scmp.ne.s32.totalorder %s2054_s2, %s1227_s24  ;;  %p1234_p10 = scmp.lt.u32.totalorder %s1227_s24, %s2054_s2 }
  0x42   : > { %p1230_p3 = pnand %p1228_p12, %p1201_p9 }
  0x44   : > { %p1231_p6 = pneg %p1230_p3 }
  0x46   : > { %p1236_p0 = pnand %p1234_p10, %p1231_p6 }
  0x48   : > { %1239 = shalt.err (!%p1236_p0)
}
  0x49   : > { %s1240_s5 = scalar_lea.vmem %s158_s9, 16  ;;  %s1247_s10 = scalar_lea.vmem %s158_s9, 32 }
  0x4a   : > { %p1241_p7 = scmp.ne.s32.totalorder %s158_s9, %s1240_s5  ;;  %p1248_p13 = scmp.lt.s32.totalorder %s158_s9, %s158_s9 }
  0x4b   : > { %p1249_p4 = scmp.lt.s32.totalorder %s1247_s10, %s1240_s5 }
  0x4c   : > { %p1243_p8 = pnand %p1241_p7, %p1201_p9 }
  0x4d   : > { %p1250_p1 = por %p1249_p4, %p1248_p13 }
  0x4e   : > { %p1244_p11 = pneg %p1243_p8 }
  0x50   : > { %p1251_p2 = pnand %p1250_p1, %p1244_p11 }
  0x52   : > { %1254 = shalt.err (!%p1251_p2)
}
  0x53   : > { %1090 = dma.hbm_to_vmem [thread:$0]  (!%p1537_p5), %s2054_s2, 16, %s158_s9, [#allocation6]  }
  0x54   : > { %s39_s15 = sadd.s32 1, %s1391_s17  ;;  %s29_s23 = sadd.s32 1, %s1403_s20 }
  0x55   : > { %s168_s24 = sand.u32 1, %s1391_s17   ;;  %p30_p9 = scmp.ge.s32.totalorder %s29_s23, 2 }
  0x56   : > { %s32_s26 = sadd.s32 1, %s1407_s21  ;;  %s109_s4 = sadd.s32 1, %s1379_s14 }
  0x57   : > { %s920_s6 = sshll.u32 %s168_s24, 10  ;;  %s2076_s23 = smov (%p30_p9, %s29_s23), 0 }
  0x58   : > { %2055 = sst [smem:[#allocation14_spill]] %s2076_s23  ;;  %s2078_s26 = smov (!%p30_p9, %s32_s26), %s1407_s21 }
  0x59   : > { %p34_p12 = scmp.ge.s32.totalorder %s2078_s26, 2  ;;  %s968_s8 = sshll.u32 %s1407_s21, 14 }
  0x5a   : > { %s105_s5 = ssub.s32 %s1403_s20, %s2076_s23  ;;  %s172_s9 = scalar_lea.vmem [#allocation2], %s920_s6 }
  0x5b   : > { %s179_s10 = sshll.u32 %s172_s9, 4  ;;  %s2080_s26 = smov (%p34_p12, %s2078_s26), 0  ;;  %s1609_s10 = int_to_ptr.vmem [resolvable:$true] %s179_s10 }
  0x5c   : > { %2056 = sst [smem:[#allocation15_spill]] %s2080_s26  ;;  %s1605_s1 = scalar_lea.hbm %s2027_s0, %s968_s8 }
  0x5d   : > { %s36_s2 = ssub.s32 %s1407_s21, %s2080_s26  ;;  %s1617_s20 = scalar_lea.sflag [#allocation3], %s168_s24 }
  0x5e   : > { %p37_p5 = scmp.eq.s32.totalorder %s36_s2, 0  ;;  %s106_s23 = sor.u32 %s105_s5, %s36_s2 }
  0x5f   : > { %p107_p3 = scmp.eq.s32.totalorder %s106_s23, 0  ;;  %s1255_s11 = scalar_lea.hbm %s1605_s1, 16384 }
  0x60   : > { %s1612_s6 = scalar_select %p37_p5, %s1391_s17, %s39_s15  }
  0x61   : > { %s1615_s9 = scalar_select %p107_p3, %s1379_s14, %s109_s4  }
  0x62   : > { %p1256_p6 = scmp.ne.s32.totalorder %s1605_s1, %s1255_s11  ;;  %p2057_p10 = scmp.ne.s32.totalorder %s2052_s7, 0 }
  0x63   : > { %s1260_s26 = scalar_lea.hbm %s2027_s0, 32768  ;;  %p1261_p11 = scmp.lt.u32.totalorder %s1605_s1, %s2027_s0 }
  0x64   : > { %p1257_p0 = pneg %p2057_p10  ;;  %p1262_p13 = scmp.lt.u32.totalorder %s1260_s26, %s1255_s11 }
  0x65   : > { %p1264_p1 = scmp.lt.u32.totalorder %s1255_s11, %s1605_s1 }
  0x66   : > { %p1258_p7 = pnand %p1257_p0, %p1256_p6  ;;  %p1263_p4 = por %p1262_p13, %p1261_p11 }
  0x68   : > { %p1259_p8 = pneg %p1258_p7  ;;  %p1265_p2 = por %p1264_p1, %p1263_p4 }
  0x6a   : > { %p1266_p9 = pnand %p1265_p2, %p1259_p8 }
  0x6c   : > { %1269 = shalt.err (!%p1266_p9)
}
  0x6d   : > { %s1270_s15 = scalar_lea.vmem %s1609_s10, 16384  ;;  %s1415_s24 = smov [#allocation2]  }
  0x6e   : > { %p1271_p12 = scmp.ne.s32.totalorder %s1609_s10, %s1270_s15  ;;  %s1275_s4 = sshll.u32 %s1415_s24, 4  ;;  %s1276_s4 = int_to_ptr.vmem [resolvable:$false] %s1275_s4 }
  0x6f   : > { %s1277_s5 = scalar_lea.vmem %s1276_s4, 32768  ;;  %p1278_p6 = scmp.lt.s32.totalorder %s1609_s10, %s1276_s4 }
  0x70   : > { %p1273_p5 = pnand %p1271_p12, %p1257_p0  ;;  %p1279_p7 = scmp.lt.s32.totalorder %s1277_s5, %s1270_s15 }
  0x72   : > { %p1274_p3 = pneg %p1273_p5  ;;  %p1280_p11 = por %p1279_p7, %p1278_p6 }
  0x74   : > { %p1281_p13 = pnand %p1280_p11, %p1274_p3 }
  0x76   : > { %1284 = shalt.err (!%p1281_p13)
}
  0x77   : > { %s1416_s26 = smov 128   ;;  %s1417_s11 = smov 8  }
  0x78   : > { %1094 = dma.hbm_to_vmem [thread:$0]  (!%p2057_p10), %s1605_s1, 16384, %s1609_s10, %s1617_s20, %s1416_s26, %s1416_s26, %s1417_s11  }
  0x79   : > { %p2058_p0 = scmp.ne.s32.totalorder %s2050_s30, 0 }
  0x7a   : > { %s193_s8 = sand.u32 (!%p2058_p0), 1, %s1387_s16   ;;  %p2059_p8 = scmp.ne.s32.totalorder (!%p2058_p0), %s2046_s27, 0 }
  0x7b   : > { %191 = sbr.rel (%p2058_p0) target bundleno = 429 (0x1ad), region = 32  ;;  %s924_s29 = sshll.u32 (!%p2058_p0), %s193_s8, 10 }
  0x7c   : > { %s194_s2 = scalar_lea.sflag (!%p2058_p0), [#allocation3], %s193_s8  ;;  %s197_s23 = scalar_lea.vmem (!%p2058_p0), [#allocation2], %s924_s29 }
  0x82   : > { %1358 = dma.done.wait (%p2059_p8), %s194_s2, 16384  }
  0x83   : > { %1360 = vsyncadd (%p2059_p8), %s194_s2, 4294950912  ;;  %p2060_p4 = scmp.ne.s32.totalorder %s2044_s25, 0 }
  0x85   : > { %1362 = dma.done.wait (%p2060_p4), [#allocation6], 48  }
  0x86   : > { %1364 = vsyncadd (%p2060_p4), [#allocation6], 4294967248  ;;  %s928_s1 = sshll.u32 %s1395_s18, 9  ;;  %vm433_vm0 = vcmask 1041408   ;;  %v328_v0 = vld [vmem:[#allocation5] sm:$0x3] }
  0x87   : > { %s1657_s20 = scalar_lea.vmem %s197_s23, %s928_s1 [#allocation2]  ;;  %vm336_vm1 = vcmask 31744   ;;  %1070 = vmatprep.subr.msk.bf16.mxu0 %vm433_vm0, %v328_v0  ;;  %1071 = vmatprep.subr.msk.bf16.mxu1 %vm433_vm0, %v328_v0  ;;  %v435_v3 = vsel %vm433_vm0, %v328_v0, 0  ;;  %s225_s25 = sand.u32 1, %s1375_s13  }
  0x88   : > { %v232_v1 = vld [vmem:[%s1657_s20] sm:$0xff]  ;;  %v233_v2 = vld [vmem:[%s1657_s20 + $0x8] sm:$0xff]  ;;  %v234_v7 = vld [vmem:[%s1657_s20 + $0x10] sm:$0xff]  ;;  %1003 = vmatpush3.bf16.msra.mxu0 %v435_v3  ;;  %1069 = vmatpush3.bf16.msra.mxu1 %v435_v3  ;;  %s927_s27 = sshll.u32 %s225_s25, 9  ;;  %s963_s7 = sshll.u32 %s1395_s18, 6 }
  0x89   : > { %v296_v4 = vpack.c.bf16 %v233_v2, %v232_v1  ;;  %v264_v5 = vld [vmem:[%s1657_s20 + $0x100] sm:$0xff]  ;;  %v265_v6 = vld [vmem:[%s1657_s20 + $0x108] sm:$0xff]  ;;  %v235_v9 = vld [vmem:[%s1657_s20 + $0x18] sm:$0xff]  ;;  %s1764_s30 = scalar_lea.vmem [#allocation8], %s927_s27  ;;  %s964_s10 = sshll.u32 %s1399_s19, 7 }
  0x8a   : > { %v312_v8 = vpack.c.bf16 %v265_v6, %v264_v5  ;;  %v266_v10 = vld [vmem:[%s1657_s20 + $0x110] sm:$0xff]  ;;  %v267_v11 = vld [vmem:[%s1657_s20 + $0x118] sm:$0xff]  ;;  %v297_v12 = vpack.c.bf16 %v235_v9, %v234_v7  ;;  %v236_v14 = vld [vmem:[%s1657_s20 + $0x20] sm:$0xff]  ;;  %s803_s18 = sadd.s32 %s964_s10, %s963_s7  ;;  %s806_s15 = sshll.u32 %s1764_s30, 4  ;;  %s1948_s15 = int_to_ptr.vmem [resolvable:$true] %s806_s15 }
  0x8b   : > { %1004 = vmatprep.mubr.msk.bf16.mxu0 %vm336_vm1, %v296_v4  ;;  %v313_v13 = vpack.c.bf16 %v267_v11, %v266_v10  ;;  %v237_v15 = vld [vmem:[%s1657_s20 + $0x28] sm:$0xff]  ;;  %v268_v16 = vld [vmem:[%s1657_s20 + $0x120] sm:$0xff]  ;;  %v238_v20 = vld [vmem:[%s1657_s20 + $0x30] sm:$0xff]  ;;  %s965_s19 = sshll.u32 %s803_s18, 7  ;;  %s1966_s26 = scalar_lea.sflag [#allocation4], %s225_s25 }
  0x8c   : > { %1036 = vmatprep.mubr.msk.bf16.mxu1 %vm336_vm1, %v312_v8  ;;  %v298_v17 = vpack.c.bf16 %v237_v15, %v236_v14  ;;  %v269_v18 = vld [vmem:[%s1657_s20 + $0x128] sm:$0xff]  ;;  %1005 = vmatmul.mubr.msk.bf16.vlgmr.msra.gmra.mrb[0].mxu0 %vm336_vm1, %v297_v12  ;;  %v239_v21 = vld [vmem:[%s1657_s20 + $0x38] sm:$0xff]  ;;  %v270_v22 = vld [vmem:[%s1657_s20 + $0x130] sm:$0xff]  ;;  %s1946_s5 = scalar_lea.hbm %s2030_s3, %s965_s19  ;;  %s1285_s11 = scalar_lea.vmem %s1948_s15, 8192 }
  0x8d   : > { %1037 = vmatmul.mubr.msk.bf16.vlgmr.msra.gmra.mrb[0].mxu1 %vm336_vm1, %v313_v13  ;;  %v314_v19 = vpack.c.bf16 %v269_v18, %v268_v16  ;;  %v271_v23 = vld [vmem:[%s1657_s20 + $0x138] sm:$0xff]  ;;  %v240_v24 = vld [vmem:[%s1657_s20 + $0x40] sm:$0xff]  ;;  %v241_v25 = vld [vmem:[%s1657_s20 + $0x48] sm:$0xff]  ;;  %v299_v28 = vpack.c.bf16 %v239_v21, %v238_v20  ;;  %p1286_p10 = scmp.ne.s32.totalorder %s1948_s15, %s1285_s11  ;;  %p2061_p1 = scmp.ne.s32.totalorder %s2047_s28, 0 }
  0x8e   : > { %1008 = vmatprep.mubr.msk.bf16.mxu0 %vm336_vm1, %v298_v17  ;;  %v272_v26 = vld [vmem:[%s1657_s20 + $0x140] sm:$0xff]  ;;  %v273_v27 = vld [vmem:[%s1657_s20 + $0x148] sm:$0xff]  ;;  %v315_v29 = vpack.c.bf16 %v271_v23, %v270_v22  ;;  %v300_v30 = vpack.c.bf16 %v241_v25, %v240_v24  ;;  %v242_v32 = vld [vmem:[%s1657_s20 + $0x50] sm:$0xff]  ;;  %s1418_s8 = smov [#allocation8]  }
  0x8f   : > { %1040 = vmatprep.mubr.msk.bf16.mxu1 %vm336_vm1, %v314_v19  ;;  %v316_v31 = vpack.c.bf16 %v273_v27, %v272_v26  ;;  %v243_v33 = vld [vmem:[%s1657_s20 + $0x58] sm:$0xff]  ;;  %v274_v34 = vld [vmem:[%s1657_s20 + $0x150] sm:$0xff]  ;;  %v244_v36 = vld [vmem:[%s1657_s20 + $0x60] sm:$0xff]  ;;  %p1287_p2 = pnand %p1286_p10, %p2061_p1  ;;  %s1289_s29 = sshll.u32 %s1418_s8, 4  ;;  %s1290_s29 = int_to_ptr.vmem [resolvable:$false] %s1289_s29 }
  0x90   : > { %v275_v35 = vld [vmem:[%s1657_s20 + $0x158] sm:$0xff]  ;;  %v245_v37 = vld [vmem:[%s1657_s20 + $0x68] sm:$0xff]  ;;  %v276_v38 = vld [vmem:[%s1657_s20 + $0x160] sm:$0xff]  ;;  %v301_v40 = vpack.c.bf16 %v243_v33, %v242_v32  ;;  %s1291_s2 = scalar_lea.vmem %s1290_s29, 16384  ;;  %p1292_p12 = scmp.lt.s32.totalorder %s1948_s15, %s1290_s29 }
  0x91   : > { %v277_v39 = vld [vmem:[%s1657_s20 + $0x168] sm:$0xff]  ;;  %v317_v41 = vpack.c.bf16 %v275_v35, %v274_v34  ;;  %v302_v42 = vpack.c.bf16 %v245_v37, %v244_v36  ;;  %v246_v44 = vld [vmem:[%s1657_s20 + $0x70] sm:$0xff]  ;;  %v247_v45 = vld [vmem:[%s1657_s20 + $0x78] sm:$0xff]  ;;  %p1288_p9 = pneg %p1287_p2  ;;  %p1293_p5 = scmp.lt.s32.totalorder %s1291_s2, %s1285_s11 }
  0x92   : > { %v318_v43 = vpack.c.bf16 %v277_v39, %v276_v38  ;;  %v278_v46 = vld [vmem:[%s1657_s20 + $0x170] sm:$0xff]  ;;  %v279_v47 = vld [vmem:[%s1657_s20 + $0x178] sm:$0xff]  ;;  %v248_v48 = vld [vmem:[%s1657_s20 + $0x80] sm:$0xff]  ;;  %v303_v52 = vpack.c.bf16 %v247_v45, %v246_v44 }
  0x93   : > { %v249_v49 = vld [vmem:[%s1657_s20 + $0x88] sm:$0xff]  ;;  %v280_v50 = vld [vmem:[%s1657_s20 + $0x180] sm:$0xff]  ;;  %v319_v53 = vpack.c.bf16 %v279_v47, %v278_v46  ;;  %v250_v56 = vld [vmem:[%s1657_s20 + $0x90] sm:$0xff]  ;;  %p1294_p3 = por %p1293_p5, %p1292_p12 }
  0x94   : > { %1009 = vmatmul.mubr.msk.bf16.gmra.mrb[4].mxu0 %vm336_vm1, %v299_v28  ;;  %v281_v51 = vld [vmem:[%s1657_s20 + $0x188] sm:$0xff]  ;;  %v304_v54 = vpack.c.bf16 %v249_v49, %v248_v48  ;;  %v251_v57 = vld [vmem:[%s1657_s20 + $0x98] sm:$0xff]  ;;  %v282_v58 = vld [vmem:[%s1657_s20 + $0x190] sm:$0xff] }
  0x95   : > { %1041 = vmatmul.mubr.msk.bf16.gmra.mrb[4].mxu1 %vm336_vm1, %v315_v29  ;;  %1012 = vmatprep.mubr.msk.bf16.mxu0 %vm336_vm1, %v300_v30  ;;  %v320_v55 = vpack.c.bf16 %v281_v51, %v280_v50  ;;  %v283_v59 = vld [vmem:[%s1657_s20 + $0x198] sm:$0xff]  ;;  %v252_v60 = vld [vmem:[%s1657_s20 + $0xa0] sm:$0xff]  ;;  %v253_v61 = vld [vmem:[%s1657_s20 + $0xa8] sm:$0xff]  ;;  %v305_v0 = vpack.c.bf16 %v251_v57, %v250_v56  ;;  %p1295_p6 = pnand %p1294_p3, %p1288_p9 }
  0x96   : > { %1044 = vmatprep.mubr.msk.bf16.mxu1 %vm336_vm1, %v316_v31  ;;  %v284_v62 = vld [vmem:[%s1657_s20 + $0x1a0] sm:$0xff]  ;;  %v285_v63 = vld [vmem:[%s1657_s20 + $0x1a8] sm:$0xff]  ;;  %v321_v1 = vpack.c.bf16 %v283_v59, %v282_v58  ;;  %v306_v2 = vpack.c.bf16 %v253_v61, %v252_v60  ;;  %v254_v4 = vld [vmem:[%s1657_s20 + $0xb0] sm:$0xff] }
  0x97   : > { %v322_v3 = vpack.c.bf16 %v285_v63, %v284_v62  ;;  %v255_v5 = vld [vmem:[%s1657_s20 + $0xb8] sm:$0xff]  ;;  %v286_v6 = vld [vmem:[%s1657_s20 + $0x1b0] sm:$0xff]  ;;  %v256_v8 = vld [vmem:[%s1657_s20 + $0xc0] sm:$0xff] }
  0x98   : > { %v287_v7 = vld [vmem:[%s1657_s20 + $0x1b8] sm:$0xff]  ;;  %v257_v9 = vld [vmem:[%s1657_s20 + $0xc8] sm:$0xff]  ;;  %v288_v10 = vld [vmem:[%s1657_s20 + $0x1c0] sm:$0xff]  ;;  %v307_v12 = vpack.c.bf16 %v255_v5, %v254_v4 }
  0x99   : > { %v289_v11 = vld [vmem:[%s1657_s20 + $0x1c8] sm:$0xff]  ;;  %v323_v13 = vpack.c.bf16 %v287_v7, %v286_v6  ;;  %v308_v14 = vpack.c.bf16 %v257_v9, %v256_v8  ;;  %v258_v16 = vld [vmem:[%s1657_s20 + $0xd0] sm:$0xff]  ;;  %v259_v17 = vld [vmem:[%s1657_s20 + $0xd8] sm:$0xff] }
  0x9a   : > { %v324_v15 = vpack.c.bf16 %v289_v11, %v288_v10  ;;  %v290_v18 = vld [vmem:[%s1657_s20 + $0x1d0] sm:$0xff]  ;;  %v291_v19 = vld [vmem:[%s1657_s20 + $0x1d8] sm:$0xff]  ;;  %v260_v20 = vld [vmem:[%s1657_s20 + $0xe0] sm:$0xff]  ;;  %v309_v24 = vpack.c.bf16 %v259_v17, %v258_v16 }
  0x9b   : > { %v261_v21 = vld [vmem:[%s1657_s20 + $0xe8] sm:$0xff]  ;;  %v292_v22 = vld [vmem:[%s1657_s20 + $0x1e0] sm:$0xff]  ;;  %v325_v25 = vpack.c.bf16 %v291_v19, %v290_v18  ;;  %v262_v28 = vld [vmem:[%s1657_s20 + $0xf0] sm:$0xff] }
  0x9c   : > { %1013 = vmatmul.mubr.msk.bf16.gmra.mrb[8].mxu0 %vm336_vm1, %v301_v40  ;;  %v293_v23 = vld [vmem:[%s1657_s20 + $0x1e8] sm:$0xff]  ;;  %v310_v26 = vpack.c.bf16 %v261_v21, %v260_v20  ;;  %v263_v29 = vld [vmem:[%s1657_s20 + $0xf8] sm:$0xff]  ;;  %v294_v30 = vld [vmem:[%s1657_s20 + $0x1f0] sm:$0xff] }
  0x9d   : > { %1045 = vmatmul.mubr.msk.bf16.gmra.mrb[8].mxu1 %vm336_vm1, %v317_v41  ;;  %1016 = vmatprep.mubr.msk.bf16.mxu0 %vm336_vm1, %v302_v42  ;;  %v326_v27 = vpack.c.bf16 %v293_v23, %v292_v22  ;;  %v295_v31 = vld [vmem:[%s1657_s20 + $0x1f8] sm:$0xff]  ;;  %v311_v32 = vpack.c.bf16 %v263_v29, %v262_v28  ;;  %v1758_v34 = vld [vmem:[#allocation7] ss:$0 sm:$0xff] }
  0x9e   : > { %1048 = vmatprep.mubr.msk.bf16.mxu1 %vm336_vm1, %v318_v43  ;;  %v327_v33 = vpack.c.bf16 %v295_v31, %v294_v30 }
  0xa4   : > { %1017 = vmatmul.mubr.msk.bf16.gmra.mrb[12].mxu0 %vm336_vm1, %v303_v52 }
  0xa5   : > { %1049 = vmatmul.mubr.msk.bf16.gmra.mrb[12].mxu1 %vm336_vm1, %v319_v53  ;;  %1020 = vmatprep.mubr.msk.bf16.mxu0 %vm336_vm1, %v304_v54 }
  0xa6   : > { %1052 = vmatprep.mubr.msk.bf16.mxu1 %vm336_vm1, %v320_v55 }
  0xac   : > { %1021 = vmatmul.mubr.msk.bf16.gmra.mrb[16].mxu0 %vm336_vm1, %v305_v0 }
  0xad   : > { %1053 = vmatmul.mubr.msk.bf16.gmra.mrb[16].mxu1 %vm336_vm1, %v321_v1  ;;  %1024 = vmatprep.mubr.msk.bf16.mxu0 %vm336_vm1, %v306_v2 }
  0xae   : > { %1056 = vmatprep.mubr.msk.bf16.mxu1 %vm336_vm1, %v322_v3 }
  0xb4   : > { %1025 = vmatmul.mubr.msk.bf16.gmra.mrb[20].mxu0 %vm336_vm1, %v307_v12 }
  0xb5   : > { %1057 = vmatmul.mubr.msk.bf16.gmra.mrb[20].mxu1 %vm336_vm1, %v323_v13  ;;  %1028 = vmatprep.mubr.msk.bf16.mxu0 %vm336_vm1, %v308_v14 }
  0xb6   : > { %1060 = vmatprep.mubr.msk.bf16.mxu1 %vm336_vm1, %v324_v15 }
  0xbc   : > { %1029 = vmatmul.mubr.msk.bf16.gmra.mrb[24].mxu0 %vm336_vm1, %v309_v24 }
  0xbd   : > { %1061 = vmatmul.mubr.msk.bf16.gmra.mrb[24].mxu1 %vm336_vm1, %v325_v25  ;;  %1032 = vmatprep.mubr.msk.bf16.mxu0 %vm336_vm1, %v310_v26 }
  0xbe   : > { %1064 = vmatprep.mubr.msk.bf16.mxu1 %vm336_vm1, %v326_v27 }
  0xc4   : > { %1033 = vmatmul.mubr.msk.bf16.gmra.mrb[28].mxu0 %vm336_vm1, %v311_v32 }
  0xc5   : > { %1065 = vmatmul.mubr.msk.bf16.gmra.mrb[28].mxu1 %vm336_vm1, %v327_v33 }
 0x15f   : > { %v1006_v35 = vpop.f32.mrb[0].mxu0 }
 0x160   : > { %v1038_v36 = vpop.f32.mrb[0].mxu1  ;;  %v480_v37 = vadd.f32 %v1006_v35, %v1758_v34  ;;  %v471_v39 = vpop.f32.mrb[1].mxu0 }
 0x161   : > { %v608_v38 = vadd.f32 %v1038_v36, %v1758_v34  ;;  %v599_v40 = vpop.f32.mrb[1].mxu1  ;;  %v472_v41 = vadd.f32 %v1758_v34, %v471_v39  ;;  %v1007_v43 = vpop.f32.mrb[2].mxu0 }
 0x162   : > { %v600_v42 = vadd.f32 %v1758_v34, %v599_v40  ;;  %v1039_v44 = vpop.f32.mrb[2].mxu1  ;;  %728 = vst.msk [vmem:[%s1764_s30 + $0x10] sm:$0xff] %vm336_vm1, %v480_v37  ;;  %v483_v45 = vadd.f32 %v1007_v43, %v1758_v34  ;;  %v474_v47 = vpop.f32.mrb[3].mxu0 }
 0x163   : > { %760 = vst.msk [vmem:[%s1764_s30 + $0x110] sm:$0xff] %vm336_vm1, %v608_v38  ;;  %v611_v46 = vadd.f32 %v1039_v44, %v1758_v34  ;;  %v602_v48 = vpop.f32.mrb[3].mxu1  ;;  %726 = vst.msk [vmem:[%s1764_s30] sm:$0xff] %vm336_vm1, %v472_v41  ;;  %v475_v49 = vadd.f32 %v1758_v34, %v474_v47 }
 0x164   : > { %758 = vst.msk [vmem:[%s1764_s30 + $0x100] sm:$0xff] %vm336_vm1, %v600_v42  ;;  %v603_v50 = vadd.f32 %v1758_v34, %v602_v48  ;;  %729 = vst.msk [vmem:[%s1764_s30 + $0x18] sm:$0xff] %vm336_vm1, %v483_v45 }
 0x165   : > { %761 = vst.msk [vmem:[%s1764_s30 + $0x118] sm:$0xff] %vm336_vm1, %v611_v46  ;;  %727 = vst.msk [vmem:[%s1764_s30 + $0x8] sm:$0xff] %vm336_vm1, %v475_v49 }
 0x166   : > { %759 = vst.msk [vmem:[%s1764_s30 + $0x108] sm:$0xff] %vm336_vm1, %v603_v50 }
 0x167   : > { %v1010_v51 = vpop.f32.mrb[4].mxu0 }
 0x168   : > { %v1042_v52 = vpop.f32.mrb[4].mxu1  ;;  %v496_v53 = vadd.f32 %v1010_v51, %v1758_v34  ;;  %v487_v55 = vpop.f32.mrb[5].mxu0 }
 0x169   : > { %v624_v54 = vadd.f32 %v1042_v52, %v1758_v34  ;;  %v615_v56 = vpop.f32.mrb[5].mxu1  ;;  %v488_v57 = vadd.f32 %v1758_v34, %v487_v55  ;;  %v1011_v59 = vpop.f32.mrb[6].mxu0 }
 0x16a   : > { %v616_v58 = vadd.f32 %v1758_v34, %v615_v56  ;;  %v1043_v60 = vpop.f32.mrb[6].mxu1  ;;  %732 = vst.msk [vmem:[%s1764_s30 + $0x30] sm:$0xff] %vm336_vm1, %v496_v53  ;;  %v499_v61 = vadd.f32 %v1011_v59, %v1758_v34  ;;  %v490_v63 = vpop.f32.mrb[7].mxu0 }
 0x16b   : > { %764 = vst.msk [vmem:[%s1764_s30 + $0x130] sm:$0xff] %vm336_vm1, %v624_v54  ;;  %v627_v62 = vadd.f32 %v1043_v60, %v1758_v34  ;;  %v618_v0 = vpop.f32.mrb[7].mxu1  ;;  %730 = vst.msk [vmem:[%s1764_s30 + $0x20] sm:$0xff] %vm336_vm1, %v488_v57  ;;  %v491_v1 = vadd.f32 %v1758_v34, %v490_v63 }
 0x16c   : > { %762 = vst.msk [vmem:[%s1764_s30 + $0x120] sm:$0xff] %vm336_vm1, %v616_v58  ;;  %v619_v2 = vadd.f32 %v1758_v34, %v618_v0  ;;  %733 = vst.msk [vmem:[%s1764_s30 + $0x38] sm:$0xff] %vm336_vm1, %v499_v61 }
 0x16d   : > { %765 = vst.msk [vmem:[%s1764_s30 + $0x138] sm:$0xff] %vm336_vm1, %v627_v62  ;;  %731 = vst.msk [vmem:[%s1764_s30 + $0x28] sm:$0xff] %vm336_vm1, %v491_v1 }
 0x16e   : > { %763 = vst.msk [vmem:[%s1764_s30 + $0x128] sm:$0xff] %vm336_vm1, %v619_v2 }
 0x16f   : > { %v1014_v3 = vpop.f32.mrb[8].mxu0 }
 0x170   : > { %v1046_v4 = vpop.f32.mrb[8].mxu1  ;;  %v512_v5 = vadd.f32 %v1014_v3, %v1758_v34  ;;  %v503_v7 = vpop.f32.mrb[9].mxu0 }
 0x171   : > { %v640_v6 = vadd.f32 %v1046_v4, %v1758_v34  ;;  %v631_v8 = vpop.f32.mrb[9].mxu1  ;;  %v504_v9 = vadd.f32 %v1758_v34, %v503_v7  ;;  %v1015_v11 = vpop.f32.mrb[10].mxu0 }
 0x172   : > { %v632_v10 = vadd.f32 %v1758_v34, %v631_v8  ;;  %v1047_v12 = vpop.f32.mrb[10].mxu1  ;;  %736 = vst.msk [vmem:[%s1764_s30 + $0x50] sm:$0xff] %vm336_vm1, %v512_v5  ;;  %v515_v13 = vadd.f32 %v1015_v11, %v1758_v34  ;;  %v506_v15 = vpop.f32.mrb[11].mxu0 }
 0x173   : > { %768 = vst.msk [vmem:[%s1764_s30 + $0x150] sm:$0xff] %vm336_vm1, %v640_v6  ;;  %v643_v14 = vadd.f32 %v1047_v12, %v1758_v34  ;;  %v634_v16 = vpop.f32.mrb[11].mxu1  ;;  %734 = vst.msk [vmem:[%s1764_s30 + $0x40] sm:$0xff] %vm336_vm1, %v504_v9  ;;  %v507_v17 = vadd.f32 %v1758_v34, %v506_v15 }
 0x174   : > { %766 = vst.msk [vmem:[%s1764_s30 + $0x140] sm:$0xff] %vm336_vm1, %v632_v10  ;;  %v635_v18 = vadd.f32 %v1758_v34, %v634_v16  ;;  %737 = vst.msk [vmem:[%s1764_s30 + $0x58] sm:$0xff] %vm336_vm1, %v515_v13 }
 0x175   : > { %769 = vst.msk [vmem:[%s1764_s30 + $0x158] sm:$0xff] %vm336_vm1, %v643_v14  ;;  %735 = vst.msk [vmem:[%s1764_s30 + $0x48] sm:$0xff] %vm336_vm1, %v507_v17 }
 0x176   : > { %767 = vst.msk [vmem:[%s1764_s30 + $0x148] sm:$0xff] %vm336_vm1, %v635_v18 }
 0x177   : > { %v1018_v19 = vpop.f32.mrb[12].mxu0 }
 0x178   : > { %v1050_v20 = vpop.f32.mrb[12].mxu1  ;;  %v528_v21 = vadd.f32 %v1018_v19, %v1758_v34  ;;  %v519_v23 = vpop.f32.mrb[13].mxu0 }
 0x179   : > { %v656_v22 = vadd.f32 %v1050_v20, %v1758_v34  ;;  %v647_v24 = vpop.f32.mrb[13].mxu1  ;;  %v520_v25 = vadd.f32 %v1758_v34, %v519_v23  ;;  %v1019_v27 = vpop.f32.mrb[14].mxu0 }
 0x17a   : > { %v648_v26 = vadd.f32 %v1758_v34, %v647_v24  ;;  %v1051_v28 = vpop.f32.mrb[14].mxu1  ;;  %740 = vst.msk [vmem:[%s1764_s30 + $0x70] sm:$0xff] %vm336_vm1, %v528_v21  ;;  %v531_v29 = vadd.f32 %v1019_v27, %v1758_v34  ;;  %v522_v31 = vpop.f32.mrb[15].mxu0 }
 0x17b   : > { %772 = vst.msk [vmem:[%s1764_s30 + $0x170] sm:$0xff] %vm336_vm1, %v656_v22  ;;  %v659_v30 = vadd.f32 %v1051_v28, %v1758_v34  ;;  %v650_v32 = vpop.f32.mrb[15].mxu1  ;;  %738 = vst.msk [vmem:[%s1764_s30 + $0x60] sm:$0xff] %vm336_vm1, %v520_v25  ;;  %v523_v33 = vadd.f32 %v1758_v34, %v522_v31 }
 0x17c   : > { %770 = vst.msk [vmem:[%s1764_s30 + $0x160] sm:$0xff] %vm336_vm1, %v648_v26  ;;  %v651_v35 = vadd.f32 %v1758_v34, %v650_v32  ;;  %741 = vst.msk [vmem:[%s1764_s30 + $0x78] sm:$0xff] %vm336_vm1, %v531_v29 }
 0x17d   : > { %773 = vst.msk [vmem:[%s1764_s30 + $0x178] sm:$0xff] %vm336_vm1, %v659_v30  ;;  %739 = vst.msk [vmem:[%s1764_s30 + $0x68] sm:$0xff] %vm336_vm1, %v523_v33 }
 0x17e   : > { %771 = vst.msk [vmem:[%s1764_s30 + $0x168] sm:$0xff] %vm336_vm1, %v651_v35 }
 0x17f   : > { %v1022_v36 = vpop.f32.mrb[16].mxu0 }
 0x180   : > { %v1054_v37 = vpop.f32.mrb[16].mxu1  ;;  %v544_v38 = vadd.f32 %v1022_v36, %v1758_v34  ;;  %v535_v40 = vpop.f32.mrb[17].mxu0 }
 0x181   : > { %v672_v39 = vadd.f32 %v1054_v37, %v1758_v34  ;;  %v663_v41 = vpop.f32.mrb[17].mxu1  ;;  %v536_v42 = vadd.f32 %v1758_v34, %v535_v40  ;;  %v1023_v44 = vpop.f32.mrb[18].mxu0 }
 0x182   : > { %v664_v43 = vadd.f32 %v1758_v34, %v663_v41  ;;  %v1055_v45 = vpop.f32.mrb[18].mxu1  ;;  %744 = vst.msk [vmem:[%s1764_s30 + $0x90] sm:$0xff] %vm336_vm1, %v544_v38  ;;  %v547_v46 = vadd.f32 %v1023_v44, %v1758_v34  ;;  %v538_v48 = vpop.f32.mrb[19].mxu0 }
 0x183   : > { %776 = vst.msk [vmem:[%s1764_s30 + $0x190] sm:$0xff] %vm336_vm1, %v672_v39  ;;  %v675_v47 = vadd.f32 %v1055_v45, %v1758_v34  ;;  %v666_v49 = vpop.f32.mrb[19].mxu1  ;;  %742 = vst.msk [vmem:[%s1764_s30 + $0x80] sm:$0xff] %vm336_vm1, %v536_v42  ;;  %v539_v50 = vadd.f32 %v1758_v34, %v538_v48 }
 0x184   : > { %774 = vst.msk [vmem:[%s1764_s30 + $0x180] sm:$0xff] %vm336_vm1, %v664_v43  ;;  %v667_v51 = vadd.f32 %v1758_v34, %v666_v49  ;;  %745 = vst.msk [vmem:[%s1764_s30 + $0x98] sm:$0xff] %vm336_vm1, %v547_v46 }
 0x185   : > { %777 = vst.msk [vmem:[%s1764_s30 + $0x198] sm:$0xff] %vm336_vm1, %v675_v47  ;;  %743 = vst.msk [vmem:[%s1764_s30 + $0x88] sm:$0xff] %vm336_vm1, %v539_v50 }
 0x186   : > { %775 = vst.msk [vmem:[%s1764_s30 + $0x188] sm:$0xff] %vm336_vm1, %v667_v51 }
 0x187   : > { %v1026_v52 = vpop.f32.mrb[20].mxu0 }
 0x188   : > { %v1058_v53 = vpop.f32.mrb[20].mxu1  ;;  %v560_v54 = vadd.f32 %v1026_v52, %v1758_v34  ;;  %v551_v56 = vpop.f32.mrb[21].mxu0 }
 0x189   : > { %v688_v55 = vadd.f32 %v1058_v53, %v1758_v34  ;;  %v679_v57 = vpop.f32.mrb[21].mxu1  ;;  %v552_v58 = vadd.f32 %v1758_v34, %v551_v56  ;;  %v1027_v60 = vpop.f32.mrb[22].mxu0 }
 0x18a   : > { %v680_v59 = vadd.f32 %v1758_v34, %v679_v57  ;;  %v1059_v61 = vpop.f32.mrb[22].mxu1  ;;  %748 = vst.msk [vmem:[%s1764_s30 + $0xb0] sm:$0xff] %vm336_vm1, %v560_v54  ;;  %v563_v62 = vadd.f32 %v1027_v60, %v1758_v34  ;;  %v554_v0 = vpop.f32.mrb[23].mxu0 }
 0x18b   : > { %780 = vst.msk [vmem:[%s1764_s30 + $0x1b0] sm:$0xff] %vm336_vm1, %v688_v55  ;;  %v691_v63 = vadd.f32 %v1059_v61, %v1758_v34  ;;  %v682_v1 = vpop.f32.mrb[23].mxu1  ;;  %746 = vst.msk [vmem:[%s1764_s30 + $0xa0] sm:$0xff] %vm336_vm1, %v552_v58  ;;  %v555_v2 = vadd.f32 %v1758_v34, %v554_v0 }
 0x18c   : > { %778 = vst.msk [vmem:[%s1764_s30 + $0x1a0] sm:$0xff] %vm336_vm1, %v680_v59  ;;  %v683_v3 = vadd.f32 %v1758_v34, %v682_v1  ;;  %749 = vst.msk [vmem:[%s1764_s30 + $0xb8] sm:$0xff] %vm336_vm1, %v563_v62 }
 0x18d   : > { %781 = vst.msk [vmem:[%s1764_s30 + $0x1b8] sm:$0xff] %vm336_vm1, %v691_v63  ;;  %747 = vst.msk [vmem:[%s1764_s30 + $0xa8] sm:$0xff] %vm336_vm1, %v555_v2 }
 0x18e   : > { %779 = vst.msk [vmem:[%s1764_s30 + $0x1a8] sm:$0xff] %vm336_vm1, %v683_v3 }
 0x18f   : > { %v1030_v4 = vpop.f32.mrb[24].mxu0 }
 0x190   : > { %v1062_v5 = vpop.f32.mrb[24].mxu1  ;;  %v576_v6 = vadd.f32 %v1030_v4, %v1758_v34  ;;  %v567_v8 = vpop.f32.mrb[25].mxu0 }
 0x191   : > { %v704_v7 = vadd.f32 %v1062_v5, %v1758_v34  ;;  %v695_v9 = vpop.f32.mrb[25].mxu1  ;;  %v568_v10 = vadd.f32 %v1758_v34, %v567_v8  ;;  %v1031_v12 = vpop.f32.mrb[26].mxu0 }
 0x192   : > { %v696_v11 = vadd.f32 %v1758_v34, %v695_v9  ;;  %v1063_v13 = vpop.f32.mrb[26].mxu1  ;;  %752 = vst.msk [vmem:[%s1764_s30 + $0xd0] sm:$0xff] %vm336_vm1, %v576_v6  ;;  %v579_v14 = vadd.f32 %v1031_v12, %v1758_v34  ;;  %v570_v16 = vpop.f32.mrb[27].mxu0 }
 0x193   : > { %784 = vst.msk [vmem:[%s1764_s30 + $0x1d0] sm:$0xff] %vm336_vm1, %v704_v7  ;;  %v707_v15 = vadd.f32 %v1063_v13, %v1758_v34  ;;  %v698_v17 = vpop.f32.mrb[27].mxu1  ;;  %750 = vst.msk [vmem:[%s1764_s30 + $0xc0] sm:$0xff] %vm336_vm1, %v568_v10  ;;  %v571_v18 = vadd.f32 %v1758_v34, %v570_v16 }
 0x194   : > { %782 = vst.msk [vmem:[%s1764_s30 + $0x1c0] sm:$0xff] %vm336_vm1, %v696_v11  ;;  %v699_v19 = vadd.f32 %v1758_v34, %v698_v17  ;;  %753 = vst.msk [vmem:[%s1764_s30 + $0xd8] sm:$0xff] %vm336_vm1, %v579_v14 }
 0x195   : > { %785 = vst.msk [vmem:[%s1764_s30 + $0x1d8] sm:$0xff] %vm336_vm1, %v707_v15  ;;  %751 = vst.msk [vmem:[%s1764_s30 + $0xc8] sm:$0xff] %vm336_vm1, %v571_v18 }
 0x196   : > { %783 = vst.msk [vmem:[%s1764_s30 + $0x1c8] sm:$0xff] %vm336_vm1, %v699_v19 }
 0x197   : > { %v1034_v20 = vpop.f32.mrb[28].mxu0 }
 0x198   : > { %v1066_v21 = vpop.f32.mrb[28].mxu1  ;;  %v592_v22 = vadd.f32 %v1034_v20, %v1758_v34  ;;  %v583_v24 = vpop.f32.mrb[29].mxu0 }
 0x199   : > { %v720_v23 = vadd.f32 %v1066_v21, %v1758_v34  ;;  %v711_v25 = vpop.f32.mrb[29].mxu1  ;;  %v584_v26 = vadd.f32 %v1758_v34, %v583_v24  ;;  %v1035_v28 = vpop.f32.mrb[30].mxu0 }
 0x19a   : > { %v712_v27 = vadd.f32 %v1758_v34, %v711_v25  ;;  %v1067_v29 = vpop.f32.mrb[30].mxu1  ;;  %756 = vst.msk [vmem:[%s1764_s30 + $0xf0] sm:$0xff] %vm336_vm1, %v592_v22  ;;  %v595_v30 = vadd.f32 %v1035_v28, %v1758_v34  ;;  %v586_v32 = vpop.f32.mrb[31].mxu0 }
 0x19b   : > { %788 = vst.msk [vmem:[%s1764_s30 + $0x1f0] sm:$0xff] %vm336_vm1, %v720_v23  ;;  %v723_v31 = vadd.f32 %v1067_v29, %v1758_v34  ;;  %v714_v33 = vpop.f32.mrb[31].mxu1  ;;  %754 = vst.msk [vmem:[%s1764_s30 + $0xe0] sm:$0xff] %vm336_vm1, %v584_v26  ;;  %v587_v35 = vadd.f32 %v1758_v34, %v586_v32 }
 0x19c   : > { %786 = vst.msk [vmem:[%s1764_s30 + $0x1e0] sm:$0xff] %vm336_vm1, %v712_v27  ;;  %v715_v36 = vadd.f32 %v1758_v34, %v714_v33  ;;  %757 = vst.msk [vmem:[%s1764_s30 + $0xf8] sm:$0xff] %vm336_vm1, %v595_v30 }
 0x19d   : > { %789 = vst.msk [vmem:[%s1764_s30 + $0x1f8] sm:$0xff] %vm336_vm1, %v723_v31  ;;  %755 = vst.msk [vmem:[%s1764_s30 + $0xe8] sm:$0xff] %vm336_vm1, %v587_v35 }
 0x19e   : > { %787 = vst.msk [vmem:[%s1764_s30 + $0x1e8] sm:$0xff] %vm336_vm1, %v715_v36 }
 0x19f   : > { %1298 = shalt.err (!%p1295_p6)
}
 0x1a0   : > { %s1299_s23 = scalar_lea.hbm %s1946_s5, 8192  ;;  %s1303_s25 = scalar_lea.hbm %s2030_s3, 32768 }
 0x1a1   : > { %p1300_p7 = scmp.ne.s32.totalorder %s1946_s5, %s1299_s23  ;;  %p1304_p0 = scmp.lt.u32.totalorder %s1946_s5, %s2030_s3 }
 0x1a2   : > { %p1305_p8 = scmp.lt.u32.totalorder %s1303_s25, %s1299_s23  ;;  %p1307_p10 = scmp.lt.u32.totalorder %s1299_s23, %s1946_s5 }
 0x1a3   : > { %p1301_p11 = pnand %p1300_p7, %p2061_p1 }
 0x1a4   : > { %p1306_p4 = por %p1305_p8, %p1304_p0 }
 0x1a5   : > { %p1302_p13 = pneg %p1301_p11 }
 0x1a6   : > { %p1308_p2 = por %p1307_p10, %p1306_p4 }
 0x1a8   : > { %p1309_p9 = pnand %p1308_p2, %p1302_p13 }
 0x1aa   : > { %1312 = shalt.err (!%p1309_p9)
}
 0x1ab   : > { %s1419_s7 = smov 128   ;;  %s1420_s10 = smov 8  }
 0x1ac   : > { %1082 = dma.vmem_to_hbm [thread:$0]  (%p2061_p1), %s1948_s15, 8192, %s1946_s5, %s1966_s26, %s1419_s7, %s1419_s7, %s1420_s10  }
 0x1ad PF: > { %s2062_s18 = sld [smem:[#allocation13_spill]]  ;;  %p1104_p12 = scmp.ge.s32.totalorder %s1411_s22, 2 }
 0x1ae   : > { %s821_s19 = sand.u32 1, %s1371_s12  }
 0x1af   : > { %s822_s24 = scalar_lea.sflag [#allocation4], %s821_s19 }
 0x1b3   : > { %p2063_p5 = scmp.ne.s32.totalorder %s2062_s18, 0 }
 0x1b5   : > { %p1096_p3 = pnand %p1104_p12, %p2063_p5 }
 0x1b7   : > { %1366 = dma.done.wait (!%p1096_p3), %s822_s24, 8192  }
 0x1b8   : > { %1368 = vsyncadd (!%p1096_p3), %s822_s24, 4294959104  ;;  %s20_s22 = sadd.s32 1, %s1411_s22   ;;  %s2064_s18 = sld [smem:[#allocation12_spill]] }
 0x1b9   : > { %p17_p6 = scmp.ge.s32.totalorder %s20_s22, 6   ;;  %s2065_s20 = sld [smem:[#allocation14_spill]] }
 0x1ba   : > { %s2066_s28 = sld [smem:[#allocation15_spill]]  ;;  %s2067_s12 = smov %s1375_s13 }
 0x1bb   : > { %s2068_s13 = smov %s1379_s14  ;;  %s2069_s14 = smov %s1615_s9 }
 0x1bc   : > { %s2070_s15 = smov %s1387_s16  ;;  %s2071_s16 = smov %s1391_s17 }
 0x1bd   : > { %s2072_s17 = smov %s1612_s6  ;;  %s2073_s19 = smov %s1407_s21 }
 0x1be   :  { %19 = sbr.rel (!%p17_p6) target bundleno = 13 (0xd), region = 86 }
 0x1c0   : > { %s2074_s21 = smov %s2066_s28 }
 0x1c5   :  { %827 = vsyncpa [#allocation3], 1 }
 0x1c6   :  { %829 = vsyncpa [#allocation3 + $0x1], 1 }
 0x1c7   :  { %830 = vsyncpa [#allocation6], 1 }
 0x1c8   :  { %831 = vsyncpa [#allocation4], 1 }
 0x1c9   :  { %833 = vsyncpa [#allocation4 + $0x1], 1 }

</bundles_post_ra>
